<compile_context>
chip_gen: v7x
topology: tpu7x:2x2x1
jax: 0.10.0
libtpu: 0.0.40
codegen_flags: <defaults>
</compile_context>

<pallas_src>
import functools
import math

import jax
import jax.numpy as jnp
from jax.experimental import pallas as pl
from jax.experimental.pallas import tpu as pltpu


def _rup(x, m):
    return ((x + m - 1) // m) * m


def _pad2(a, rows, cols, value=0.0):
    r, c = a.shape
    if r == rows and c == cols:
        return a
    return jnp.pad(a, ((0, rows - r), (0, cols - c)), constant_values=value)


# ------------------------------ Pallas kernels ------------------------------

def _mm_kernel(a_ref, b_ref, shift_ref, o_ref, *, relu):
    """Single-shot bf16 matmul (f32 accumulate) + shift (+ReLU) epilogue."""
    y = jnp.dot(a_ref[...], b_ref[...], preferred_element_type=jnp.float32)
    y = y + shift_ref[...]
    if relu:
        y = jnp.maximum(y, 0.0)
    o_ref[...] = y.astype(o_ref.dtype)


def _mm_res_kernel(a_ref, b_ref, shift_ref, res_ref, o_ref, *, relu):
    """Single-shot matmul + shift + residual add (+ReLU) epilogue."""
    y = jnp.dot(a_ref[...], b_ref[...], preferred_element_type=jnp.float32)
    y = y + shift_ref[...] + res_ref[...].astype(jnp.float32)
    if relu:
        y = jnp.maximum(y, 0.0)
    o_ref[...] = y.astype(o_ref.dtype)


def _maxpool_kernel(x_ref, o_ref):
    # (tm, taps, C) -> (tm, C): reduction over the tap axis goes to the XLU.
    o_ref[...] = jnp.max(x_ref[...].astype(jnp.float32), axis=1).astype(o_ref.dtype)


def _mean_kernel(x_ref, o_ref, *, inv):
    # (N, T, C) -> (N, C), f32 accumulation.
    o_ref[...] = (jnp.sum(x_ref[...].astype(jnp.float32), axis=1) * inv
                  ).astype(o_ref.dtype)


# ------------------------------ Pallas wrappers ------------------------------

def fused_matmul(a, b, shift, residual=None, relu=False, out_dtype=jnp.bfloat16):
    """y = relu?((a @ b) + shift [+ residual]).

    a: (M, K), b: (K, N) with any per-output-channel scale already folded into
    its columns, shift: (N,), residual: (M, N) or None.
    Operands go to the MXU in bf16; accumulation and epilogue are f32; the
    result is written in `out_dtype` (bf16 for intermediate activations).
    """
    m, k = a.shape
    n = b.shape[1]
    # >=16 rows for bf16 sublane packing; cap at 256 so v7x megacore can split M.
    tm = min(_rup(m, 16), 256)
    tn = min(_rup(n, 128), 256)
    kp = _rup(k, 128)                      # no K grid axis: K <= ~640 everywhere
    mp, np_ = _rup(m, tm), _rup(n, tn)

    a_p = _pad2(a.astype(jnp.bfloat16), mp, kp)
    b_p = _pad2(b.astype(jnp.float32), kp, np_).astype(jnp.bfloat16)
    sh = _pad2(shift.astype(jnp.float32).reshape(1, n), 1, np_)

    in_specs = [
        pl.BlockSpec((tm, kp), lambda i, j: (i, 0)),
        pl.BlockSpec((kp, tn), lambda i, j: (0, j)),
        pl.BlockSpec((1, tn), lambda i, j: (0, j)),
    ]
    args = [a_p, b_p, sh]
    if residual is None:
        kern = functools.partial(_mm_kernel, relu=relu)
    else:
        in_specs.append(pl.BlockSpec((tm, tn), lambda i, j: (i, j)))
        args.append(_pad2(residual.astype(jnp.bfloat16), mp, np_))
        kern = functools.partial(_mm_res_kernel, relu=relu)

    out = pl.pallas_call(
        kern,
        grid=(mp // tm, np_ // tn),
        in_specs=in_specs,
        out_specs=pl.BlockSpec((tm, tn), lambda i, j: (i, j)),
        out_shape=jax.ShapeDtypeStruct((mp, np_), out_dtype),
        compiler_params=pltpu.CompilerParams(
            dimension_semantics=("parallel", "parallel")),
    )(*args)
    if mp != m or np_ != n:
        out = out[:m, :n]
    return out


def linear(x, w, b, out_dtype=jnp.float32):
    # x: (N, in), w: (out, in) PyTorch layout, b: (out,).  No BN scale.
    return fused_matmul(x, jnp.transpose(w), b, relu=False, out_dtype=out_dtype)


# ------------------------------ conv helpers ------------------------------

def extract_patches(x, kh, kw, stride, pad, pad_value=0.0):
    # x: (N, H, W, C) bf16 -> (N, OH, OW, KH*KW, C), flattening order (kh, kw, c).
    n, h, w, c = x.shape
    xp = x if pad == 0 else jnp.pad(
        x, ((0, 0), (pad, pad), (pad, pad), (0, 0)), constant_values=pad_value)
    oh = (h + 2 * pad - kh) // stride + 1
    ow = (w + 2 * pad - kw) // stride + 1
    cols = []
    for i in range(kh):
        for j in range(kw):
            cols.append(xp[:, i:i + stride * oh:stride, j:j + stride * ow:stride, :])
    p = jnp.stack(cols, axis=3)  # (N, OH, OW, KH*KW, C), bf16
    return p, (n, oh, ow)
# TODO(synk): the tap gather is still XLA shifted-slice im2col (bf16 now); an
#             in-kernel halo'd gather would avoid materializing it in HBM.


def conv_bn_act(x, w, scale, shift, *, stride, pad, relu=True, residual2d=None):
    """Conv2d (no bias) + BN(scale, shift) [+ residual] [+ ReLU], one pallas_call.

    x: (N, H, W, C) NHWC; w: (Cout, Cin, KH, KW) PyTorch layout.
    BN scale is folded into the weight columns; only shift is applied in-kernel.
    """
    cout, cin, kh, kw = w.shape
    x = x.astype(jnp.bfloat16)
    if kh == 1 and kw == 1 and pad == 0:
        xs = x if stride == 1 else x[:, ::stride, ::stride, :]
        n, oh, ow, _ = xs.shape
        a = xs.reshape(n * oh * ow, cin)
    else:
        p, (n, oh, ow) = extract_patches(x, kh, kw, stride, pad, 0.0)
        a = p.reshape(n * oh * ow, kh * kw * cin)
    wmat = jnp.transpose(w, (2, 3, 1, 0)).reshape(kh * kw * cin, cout)
    wmat = wmat * scale[None, :]          # fold BN scale into the weights
    y = fused_matmul(a, wmat, shift, residual=residual2d, relu=relu)
    return y.reshape(n, oh, ow, cout)


def maxpool_3x3_s2_p1(x):
    c = x.shape[-1]
    x = x.astype(jnp.bfloat16)
    p, (n, oh, ow) = extract_patches(x, 3, 3, 2, 1, pad_value=-1e30)
    m = n * oh * ow
    patches = p.reshape(m, 9, c)
    cp = _rup(c, 128)
    tm = min(_rup(m, 16), 256)
    mp = _rup(m, tm)
    if mp != m or cp != c:
        patches = jnp.pad(patches, ((0, mp - m), (0, 0), (0, cp - c)),
                          constant_values=-1e30)
    out = pl.pallas_call(
        _maxpool_kernel,
        grid=(mp // tm,),
        in_specs=[pl.BlockSpec((tm, 9, cp), lambda i: (i, 0, 0))],
        out_specs=pl.BlockSpec((tm, cp), lambda i: (i, 0)),
        out_shape=jax.ShapeDtypeStruct((mp, cp), jnp.bfloat16),
        compiler_params=pltpu.CompilerParams(dimension_semantics=("parallel",)),
    )(patches)
    if mp != m or cp != c:
        out = out[:m, :c]
    return out.reshape(n, oh, ow, c)


def mean_over_axis1(x3d):
    # x3d: (N, T, C) -> (N, C) mean over T (global avg pool / AdaptiveAvgPool1d(1)).
    x3d = x3d.astype(jnp.bfloat16)
    n, t, c = x3d.shape
    cp = _rup(c, 128)
    xp = x3d if cp == c else jnp.pad(x3d, ((0, 0), (0, 0), (0, cp - c)))
    out = pl.pallas_call(
        functools.partial(_mean_kernel, inv=1.0 / t),
        grid=(1,),
        in_specs=[pl.BlockSpec((n, t, cp), lambda i: (0, 0, 0))],
        out_specs=pl.BlockSpec((n, cp), lambda i: (0, 0)),
        out_shape=jax.ShapeDtypeStruct((n, cp), jnp.bfloat16),
    )(xp)
    return out[:, :c] if cp != c else out


# ------------------------------ parameter init ------------------------------

def init_params(key, base=8, output_dim=200, num_classes=20):
    """ResNet-50 structure with channel widths scaled by base/64; full-width audio CNN."""
    expansion = 4
    cfg = [(3, base, 1), (4, base * 2, 2), (6, base * 4, 2), (3, base * 8, 2)]
    keys = iter(jax.random.split(key, 2048))

    def conv_w(cout, cin, k):
        fan_in = cin * k * k
        return (jax.random.normal(next(keys), (cout, cin, k, k), jnp.float32)
                * (1.0 / math.sqrt(fan_in)))

    def bn(c):
        eps = 1e-5
        gamma = 1.0 + 0.1 * jax.random.normal(next(keys), (c,), jnp.float32)
        beta = 0.1 * jax.random.normal(next(keys), (c,), jnp.float32)
        mean = 0.05 * jax.random.normal(next(keys), (c,), jnp.float32)
        var = 1.0 + 0.1 * jax.random.uniform(next(keys), (c,), jnp.float32)
        scale = gamma / jnp.sqrt(var + eps)
        shift = beta - mean * scale
        return scale, shift

    def bias(c):
        return 0.01 * jax.random.normal(next(keys), (c,), jnp.float32)

    visual = {"stem_conv": conv_w(base, 3, 7), "stem_bn": bn(base)}
    layers = []
    in_c = base
    for (nblocks, planes, stride) in cfg:
        blocks = []
        for bi in range(nblocks):
            s = stride if bi == 0 else 1
            blk = {
                "stride": s,
                "conv1": conv_w(planes, in_c, 1), "bn1": bn(planes),
                "conv2": conv_w(planes, planes, 3), "bn2": bn(planes),
                "conv3": conv_w(planes * expansion, planes, 1),
                "bn3": bn(planes * expansion),
            }
            if s != 1 or in_c != planes * expansion:
                blk["down_conv"] = conv_w(planes * expansion, in_c, 1)
                blk["down_bn"] = bn(planes * expansion)
            in_c = planes * expansion
            blocks.append(blk)
        layers.append(blocks)
    visual["layers"] = layers
    num_features = in_c
    visual["fc_w"] = (jax.random.normal(next(keys), (output_dim, num_features), jnp.float32)
                      * (1.0 / math.sqrt(num_features)))
    visual["fc_b"] = bias(output_dim)

    def conv1d_w(cout, cin, k):
        return (jax.random.normal(next(keys), (cout, cin, k), jnp.float32)
                * (1.0 / math.sqrt(cin * k)))

    audio = {
        "conv1_w": conv1d_w(64, 1, 5), "conv1_b": bias(64),
        "conv2_w": conv1d_w(128, 64, 5), "conv2_b": bias(128),
        "conv3_w": conv1d_w(256, 128, 5), "conv3_b": bias(256),
        "fc_w": (jax.random.normal(next(keys), (output_dim, 256), jnp.float32)
                 * (1.0 / math.sqrt(256))),
        "fc_b": bias(output_dim),
    }

    joint_w = (jax.random.normal(next(keys), (num_classes, output_dim * 2), jnp.float32)
               * (1.0 / math.sqrt(output_dim * 2)))
    joint_b = bias(num_classes)
    return {"visual": visual, "audio": audio,
            "joint_fc_w": joint_w, "joint_fc_b": joint_b}


# ------------------------------ forward passes ------------------------------

def resnet_branch_forward(params, x_nchw):
    # x_nchw: (N, 3, H, W) float32, PyTorch NCHW convention.
    x = jnp.transpose(x_nchw, (0, 2, 3, 1)).astype(jnp.bfloat16)   # -> NHWC bf16
    sc, sh = params["stem_bn"]
    x = conv_bn_act(x, params["stem_conv"], sc, sh, stride=2, pad=3, relu=True)
    x = maxpool_3x3_s2_p1(x)
    # TODO(synk): each bottleneck is 3-4 pallas_calls; whole-block fusion with
    #             VMEM-resident activations would remove the launch/glue cost.
    for blocks in params["layers"]:
        for blk in blocks:
            identity = x
            out = conv_bn_act(x, blk["conv1"], *blk["bn1"],
                              stride=1, pad=0, relu=True)
            out = conv_bn_act(out, blk["conv2"], *blk["bn2"],
                              stride=blk["stride"], pad=1, relu=True)
            if "down_conv" in blk:
                identity = conv_bn_act(identity, blk["down_conv"], *blk["down_bn"],
                                       stride=blk["stride"], pad=0, relu=False)
            ni, hi, wi, ci = identity.shape
            res2d = identity.reshape(ni * hi * wi, ci)
            # conv3 + bn3 + residual add + ReLU fused into one kernel.
            x = conv_bn_act(out, blk["conv3"], *blk["bn3"],
                            stride=1, pad=0, relu=True, residual2d=res2d)
    n, h, w, c = x.shape
    feat = mean_over_axis1(x.reshape(n, h * w, c))   # global average pool
    return linear(feat, params["fc_w"], params["fc_b"])


def _conv1d_relu(x, w, b, stride):
    # x: (N, L, Cin) channels-last bf16; w: (Cout, Cin, K) PyTorch layout.
    cout, cin, k = w.shape
    n, l, _ = x.shape
    x = x.astype(jnp.bfloat16)
    lo = (l - k) // stride + 1
    cols = [x[:, t:t + stride * lo:stride, :] for t in range(k)]
    p = jnp.stack(cols, axis=2)                     # (N, Lout, K, Cin) bf16
    a = p.reshape(n * lo, k * cin)
    bm = jnp.transpose(w, (2, 1, 0)).reshape(k * cin, cout)
    y = fused_matmul(a, bm, b, relu=True)
    return y.reshape(n, lo, cout)


def audio_branch_forward(params, audio_ncl):
    # audio_ncl: (N, 1, L) float32, PyTorch (N, C, L) convention.
    x = jnp.transpose(audio_ncl, (0, 2, 1)).astype(jnp.bfloat16)  # -> (N, L, C)
    x = _conv1d_relu(x, params["conv1_w"], params["conv1_b"], 2)
    x = _conv1d_relu(x, params["conv2_w"], params["conv2_b"], 2)
    x = _conv1d_relu(x, params["conv3_w"], params["conv3_b"], 2)
    feat = mean_over_axis1(x)                       # AdaptiveAvgPool1d(1) + flatten
    return linear(feat, params["fc_w"], params["fc_b"])


def cross_sensory_forward(params, audio_input, visual_input):
    visual_output = resnet_branch_forward(params["visual"], visual_input)
    audio_output = audio_branch_forward(params["audio"], audio_input)
    joint_input = jnp.concatenate([visual_output, audio_output], axis=1)
    joint_embeddings = linear(joint_input, params["joint_fc_w"], params["joint_fc_b"])
    return audio_output, visual_output, joint_embeddings


if __name__ == "__main__":
    key = jax.random.PRNGKey(0)
    pkey, akey, vkey = jax.random.split(key, 3)
    params = init_params(pkey, base=8, output_dim=200, num_classes=20)
    visual = jax.random.normal(vkey, (2, 3, 32, 32), jnp.float32)   # NCHW
    audio = jax.random.normal(akey, (2, 1, 400), jnp.float32)       # NCL

    fwd = jax.jit(lambda a, v: cross_sensory_forward(params, a, v))
    audio_out, visual_out, joint = jax.block_until_ready(fwd(audio, visual))

    assert audio_out.shape == (2, 200), audio_out.shape
    assert visual_out.shape == (2, 200), visual_out.shape
    assert joint.shape == (2, 20), joint.shape
    assert bool(jnp.all(jnp.isfinite(audio_out)))
    assert bool(jnp.all(jnp.isfinite(visual_out)))
    assert bool(jnp.all(jnp.isfinite(joint)))
    print("KERNEL_OK")
</pallas_src>

<mosaic_0001>
module attributes {stable_mosaic.version = 11 : i64} {
  func.func @_mm_kernel(%arg0: i32, %arg1: i32, %arg2: memref<256x256xbf16, #tpu.memory_space<vmem>>, %arg3: memref<256x128xbf16, #tpu.memory_space<vmem>>, %arg4: memref<1x128xf32, #tpu.memory_space<vmem>>, %arg5: memref<256x128xbf16, #tpu.memory_space<vmem>>) attributes {dimension_semantics = [#tpu.dimension_semantics<parallel>, #tpu.dimension_semantics<parallel>], iteration_bounds = array<i64: 2, 1>, scalar_prefetch = 0 : i64, scratch_operands = 0 : i64, tpu.core_type = #tpu.core_type<tc>, window_params = [{transform_indices = @transform_0, window_bounds = array<i64: 256, 256>}, {transform_indices = @transform_1, window_bounds = array<i64: 256, 128>}, {transform_indices = @transform_2, window_bounds = array<i64: 1, 128>}, {transform_indices = @transform_3, window_bounds = array<i64: 256, 128>}]} {
    %c0 = arith.constant 0 : index
    %c0_0 = arith.constant 0 : index
    %0 = vector.load %arg2[%c0, %c0_0] : memref<256x256xbf16, #tpu.memory_space<vmem>>, vector<256x256xbf16>
    %c0_1 = arith.constant 0 : index
    %c0_2 = arith.constant 0 : index
    %1 = vector.load %arg3[%c0_1, %c0_2] : memref<256x128xbf16, #tpu.memory_space<vmem>>, vector<256x128xbf16>
    %cst = arith.constant dense<0.000000e+00> : vector<256x128xf32>
    %2 = tpu.matmul %0, %1, %cst {dimension_numbers = #tpu.dot_dimension_numbers<[1], [0], [0], [1], [0, 0, 1, 1], [], []>} : vector<256x256xbf16>, vector<256x128xbf16>, vector<256x128xf32> -> vector<256x128xf32>
    %c0_3 = arith.constant 0 : index
    %c0_4 = arith.constant 0 : index
    %3 = vector.load %arg4[%c0_3, %c0_4] : memref<1x128xf32, #tpu.memory_space<vmem>>, vector<1x128xf32>
    %4 = vector.broadcast %3 : vector<1x128xf32> to vector<256x128xf32>
    %5 = arith.addf %2, %4 : vector<256x128xf32>
    %cst_5 = arith.constant 0.000000e+00 : f32
    %6 = vector.broadcast %cst_5 : f32 to vector<256x128xf32>
    %7 = arith.maximumf %5, %6 : vector<256x128xf32>
    %8 = arith.truncf %7 : vector<256x128xf32> to vector<256x128xbf16>
    %c0_6 = arith.constant 0 : index
    %c0_7 = arith.constant 0 : index
    %9 = vector.load %arg5[%c0_6, %c0_7] : memref<256x128xbf16, #tpu.memory_space<vmem>>, vector<256x128xbf16>
    tpu.vector_store %arg5[%c0_6, %c0_7], %8 {strides = array<i32>} : memref<256x128xbf16, #tpu.memory_space<vmem>>, vector<256x128xbf16>,
    return
  }
  func.func @transform_0(%arg0: i32, %arg1: i32) -> (i32, i32) {
    %c0_i32 = arith.constant 0 : i32
    %c0_i32_0 = arith.constant 0 : i32
    return %arg0, %c0_i32 : i32, i32
  }
  func.func @transform_1(%arg0: i32, %arg1: i32) -> (i32, i32) {
    %c0_i32 = arith.constant 0 : i32
    %c0_i32_0 = arith.constant 0 : i32
    return %c0_i32, %arg1 : i32, i32
  }
  func.func @transform_2(%arg0: i32, %arg1: i32) -> (i32, i32) {
    %c0_i32 = arith.constant 0 : i32
    %c0_i32_0 = arith.constant 0 : i32
    return %c0_i32, %arg1 : i32, i32
  }
  func.func @transform_3(%arg0: i32, %arg1: i32) -> (i32, i32) {
    %c0_i32 = arith.constant 0 : i32
    return %arg0, %arg1 : i32, i32
  }
}

module attributes {stable_mosaic.version = 11 : i64} {
  func.func @_maxpool_kernel(%arg0: i32, %arg1: memref<128x9x128xbf16, #tpu.memory_space<vmem>>, %arg2: memref<128x128xbf16, #tpu.memory_space<vmem>>) attributes {dimension_semantics = [#tpu.dimension_semantics<parallel>], iteration_bounds = array<i64: 1>, scalar_prefetch = 0 : i64, scratch_operands = 0 : i64, tpu.core_type = #tpu.core_type<tc>, window_params = [{transform_indices = @transform_0, window_bounds = array<i64: 128, 9, 128>}, {transform_indices = @transform_1, window_bounds = array<i64: 128, 128>}]} {
    %c0 = arith.constant 0 : index
    %c0_0 = arith.constant 0 : index
    %c0_1 = arith.constant 0 : index
    %0 = vector.load %arg1[%c0, %c0_0, %c0_1] : memref<128x9x128xbf16, #tpu.memory_space<vmem>>, vector<128x9x128xbf16>
    %1 = arith.extf %0 : vector<128x9x128xbf16> to vector<128x9x128xf32>
    %cst = arith.constant dense<0xFF800000> : vector<128x128xf32>
    %2 = vector.multi_reduction <maximumf>, %1, %cst [1] : vector<128x9x128xf32> to vector<128x128xf32>
    %3 = arith.truncf %2 : vector<128x128xf32> to vector<128x128xbf16>
    %c0_2 = arith.constant 0 : index
    %c0_3 = arith.constant 0 : index
    %4 = vector.load %arg2[%c0_2, %c0_3] : memref<128x128xbf16, #tpu.memory_space<vmem>>, vector<128x128xbf16>
    tpu.vector_store %arg2[%c0_2, %c0_3], %3 {strides = array<i32>} : memref<128x128xbf16, #tpu.memory_space<vmem>>, vector<128x128xbf16>,
    return
  }
  func.func @transform_0(%arg0: i32) -> (i32, i32, i32) {
    %c0_i32 = arith.constant 0 : i32
    %c0_i32_0 = arith.constant 0 : i32
    %c0_i32_1 = arith.constant 0 : i32
    return %arg0, %c0_i32, %c0_i32_0 : i32, i32, i32
  }
  func.func @transform_1(%arg0: i32) -> (i32, i32) {
    %c0_i32 = arith.constant 0 : i32
    %c0_i32_0 = arith.constant 0 : i32
    return %arg0, %c0_i32 : i32, i32
  }
}

module attributes {stable_mosaic.version = 11 : i64} {
  func.func @_mm_kernel(%arg0: i32, %arg1: i32, %arg2: memref<128x128xbf16, #tpu.memory_space<vmem>>, %arg3: memref<128x128xbf16, #tpu.memory_space<vmem>>, %arg4: memref<1x128xf32, #tpu.memory_space<vmem>>, %arg5: memref<128x128xbf16, #tpu.memory_space<vmem>>) attributes {dimension_semantics = [#tpu.dimension_semantics<parallel>, #tpu.dimension_semantics<parallel>], iteration_bounds = array<i64: 1, 1>, scalar_prefetch = 0 : i64, scratch_operands = 0 : i64, tpu.core_type = #tpu.core_type<tc>, window_params = [{transform_indices = @transform_0, window_bounds = array<i64: 128, 128>}, {transform_indices = @transform_1, window_bounds = array<i64: 128, 128>}, {transform_indices = @transform_2, window_bounds = array<i64: 1, 128>}, {transform_indices = @transform_3, window_bounds = array<i64: 128, 128>}]} {
    %c0 = arith.constant 0 : index
    %c0_0 = arith.constant 0 : index
    %0 = vector.load %arg2[%c0, %c0_0] : memref<128x128xbf16, #tpu.memory_space<vmem>>, vector<128x128xbf16>
    %c0_1 = arith.constant 0 : index
    %c0_2 = arith.constant 0 : index
    %1 = vector.load %arg3[%c0_1, %c0_2] : memref<128x128xbf16, #tpu.memory_space<vmem>>, vector<128x128xbf16>
    %cst = arith.constant dense<0.000000e+00> : vector<128x128xf32>
    %2 = tpu.matmul %0, %1, %cst {dimension_numbers = #tpu.dot_dimension_numbers<[1], [0], [0], [1], [0, 0, 1, 1], [], []>} : vector<128x128xbf16>, vector<128x128xbf16>, vector<128x128xf32> -> vector<128x128xf32>
    %c0_3 = arith.constant 0 : index
    %c0_4 = arith.constant 0 : index
    %3 = vector.load %arg4[%c0_3, %c0_4] : memref<1x128xf32, #tpu.memory_space<vmem>>, vector<1x128xf32>
    %4 = vector.broadcast %3 : vector<1x128xf32> to vector<128x128xf32>
    %5 = arith.addf %2, %4 : vector<128x128xf32>
    %cst_5 = arith.constant 0.000000e+00 : f32
    %6 = vector.broadcast %cst_5 : f32 to vector<128x128xf32>
    %7 = arith.maximumf %5, %6 : vector<128x128xf32>
    %8 = arith.truncf %7 : vector<128x128xf32> to vector<128x128xbf16>
    %c0_6 = arith.constant 0 : index
    %c0_7 = arith.constant 0 : index
    %9 = vector.load %arg5[%c0_6, %c0_7] : memref<128x128xbf16, #tpu.memory_space<vmem>>, vector<128x128xbf16>
    tpu.vector_store %arg5[%c0_6, %c0_7], %8 {strides = array<i32>} : memref<128x128xbf16, #tpu.memory_space<vmem>>, vector<128x128xbf16>,
    return
  }
  func.func @transform_0(%arg0: i32, %arg1: i32) -> (i32, i32) {
    %c0_i32 = arith.constant 0 : i32
    %c0_i32_0 = arith.constant 0 : i32
    return %arg0, %c0_i32 : i32, i32
  }
  func.func @transform_1(%arg0: i32, %arg1: i32) -> (i32, i32) {
    %c0_i32 = arith.constant 0 : i32
    %c0_i32_0 = arith.constant 0 : i32
    return %c0_i32, %arg1 : i32, i32
  }
  func.func @transform_2(%arg0: i32, %arg1: i32) -> (i32, i32) {
    %c0_i32 = arith.constant 0 : i32
    %c0_i32_0 = arith.constant 0 : i32
    return %c0_i32, %arg1 : i32, i32
  }
  func.func @transform_3(%arg0: i32, %arg1: i32) -> (i32, i32) {
    %c0_i32 = arith.constant 0 : i32
    return %arg0, %arg1 : i32, i32
  }
}

module attributes {stable_mosaic.version = 11 : i64} {
  func.func @_mm_kernel(%arg0: i32, %arg1: i32, %arg2: memref<128x128xbf16, #tpu.memory_space<vmem>>, %arg3: memref<128x128xbf16, #tpu.memory_space<vmem>>, %arg4: memref<1x128xf32, #tpu.memory_space<vmem>>, %arg5: memref<128x128xbf16, #tpu.memory_space<vmem>>) attributes {dimension_semantics = [#tpu.dimension_semantics<parallel>, #tpu.dimension_semantics<parallel>], iteration_bounds = array<i64: 1, 1>, scalar_prefetch = 0 : i64, scratch_operands = 0 : i64, tpu.core_type = #tpu.core_type<tc>, window_params = [{transform_indices = @transform_0, window_bounds = array<i64: 128, 128>}, {transform_indices = @transform_1, window_bounds = array<i64: 128, 128>}, {transform_indices = @transform_2, window_bounds = array<i64: 1, 128>}, {transform_indices = @transform_3, window_bounds = array<i64: 128, 128>}]} {
    %c0 = arith.constant 0 : index
    %c0_0 = arith.constant 0 : index
    %0 = vector.load %arg2[%c0, %c0_0] : memref<128x128xbf16, #tpu.memory_space<vmem>>, vector<128x128xbf16>
    %c0_1 = arith.constant 0 : index
    %c0_2 = arith.constant 0 : index
    %1 = vector.load %arg3[%c0_1, %c0_2] : memref<128x128xbf16, #tpu.memory_space<vmem>>, vector<128x128xbf16>
    %cst = arith.constant dense<0.000000e+00> : vector<128x128xf32>
    %2 = tpu.matmul %0, %1, %cst {dimension_numbers = #tpu.dot_dimension_numbers<[1], [0], [0], [1], [0, 0, 1, 1], [], []>} : vector<128x128xbf16>, vector<128x128xbf16>, vector<128x128xf32> -> vector<128x128xf32>
    %c0_3 = arith.constant 0 : index
    %c0_4 = arith.constant 0 : index
    %3 = vector.load %arg4[%c0_3, %c0_4] : memref<1x128xf32, #tpu.memory_space<vmem>>, vector<1x128xf32>
    %4 = vector.broadcast %3 : vector<1x128xf32> to vector<128x128xf32>
    %5 = arith.addf %2, %4 : vector<128x128xf32>
    %6 = arith.truncf %5 : vector<128x128xf32> to vector<128x128xbf16>
    %c0_5 = arith.constant 0 : index
    %c0_6 = arith.constant 0 : index
    %7 = vector.load %arg5[%c0_5, %c0_6] : memref<128x128xbf16, #tpu.memory_space<vmem>>, vector<128x128xbf16>
    tpu.vector_store %arg5[%c0_5, %c0_6], %6 {strides = array<i32>} : memref<128x128xbf16, #tpu.memory_space<vmem>>, vector<128x128xbf16>,
    return
  }
  func.func @transform_0(%arg0: i32, %arg1: i32) -> (i32, i32) {
    %c0_i32 = arith.constant 0 : i32
    %c0_i32_0 = arith.constant 0 : i32
    return %arg0, %c0_i32 : i32, i32
  }
  func.func @transform_1(%arg0: i32, %arg1: i32) -> (i32, i32) {
    %c0_i32 = arith.constant 0 : i32
    %c0_i32_0 = arith.constant 0 : i32
    return %c0_i32, %arg1 : i32, i32
  }
  func.func @transform_2(%arg0: i32, %arg1: i32) -> (i32, i32) {
    %c0_i32 = arith.constant 0 : i32
    %c0_i32_0 = arith.constant 0 : i32
    return %c0_i32, %arg1 : i32, i32
  }
  func.func @transform_3(%arg0: i32, %arg1: i32) -> (i32, i32) {
    %c0_i32 = arith.constant 0 : i32
    return %arg0, %arg1 : i32, i32
  }
}

module attributes {stable_mosaic.version = 11 : i64} {
  func.func @_mm_res_kernel(%arg0: i32, %arg1: i32, %arg2: memref<128x128xbf16, #tpu.memory_space<vmem>>, %arg3: memref<128x128xbf16, #tpu.memory_space<vmem>>, %arg4: memref<1x128xf32, #tpu.memory_space<vmem>>, %arg5: memref<128x128xbf16, #tpu.memory_space<vmem>>, %arg6: memref<128x128xbf16, #tpu.memory_space<vmem>>) attributes {dimension_semantics = [#tpu.dimension_semantics<parallel>, #tpu.dimension_semantics<parallel>], iteration_bounds = array<i64: 1, 1>, scalar_prefetch = 0 : i64, scratch_operands = 0 : i64, tpu.core_type = #tpu.core_type<tc>, window_params = [{transform_indices = @transform_0, window_bounds = array<i64: 128, 128>}, {transform_indices = @transform_1, window_bounds = array<i64: 128, 128>}, {transform_indices = @transform_2, window_bounds = array<i64: 1, 128>}, {transform_indices = @transform_3, window_bounds = array<i64: 128, 128>}, {transform_indices = @transform_4, window_bounds = array<i64: 128, 128>}]} {
    %c0 = arith.constant 0 : index
    %c0_0 = arith.constant 0 : index
    %0 = vector.load %arg2[%c0, %c0_0] : memref<128x128xbf16, #tpu.memory_space<vmem>>, vector<128x128xbf16>
    %c0_1 = arith.constant 0 : index
    %c0_2 = arith.constant 0 : index
    %1 = vector.load %arg3[%c0_1, %c0_2] : memref<128x128xbf16, #tpu.memory_space<vmem>>, vector<128x128xbf16>
    %cst = arith.constant dense<0.000000e+00> : vector<128x128xf32>
    %2 = tpu.matmul %0, %1, %cst {dimension_numbers = #tpu.dot_dimension_numbers<[1], [0], [0], [1], [0, 0, 1, 1], [], []>} : vector<128x128xbf16>, vector<128x128xbf16>, vector<128x128xf32> -> vector<128x128xf32>
    %c0_3 = arith.constant 0 : index
    %c0_4 = arith.constant 0 : index
    %3 = vector.load %arg4[%c0_3, %c0_4] : memref<1x128xf32, #tpu.memory_space<vmem>>, vector<1x128xf32>
    %4 = vector.broadcast %3 : vector<1x128xf32> to vector<128x128xf32>
    %5 = arith.addf %2, %4 : vector<128x128xf32>
    %c0_5 = arith.constant 0 : index
    %c0_6 = arith.constant 0 : index
    %6 = vector.load %arg5[%c0_5, %c0_6] : memref<128x128xbf16, #tpu.memory_space<vmem>>, vector<128x128xbf16>
    %7 = arith.extf %6 : vector<128x128xbf16> to vector<128x128xf32>
    %8 = arith.addf %5, %7 : vector<128x128xf32>
    %cst_7 = arith.constant 0.000000e+00 : f32
    %9 = vector.broadcast %cst_7 : f32 to vector<128x128xf32>
    %10 = arith.maximumf %8, %9 : vector<128x128xf32>
    %11 = arith.truncf %10 : vector<128x128xf32> to vector<128x128xbf16>
    %c0_8 = arith.constant 0 : index
    %c0_9 = arith.constant 0 : index
    %12 = vector.load %arg6[%c0_8, %c0_9] : memref<128x128xbf16, #tpu.memory_space<vmem>>, vector<128x128xbf16>
    tpu.vector_store %arg6[%c0_8, %c0_9], %11 {strides = array<i32>} : memref<128x128xbf16, #tpu.memory_space<vmem>>, vector<128x128xbf16>,
    return
  }
  func.func @transform_0(%arg0: i32, %arg1: i32) -> (i32, i32) {
    %c0_i32 = arith.constant 0 : i32
    %c0_i32_0 = arith.constant 0 : i32
    return %arg0, %c0_i32 : i32, i32
  }
  func.func @transform_1(%arg0: i32, %arg1: i32) -> (i32, i32) {
    %c0_i32 = arith.constant 0 : i32
    %c0_i32_0 = arith.constant 0 : i32
    return %c0_i32, %arg1 : i32, i32
  }
  func.func @transform_2(%arg0: i32, %arg1: i32) -> (i32, i32) {
    %c0_i32 = arith.constant 0 : i32
    %c0_i32_0 = arith.constant 0 : i32
    return %c0_i32, %arg1 : i32, i32
  }
  func.func @transform_3(%arg0: i32, %arg1: i32) -> (i32, i32) {
    %c0_i32 = arith.constant 0 : i32
    return %arg0, %arg1 : i32, i32
  }
  func.func @transform_4(%arg0: i32, %arg1: i32) -> (i32, i32) {
    %c0_i32 = arith.constant 0 : i32
    return %arg0, %arg1 : i32, i32
  }
}

module attributes {stable_mosaic.version = 11 : i64} {
  func.func @_mm_kernel(%arg0: i32, %arg1: i32, %arg2: memref<32x256xbf16, #tpu.memory_space<vmem>>, %arg3: memref<256x128xbf16, #tpu.memory_space<vmem>>, %arg4: memref<1x128xf32, #tpu.memory_space<vmem>>, %arg5: memref<32x128xbf16, #tpu.memory_space<vmem>>) attributes {dimension_semantics = [#tpu.dimension_semantics<parallel>, #tpu.dimension_semantics<parallel>], iteration_bounds = array<i64: 1, 1>, scalar_prefetch = 0 : i64, scratch_operands = 0 : i64, tpu.core_type = #tpu.core_type<tc>, window_params = [{transform_indices = @transform_0, window_bounds = array<i64: 32, 256>}, {transform_indices = @transform_1, window_bounds = array<i64: 256, 128>}, {transform_indices = @transform_2, window_bounds = array<i64: 1, 128>}, {transform_indices = @transform_3, window_bounds = array<i64: 32, 128>}]} {
    %c0 = arith.constant 0 : index
    %c0_0 = arith.constant 0 : index
    %0 = vector.load %arg2[%c0, %c0_0] : memref<32x256xbf16, #tpu.memory_space<vmem>>, vector<32x256xbf16>
    %c0_1 = arith.constant 0 : index
    %c0_2 = arith.constant 0 : index
    %1 = vector.load %arg3[%c0_1, %c0_2] : memref<256x128xbf16, #tpu.memory_space<vmem>>, vector<256x128xbf16>
    %cst = arith.constant dense<0.000000e+00> : vector<32x128xf32>
    %2 = tpu.matmul %0, %1, %cst {dimension_numbers = #tpu.dot_dimension_numbers<[1], [0], [0], [1], [0, 0, 1, 1], [], []>} : vector<32x256xbf16>, vector<256x128xbf16>, vector<32x128xf32> -> vector<32x128xf32>
    %c0_3 = arith.constant 0 : index
    %c0_4 = arith.constant 0 : index
    %3 = vector.load %arg4[%c0_3, %c0_4] : memref<1x128xf32, #tpu.memory_space<vmem>>, vector<1x128xf32>
    %4 = vector.broadcast %3 : vector<1x128xf32> to vector<32x128xf32>
    %5 = arith.addf %2, %4 : vector<32x128xf32>
    %cst_5 = arith.constant 0.000000e+00 : f32
    %6 = vector.broadcast %cst_5 : f32 to vector<32x128xf32>
    %7 = arith.maximumf %5, %6 : vector<32x128xf32>
    %8 = arith.truncf %7 : vector<32x128xf32> to vector<32x128xbf16>
    %c0_6 = arith.constant 0 : index
    %c0_7 = arith.constant 0 : index
    %9 = vector.load %arg5[%c0_6, %c0_7] : memref<32x128xbf16, #tpu.memory_space<vmem>>, vector<32x128xbf16>
    tpu.vector_store %arg5[%c0_6, %c0_7], %8 {strides = array<i32>} : memref<32x128xbf16, #tpu.memory_space<vmem>>, vector<32x128xbf16>,
    return
  }
  func.func @transform_0(%arg0: i32, %arg1: i32) -> (i32, i32) {
    %c0_i32 = arith.constant 0 : i32
    %c0_i32_0 = arith.constant 0 : i32
    return %arg0, %c0_i32 : i32, i32
  }
  func.func @transform_1(%arg0: i32, %arg1: i32) -> (i32, i32) {
    %c0_i32 = arith.constant 0 : i32
    %c0_i32_0 = arith.constant 0 : i32
    return %c0_i32, %arg1 : i32, i32
  }
  func.func @transform_2(%arg0: i32, %arg1: i32) -> (i32, i32) {
    %c0_i32 = arith.constant 0 : i32
    %c0_i32_0 = arith.constant 0 : i32
    return %c0_i32, %arg1 : i32, i32
  }
  func.func @transform_3(%arg0: i32, %arg1: i32) -> (i32, i32) {
    %c0_i32 = arith.constant 0 : i32
    return %arg0, %arg1 : i32, i32
  }
}

module attributes {stable_mosaic.version = 11 : i64} {
  func.func @_mm_kernel(%arg0: i32, %arg1: i32, %arg2: memref<32x128xbf16, #tpu.memory_space<vmem>>, %arg3: memref<128x128xbf16, #tpu.memory_space<vmem>>, %arg4: memref<1x128xf32, #tpu.memory_space<vmem>>, %arg5: memref<32x128xbf16, #tpu.memory_space<vmem>>) attributes {dimension_semantics = [#tpu.dimension_semantics<parallel>, #tpu.dimension_semantics<parallel>], iteration_bounds = array<i64: 1, 1>, scalar_prefetch = 0 : i64, scratch_operands = 0 : i64, tpu.core_type = #tpu.core_type<tc>, window_params = [{transform_indices = @transform_0, window_bounds = array<i64: 32, 128>}, {transform_indices = @transform_1, window_bounds = array<i64: 128, 128>}, {transform_indices = @transform_2, window_bounds = array<i64: 1, 128>}, {transform_indices = @transform_3, window_bounds = array<i64: 32, 128>}]} {
    %c0 = arith.constant 0 : index
    %c0_0 = arith.constant 0 : index
    %0 = vector.load %arg2[%c0, %c0_0] : memref<32x128xbf16, #tpu.memory_space<vmem>>, vector<32x128xbf16>
    %c0_1 = arith.constant 0 : index
    %c0_2 = arith.constant 0 : index
    %1 = vector.load %arg3[%c0_1, %c0_2] : memref<128x128xbf16, #tpu.memory_space<vmem>>, vector<128x128xbf16>
    %cst = arith.constant dense<0.000000e+00> : vector<32x128xf32>
    %2 = tpu.matmul %0, %1, %cst {dimension_numbers = #tpu.dot_dimension_numbers<[1], [0], [0], [1], [0, 0, 1, 1], [], []>} : vector<32x128xbf16>, vector<128x128xbf16>, vector<32x128xf32> -> vector<32x128xf32>
    %c0_3 = arith.constant 0 : index
    %c0_4 = arith.constant 0 : index
    %3 = vector.load %arg4[%c0_3, %c0_4] : memref<1x128xf32, #tpu.memory_space<vmem>>, vector<1x128xf32>
    %4 = vector.broadcast %3 : vector<1x128xf32> to vector<32x128xf32>
    %5 = arith.addf %2, %4 : vector<32x128xf32>
    %6 = arith.truncf %5 : vector<32x128xf32> to vector<32x128xbf16>
    %c0_5 = arith.constant 0 : index
    %c0_6 = arith.constant 0 : index
    %7 = vector.load %arg5[%c0_5, %c0_6] : memref<32x128xbf16, #tpu.memory_space<vmem>>, vector<32x128xbf16>
    tpu.vector_store %arg5[%c0_5, %c0_6], %6 {strides = array<i32>} : memref<32x128xbf16, #tpu.memory_space<vmem>>, vector<32x128xbf16>,
    return
  }
  func.func @transform_0(%arg0: i32, %arg1: i32) -> (i32, i32) {
    %c0_i32 = arith.constant 0 : i32
    %c0_i32_0 = arith.constant 0 : i32
    return %arg0, %c0_i32 : i32, i32
  }
  func.func @transform_1(%arg0: i32, %arg1: i32) -> (i32, i32) {
    %c0_i32 = arith.constant 0 : i32
    %c0_i32_0 = arith.constant 0 : i32
    return %c0_i32, %arg1 : i32, i32
  }
  func.func @transform_2(%arg0: i32, %arg1: i32) -> (i32, i32) {
    %c0_i32 = arith.constant 0 : i32
    %c0_i32_0 = arith.constant 0 : i32
    return %c0_i32, %arg1 : i32, i32
  }
  func.func @transform_3(%arg0: i32, %arg1: i32) -> (i32, i32) {
    %c0_i32 = arith.constant 0 : i32
    return %arg0, %arg1 : i32, i32
  }
}

module attributes {stable_mosaic.version = 11 : i64} {
  func.func @_mm_res_kernel(%arg0: i32, %arg1: i32, %arg2: memref<32x128xbf16, #tpu.memory_space<vmem>>, %arg3: memref<128x128xbf16, #tpu.memory_space<vmem>>, %arg4: memref<1x128xf32, #tpu.memory_space<vmem>>, %arg5: memref<32x128xbf16, #tpu.memory_space<vmem>>, %arg6: memref<32x128xbf16, #tpu.memory_space<vmem>>) attributes {dimension_semantics = [#tpu.dimension_semantics<parallel>, #tpu.dimension_semantics<parallel>], iteration_bounds = array<i64: 1, 1>, scalar_prefetch = 0 : i64, scratch_operands = 0 : i64, tpu.core_type = #tpu.core_type<tc>, window_params = [{transform_indices = @transform_0, window_bounds = array<i64: 32, 128>}, {transform_indices = @transform_1, window_bounds = array<i64: 128, 128>}, {transform_indices = @transform_2, window_bounds = array<i64: 1, 128>}, {transform_indices = @transform_3, window_bounds = array<i64: 32, 128>}, {transform_indices = @transform_4, window_bounds = array<i64: 32, 128>}]} {
    %c0 = arith.constant 0 : index
    %c0_0 = arith.constant 0 : index
    %0 = vector.load %arg2[%c0, %c0_0] : memref<32x128xbf16, #tpu.memory_space<vmem>>, vector<32x128xbf16>
    %c0_1 = arith.constant 0 : index
    %c0_2 = arith.constant 0 : index
    %1 = vector.load %arg3[%c0_1, %c0_2] : memref<128x128xbf16, #tpu.memory_space<vmem>>, vector<128x128xbf16>
    %cst = arith.constant dense<0.000000e+00> : vector<32x128xf32>
    %2 = tpu.matmul %0, %1, %cst {dimension_numbers = #tpu.dot_dimension_numbers<[1], [0], [0], [1], [0, 0, 1, 1], [], []>} : vector<32x128xbf16>, vector<128x128xbf16>, vector<32x128xf32> -> vector<32x128xf32>
    %c0_3 = arith.constant 0 : index
    %c0_4 = arith.constant 0 : index
    %3 = vector.load %arg4[%c0_3, %c0_4] : memref<1x128xf32, #tpu.memory_space<vmem>>, vector<1x128xf32>
    %4 = vector.broadcast %3 : vector<1x128xf32> to vector<32x128xf32>
    %5 = arith.addf %2, %4 : vector<32x128xf32>
    %c0_5 = arith.constant 0 : index
    %c0_6 = arith.constant 0 : index
    %6 = vector.load %arg5[%c0_5, %c0_6] : memref<32x128xbf16, #tpu.memory_space<vmem>>, vector<32x128xbf16>
    %7 = arith.extf %6 : vector<32x128xbf16> to vector<32x128xf32>
    %8 = arith.addf %5, %7 : vector<32x128xf32>
    %cst_7 = arith.constant 0.000000e+00 : f32
    %9 = vector.broadcast %cst_7 : f32 to vector<32x128xf32>
    %10 = arith.maximumf %8, %9 : vector<32x128xf32>
    %11 = arith.truncf %10 : vector<32x128xf32> to vector<32x128xbf16>
    %c0_8 = arith.constant 0 : index
    %c0_9 = arith.constant 0 : index
    %12 = vector.load %arg6[%c0_8, %c0_9] : memref<32x128xbf16, #tpu.memory_space<vmem>>, vector<32x128xbf16>
    tpu.vector_store %arg6[%c0_8, %c0_9], %11 {strides = array<i32>} : memref<32x128xbf16, #tpu.memory_space<vmem>>, vector<32x128xbf16>,
    return
  }
  func.func @transform_0(%arg0: i32, %arg1: i32) -> (i32, i32) {
    %c0_i32 = arith.constant 0 : i32
    %c0_i32_0 = arith.constant 0 : i32
    return %arg0, %c0_i32 : i32, i32
  }
  func.func @transform_1(%arg0: i32, %arg1: i32) -> (i32, i32) {
    %c0_i32 = arith.constant 0 : i32
    %c0_i32_0 = arith.constant 0 : i32
    return %c0_i32, %arg1 : i32, i32
  }
  func.func @transform_2(%arg0: i32, %arg1: i32) -> (i32, i32) {
    %c0_i32 = arith.constant 0 : i32
    %c0_i32_0 = arith.constant 0 : i32
    return %c0_i32, %arg1 : i32, i32
  }
  func.func @transform_3(%arg0: i32, %arg1: i32) -> (i32, i32) {
    %c0_i32 = arith.constant 0 : i32
    return %arg0, %arg1 : i32, i32
  }
  func.func @transform_4(%arg0: i32, %arg1: i32) -> (i32, i32) {
    %c0_i32 = arith.constant 0 : i32
    return %arg0, %arg1 : i32, i32
  }
}

module attributes {stable_mosaic.version = 11 : i64} {
  func.func @_mm_kernel(%arg0: i32, %arg1: i32, %arg2: memref<32x128xbf16, #tpu.memory_space<vmem>>, %arg3: memref<128x128xbf16, #tpu.memory_space<vmem>>, %arg4: memref<1x128xf32, #tpu.memory_space<vmem>>, %arg5: memref<32x128xbf16, #tpu.memory_space<vmem>>) attributes {dimension_semantics = [#tpu.dimension_semantics<parallel>, #tpu.dimension_semantics<parallel>], iteration_bounds = array<i64: 1, 1>, scalar_prefetch = 0 : i64, scratch_operands = 0 : i64, tpu.core_type = #tpu.core_type<tc>, window_params = [{transform_indices = @transform_0, window_bounds = array<i64: 32, 128>}, {transform_indices = @transform_1, window_bounds = array<i64: 128, 128>}, {transform_indices = @transform_2, window_bounds = array<i64: 1, 128>}, {transform_indices = @transform_3, window_bounds = array<i64: 32, 128>}]} {
    %c0 = arith.constant 0 : index
    %c0_0 = arith.constant 0 : index
    %0 = vector.load %arg2[%c0, %c0_0] : memref<32x128xbf16, #tpu.memory_space<vmem>>, vector<32x128xbf16>
    %c0_1 = arith.constant 0 : index
    %c0_2 = arith.constant 0 : index
    %1 = vector.load %arg3[%c0_1, %c0_2] : memref<128x128xbf16, #tpu.memory_space<vmem>>, vector<128x128xbf16>
    %cst = arith.constant dense<0.000000e+00> : vector<32x128xf32>
    %2 = tpu.matmul %0, %1, %cst {dimension_numbers = #tpu.dot_dimension_numbers<[1], [0], [0], [1], [0, 0, 1, 1], [], []>} : vector<32x128xbf16>, vector<128x128xbf16>, vector<32x128xf32> -> vector<32x128xf32>
    %c0_3 = arith.constant 0 : index
    %c0_4 = arith.constant 0 : index
    %3 = vector.load %arg4[%c0_3, %c0_4] : memref<1x128xf32, #tpu.memory_space<vmem>>, vector<1x128xf32>
    %4 = vector.broadcast %3 : vector<1x128xf32> to vector<32x128xf32>
    %5 = arith.addf %2, %4 : vector<32x128xf32>
    %cst_5 = arith.constant 0.000000e+00 : f32
    %6 = vector.broadcast %cst_5 : f32 to vector<32x128xf32>
    %7 = arith.maximumf %5, %6 : vector<32x128xf32>
    %8 = arith.truncf %7 : vector<32x128xf32> to vector<32x128xbf16>
    %c0_6 = arith.constant 0 : index
    %c0_7 = arith.constant 0 : index
    %9 = vector.load %arg5[%c0_6, %c0_7] : memref<32x128xbf16, #tpu.memory_space<vmem>>, vector<32x128xbf16>
    tpu.vector_store %arg5[%c0_6, %c0_7], %8 {strides = array<i32>} : memref<32x128xbf16, #tpu.memory_space<vmem>>, vector<32x128xbf16>,
    return
  }
  func.func @transform_0(%arg0: i32, %arg1: i32) -> (i32, i32) {
    %c0_i32 = arith.constant 0 : i32
    %c0_i32_0 = arith.constant 0 : i32
    return %arg0, %c0_i32 : i32, i32
  }
  func.func @transform_1(%arg0: i32, %arg1: i32) -> (i32, i32) {
    %c0_i32 = arith.constant 0 : i32
    %c0_i32_0 = arith.constant 0 : i32
    return %c0_i32, %arg1 : i32, i32
  }
  func.func @transform_2(%arg0: i32, %arg1: i32) -> (i32, i32) {
    %c0_i32 = arith.constant 0 : i32
    %c0_i32_0 = arith.constant 0 : i32
    return %c0_i32, %arg1 : i32, i32
  }
  func.func @transform_3(%arg0: i32, %arg1: i32) -> (i32, i32) {
    %c0_i32 = arith.constant 0 : i32
    return %arg0, %arg1 : i32, i32
  }
}

module attributes {stable_mosaic.version = 11 : i64} {
  func.func @_mm_kernel(%arg0: i32, %arg1: i32, %arg2: memref<16x128xbf16, #tpu.memory_space<vmem>>, %arg3: memref<128x128xbf16, #tpu.memory_space<vmem>>, %arg4: memref<1x128xf32, #tpu.memory_space<vmem>>, %arg5: memref<16x128xbf16, #tpu.memory_space<vmem>>) attributes {dimension_semantics = [#tpu.dimension_semantics<parallel>, #tpu.dimension_semantics<parallel>], iteration_bounds = array<i64: 1, 1>, scalar_prefetch = 0 : i64, scratch_operands = 0 : i64, tpu.core_type = #tpu.core_type<tc>, window_params = [{transform_indices = @transform_0, window_bounds = array<i64: 16, 128>}, {transform_indices = @transform_1, window_bounds = array<i64: 128, 128>}, {transform_indices = @transform_2, window_bounds = array<i64: 1, 128>}, {transform_indices = @transform_3, window_bounds = array<i64: 16, 128>}]} {
    %c0 = arith.constant 0 : index
    %c0_0 = arith.constant 0 : index
    %0 = vector.load %arg2[%c0, %c0_0] : memref<16x128xbf16, #tpu.memory_space<vmem>>, vector<16x128xbf16>
    %c0_1 = arith.constant 0 : index
    %c0_2 = arith.constant 0 : index
    %1 = vector.load %arg3[%c0_1, %c0_2] : memref<128x128xbf16, #tpu.memory_space<vmem>>, vector<128x128xbf16>
    %cst = arith.constant dense<0.000000e+00> : vector<16x128xf32>
    %2 = tpu.matmul %0, %1, %cst {dimension_numbers = #tpu.dot_dimension_numbers<[1], [0], [0], [1], [0, 0, 1, 1], [], []>} : vector<16x128xbf16>, vector<128x128xbf16>, vector<16x128xf32> -> vector<16x128xf32>
    %c0_3 = arith.constant 0 : index
    %c0_4 = arith.constant 0 : index
    %3 = vector.load %arg4[%c0_3, %c0_4] : memref<1x128xf32, #tpu.memory_space<vmem>>, vector<1x128xf32>
    %4 = vector.broadcast %3 : vector<1x128xf32> to vector<16x128xf32>
    %5 = arith.addf %2, %4 : vector<16x128xf32>
    %6 = arith.truncf %5 : vector<16x128xf32> to vector<16x128xbf16>
    %c0_5 = arith.constant 0 : index
    %c0_6 = arith.constant 0 : index
    %7 = vector.load %arg5[%c0_5, %c0_6] : memref<16x128xbf16, #tpu.memory_space<vmem>>, vector<16x128xbf16>
    tpu.vector_store %arg5[%c0_5, %c0_6], %6 {strides = array<i32>} : memref<16x128xbf16, #tpu.memory_space<vmem>>, vector<16x128xbf16>,
    return
  }
  func.func @transform_0(%arg0: i32, %arg1: i32) -> (i32, i32) {
    %c0_i32 = arith.constant 0 : i32
    %c0_i32_0 = arith.constant 0 : i32
    return %arg0, %c0_i32 : i32, i32
  }
  func.func @transform_1(%arg0: i32, %arg1: i32) -> (i32, i32) {
    %c0_i32 = arith.constant 0 : i32
    %c0_i32_0 = arith.constant 0 : i32
    return %c0_i32, %arg1 : i32, i32
  }
  func.func @transform_2(%arg0: i32, %arg1: i32) -> (i32, i32) {
    %c0_i32 = arith.constant 0 : i32
    %c0_i32_0 = arith.constant 0 : i32
    return %c0_i32, %arg1 : i32, i32
  }
  func.func @transform_3(%arg0: i32, %arg1: i32) -> (i32, i32) {
    %c0_i32 = arith.constant 0 : i32
    return %arg0, %arg1 : i32, i32
  }
}

module attributes {stable_mosaic.version = 11 : i64} {
  func.func @_mm_kernel(%arg0: i32, %arg1: i32, %arg2: memref<16x384xbf16, #tpu.memory_space<vmem>>, %arg3: memref<384x128xbf16, #tpu.memory_space<vmem>>, %arg4: memref<1x128xf32, #tpu.memory_space<vmem>>, %arg5: memref<16x128xbf16, #tpu.memory_space<vmem>>) attributes {dimension_semantics = [#tpu.dimension_semantics<parallel>, #tpu.dimension_semantics<parallel>], iteration_bounds = array<i64: 1, 1>, scalar_prefetch = 0 : i64, scratch_operands = 0 : i64, tpu.core_type = #tpu.core_type<tc>, window_params = [{transform_indices = @transform_0, window_bounds = array<i64: 16, 384>}, {transform_indices = @transform_1, window_bounds = array<i64: 384, 128>}, {transform_indices = @transform_2, window_bounds = array<i64: 1, 128>}, {transform_indices = @transform_3, window_bounds = array<i64: 16, 128>}]} {
    %c0 = arith.constant 0 : index
    %c0_0 = arith.constant 0 : index
    %0 = vector.load %arg2[%c0, %c0_0] : memref<16x384xbf16, #tpu.memory_space<vmem>>, vector<16x384xbf16>
    %c0_1 = arith.constant 0 : index
    %c0_2 = arith.constant 0 : index
    %1 = vector.load %arg3[%c0_1, %c0_2] : memref<384x128xbf16, #tpu.memory_space<vmem>>, vector<384x128xbf16>
    %cst = arith.constant dense<0.000000e+00> : vector<16x128xf32>
    %2 = tpu.matmul %0, %1, %cst {dimension_numbers = #tpu.dot_dimension_numbers<[1], [0], [0], [1], [0, 0, 1, 1], [], []>} : vector<16x384xbf16>, vector<384x128xbf16>, vector<16x128xf32> -> vector<16x128xf32>
    %c0_3 = arith.constant 0 : index
    %c0_4 = arith.constant 0 : index
    %3 = vector.load %arg4[%c0_3, %c0_4] : memref<1x128xf32, #tpu.memory_space<vmem>>, vector<1x128xf32>
    %4 = vector.broadcast %3 : vector<1x128xf32> to vector<16x128xf32>
    %5 = arith.addf %2, %4 : vector<16x128xf32>
    %cst_5 = arith.constant 0.000000e+00 : f32
    %6 = vector.broadcast %cst_5 : f32 to vector<16x128xf32>
    %7 = arith.maximumf %5, %6 : vector<16x128xf32>
    %8 = arith.truncf %7 : vector<16x128xf32> to vector<16x128xbf16>
    %c0_6 = arith.constant 0 : index
    %c0_7 = arith.constant 0 : index
    %9 = vector.load %arg5[%c0_6, %c0_7] : memref<16x128xbf16, #tpu.memory_space<vmem>>, vector<16x128xbf16>
    tpu.vector_store %arg5[%c0_6, %c0_7], %8 {strides = array<i32>} : memref<16x128xbf16, #tpu.memory_space<vmem>>, vector<16x128xbf16>,
    return
  }
  func.func @transform_0(%arg0: i32, %arg1: i32) -> (i32, i32) {
    %c0_i32 = arith.constant 0 : i32
    %c0_i32_0 = arith.constant 0 : i32
    return %arg0, %c0_i32 : i32, i32
  }
  func.func @transform_1(%arg0: i32, %arg1: i32) -> (i32, i32) {
    %c0_i32 = arith.constant 0 : i32
    %c0_i32_0 = arith.constant 0 : i32
    return %c0_i32, %arg1 : i32, i32
  }
  func.func @transform_2(%arg0: i32, %arg1: i32) -> (i32, i32) {
    %c0_i32 = arith.constant 0 : i32
    %c0_i32_0 = arith.constant 0 : i32
    return %c0_i32, %arg1 : i32, i32
  }
  func.func @transform_3(%arg0: i32, %arg1: i32) -> (i32, i32) {
    %c0_i32 = arith.constant 0 : i32
    return %arg0, %arg1 : i32, i32
  }
}

module attributes {stable_mosaic.version = 11 : i64} {
  func.func @_mm_res_kernel(%arg0: i32, %arg1: i32, %arg2: memref<16x128xbf16, #tpu.memory_space<vmem>>, %arg3: memref<128x128xbf16, #tpu.memory_space<vmem>>, %arg4: memref<1x128xf32, #tpu.memory_space<vmem>>, %arg5: memref<16x128xbf16, #tpu.memory_space<vmem>>, %arg6: memref<16x128xbf16, #tpu.memory_space<vmem>>) attributes {dimension_semantics = [#tpu.dimension_semantics<parallel>, #tpu.dimension_semantics<parallel>], iteration_bounds = array<i64: 1, 1>, scalar_prefetch = 0 : i64, scratch_operands = 0 : i64, tpu.core_type = #tpu.core_type<tc>, window_params = [{transform_indices = @transform_0, window_bounds = array<i64: 16, 128>}, {transform_indices = @transform_1, window_bounds = array<i64: 128, 128>}, {transform_indices = @transform_2, window_bounds = array<i64: 1, 128>}, {transform_indices = @transform_3, window_bounds = array<i64: 16, 128>}, {transform_indices = @transform_4, window_bounds = array<i64: 16, 128>}]} {
    %c0 = arith.constant 0 : index
    %c0_0 = arith.constant 0 : index
    %0 = vector.load %arg2[%c0, %c0_0] : memref<16x128xbf16, #tpu.memory_space<vmem>>, vector<16x128xbf16>
    %c0_1 = arith.constant 0 : index
    %c0_2 = arith.constant 0 : index
    %1 = vector.load %arg3[%c0_1, %c0_2] : memref<128x128xbf16, #tpu.memory_space<vmem>>, vector<128x128xbf16>
    %cst = arith.constant dense<0.000000e+00> : vector<16x128xf32>
    %2 = tpu.matmul %0, %1, %cst {dimension_numbers = #tpu.dot_dimension_numbers<[1], [0], [0], [1], [0, 0, 1, 1], [], []>} : vector<16x128xbf16>, vector<128x128xbf16>, vector<16x128xf32> -> vector<16x128xf32>
    %c0_3 = arith.constant 0 : index
    %c0_4 = arith.constant 0 : index
    %3 = vector.load %arg4[%c0_3, %c0_4] : memref<1x128xf32, #tpu.memory_space<vmem>>, vector<1x128xf32>
    %4 = vector.broadcast %3 : vector<1x128xf32> to vector<16x128xf32>
    %5 = arith.addf %2, %4 : vector<16x128xf32>
    %c0_5 = arith.constant 0 : index
    %c0_6 = arith.constant 0 : index
    %6 = vector.load %arg5[%c0_5, %c0_6] : memref<16x128xbf16, #tpu.memory_space<vmem>>, vector<16x128xbf16>
    %7 = arith.extf %6 : vector<16x128xbf16> to vector<16x128xf32>
    %8 = arith.addf %5, %7 : vector<16x128xf32>
    %cst_7 = arith.constant 0.000000e+00 : f32
    %9 = vector.broadcast %cst_7 : f32 to vector<16x128xf32>
    %10 = arith.maximumf %8, %9 : vector<16x128xf32>
    %11 = arith.truncf %10 : vector<16x128xf32> to vector<16x128xbf16>
    %c0_8 = arith.constant 0 : index
    %c0_9 = arith.constant 0 : index
    %12 = vector.load %arg6[%c0_8, %c0_9] : memref<16x128xbf16, #tpu.memory_space<vmem>>, vector<16x128xbf16>
    tpu.vector_store %arg6[%c0_8, %c0_9], %11 {strides = array<i32>} : memref<16x128xbf16, #tpu.memory_space<vmem>>, vector<16x128xbf16>,
    return
  }
  func.func @transform_0(%arg0: i32, %arg1: i32) -> (i32, i32) {
    %c0_i32 = arith.constant 0 : i32
    %c0_i32_0 = arith.constant 0 : i32
    return %arg0, %c0_i32 : i32, i32
  }
  func.func @transform_1(%arg0: i32, %arg1: i32) -> (i32, i32) {
    %c0_i32 = arith.constant 0 : i32
    %c0_i32_0 = arith.constant 0 : i32
    return %c0_i32, %arg1 : i32, i32
  }
  func.func @transform_2(%arg0: i32, %arg1: i32) -> (i32, i32) {
    %c0_i32 = arith.constant 0 : i32
    %c0_i32_0 = arith.constant 0 : i32
    return %c0_i32, %arg1 : i32, i32
  }
  func.func @transform_3(%arg0: i32, %arg1: i32) -> (i32, i32) {
    %c0_i32 = arith.constant 0 : i32
    return %arg0, %arg1 : i32, i32
  }
  func.func @transform_4(%arg0: i32, %arg1: i32) -> (i32, i32) {
    %c0_i32 = arith.constant 0 : i32
    return %arg0, %arg1 : i32, i32
  }
}

module attributes {stable_mosaic.version = 11 : i64} {
  func.func @_mm_kernel(%arg0: i32, %arg1: i32, %arg2: memref<16x128xbf16, #tpu.memory_space<vmem>>, %arg3: memref<128x128xbf16, #tpu.memory_space<vmem>>, %arg4: memref<1x128xf32, #tpu.memory_space<vmem>>, %arg5: memref<16x128xbf16, #tpu.memory_space<vmem>>) attributes {dimension_semantics = [#tpu.dimension_semantics<parallel>, #tpu.dimension_semantics<parallel>], iteration_bounds = array<i64: 1, 1>, scalar_prefetch = 0 : i64, scratch_operands = 0 : i64, tpu.core_type = #tpu.core_type<tc>, window_params = [{transform_indices = @transform_0, window_bounds = array<i64: 16, 128>}, {transform_indices = @transform_1, window_bounds = array<i64: 128, 128>}, {transform_indices = @transform_2, window_bounds = array<i64: 1, 128>}, {transform_indices = @transform_3, window_bounds = array<i64: 16, 128>}]} {
    %c0 = arith.constant 0 : index
    %c0_0 = arith.constant 0 : index
    %0 = vector.load %arg2[%c0, %c0_0] : memref<16x128xbf16, #tpu.memory_space<vmem>>, vector<16x128xbf16>
    %c0_1 = arith.constant 0 : index
    %c0_2 = arith.constant 0 : index
    %1 = vector.load %arg3[%c0_1, %c0_2] : memref<128x128xbf16, #tpu.memory_space<vmem>>, vector<128x128xbf16>
    %cst = arith.constant dense<0.000000e+00> : vector<16x128xf32>
    %2 = tpu.matmul %0, %1, %cst {dimension_numbers = #tpu.dot_dimension_numbers<[1], [0], [0], [1], [0, 0, 1, 1], [], []>} : vector<16x128xbf16>, vector<128x128xbf16>, vector<16x128xf32> -> vector<16x128xf32>
    %c0_3 = arith.constant 0 : index
    %c0_4 = arith.constant 0 : index
    %3 = vector.load %arg4[%c0_3, %c0_4] : memref<1x128xf32, #tpu.memory_space<vmem>>, vector<1x128xf32>
    %4 = vector.broadcast %3 : vector<1x128xf32> to vector<16x128xf32>
    %5 = arith.addf %2, %4 : vector<16x128xf32>
    %cst_5 = arith.constant 0.000000e+00 : f32
    %6 = vector.broadcast %cst_5 : f32 to vector<16x128xf32>
    %7 = arith.maximumf %5, %6 : vector<16x128xf32>
    %8 = arith.truncf %7 : vector<16x128xf32> to vector<16x128xbf16>
    %c0_6 = arith.constant 0 : index
    %c0_7 = arith.constant 0 : index
    %9 = vector.load %arg5[%c0_6, %c0_7] : memref<16x128xbf16, #tpu.memory_space<vmem>>, vector<16x128xbf16>
    tpu.vector_store %arg5[%c0_6, %c0_7], %8 {strides = array<i32>} : memref<16x128xbf16, #tpu.memory_space<vmem>>, vector<16x128xbf16>,
    return
  }
  func.func @transform_0(%arg0: i32, %arg1: i32) -> (i32, i32) {
    %c0_i32 = arith.constant 0 : i32
    %c0_i32_0 = arith.constant 0 : i32
    return %arg0, %c0_i32 : i32, i32
  }
  func.func @transform_1(%arg0: i32, %arg1: i32) -> (i32, i32) {
    %c0_i32 = arith.constant 0 : i32
    %c0_i32_0 = arith.constant 0 : i32
    return %c0_i32, %arg1 : i32, i32
  }
  func.func @transform_2(%arg0: i32, %arg1: i32) -> (i32, i32) {
    %c0_i32 = arith.constant 0 : i32
    %c0_i32_0 = arith.constant 0 : i32
    return %c0_i32, %arg1 : i32, i32
  }
  func.func @transform_3(%arg0: i32, %arg1: i32) -> (i32, i32) {
    %c0_i32 = arith.constant 0 : i32
    return %arg0, %arg1 : i32, i32
  }
}

module attributes {stable_mosaic.version = 11 : i64} {
  func.func @_mm_kernel(%arg0: i32, %arg1: i32, %arg2: memref<16x384xbf16, #tpu.memory_space<vmem>>, %arg3: memref<384x128xbf16, #tpu.memory_space<vmem>>, %arg4: memref<1x128xf32, #tpu.memory_space<vmem>>, %arg5: memref<16x128xbf16, #tpu.memory_space<vmem>>) attributes {dimension_semantics = [#tpu.dimension_semantics<parallel>, #tpu.dimension_semantics<parallel>], iteration_bounds = array<i64: 1, 1>, scalar_prefetch = 0 : i64, scratch_operands = 0 : i64, tpu.core_type = #tpu.core_type<tc>, window_params = [{transform_indices = @transform_0, window_bounds = array<i64: 16, 384>}, {transform_indices = @transform_1, window_bounds = array<i64: 384, 128>}, {transform_indices = @transform_2, window_bounds = array<i64: 1, 128>}, {transform_indices = @transform_3, window_bounds = array<i64: 16, 128>}]} {
    %c0 = arith.constant 0 : index
    %c0_0 = arith.constant 0 : index
    %0 = vector.load %arg2[%c0, %c0_0] : memref<16x384xbf16, #tpu.memory_space<vmem>>, vector<16x384xbf16>
    %c0_1 = arith.constant 0 : index
    %c0_2 = arith.constant 0 : index
    %1 = vector.load %arg3[%c0_1, %c0_2] : memref<384x128xbf16, #tpu.memory_space<vmem>>, vector<384x128xbf16>
    %cst = arith.constant dense<0.000000e+00> : vector<16x128xf32>
    %2 = tpu.matmul %0, %1, %cst {dimension_numbers = #tpu.dot_dimension_numbers<[1], [0], [0], [1], [0, 0, 1, 1], [], []>} : vector<16x384xbf16>, vector<384x128xbf16>, vector<16x128xf32> -> vector<16x128xf32>
    %c0_3 = arith.constant 0 : index
    %c0_4 = arith.constant 0 : index
    %3 = vector.load %arg4[%c0_3, %c0_4] : memref<1x128xf32, #tpu.memory_space<vmem>>, vector<1x128xf32>
    %4 = vector.broadcast %3 : vector<1x128xf32> to vector<16x128xf32>
    %5 = arith.addf %2, %4 : vector<16x128xf32>
    %cst_5 = arith.constant 0.000000e+00 : f32
    %6 = vector.broadcast %cst_5 : f32 to vector<16x128xf32>
    %7 = arith.maximumf %5, %6 : vector<16x128xf32>
    %8 = arith.truncf %7 : vector<16x128xf32> to vector<16x128xbf16>
    %c0_6 = arith.constant 0 : index
    %c0_7 = arith.constant 0 : index
    %9 = vector.load %arg5[%c0_6, %c0_7] : memref<16x128xbf16, #tpu.memory_space<vmem>>, vector<16x128xbf16>
    tpu.vector_store %arg5[%c0_6, %c0_7], %8 {strides = array<i32>} : memref<16x128xbf16, #tpu.memory_space<vmem>>, vector<16x128xbf16>,
    return
  }
  func.func @transform_0(%arg0: i32, %arg1: i32) -> (i32, i32) {
    %c0_i32 = arith.constant 0 : i32
    %c0_i32_0 = arith.constant 0 : i32
    return %arg0, %c0_i32 : i32, i32
  }
  func.func @transform_1(%arg0: i32, %arg1: i32) -> (i32, i32) {
    %c0_i32 = arith.constant 0 : i32
    %c0_i32_0 = arith.constant 0 : i32
    return %c0_i32, %arg1 : i32, i32
  }
  func.func @transform_2(%arg0: i32, %arg1: i32) -> (i32, i32) {
    %c0_i32 = arith.constant 0 : i32
    %c0_i32_0 = arith.constant 0 : i32
    return %c0_i32, %arg1 : i32, i32
  }
  func.func @transform_3(%arg0: i32, %arg1: i32) -> (i32, i32) {
    %c0_i32 = arith.constant 0 : i32
    return %arg0, %arg1 : i32, i32
  }
}

module attributes {stable_mosaic.version = 11 : i64} {
  func.func @_mm_res_kernel(%arg0: i32, %arg1: i32, %arg2: memref<16x128xbf16, #tpu.memory_space<vmem>>, %arg3: memref<128x128xbf16, #tpu.memory_space<vmem>>, %arg4: memref<1x128xf32, #tpu.memory_space<vmem>>, %arg5: memref<16x128xbf16, #tpu.memory_space<vmem>>, %arg6: memref<16x128xbf16, #tpu.memory_space<vmem>>) attributes {dimension_semantics = [#tpu.dimension_semantics<parallel>, #tpu.dimension_semantics<parallel>], iteration_bounds = array<i64: 1, 1>, scalar_prefetch = 0 : i64, scratch_operands = 0 : i64, tpu.core_type = #tpu.core_type<tc>, window_params = [{transform_indices = @transform_0, window_bounds = array<i64: 16, 128>}, {transform_indices = @transform_1, window_bounds = array<i64: 128, 128>}, {transform_indices = @transform_2, window_bounds = array<i64: 1, 128>}, {transform_indices = @transform_3, window_bounds = array<i64: 16, 128>}, {transform_indices = @transform_4, window_bounds = array<i64: 16, 128>}]} {
    %c0 = arith.constant 0 : index
    %c0_0 = arith.constant 0 : index
    %0 = vector.load %arg2[%c0, %c0_0] : memref<16x128xbf16, #tpu.memory_space<vmem>>, vector<16x128xbf16>
    %c0_1 = arith.constant 0 : index
    %c0_2 = arith.constant 0 : index
    %1 = vector.load %arg3[%c0_1, %c0_2] : memref<128x128xbf16, #tpu.memory_space<vmem>>, vector<128x128xbf16>
    %cst = arith.constant dense<0.000000e+00> : vector<16x128xf32>
    %2 = tpu.matmul %0, %1, %cst {dimension_numbers = #tpu.dot_dimension_numbers<[1], [0], [0], [1], [0, 0, 1, 1], [], []>} : vector<16x128xbf16>, vector<128x128xbf16>, vector<16x128xf32> -> vector<16x128xf32>
    %c0_3 = arith.constant 0 : index
    %c0_4 = arith.constant 0 : index
    %3 = vector.load %arg4[%c0_3, %c0_4] : memref<1x128xf32, #tpu.memory_space<vmem>>, vector<1x128xf32>
    %4 = vector.broadcast %3 : vector<1x128xf32> to vector<16x128xf32>
    %5 = arith.addf %2, %4 : vector<16x128xf32>
    %c0_5 = arith.constant 0 : index
    %c0_6 = arith.constant 0 : index
    %6 = vector.load %arg5[%c0_5, %c0_6] : memref<16x128xbf16, #tpu.memory_space<vmem>>, vector<16x128xbf16>
    %7 = arith.extf %6 : vector<16x128xbf16> to vector<16x128xf32>
    %8 = arith.addf %5, %7 : vector<16x128xf32>
    %cst_7 = arith.constant 0.000000e+00 : f32
    %9 = vector.broadcast %cst_7 : f32 to vector<16x128xf32>
    %10 = arith.maximumf %8, %9 : vector<16x128xf32>
    %11 = arith.truncf %10 : vector<16x128xf32> to vector<16x128xbf16>
    %c0_8 = arith.constant 0 : index
    %c0_9 = arith.constant 0 : index
    %12 = vector.load %arg6[%c0_8, %c0_9] : memref<16x128xbf16, #tpu.memory_space<vmem>>, vector<16x128xbf16>
    tpu.vector_store %arg6[%c0_8, %c0_9], %11 {strides = array<i32>} : memref<16x128xbf16, #tpu.memory_space<vmem>>, vector<16x128xbf16>,
    return
  }
  func.func @transform_0(%arg0: i32, %arg1: i32) -> (i32, i32) {
    %c0_i32 = arith.constant 0 : i32
    %c0_i32_0 = arith.constant 0 : i32
    return %arg0, %c0_i32 : i32, i32
  }
  func.func @transform_1(%arg0: i32, %arg1: i32) -> (i32, i32) {
    %c0_i32 = arith.constant 0 : i32
    %c0_i32_0 = arith.constant 0 : i32
    return %c0_i32, %arg1 : i32, i32
  }
  func.func @transform_2(%arg0: i32, %arg1: i32) -> (i32, i32) {
    %c0_i32 = arith.constant 0 : i32
    %c0_i32_0 = arith.constant 0 : i32
    return %c0_i32, %arg1 : i32, i32
  }
  func.func @transform_3(%arg0: i32, %arg1: i32) -> (i32, i32) {
    %c0_i32 = arith.constant 0 : i32
    return %arg0, %arg1 : i32, i32
  }
  func.func @transform_4(%arg0: i32, %arg1: i32) -> (i32, i32) {
    %c0_i32 = arith.constant 0 : i32
    return %arg0, %arg1 : i32, i32
  }
}

module attributes {stable_mosaic.version = 11 : i64} {
  func.func @_mm_kernel(%arg0: i32, %arg1: i32, %arg2: memref<16x128xbf16, #tpu.memory_space<vmem>>, %arg3: memref<128x256xbf16, #tpu.memory_space<vmem>>, %arg4: memref<1x256xf32, #tpu.memory_space<vmem>>, %arg5: memref<16x256xbf16, #tpu.memory_space<vmem>>) attributes {dimension_semantics = [#tpu.dimension_semantics<parallel>, #tpu.dimension_semantics<parallel>], iteration_bounds = array<i64: 1, 1>, scalar_prefetch = 0 : i64, scratch_operands = 0 : i64, tpu.core_type = #tpu.core_type<tc>, window_params = [{transform_indices = @transform_0, window_bounds = array<i64: 16, 128>}, {transform_indices = @transform_1, window_bounds = array<i64: 128, 256>}, {transform_indices = @transform_2, window_bounds = array<i64: 1, 256>}, {transform_indices = @transform_3, window_bounds = array<i64: 16, 256>}]} {
    %c0 = arith.constant 0 : index
    %c0_0 = arith.constant 0 : index
    %0 = vector.load %arg2[%c0, %c0_0] : memref<16x128xbf16, #tpu.memory_space<vmem>>, vector<16x128xbf16>
    %c0_1 = arith.constant 0 : index
    %c0_2 = arith.constant 0 : index
    %1 = vector.load %arg3[%c0_1, %c0_2] : memref<128x256xbf16, #tpu.memory_space<vmem>>, vector<128x256xbf16>
    %cst = arith.constant dense<0.000000e+00> : vector<16x256xf32>
    %2 = tpu.matmul %0, %1, %cst {dimension_numbers = #tpu.dot_dimension_numbers<[1], [0], [0], [1], [0, 0, 1, 1], [], []>} : vector<16x128xbf16>, vector<128x256xbf16>, vector<16x256xf32> -> vector<16x256xf32>
    %c0_3 = arith.constant 0 : index
    %c0_4 = arith.constant 0 : index
    %3 = vector.load %arg4[%c0_3, %c0_4] : memref<1x256xf32, #tpu.memory_space<vmem>>, vector<1x256xf32>
    %4 = vector.broadcast %3 : vector<1x256xf32> to vector<16x256xf32>
    %5 = arith.addf %2, %4 : vector<16x256xf32>
    %6 = arith.truncf %5 : vector<16x256xf32> to vector<16x256xbf16>
    %c0_5 = arith.constant 0 : index
    %c0_6 = arith.constant 0 : index
    %7 = vector.load %arg5[%c0_5, %c0_6] : memref<16x256xbf16, #tpu.memory_space<vmem>>, vector<16x256xbf16>
    tpu.vector_store %arg5[%c0_5, %c0_6], %6 {strides = array<i32>} : memref<16x256xbf16, #tpu.memory_space<vmem>>, vector<16x256xbf16>,
    return
  }
  func.func @transform_0(%arg0: i32, %arg1: i32) -> (i32, i32) {
    %c0_i32 = arith.constant 0 : i32
    %c0_i32_0 = arith.constant 0 : i32
    return %arg0, %c0_i32 : i32, i32
  }
  func.func @transform_1(%arg0: i32, %arg1: i32) -> (i32, i32) {
    %c0_i32 = arith.constant 0 : i32
    %c0_i32_0 = arith.constant 0 : i32
    return %c0_i32, %arg1 : i32, i32
  }
  func.func @transform_2(%arg0: i32, %arg1: i32) -> (i32, i32) {
    %c0_i32 = arith.constant 0 : i32
    %c0_i32_0 = arith.constant 0 : i32
    return %c0_i32, %arg1 : i32, i32
  }
  func.func @transform_3(%arg0: i32, %arg1: i32) -> (i32, i32) {
    %c0_i32 = arith.constant 0 : i32
    return %arg0, %arg1 : i32, i32
  }
}

module attributes {stable_mosaic.version = 11 : i64} {
  func.func @_mm_kernel(%arg0: i32, %arg1: i32, %arg2: memref<16x128xbf16, #tpu.memory_space<vmem>>, %arg3: memref<128x128xbf16, #tpu.memory_space<vmem>>, %arg4: memref<1x128xf32, #tpu.memory_space<vmem>>, %arg5: memref<16x128xbf16, #tpu.memory_space<vmem>>) attributes {dimension_semantics = [#tpu.dimension_semantics<parallel>, #tpu.dimension_semantics<parallel>], iteration_bounds = array<i64: 1, 1>, scalar_prefetch = 0 : i64, scratch_operands = 0 : i64, tpu.core_type = #tpu.core_type<tc>, window_params = [{transform_indices = @transform_0, window_bounds = array<i64: 16, 128>}, {transform_indices = @transform_1, window_bounds = array<i64: 128, 128>}, {transform_indices = @transform_2, window_bounds = array<i64: 1, 128>}, {transform_indices = @transform_3, window_bounds = array<i64: 16, 128>}]} {
    %c0 = arith.constant 0 : index
    %c0_0 = arith.constant 0 : index
    %0 = vector.load %arg2[%c0, %c0_0] : memref<16x128xbf16, #tpu.memory_space<vmem>>, vector<16x128xbf16>
    %c0_1 = arith.constant 0 : index
    %c0_2 = arith.constant 0 : index
    %1 = vector.load %arg3[%c0_1, %c0_2] : memref<128x128xbf16, #tpu.memory_space<vmem>>, vector<128x128xbf16>
    %cst = arith.constant dense<0.000000e+00> : vector<16x128xf32>
    %2 = tpu.matmul %0, %1, %cst {dimension_numbers = #tpu.dot_dimension_numbers<[1], [0], [0], [1], [0, 0, 1, 1], [], []>} : vector<16x128xbf16>, vector<128x128xbf16>, vector<16x128xf32> -> vector<16x128xf32>
    %c0_3 = arith.constant 0 : index
    %c0_4 = arith.constant 0 : index
    %3 = vector.load %arg4[%c0_3, %c0_4] : memref<1x128xf32, #tpu.memory_space<vmem>>, vector<1x128xf32>
    %4 = vector.broadcast %3 : vector<1x128xf32> to vector<16x128xf32>
    %5 = arith.addf %2, %4 : vector<16x128xf32>
    %cst_5 = arith.constant 0.000000e+00 : f32
    %6 = vector.broadcast %cst_5 : f32 to vector<16x128xf32>
    %7 = arith.maximumf %5, %6 : vector<16x128xf32>
    %8 = arith.truncf %7 : vector<16x128xf32> to vector<16x128xbf16>
    %c0_6 = arith.constant 0 : index
    %c0_7 = arith.constant 0 : index
    %9 = vector.load %arg5[%c0_6, %c0_7] : memref<16x128xbf16, #tpu.memory_space<vmem>>, vector<16x128xbf16>
    tpu.vector_store %arg5[%c0_6, %c0_7], %8 {strides = array<i32>} : memref<16x128xbf16, #tpu.memory_space<vmem>>, vector<16x128xbf16>,
    return
  }
  func.func @transform_0(%arg0: i32, %arg1: i32) -> (i32, i32) {
    %c0_i32 = arith.constant 0 : i32
    %c0_i32_0 = arith.constant 0 : i32
    return %arg0, %c0_i32 : i32, i32
  }
  func.func @transform_1(%arg0: i32, %arg1: i32) -> (i32, i32) {
    %c0_i32 = arith.constant 0 : i32
    %c0_i32_0 = arith.constant 0 : i32
    return %c0_i32, %arg1 : i32, i32
  }
  func.func @transform_2(%arg0: i32, %arg1: i32) -> (i32, i32) {
    %c0_i32 = arith.constant 0 : i32
    %c0_i32_0 = arith.constant 0 : i32
    return %c0_i32, %arg1 : i32, i32
  }
  func.func @transform_3(%arg0: i32, %arg1: i32) -> (i32, i32) {
    %c0_i32 = arith.constant 0 : i32
    return %arg0, %arg1 : i32, i32
  }
}

module attributes {stable_mosaic.version = 11 : i64} {
  func.func @_mm_kernel(%arg0: i32, %arg1: i32, %arg2: memref<16x640xbf16, #tpu.memory_space<vmem>>, %arg3: memref<640x128xbf16, #tpu.memory_space<vmem>>, %arg4: memref<1x128xf32, #tpu.memory_space<vmem>>, %arg5: memref<16x128xbf16, #tpu.memory_space<vmem>>) attributes {dimension_semantics = [#tpu.dimension_semantics<parallel>, #tpu.dimension_semantics<parallel>], iteration_bounds = array<i64: 1, 1>, scalar_prefetch = 0 : i64, scratch_operands = 0 : i64, tpu.core_type = #tpu.core_type<tc>, window_params = [{transform_indices = @transform_0, window_bounds = array<i64: 16, 640>}, {transform_indices = @transform_1, window_bounds = array<i64: 640, 128>}, {transform_indices = @transform_2, window_bounds = array<i64: 1, 128>}, {transform_indices = @transform_3, window_bounds = array<i64: 16, 128>}]} {
    %c0 = arith.constant 0 : index
    %c0_0 = arith.constant 0 : index
    %0 = vector.load %arg2[%c0, %c0_0] : memref<16x640xbf16, #tpu.memory_space<vmem>>, vector<16x640xbf16>
    %c0_1 = arith.constant 0 : index
    %c0_2 = arith.constant 0 : index
    %1 = vector.load %arg3[%c0_1, %c0_2] : memref<640x128xbf16, #tpu.memory_space<vmem>>, vector<640x128xbf16>
    %cst = arith.constant dense<0.000000e+00> : vector<16x128xf32>
    %2 = tpu.matmul %0, %1, %cst {dimension_numbers = #tpu.dot_dimension_numbers<[1], [0], [0], [1], [0, 0, 1, 1], [], []>} : vector<16x640xbf16>, vector<640x128xbf16>, vector<16x128xf32> -> vector<16x128xf32>
    %c0_3 = arith.constant 0 : index
    %c0_4 = arith.constant 0 : index
    %3 = vector.load %arg4[%c0_3, %c0_4] : memref<1x128xf32, #tpu.memory_space<vmem>>, vector<1x128xf32>
    %4 = vector.broadcast %3 : vector<1x128xf32> to vector<16x128xf32>
    %5 = arith.addf %2, %4 : vector<16x128xf32>
    %cst_5 = arith.constant 0.000000e+00 : f32
    %6 = vector.broadcast %cst_5 : f32 to vector<16x128xf32>
    %7 = arith.maximumf %5, %6 : vector<16x128xf32>
    %8 = arith.truncf %7 : vector<16x128xf32> to vector<16x128xbf16>
    %c0_6 = arith.constant 0 : index
    %c0_7 = arith.constant 0 : index
    %9 = vector.load %arg5[%c0_6, %c0_7] : memref<16x128xbf16, #tpu.memory_space<vmem>>, vector<16x128xbf16>
    tpu.vector_store %arg5[%c0_6, %c0_7], %8 {strides = array<i32>} : memref<16x128xbf16, #tpu.memory_space<vmem>>, vector<16x128xbf16>,
    return
  }
  func.func @transform_0(%arg0: i32, %arg1: i32) -> (i32, i32) {
    %c0_i32 = arith.constant 0 : i32
    %c0_i32_0 = arith.constant 0 : i32
    return %arg0, %c0_i32 : i32, i32
  }
  func.func @transform_1(%arg0: i32, %arg1: i32) -> (i32, i32) {
    %c0_i32 = arith.constant 0 : i32
    %c0_i32_0 = arith.constant 0 : i32
    return %c0_i32, %arg1 : i32, i32
  }
  func.func @transform_2(%arg0: i32, %arg1: i32) -> (i32, i32) {
    %c0_i32 = arith.constant 0 : i32
    %c0_i32_0 = arith.constant 0 : i32
    return %c0_i32, %arg1 : i32, i32
  }
  func.func @transform_3(%arg0: i32, %arg1: i32) -> (i32, i32) {
    %c0_i32 = arith.constant 0 : i32
    return %arg0, %arg1 : i32, i32
  }
}

module attributes {stable_mosaic.version = 11 : i64} {
  func.func @_mm_res_kernel(%arg0: i32, %arg1: i32, %arg2: memref<16x128xbf16, #tpu.memory_space<vmem>>, %arg3: memref<128x256xbf16, #tpu.memory_space<vmem>>, %arg4: memref<1x256xf32, #tpu.memory_space<vmem>>, %arg5: memref<16x256xbf16, #tpu.memory_space<vmem>>, %arg6: memref<16x256xbf16, #tpu.memory_space<vmem>>) attributes {dimension_semantics = [#tpu.dimension_semantics<parallel>, #tpu.dimension_semantics<parallel>], iteration_bounds = array<i64: 1, 1>, scalar_prefetch = 0 : i64, scratch_operands = 0 : i64, tpu.core_type = #tpu.core_type<tc>, window_params = [{transform_indices = @transform_0, window_bounds = array<i64: 16, 128>}, {transform_indices = @transform_1, window_bounds = array<i64: 128, 256>}, {transform_indices = @transform_2, window_bounds = array<i64: 1, 256>}, {transform_indices = @transform_3, window_bounds = array<i64: 16, 256>}, {transform_indices = @transform_4, window_bounds = array<i64: 16, 256>}]} {
    %c0 = arith.constant 0 : index
    %c0_0 = arith.constant 0 : index
    %0 = vector.load %arg2[%c0, %c0_0] : memref<16x128xbf16, #tpu.memory_space<vmem>>, vector<16x128xbf16>
    %c0_1 = arith.constant 0 : index
    %c0_2 = arith.constant 0 : index
    %1 = vector.load %arg3[%c0_1, %c0_2] : memref<128x256xbf16, #tpu.memory_space<vmem>>, vector<128x256xbf16>
    %cst = arith.constant dense<0.000000e+00> : vector<16x256xf32>
    %2 = tpu.matmul %0, %1, %cst {dimension_numbers = #tpu.dot_dimension_numbers<[1], [0], [0], [1], [0, 0, 1, 1], [], []>} : vector<16x128xbf16>, vector<128x256xbf16>, vector<16x256xf32> -> vector<16x256xf32>
    %c0_3 = arith.constant 0 : index
    %c0_4 = arith.constant 0 : index
    %3 = vector.load %arg4[%c0_3, %c0_4] : memref<1x256xf32, #tpu.memory_space<vmem>>, vector<1x256xf32>
    %4 = vector.broadcast %3 : vector<1x256xf32> to vector<16x256xf32>
    %5 = arith.addf %2, %4 : vector<16x256xf32>
    %c0_5 = arith.constant 0 : index
    %c0_6 = arith.constant 0 : index
    %6 = vector.load %arg5[%c0_5, %c0_6] : memref<16x256xbf16, #tpu.memory_space<vmem>>, vector<16x256xbf16>
    %7 = arith.extf %6 : vector<16x256xbf16> to vector<16x256xf32>
    %8 = arith.addf %5, %7 : vector<16x256xf32>
    %cst_7 = arith.constant 0.000000e+00 : f32
    %9 = vector.broadcast %cst_7 : f32 to vector<16x256xf32>
    %10 = arith.maximumf %8, %9 : vector<16x256xf32>
    %11 = arith.truncf %10 : vector<16x256xf32> to vector<16x256xbf16>
    %c0_8 = arith.constant 0 : index
    %c0_9 = arith.constant 0 : index
    %12 = vector.load %arg6[%c0_8, %c0_9] : memref<16x256xbf16, #tpu.memory_space<vmem>>, vector<16x256xbf16>
    tpu.vector_store %arg6[%c0_8, %c0_9], %11 {strides = array<i32>} : memref<16x256xbf16, #tpu.memory_space<vmem>>, vector<16x256xbf16>,
    return
  }
  func.func @transform_0(%arg0: i32, %arg1: i32) -> (i32, i32) {
    %c0_i32 = arith.constant 0 : i32
    %c0_i32_0 = arith.constant 0 : i32
    return %arg0, %c0_i32 : i32, i32
  }
  func.func @transform_1(%arg0: i32, %arg1: i32) -> (i32, i32) {
    %c0_i32 = arith.constant 0 : i32
    %c0_i32_0 = arith.constant 0 : i32
    return %c0_i32, %arg1 : i32, i32
  }
  func.func @transform_2(%arg0: i32, %arg1: i32) -> (i32, i32) {
    %c0_i32 = arith.constant 0 : i32
    %c0_i32_0 = arith.constant 0 : i32
    return %c0_i32, %arg1 : i32, i32
  }
  func.func @transform_3(%arg0: i32, %arg1: i32) -> (i32, i32) {
    %c0_i32 = arith.constant 0 : i32
    return %arg0, %arg1 : i32, i32
  }
  func.func @transform_4(%arg0: i32, %arg1: i32) -> (i32, i32) {
    %c0_i32 = arith.constant 0 : i32
    return %arg0, %arg1 : i32, i32
  }
}

module attributes {stable_mosaic.version = 11 : i64} {
  func.func @_mm_kernel(%arg0: i32, %arg1: i32, %arg2: memref<16x256xbf16, #tpu.memory_space<vmem>>, %arg3: memref<256x128xbf16, #tpu.memory_space<vmem>>, %arg4: memref<1x128xf32, #tpu.memory_space<vmem>>, %arg5: memref<16x128xbf16, #tpu.memory_space<vmem>>) attributes {dimension_semantics = [#tpu.dimension_semantics<parallel>, #tpu.dimension_semantics<parallel>], iteration_bounds = array<i64: 1, 1>, scalar_prefetch = 0 : i64, scratch_operands = 0 : i64, tpu.core_type = #tpu.core_type<tc>, window_params = [{transform_indices = @transform_0, window_bounds = array<i64: 16, 256>}, {transform_indices = @transform_1, window_bounds = array<i64: 256, 128>}, {transform_indices = @transform_2, window_bounds = array<i64: 1, 128>}, {transform_indices = @transform_3, window_bounds = array<i64: 16, 128>}]} {
    %c0 = arith.constant 0 : index
    %c0_0 = arith.constant 0 : index
    %0 = vector.load %arg2[%c0, %c0_0] : memref<16x256xbf16, #tpu.memory_space<vmem>>, vector<16x256xbf16>
    %c0_1 = arith.constant 0 : index
    %c0_2 = arith.constant 0 : index
    %1 = vector.load %arg3[%c0_1, %c0_2] : memref<256x128xbf16, #tpu.memory_space<vmem>>, vector<256x128xbf16>
    %cst = arith.constant dense<0.000000e+00> : vector<16x128xf32>
    %2 = tpu.matmul %0, %1, %cst {dimension_numbers = #tpu.dot_dimension_numbers<[1], [0], [0], [1], [0, 0, 1, 1], [], []>} : vector<16x256xbf16>, vector<256x128xbf16>, vector<16x128xf32> -> vector<16x128xf32>
    %c0_3 = arith.constant 0 : index
    %c0_4 = arith.constant 0 : index
    %3 = vector.load %arg4[%c0_3, %c0_4] : memref<1x128xf32, #tpu.memory_space<vmem>>, vector<1x128xf32>
    %4 = vector.broadcast %3 : vector<1x128xf32> to vector<16x128xf32>
    %5 = arith.addf %2, %4 : vector<16x128xf32>
    %cst_5 = arith.constant 0.000000e+00 : f32
    %6 = vector.broadcast %cst_5 : f32 to vector<16x128xf32>
    %7 = arith.maximumf %5, %6 : vector<16x128xf32>
    %8 = arith.truncf %7 : vector<16x128xf32> to vector<16x128xbf16>
    %c0_6 = arith.constant 0 : index
    %c0_7 = arith.constant 0 : index
    %9 = vector.load %arg5[%c0_6, %c0_7] : memref<16x128xbf16, #tpu.memory_space<vmem>>, vector<16x128xbf16>
    tpu.vector_store %arg5[%c0_6, %c0_7], %8 {strides = array<i32>} : memref<16x128xbf16, #tpu.memory_space<vmem>>, vector<16x128xbf16>,
    return
  }
  func.func @transform_0(%arg0: i32, %arg1: i32) -> (i32, i32) {
    %c0_i32 = arith.constant 0 : i32
    %c0_i32_0 = arith.constant 0 : i32
    return %arg0, %c0_i32 : i32, i32
  }
  func.func @transform_1(%arg0: i32, %arg1: i32) -> (i32, i32) {
    %c0_i32 = arith.constant 0 : i32
    %c0_i32_0 = arith.constant 0 : i32
    return %c0_i32, %arg1 : i32, i32
  }
  func.func @transform_2(%arg0: i32, %arg1: i32) -> (i32, i32) {
    %c0_i32 = arith.constant 0 : i32
    %c0_i32_0 = arith.constant 0 : i32
    return %c0_i32, %arg1 : i32, i32
  }
  func.func @transform_3(%arg0: i32, %arg1: i32) -> (i32, i32) {
    %c0_i32 = arith.constant 0 : i32
    return %arg0, %arg1 : i32, i32
  }
}

module attributes {stable_mosaic.version = 11 : i64} {
  func.func @_mean_kernel(%arg0: i32, %arg1: memref<2x1x256xbf16, #tpu.memory_space<vmem>>, %arg2: memref<2x256xbf16, #tpu.memory_space<vmem>>) attributes {dimension_semantics = [#tpu.dimension_semantics<arbitrary>], iteration_bounds = array<i64: 1>, scalar_prefetch = 0 : i64, scratch_operands = 0 : i64, tpu.core_type = #tpu.core_type<tc>, window_params = [{pipeline_mode = #tpu.pipeline_mode<synchronous>, transform_indices = @transform_0, window_bounds = array<i64: 2, 1, 256>}, {pipeline_mode = #tpu.pipeline_mode<synchronous>, transform_indices = @transform_1, window_bounds = array<i64: 2, 256>}]} {
    %c0 = arith.constant 0 : index
    %c0_0 = arith.constant 0 : index
    %c0_1 = arith.constant 0 : index
    %0 = vector.load %arg1[%c0, %c0_0, %c0_1] : memref<2x1x256xbf16, #tpu.memory_space<vmem>>, vector<2x1x256xbf16>
    %1 = arith.extf %0 : vector<2x1x256xbf16> to vector<2x1x256xf32>
    %cst = arith.constant dense<0.000000e+00> : vector<2x256xf32>
    %2 = vector.multi_reduction <add>, %1, %cst [1] : vector<2x1x256xf32> to vector<2x256xf32>
    %cst_2 = arith.constant 1.000000e+00 : f32
    %3 = vector.broadcast %cst_2 : f32 to vector<2x256xf32>
    %4 = arith.mulf %2, %3 : vector<2x256xf32>
    %5 = arith.truncf %4 : vector<2x256xf32> to vector<2x256xbf16>
    %c0_3 = arith.constant 0 : index
    %c0_4 = arith.constant 0 : index
    %6 = vector.load %arg2[%c0_3, %c0_4] : memref<2x256xbf16, #tpu.memory_space<vmem>>, vector<2x256xbf16>
    tpu.vector_store %arg2[%c0_3, %c0_4], %5 {strides = array<i32>} : memref<2x256xbf16, #tpu.memory_space<vmem>>, vector<2x256xbf16>,
    return
  }
  func.func @transform_0(%arg0: i32) -> (i32, i32, i32) {
    %c0_i32 = arith.constant 0 : i32
    %c0_i32_0 = arith.constant 0 : i32
    %c0_i32_1 = arith.constant 0 : i32
    %c0_i32_2 = arith.constant 0 : i32
    return %c0_i32, %c0_i32_0, %c0_i32_1 : i32, i32, i32
  }
  func.func @transform_1(%arg0: i32) -> (i32, i32) {
    %c0_i32 = arith.constant 0 : i32
    %c0_i32_0 = arith.constant 0 : i32
    %c0_i32_1 = arith.constant 0 : i32
    return %c0_i32, %c0_i32_0 : i32, i32
  }
}

module attributes {stable_mosaic.version = 11 : i64} {
  func.func @_mm_kernel(%arg0: i32, %arg1: i32, %arg2: memref<16x256xbf16, #tpu.memory_space<vmem>>, %arg3: memref<256x256xbf16, #tpu.memory_space<vmem>>, %arg4: memref<1x256xf32, #tpu.memory_space<vmem>>, %arg5: memref<16x256xf32, #tpu.memory_space<vmem>>) attributes {dimension_semantics = [#tpu.dimension_semantics<parallel>, #tpu.dimension_semantics<parallel>], iteration_bounds = array<i64: 1, 1>, scalar_prefetch = 0 : i64, scratch_operands = 0 : i64, tpu.core_type = #tpu.core_type<tc>, window_params = [{transform_indices = @transform_0, window_bounds = array<i64: 16, 256>}, {transform_indices = @transform_1, window_bounds = array<i64: 256, 256>}, {transform_indices = @transform_2, window_bounds = array<i64: 1, 256>}, {transform_indices = @transform_3, window_bounds = array<i64: 16, 256>}]} {
    %c0 = arith.constant 0 : index
    %c0_0 = arith.constant 0 : index
    %0 = vector.load %arg2[%c0, %c0_0] : memref<16x256xbf16, #tpu.memory_space<vmem>>, vector<16x256xbf16>
    %c0_1 = arith.constant 0 : index
    %c0_2 = arith.constant 0 : index
    %1 = vector.load %arg3[%c0_1, %c0_2] : memref<256x256xbf16, #tpu.memory_space<vmem>>, vector<256x256xbf16>
    %cst = arith.constant dense<0.000000e+00> : vector<16x256xf32>
    %2 = tpu.matmul %0, %1, %cst {dimension_numbers = #tpu.dot_dimension_numbers<[1], [0], [0], [1], [0, 0, 1, 1], [], []>} : vector<16x256xbf16>, vector<256x256xbf16>, vector<16x256xf32> -> vector<16x256xf32>
    %c0_3 = arith.constant 0 : index
    %c0_4 = arith.constant 0 : index
    %3 = vector.load %arg4[%c0_3, %c0_4] : memref<1x256xf32, #tpu.memory_space<vmem>>, vector<1x256xf32>
    %4 = vector.broadcast %3 : vector<1x256xf32> to vector<16x256xf32>
    %5 = arith.addf %2, %4 : vector<16x256xf32>
    %c0_5 = arith.constant 0 : index
    %c0_6 = arith.constant 0 : index
    %6 = vector.load %arg5[%c0_5, %c0_6] : memref<16x256xf32, #tpu.memory_space<vmem>>, vector<16x256xf32>
    tpu.vector_store %arg5[%c0_5, %c0_6], %5 {strides = array<i32>} : memref<16x256xf32, #tpu.memory_space<vmem>>, vector<16x256xf32>,
    return
  }
  func.func @transform_0(%arg0: i32, %arg1: i32) -> (i32, i32) {
    %c0_i32 = arith.constant 0 : i32
    %c0_i32_0 = arith.constant 0 : i32
    return %arg0, %c0_i32 : i32, i32
  }
  func.func @transform_1(%arg0: i32, %arg1: i32) -> (i32, i32) {
    %c0_i32 = arith.constant 0 : i32
    %c0_i32_0 = arith.constant 0 : i32
    return %c0_i32, %arg1 : i32, i32
  }
  func.func @transform_2(%arg0: i32, %arg1: i32) -> (i32, i32) {
    %c0_i32 = arith.constant 0 : i32
    %c0_i32_0 = arith.constant 0 : i32
    return %c0_i32, %arg1 : i32, i32
  }
  func.func @transform_3(%arg0: i32, %arg1: i32) -> (i32, i32) {
    %c0_i32 = arith.constant 0 : i32
    return %arg0, %arg1 : i32, i32
  }
}

module attributes {stable_mosaic.version = 11 : i64} {
  func.func @_mm_kernel(%arg0: i32, %arg1: i32, %arg2: memref<256x128xbf16, #tpu.memory_space<vmem>>, %arg3: memref<128x128xbf16, #tpu.memory_space<vmem>>, %arg4: memref<1x128xf32, #tpu.memory_space<vmem>>, %arg5: memref<256x128xbf16, #tpu.memory_space<vmem>>) attributes {dimension_semantics = [#tpu.dimension_semantics<parallel>, #tpu.dimension_semantics<parallel>], iteration_bounds = array<i64: 2, 1>, scalar_prefetch = 0 : i64, scratch_operands = 0 : i64, tpu.core_type = #tpu.core_type<tc>, window_params = [{transform_indices = @transform_0, window_bounds = array<i64: 256, 128>}, {transform_indices = @transform_1, window_bounds = array<i64: 128, 128>}, {transform_indices = @transform_2, window_bounds = array<i64: 1, 128>}, {transform_indices = @transform_3, window_bounds = array<i64: 256, 128>}]} {
    %c0 = arith.constant 0 : index
    %c0_0 = arith.constant 0 : index
    %0 = vector.load %arg2[%c0, %c0_0] : memref<256x128xbf16, #tpu.memory_space<vmem>>, vector<256x128xbf16>
    %c0_1 = arith.constant 0 : index
    %c0_2 = arith.constant 0 : index
    %1 = vector.load %arg3[%c0_1, %c0_2] : memref<128x128xbf16, #tpu.memory_space<vmem>>, vector<128x128xbf16>
    %cst = arith.constant dense<0.000000e+00> : vector<256x128xf32>
    %2 = tpu.matmul %0, %1, %cst {dimension_numbers = #tpu.dot_dimension_numbers<[1], [0], [0], [1], [0, 0, 1, 1], [], []>} : vector<256x128xbf16>, vector<128x128xbf16>, vector<256x128xf32> -> vector<256x128xf32>
    %c0_3 = arith.constant 0 : index
    %c0_4 = arith.constant 0 : index
    %3 = vector.load %arg4[%c0_3, %c0_4] : memref<1x128xf32, #tpu.memory_space<vmem>>, vector<1x128xf32>
    %4 = vector.broadcast %3 : vector<1x128xf32> to vector<256x128xf32>
    %5 = arith.addf %2, %4 : vector<256x128xf32>
    %cst_5 = arith.constant 0.000000e+00 : f32
    %6 = vector.broadcast %cst_5 : f32 to vector<256x128xf32>
    %7 = arith.maximumf %5, %6 : vector<256x128xf32>
    %8 = arith.truncf %7 : vector<256x128xf32> to vector<256x128xbf16>
    %c0_6 = arith.constant 0 : index
    %c0_7 = arith.constant 0 : index
    %9 = vector.load %arg5[%c0_6, %c0_7] : memref<256x128xbf16, #tpu.memory_space<vmem>>, vector<256x128xbf16>
    tpu.vector_store %arg5[%c0_6, %c0_7], %8 {strides = array<i32>} : memref<256x128xbf16, #tpu.memory_space<vmem>>, vector<256x128xbf16>,
    return
  }
  func.func @transform_0(%arg0: i32, %arg1: i32) -> (i32, i32) {
    %c0_i32 = arith.constant 0 : i32
    %c0_i32_0 = arith.constant 0 : i32
    return %arg0, %c0_i32 : i32, i32
  }
  func.func @transform_1(%arg0: i32, %arg1: i32) -> (i32, i32) {
    %c0_i32 = arith.constant 0 : i32
    %c0_i32_0 = arith.constant 0 : i32
    return %c0_i32, %arg1 : i32, i32
  }
  func.func @transform_2(%arg0: i32, %arg1: i32) -> (i32, i32) {
    %c0_i32 = arith.constant 0 : i32
    %c0_i32_0 = arith.constant 0 : i32
    return %c0_i32, %arg1 : i32, i32
  }
  func.func @transform_3(%arg0: i32, %arg1: i32) -> (i32, i32) {
    %c0_i32 = arith.constant 0 : i32
    return %arg0, %arg1 : i32, i32
  }
}

module attributes {stable_mosaic.version = 11 : i64} {
  func.func @_mm_kernel(%arg0: i32, %arg1: i32, %arg2: memref<208x384xbf16, #tpu.memory_space<vmem>>, %arg3: memref<384x128xbf16, #tpu.memory_space<vmem>>, %arg4: memref<1x128xf32, #tpu.memory_space<vmem>>, %arg5: memref<208x128xbf16, #tpu.memory_space<vmem>>) attributes {dimension_semantics = [#tpu.dimension_semantics<parallel>, #tpu.dimension_semantics<parallel>], iteration_bounds = array<i64: 1, 1>, scalar_prefetch = 0 : i64, scratch_operands = 0 : i64, tpu.core_type = #tpu.core_type<tc>, window_params = [{transform_indices = @transform_0, window_bounds = array<i64: 208, 384>}, {transform_indices = @transform_1, window_bounds = array<i64: 384, 128>}, {transform_indices = @transform_2, window_bounds = array<i64: 1, 128>}, {transform_indices = @transform_3, window_bounds = array<i64: 208, 128>}]} {
    %c0 = arith.constant 0 : index
    %c0_0 = arith.constant 0 : index
    %0 = vector.load %arg2[%c0, %c0_0] : memref<208x384xbf16, #tpu.memory_space<vmem>>, vector<208x384xbf16>
    %c0_1 = arith.constant 0 : index
    %c0_2 = arith.constant 0 : index
    %1 = vector.load %arg3[%c0_1, %c0_2] : memref<384x128xbf16, #tpu.memory_space<vmem>>, vector<384x128xbf16>
    %cst = arith.constant dense<0.000000e+00> : vector<208x128xf32>
    %2 = tpu.matmul %0, %1, %cst {dimension_numbers = #tpu.dot_dimension_numbers<[1], [0], [0], [1], [0, 0, 1, 1], [], []>} : vector<208x384xbf16>, vector<384x128xbf16>, vector<208x128xf32> -> vector<208x128xf32>
    %c0_3 = arith.constant 0 : index
    %c0_4 = arith.constant 0 : index
    %3 = vector.load %arg4[%c0_3, %c0_4] : memref<1x128xf32, #tpu.memory_space<vmem>>, vector<1x128xf32>
    %4 = vector.broadcast %3 : vector<1x128xf32> to vector<208x128xf32>
    %5 = arith.addf %2, %4 : vector<208x128xf32>
    %cst_5 = arith.constant 0.000000e+00 : f32
    %6 = vector.broadcast %cst_5 : f32 to vector<208x128xf32>
    %7 = arith.maximumf %5, %6 : vector<208x128xf32>
    %8 = arith.truncf %7 : vector<208x128xf32> to vector<208x128xbf16>
    %c0_6 = arith.constant 0 : index
    %c0_7 = arith.constant 0 : index
    %9 = vector.load %arg5[%c0_6, %c0_7] : memref<208x128xbf16, #tpu.memory_space<vmem>>, vector<208x128xbf16>
    tpu.vector_store %arg5[%c0_6, %c0_7], %8 {strides = array<i32>} : memref<208x128xbf16, #tpu.memory_space<vmem>>, vector<208x128xbf16>,
    return
  }
  func.func @transform_0(%arg0: i32, %arg1: i32) -> (i32, i32) {
    %c0_i32 = arith.constant 0 : i32
    %c0_i32_0 = arith.constant 0 : i32
    return %arg0, %c0_i32 : i32, i32
  }
  func.func @transform_1(%arg0: i32, %arg1: i32) -> (i32, i32) {
    %c0_i32 = arith.constant 0 : i32
    %c0_i32_0 = arith.constant 0 : i32
    return %c0_i32, %arg1 : i32, i32
  }
  func.func @transform_2(%arg0: i32, %arg1: i32) -> (i32, i32) {
    %c0_i32 = arith.constant 0 : i32
    %c0_i32_0 = arith.constant 0 : i32
    return %c0_i32, %arg1 : i32, i32
  }
  func.func @transform_3(%arg0: i32, %arg1: i32) -> (i32, i32) {
    %c0_i32 = arith.constant 0 : i32
    return %arg0, %arg1 : i32, i32
  }
}

module attributes {stable_mosaic.version = 11 : i64} {
  func.func @_mm_kernel(%arg0: i32, %arg1: i32, %arg2: memref<96x640xbf16, #tpu.memory_space<vmem>>, %arg3: memref<640x256xbf16, #tpu.memory_space<vmem>>, %arg4: memref<1x256xf32, #tpu.memory_space<vmem>>, %arg5: memref<96x256xbf16, #tpu.memory_space<vmem>>) attributes {dimension_semantics = [#tpu.dimension_semantics<parallel>, #tpu.dimension_semantics<parallel>], iteration_bounds = array<i64: 1, 1>, scalar_prefetch = 0 : i64, scratch_operands = 0 : i64, tpu.core_type = #tpu.core_type<tc>, window_params = [{transform_indices = @transform_0, window_bounds = array<i64: 96, 640>}, {transform_indices = @transform_1, window_bounds = array<i64: 640, 256>}, {transform_indices = @transform_2, window_bounds = array<i64: 1, 256>}, {transform_indices = @transform_3, window_bounds = array<i64: 96, 256>}]} {
    %c0 = arith.constant 0 : index
    %c0_0 = arith.constant 0 : index
    %0 = vector.load %arg2[%c0, %c0_0] : memref<96x640xbf16, #tpu.memory_space<vmem>>, vector<96x640xbf16>
    %c0_1 = arith.constant 0 : index
    %c0_2 = arith.constant 0 : index
    %1 = vector.load %arg3[%c0_1, %c0_2] : memref<640x256xbf16, #tpu.memory_space<vmem>>, vector<640x256xbf16>
    %cst = arith.constant dense<0.000000e+00> : vector<96x256xf32>
    %2 = tpu.matmul %0, %1, %cst {dimension_numbers = #tpu.dot_dimension_numbers<[1], [0], [0], [1], [0, 0, 1, 1], [], []>} : vector<96x640xbf16>, vector<640x256xbf16>, vector<96x256xf32> -> vector<96x256xf32>
    %c0_3 = arith.constant 0 : index
    %c0_4 = arith.constant 0 : index
    %3 = vector.load %arg4[%c0_3, %c0_4] : memref<1x256xf32, #tpu.memory_space<vmem>>, vector<1x256xf32>
    %4 = vector.broadcast %3 : vector<1x256xf32> to vector<96x256xf32>
    %5 = arith.addf %2, %4 : vector<96x256xf32>
    %cst_5 = arith.constant 0.000000e+00 : f32
    %6 = vector.broadcast %cst_5 : f32 to vector<96x256xf32>
    %7 = arith.maximumf %5, %6 : vector<96x256xf32>
    %8 = arith.truncf %7 : vector<96x256xf32> to vector<96x256xbf16>
    %c0_6 = arith.constant 0 : index
    %c0_7 = arith.constant 0 : index
    %9 = vector.load %arg5[%c0_6, %c0_7] : memref<96x256xbf16, #tpu.memory_space<vmem>>, vector<96x256xbf16>
    tpu.vector_store %arg5[%c0_6, %c0_7], %8 {strides = array<i32>} : memref<96x256xbf16, #tpu.memory_space<vmem>>, vector<96x256xbf16>,
    return
  }
  func.func @transform_0(%arg0: i32, %arg1: i32) -> (i32, i32) {
    %c0_i32 = arith.constant 0 : i32
    %c0_i32_0 = arith.constant 0 : i32
    return %arg0, %c0_i32 : i32, i32
  }
  func.func @transform_1(%arg0: i32, %arg1: i32) -> (i32, i32) {
    %c0_i32 = arith.constant 0 : i32
    %c0_i32_0 = arith.constant 0 : i32
    return %c0_i32, %arg1 : i32, i32
  }
  func.func @transform_2(%arg0: i32, %arg1: i32) -> (i32, i32) {
    %c0_i32 = arith.constant 0 : i32
    %c0_i32_0 = arith.constant 0 : i32
    return %c0_i32, %arg1 : i32, i32
  }
  func.func @transform_3(%arg0: i32, %arg1: i32) -> (i32, i32) {
    %c0_i32 = arith.constant 0 : i32
    return %arg0, %arg1 : i32, i32
  }
}

module attributes {stable_mosaic.version = 11 : i64} {
  func.func @_mean_kernel(%arg0: i32, %arg1: memref<2x47x256xbf16, #tpu.memory_space<vmem>>, %arg2: memref<2x256xbf16, #tpu.memory_space<vmem>>) attributes {dimension_semantics = [#tpu.dimension_semantics<arbitrary>], iteration_bounds = array<i64: 1>, scalar_prefetch = 0 : i64, scratch_operands = 0 : i64, tpu.core_type = #tpu.core_type<tc>, window_params = [{pipeline_mode = #tpu.pipeline_mode<synchronous>, transform_indices = @transform_0, window_bounds = array<i64: 2, 47, 256>}, {pipeline_mode = #tpu.pipeline_mode<synchronous>, transform_indices = @transform_1, window_bounds = array<i64: 2, 256>}]} {
    %c0 = arith.constant 0 : index
    %c0_0 = arith.constant 0 : index
    %c0_1 = arith.constant 0 : index
    %0 = vector.load %arg1[%c0, %c0_0, %c0_1] : memref<2x47x256xbf16, #tpu.memory_space<vmem>>, vector<2x47x256xbf16>
    %1 = arith.extf %0 : vector<2x47x256xbf16> to vector<2x47x256xf32>
    %cst = arith.constant dense<0.000000e+00> : vector<2x256xf32>
    %2 = vector.multi_reduction <add>, %1, %cst [1] : vector<2x47x256xf32> to vector<2x256xf32>
    %cst_2 = arith.constant 0.0212765951 : f32
    %3 = vector.broadcast %cst_2 : f32 to vector<2x256xf32>
    %4 = arith.mulf %2, %3 : vector<2x256xf32>
    %5 = arith.truncf %4 : vector<2x256xf32> to vector<2x256xbf16>
    %c0_3 = arith.constant 0 : index
    %c0_4 = arith.constant 0 : index
    %6 = vector.load %arg2[%c0_3, %c0_4] : memref<2x256xbf16, #tpu.memory_space<vmem>>, vector<2x256xbf16>
    tpu.vector_store %arg2[%c0_3, %c0_4], %5 {strides = array<i32>} : memref<2x256xbf16, #tpu.memory_space<vmem>>, vector<2x256xbf16>,
    return
  }
  func.func @transform_0(%arg0: i32) -> (i32, i32, i32) {
    %c0_i32 = arith.constant 0 : i32
    %c0_i32_0 = arith.constant 0 : i32
    %c0_i32_1 = arith.constant 0 : i32
    %c0_i32_2 = arith.constant 0 : i32
    return %c0_i32, %c0_i32_0, %c0_i32_1 : i32, i32, i32
  }
  func.func @transform_1(%arg0: i32) -> (i32, i32) {
    %c0_i32 = arith.constant 0 : i32
    %c0_i32_0 = arith.constant 0 : i32
    %c0_i32_1 = arith.constant 0 : i32
    return %c0_i32, %c0_i32_0 : i32, i32
  }
}

module attributes {stable_mosaic.version = 11 : i64} {
  func.func @_mm_kernel(%arg0: i32, %arg1: i32, %arg2: memref<16x512xbf16, #tpu.memory_space<vmem>>, %arg3: memref<512x128xbf16, #tpu.memory_space<vmem>>, %arg4: memref<1x128xf32, #tpu.memory_space<vmem>>, %arg5: memref<16x128xf32, #tpu.memory_space<vmem>>) attributes {dimension_semantics = [#tpu.dimension_semantics<parallel>, #tpu.dimension_semantics<parallel>], iteration_bounds = array<i64: 1, 1>, scalar_prefetch = 0 : i64, scratch_operands = 0 : i64, tpu.core_type = #tpu.core_type<tc>, window_params = [{transform_indices = @transform_0, window_bounds = array<i64: 16, 512>}, {transform_indices = @transform_1, window_bounds = array<i64: 512, 128>}, {transform_indices = @transform_2, window_bounds = array<i64: 1, 128>}, {transform_indices = @transform_3, window_bounds = array<i64: 16, 128>}]} {
    %c0 = arith.constant 0 : index
    %c0_0 = arith.constant 0 : index
    %0 = vector.load %arg2[%c0, %c0_0] : memref<16x512xbf16, #tpu.memory_space<vmem>>, vector<16x512xbf16>
    %c0_1 = arith.constant 0 : index
    %c0_2 = arith.constant 0 : index
    %1 = vector.load %arg3[%c0_1, %c0_2] : memref<512x128xbf16, #tpu.memory_space<vmem>>, vector<512x128xbf16>
    %cst = arith.constant dense<0.000000e+00> : vector<16x128xf32>
    %2 = tpu.matmul %0, %1, %cst {dimension_numbers = #tpu.dot_dimension_numbers<[1], [0], [0], [1], [0, 0, 1, 1], [], []>} : vector<16x512xbf16>, vector<512x128xbf16>, vector<16x128xf32> -> vector<16x128xf32>
    %c0_3 = arith.constant 0 : index
    %c0_4 = arith.constant 0 : index
    %3 = vector.load %arg4[%c0_3, %c0_4] : memref<1x128xf32, #tpu.memory_space<vmem>>, vector<1x128xf32>
    %4 = vector.broadcast %3 : vector<1x128xf32> to vector<16x128xf32>
    %5 = arith.addf %2, %4 : vector<16x128xf32>
    %c0_5 = arith.constant 0 : index
    %c0_6 = arith.constant 0 : index
    %6 = vector.load %arg5[%c0_5, %c0_6] : memref<16x128xf32, #tpu.memory_space<vmem>>, vector<16x128xf32>
    tpu.vector_store %arg5[%c0_5, %c0_6], %5 {strides = array<i32>} : memref<16x128xf32, #tpu.memory_space<vmem>>, vector<16x128xf32>,
    return
  }
  func.func @transform_0(%arg0: i32, %arg1: i32) -> (i32, i32) {
    %c0_i32 = arith.constant 0 : i32
    %c0_i32_0 = arith.constant 0 : i32
    return %arg0, %c0_i32 : i32, i32
  }
  func.func @transform_1(%arg0: i32, %arg1: i32) -> (i32, i32) {
    %c0_i32 = arith.constant 0 : i32
    %c0_i32_0 = arith.constant 0 : i32
    return %c0_i32, %arg1 : i32, i32
  }
  func.func @transform_2(%arg0: i32, %arg1: i32) -> (i32, i32) {
    %c0_i32 = arith.constant 0 : i32
    %c0_i32_0 = arith.constant 0 : i32
    return %c0_i32, %arg1 : i32, i32
  }
  func.func @transform_3(%arg0: i32, %arg1: i32) -> (i32, i32) {
    %c0_i32 = arith.constant 0 : i32
    return %arg0, %arg1 : i32, i32
  }
}

</mosaic_0001>

<bundles_post_ra>
// kernel: _lambda_.62
= control target key start
LH: loop header
LB: loop body
LE: loop exit
PB: predicated region body
PF: predicated region fallthrough
CT: control target
= control target key end

     0   :  { %s1494_s12 = smov 0   ;;  %s1496_s13 = smov 0   ;;  %s1668_s0 = inlined_call_operand.vmem [shape: bf16[512,256], index: 0, kind: input, shape index: {}]   ;;  %s1669_s1 = inlined_call_operand.vmem [shape: bf16[256,128], index: 1, kind: input, shape index: {}]   ;;  %s1670_s2 = inlined_call_operand.vmem [shape: f32[1,128], index: 2, kind: input, shape index: {}]   ;;  %s1671_s3 = inlined_call_operand.vmem [shape: bf16[512,128], index: 3, kind: output, shape index: {}]  }
   0x1   :  { %s1498_s14 = smov 0  }
   0x2 LB: > { %s25_s15 = sadd.s32 1, %s1468_s13  ;;  %p1017_p0 = scmp.ge.s32.totalorder %s1472_s14, 1  ;;  %s1472_s14 = sphi %s1498_s14, %s13_s14   ;;  %s1468_s13 = sphi %s1496_s13, %s1673_s13   ;;  %s1464_s12 = sphi %s1494_s12, %s1672_s12  }
   0x3   : > { %p27_p1 = scmp.ge.s32.totalorder %s25_s15, 2  ;;  %p170_p2 = scmp.lt.s32.totalorder %s1472_s14, 3 }
   0x5   : > { %s1675_s15 = smov (%p27_p1, %s25_s15), 0  ;;  %p171_p3 = pnand %p1017_p0, %p170_p2 }
   0x6   : > { %v1386_v0 = vld [vmem:[%s1669_s1 + $0x40] sm:$0xff] (!%p171_p3)   ;;  %s1018_s18 = sshll.u32 (!%p171_p3), %s1464_s12, 5  ;;  %v1388_v2 = vld [vmem:[%s1669_s1 + $0x48] sm:$0xff] (!%p171_p3)   ;;  %v1390_v4 = vld [vmem:[%s1669_s1 + $0x50] sm:$0xff] (!%p171_p3)  }
   0x7   : > { %174 = sbr.rel (%p171_p3) target bundleno = 320 (0x140), region = 32  ;;  %v1387_v1 = vld [vmem:[%s1669_s1] sm:$0xff] (!%p171_p3)   ;;  %1234 = vmatprep.subr.bf16.mxu0 (!%p171_p3), %v1386_v0  ;;  %1346 = vmatprep.subr.bf16.mxu1 (!%p171_p3), %v1386_v0  ;;  %v1389_v3 = vld [vmem:[%s1669_s1 + $0x8] sm:$0xff] (!%p171_p3)   ;;  %p206_p4 = scmp.lt.s32.totalorder (!%p171_p3), %s1018_s18, 63  ;;  %v1391_v5 = vld [vmem:[%s1669_s1 + $0x10] sm:$0xff] (!%p171_p3)  }
   0x8   : > { %1235 = vmatpush3.bf16.msra.mxu0 (!%p171_p3), %v1387_v1  ;;  %1354 = vmatpush3.bf16.msra.mxu1 (!%p171_p3), %v1387_v1  ;;  %v1392_v6 = vld [vmem:[%s1669_s1 + $0x58] sm:$0xff] (!%p171_p3)   ;;  %v1394_v8 = vld [vmem:[%s1669_s1 + $0x60] sm:$0xff] (!%p171_p3)   ;;  %v1396_v10 = vld [vmem:[%s1669_s1 + $0x68] sm:$0xff] (!%p171_p3)  }
   0x9   : > { %1236 = vmatprep.subr.bf16.mxu0 (!%p171_p3), %v1388_v2  ;;  %1347 = vmatprep.subr.bf16.mxu1 (!%p171_p3), %v1388_v2  ;;  %v1393_v7 = vld [vmem:[%s1669_s1 + $0x18] sm:$0xff] (!%p171_p3)   ;;  %v1395_v9 = vld [vmem:[%s1669_s1 + $0x20] sm:$0xff] (!%p171_p3)   ;;  %v1397_v13 = vld [vmem:[%s1669_s1 + $0x28] sm:$0xff] (!%p171_p3)  }
   0xa   : > { %v1398_v14 = vld [vmem:[%s1669_s1 + $0x70] sm:$0xff] (!%p171_p3)   ;;  %v1400_v16 = vld [vmem:[%s1669_s1 + $0x78] sm:$0xff] (!%p171_p3)   ;;  %v1603_v50 = vld [vmem:[%s1670_s2] ss:$0 sm:$0xff] (!%p171_p3) }
   0xb   : > { %v1399_v15 = vld [vmem:[%s1669_s1 + $0x30] sm:$0xff] (!%p171_p3)   ;;  %v1401_v17 = vld [vmem:[%s1669_s1 + $0x38] sm:$0xff] (!%p171_p3)  }
   0xc   : > { %1237 = vmatpush3.bf16.msra.mxu0 (!%p171_p3), %v1389_v3  ;;  %1355 = vmatpush3.bf16.msra.mxu1 (!%p171_p3), %v1389_v3 }
   0xd   : > { %1238 = vmatprep.subr.bf16.mxu0 (!%p171_p3), %v1390_v4  ;;  %1348 = vmatprep.subr.bf16.mxu1 (!%p171_p3), %v1390_v4 }
   0xe   : > { %s1677_s18 = smov (!%p206_p4, %s1018_s18), 63 }
   0xf   : > { %s1106_s6 = sshll.u32 %s1677_s18, 3  ;;  %s1022_s5 = sshll.u32 %s1677_s18, 2 }
  0x10   : > { %1239 = vmatpush3.bf16.msra.mxu0 %v1391_v5  ;;  %1356 = vmatpush3.bf16.msra.mxu1 %v1391_v5  ;;  %s1545_s11 = scalar_lea.vmem %s1668_s0, %s1106_s6  ;;  %s1613_s8 = scalar_lea.vmem %s1671_s3, %s1022_s5 }
  0x11   : > { %1240 = vmatprep.subr.bf16.mxu0 %v1392_v6  ;;  %1349 = vmatprep.subr.bf16.mxu1 %v1392_v6  ;;  %v1404_v11 = vld [vmem:[%s1545_s11 + $0x4] ss:$8 sps:$4 sm:$0xff]   ;;  %v1402_v18 = vld [vmem:[%s1545_s11] ss:$8 sps:$4 sm:$0xff]   ;;  %v1408_v20 = vld [vmem:[%s1545_s11 + $0x14] ss:$8 sps:$4 sm:$0xff]  }
  0x12   : > { %v1407_v12 = vld [vmem:[%s1545_s11 + $0x84] ss:$8 sps:$4 sm:$0xff]   ;;  %588 = vmatprep.mubr.bf16.mxu0 %v1404_v11  ;;  %v1405_v19 = vld [vmem:[%s1545_s11 + $0x80] ss:$8 sps:$4 sm:$0xff]   ;;  %v1410_v21 = vld [vmem:[%s1545_s11 + $0x94] ss:$8 sps:$4 sm:$0xff]  }
  0x13   : > { %652 = vmatprep.mubr.bf16.mxu1 %v1407_v12  ;;  %v1412_v22 = vld [vmem:[%s1545_s11 + $0x10] ss:$8 sps:$4 sm:$0xff]   ;;  %v1414_v24 = vld [vmem:[%s1545_s11 + $0x24] ss:$8 sps:$4 sm:$0xff]   ;;  %v1418_v26 = vld [vmem:[%s1545_s11 + $0x20] ss:$8 sps:$4 sm:$0xff]  }
  0x14   : > { %1241 = vmatpush3.bf16.msra.mxu0 %v1393_v7  ;;  %1357 = vmatpush3.bf16.msra.mxu1 %v1393_v7  ;;  %v1413_v23 = vld [vmem:[%s1545_s11 + $0x90] ss:$8 sps:$4 sm:$0xff]   ;;  %v1416_v25 = vld [vmem:[%s1545_s11 + $0xa4] ss:$8 sps:$4 sm:$0xff]   ;;  %v1419_v27 = vld [vmem:[%s1545_s11 + $0xa0] ss:$8 sps:$4 sm:$0xff]  }
  0x15   : > { %1242 = vmatprep.subr.bf16.mxu0 %v1394_v8  ;;  %1350 = vmatprep.subr.bf16.mxu1 %v1394_v8  ;;  %v1420_v28 = vld [vmem:[%s1545_s11 + $0x34] ss:$8 sps:$4 sm:$0xff]   ;;  %v1424_v30 = vld [vmem:[%s1545_s11 + $0x30] ss:$8 sps:$4 sm:$0xff]   ;;  %v1426_v32 = vld [vmem:[%s1545_s11 + $0x44] ss:$8 sps:$4 sm:$0xff]  }
  0x16   : > { %v1422_v29 = vld [vmem:[%s1545_s11 + $0xb4] ss:$8 sps:$4 sm:$0xff]   ;;  %v1425_v31 = vld [vmem:[%s1545_s11 + $0xb0] ss:$8 sps:$4 sm:$0xff]   ;;  %v1428_v33 = vld [vmem:[%s1545_s11 + $0xc4] ss:$8 sps:$4 sm:$0xff]  }
  0x17   : > { %v1430_v34 = vld [vmem:[%s1545_s11 + $0x40] ss:$8 sps:$4 sm:$0xff]   ;;  %v1432_v36 = vld [vmem:[%s1545_s11 + $0x54] ss:$8 sps:$4 sm:$0xff]   ;;  %v1436_v38 = vld [vmem:[%s1545_s11 + $0x50] ss:$8 sps:$4 sm:$0xff]  }
  0x18   : > { %1243 = vmatpush3.bf16.msra.mxu0 %v1395_v9  ;;  %1358 = vmatpush3.bf16.msra.mxu1 %v1395_v9  ;;  %v1431_v35 = vld [vmem:[%s1545_s11 + $0xc0] ss:$8 sps:$4 sm:$0xff]   ;;  %v1434_v37 = vld [vmem:[%s1545_s11 + $0xd4] ss:$8 sps:$4 sm:$0xff]   ;;  %v1437_v39 = vld [vmem:[%s1545_s11 + $0xd0] ss:$8 sps:$4 sm:$0xff]  }
  0x19   : > { %1244 = vmatprep.subr.bf16.mxu0 %v1396_v10  ;;  %1351 = vmatprep.subr.bf16.mxu1 %v1396_v10  ;;  %v1438_v40 = vld [vmem:[%s1545_s11 + $0x64] ss:$8 sps:$4 sm:$0xff]   ;;  %v1442_v42 = vld [vmem:[%s1545_s11 + $0x60] ss:$8 sps:$4 sm:$0xff]   ;;  %v1444_v44 = vld [vmem:[%s1545_s11 + $0x74] ss:$8 sps:$4 sm:$0xff]  }
  0x1a   : > { %v1440_v41 = vld [vmem:[%s1545_s11 + $0xe4] ss:$8 sps:$4 sm:$0xff]   ;;  %v1443_v43 = vld [vmem:[%s1545_s11 + $0xe0] ss:$8 sps:$4 sm:$0xff]   ;;  %v1446_v45 = vld [vmem:[%s1545_s11 + $0xf4] ss:$8 sps:$4 sm:$0xff]  }
  0x1b   : > { %v1448_v46 = vld [vmem:[%s1545_s11 + $0x70] ss:$8 sps:$4 sm:$0xff]  }
  0x1c   : > { %1245 = vmatpush3.bf16.msra.mxu0 %v1397_v13  ;;  %1359 = vmatpush3.bf16.msra.mxu1 %v1397_v13  ;;  %v1449_v47 = vld [vmem:[%s1545_s11 + $0xf0] ss:$8 sps:$4 sm:$0xff]  }
  0x1d   : > { %1246 = vmatprep.subr.bf16.mxu0 %v1398_v14  ;;  %1352 = vmatprep.subr.bf16.mxu1 %v1398_v14 }
  0x20   : > { %1247 = vmatpush3.bf16.msra.mxu0 %v1399_v15  ;;  %1360 = vmatpush3.bf16.msra.mxu1 %v1399_v15 }
  0x21   : > { %1248 = vmatprep.subr.bf16.mxu0 %v1400_v16  ;;  %1353 = vmatprep.subr.bf16.mxu1 %v1400_v16 }
  0x24   : > { %1249 = vmatpush3.bf16.msra.mxu0 %v1401_v17  ;;  %1361 = vmatpush3.bf16.msra.mxu1 %v1401_v17 }
  0x27   : > { %589 = vmatmul.mubr.bf16.vlgmr.msra.gmra.mrb[0].mxu0 %v1402_v18  ;;  %653 = vmatmul.mubr.bf16.vlgmr.msra.gmra.mrb[0].mxu1 %v1405_v19 }
  0x28   : > { %596 = vmatprep.mubr.bf16.mxu0 %v1408_v20  ;;  %660 = vmatprep.mubr.bf16.mxu1 %v1410_v21 }
  0x2f   : > { %597 = vmatmul.mubr.bf16.gmra.mrb[4].mxu0 %v1412_v22  ;;  %661 = vmatmul.mubr.bf16.gmra.mrb[4].mxu1 %v1413_v23 }
  0x30   : > { %604 = vmatprep.mubr.bf16.mxu0 %v1414_v24  ;;  %668 = vmatprep.mubr.bf16.mxu1 %v1416_v25 }
  0x37   : > { %605 = vmatmul.mubr.bf16.gmra.mrb[8].mxu0 %v1418_v26  ;;  %669 = vmatmul.mubr.bf16.gmra.mrb[8].mxu1 %v1419_v27 }
  0x38   : > { %612 = vmatprep.mubr.bf16.mxu0 %v1420_v28  ;;  %676 = vmatprep.mubr.bf16.mxu1 %v1422_v29 }
  0x3f   : > { %613 = vmatmul.mubr.bf16.gmra.mrb[12].mxu0 %v1424_v30  ;;  %677 = vmatmul.mubr.bf16.gmra.mrb[12].mxu1 %v1425_v31 }
  0x40   : > { %620 = vmatprep.mubr.bf16.mxu0 %v1426_v32  ;;  %684 = vmatprep.mubr.bf16.mxu1 %v1428_v33 }
  0x47   : > { %621 = vmatmul.mubr.bf16.gmra.mrb[16].mxu0 %v1430_v34  ;;  %685 = vmatmul.mubr.bf16.gmra.mrb[16].mxu1 %v1431_v35 }
  0x48   : > { %628 = vmatprep.mubr.bf16.mxu0 %v1432_v36  ;;  %692 = vmatprep.mubr.bf16.mxu1 %v1434_v37 }
  0x4f   : > { %629 = vmatmul.mubr.bf16.gmra.mrb[20].mxu0 %v1436_v38  ;;  %693 = vmatmul.mubr.bf16.gmra.mrb[20].mxu1 %v1437_v39 }
  0x50   : > { %636 = vmatprep.mubr.bf16.mxu0 %v1438_v40  ;;  %700 = vmatprep.mubr.bf16.mxu1 %v1440_v41 }
  0x57   : > { %637 = vmatmul.mubr.bf16.gmra.mrb[24].mxu0 %v1442_v42  ;;  %701 = vmatmul.mubr.bf16.gmra.mrb[24].mxu1 %v1443_v43 }
  0x58   : > { %644 = vmatprep.mubr.bf16.mxu0 %v1444_v44  ;;  %708 = vmatprep.mubr.bf16.mxu1 %v1446_v45 }
  0x5f   : > { %645 = vmatmul.mubr.bf16.gmra.mrb[28].mxu0 %v1448_v46  ;;  %709 = vmatmul.mubr.bf16.gmra.mrb[28].mxu1 %v1449_v47 }
  0xfa   : > { %v1250_v48 = vpop.f32.mrb[0].mxu0  ;;  %v1298_v49 = vpop.f32.mrb[0].mxu1 }
  0xfb   : > { %v1251_v51 = vpop.f32.mrb[1].mxu0  ;;  %v1299_v52 = vpop.f32.mrb[1].mxu1 }
  0xfc   : > { %v1252_v53 = vadd.f32 %v1251_v51, %v1250_v48  ;;  %v1300_v54 = vadd.f32 %v1299_v52, %v1298_v49  ;;  %v1253_v55 = vpop.f32.mrb[2].mxu0  ;;  %v1301_v56 = vpop.f32.mrb[2].mxu1 }
  0xfd   : > { %v1254_v57 = vpop.f32.mrb[3].mxu0  ;;  %v1302_v58 = vpop.f32.mrb[3].mxu1 }
  0xfe   : > { %v591_v59 = vadd.f32 %v1252_v53, %v1603_v50  ;;  %v655_v60 = vadd.f32 %v1300_v54, %v1603_v50  ;;  %v1255_v61 = vadd.f32 %v1254_v57, %v1253_v55  ;;  %v1303_v62 = vadd.f32 %v1302_v58, %v1301_v56 }
 0x100   : > { %v594_v63 = vadd.f32 %v1255_v61, %v1603_v50  ;;  %v658_v0 = vadd.f32 %v1303_v62, %v1603_v50  ;;  %v717_v1 = vmax.f32 %v591_v59, 0.0  ;;  %v733_v2 = vmax.f32 %v655_v60, 0.0 }
 0x102   : > { %v718_v3 = vmax.f32 %v594_v63, 0.0  ;;  %v734_v4 = vmax.f32 %v658_v0, 0.0  ;;  %v1256_v5 = vpop.f32.mrb[4].mxu0  ;;  %v1304_v6 = vpop.f32.mrb[4].mxu1 }
 0x103   : > { %v1257_v7 = vpop.f32.mrb[5].mxu0  ;;  %v1305_v8 = vpop.f32.mrb[5].mxu1 }
 0x104   : > { %v1142_v9 = vpack.c.bf16 %v718_v3, %v717_v1  ;;  %v1182_v10 = vpack.c.bf16 %v734_v4, %v733_v2  ;;  %v1258_v11 = vadd.f32 %v1257_v7, %v1256_v5  ;;  %v1306_v12 = vadd.f32 %v1305_v8, %v1304_v6  ;;  %v1259_v13 = vpop.f32.mrb[6].mxu0  ;;  %v1307_v14 = vpop.f32.mrb[6].mxu1 }
 0x105   : > { %v1260_v15 = vpop.f32.mrb[7].mxu0  ;;  %v1308_v16 = vpop.f32.mrb[7].mxu1 }
 0x106   : > { %1143 = vst [vmem:[%s1613_s8] sm:$0xff] %v1142_v9   ;;  %1226 = vst [vmem:[%s1613_s8 + $0x40] sm:$0xff] %v1182_v10   ;;  %v599_v17 = vadd.f32 %v1258_v11, %v1603_v50  ;;  %v663_v18 = vadd.f32 %v1306_v12, %v1603_v50  ;;  %v1261_v19 = vadd.f32 %v1260_v15, %v1259_v13 }
 0x107   : > { %v1309_v20 = vadd.f32 %v1308_v16, %v1307_v14 }
 0x108   : > { %v602_v21 = vadd.f32 %v1261_v19, %v1603_v50  ;;  %v719_v23 = vmax.f32 %v599_v17, 0.0  ;;  %v735_v24 = vmax.f32 %v663_v18, 0.0 }
 0x109   : > { %v666_v22 = vadd.f32 %v1309_v20, %v1603_v50 }
 0x10a   : > { %v720_v25 = vmax.f32 %v602_v21, 0.0  ;;  %v1262_v27 = vpop.f32.mrb[8].mxu0  ;;  %v1310_v28 = vpop.f32.mrb[8].mxu1 }
 0x10b   : > { %v736_v26 = vmax.f32 %v666_v22, 0.0  ;;  %v1263_v29 = vpop.f32.mrb[9].mxu0  ;;  %v1311_v30 = vpop.f32.mrb[9].mxu1 }
 0x10c   : > { %v1147_v31 = vpack.c.bf16 %v720_v25, %v719_v23  ;;  %v1264_v33 = vadd.f32 %v1263_v29, %v1262_v27  ;;  %v1312_v34 = vadd.f32 %v1311_v30, %v1310_v28  ;;  %v1265_v35 = vpop.f32.mrb[10].mxu0  ;;  %v1313_v36 = vpop.f32.mrb[10].mxu1 }
 0x10d   : > { %v1187_v32 = vpack.c.bf16 %v736_v26, %v735_v24  ;;  %v1266_v37 = vpop.f32.mrb[11].mxu0  ;;  %v1314_v38 = vpop.f32.mrb[11].mxu1 }
 0x10e   : > { %1219 = vst [vmem:[%s1613_s8 + $0x8] sm:$0xff] %v1147_v31   ;;  %v607_v39 = vadd.f32 %v1264_v33, %v1603_v50  ;;  %v671_v40 = vadd.f32 %v1312_v34, %v1603_v50  ;;  %v1267_v41 = vadd.f32 %v1266_v37, %v1265_v35  ;;  %v1315_v42 = vadd.f32 %v1314_v38, %v1313_v36 }
 0x10f   : > { %1227 = vst [vmem:[%s1613_s8 + $0x48] sm:$0xff] %v1187_v32  }
 0x110   : > { %v610_v43 = vadd.f32 %v1267_v41, %v1603_v50  ;;  %v674_v44 = vadd.f32 %v1315_v42, %v1603_v50  ;;  %v721_v45 = vmax.f32 %v607_v39, 0.0  ;;  %v737_v46 = vmax.f32 %v671_v40, 0.0 }
 0x112   : > { %v722_v47 = vmax.f32 %v610_v43, 0.0  ;;  %v738_v48 = vmax.f32 %v674_v44, 0.0  ;;  %v1268_v49 = vpop.f32.mrb[12].mxu0  ;;  %v1316_v51 = vpop.f32.mrb[12].mxu1 }
 0x113   : > { %v1269_v52 = vpop.f32.mrb[13].mxu0  ;;  %v1317_v53 = vpop.f32.mrb[13].mxu1 }
 0x114   : > { %v1152_v54 = vpack.c.bf16 %v722_v47, %v721_v45  ;;  %v1192_v55 = vpack.c.bf16 %v738_v48, %v737_v46  ;;  %v1270_v56 = vadd.f32 %v1269_v52, %v1268_v49  ;;  %v1318_v57 = vadd.f32 %v1317_v53, %v1316_v51  ;;  %v1271_v58 = vpop.f32.mrb[14].mxu0  ;;  %v1319_v59 = vpop.f32.mrb[14].mxu1 }
 0x115   : > { %v1272_v60 = vpop.f32.mrb[15].mxu0  ;;  %v1320_v61 = vpop.f32.mrb[15].mxu1 }
 0x116   : > { %1220 = vst [vmem:[%s1613_s8 + $0x10] sm:$0xff] %v1152_v54   ;;  %1228 = vst [vmem:[%s1613_s8 + $0x50] sm:$0xff] %v1192_v55   ;;  %v615_v62 = vadd.f32 %v1270_v56, %v1603_v50  ;;  %v679_v63 = vadd.f32 %v1318_v57, %v1603_v50  ;;  %v1273_v0 = vadd.f32 %v1272_v60, %v1271_v58 }
 0x117   : > { %v1321_v1 = vadd.f32 %v1320_v61, %v1319_v59 }
 0x118   : > { %v618_v2 = vadd.f32 %v1273_v0, %v1603_v50  ;;  %v723_v4 = vmax.f32 %v615_v62, 0.0  ;;  %v739_v5 = vmax.f32 %v679_v63, 0.0 }
 0x119   : > { %v682_v3 = vadd.f32 %v1321_v1, %v1603_v50 }
 0x11a   : > { %v724_v6 = vmax.f32 %v618_v2, 0.0  ;;  %v1274_v8 = vpop.f32.mrb[16].mxu0  ;;  %v1322_v9 = vpop.f32.mrb[16].mxu1 }
 0x11b   : > { %v740_v7 = vmax.f32 %v682_v3, 0.0  ;;  %v1275_v10 = vpop.f32.mrb[17].mxu0  ;;  %v1323_v11 = vpop.f32.mrb[17].mxu1 }
 0x11c   : > { %v1157_v12 = vpack.c.bf16 %v724_v6, %v723_v4  ;;  %v1276_v14 = vadd.f32 %v1275_v10, %v1274_v8  ;;  %v1324_v15 = vadd.f32 %v1323_v11, %v1322_v9  ;;  %v1277_v16 = vpop.f32.mrb[18].mxu0  ;;  %v1325_v17 = vpop.f32.mrb[18].mxu1 }
 0x11d   : > { %v1197_v13 = vpack.c.bf16 %v740_v7, %v739_v5  ;;  %v1278_v18 = vpop.f32.mrb[19].mxu0  ;;  %v1326_v19 = vpop.f32.mrb[19].mxu1 }
 0x11e   : > { %1221 = vst [vmem:[%s1613_s8 + $0x18] sm:$0xff] %v1157_v12   ;;  %v623_v20 = vadd.f32 %v1276_v14, %v1603_v50  ;;  %v687_v21 = vadd.f32 %v1324_v15, %v1603_v50  ;;  %v1279_v22 = vadd.f32 %v1278_v18, %v1277_v16  ;;  %v1327_v23 = vadd.f32 %v1326_v19, %v1325_v17 }
 0x11f   : > { %1229 = vst [vmem:[%s1613_s8 + $0x58] sm:$0xff] %v1197_v13  }
 0x120   : > { %v626_v24 = vadd.f32 %v1279_v22, %v1603_v50  ;;  %v690_v25 = vadd.f32 %v1327_v23, %v1603_v50  ;;  %v725_v26 = vmax.f32 %v623_v20, 0.0  ;;  %v741_v27 = vmax.f32 %v687_v21, 0.0 }
 0x122   : > { %v726_v28 = vmax.f32 %v626_v24, 0.0  ;;  %v742_v29 = vmax.f32 %v690_v25, 0.0  ;;  %v1280_v30 = vpop.f32.mrb[20].mxu0  ;;  %v1328_v31 = vpop.f32.mrb[20].mxu1 }
 0x123   : > { %v1281_v32 = vpop.f32.mrb[21].mxu0  ;;  %v1329_v33 = vpop.f32.mrb[21].mxu1 }
 0x124   : > { %v1162_v34 = vpack.c.bf16 %v726_v28, %v725_v26  ;;  %v1202_v35 = vpack.c.bf16 %v742_v29, %v741_v27  ;;  %v1282_v36 = vadd.f32 %v1281_v32, %v1280_v30  ;;  %v1330_v37 = vadd.f32 %v1329_v33, %v1328_v31  ;;  %v1283_v38 = vpop.f32.mrb[22].mxu0  ;;  %v1331_v39 = vpop.f32.mrb[22].mxu1 }
 0x125   : > { %v1284_v40 = vpop.f32.mrb[23].mxu0  ;;  %v1332_v41 = vpop.f32.mrb[23].mxu1 }
 0x126   : > { %1222 = vst [vmem:[%s1613_s8 + $0x20] sm:$0xff] %v1162_v34   ;;  %1230 = vst [vmem:[%s1613_s8 + $0x60] sm:$0xff] %v1202_v35   ;;  %v631_v42 = vadd.f32 %v1282_v36, %v1603_v50  ;;  %v695_v43 = vadd.f32 %v1330_v37, %v1603_v50  ;;  %v1285_v44 = vadd.f32 %v1284_v40, %v1283_v38 }
 0x127   : > { %v1333_v45 = vadd.f32 %v1332_v41, %v1331_v39 }
 0x128   : > { %v634_v46 = vadd.f32 %v1285_v44, %v1603_v50  ;;  %v727_v48 = vmax.f32 %v631_v42, 0.0  ;;  %v743_v49 = vmax.f32 %v695_v43, 0.0 }
 0x129   : > { %v698_v47 = vadd.f32 %v1333_v45, %v1603_v50 }
 0x12a   : > { %v728_v51 = vmax.f32 %v634_v46, 0.0  ;;  %v1286_v53 = vpop.f32.mrb[24].mxu0  ;;  %v1334_v54 = vpop.f32.mrb[24].mxu1 }
 0x12b   : > { %v744_v52 = vmax.f32 %v698_v47, 0.0  ;;  %v1287_v55 = vpop.f32.mrb[25].mxu0  ;;  %v1335_v56 = vpop.f32.mrb[25].mxu1 }
 0x12c   : > { %v1167_v57 = vpack.c.bf16 %v728_v51, %v727_v48  ;;  %v1288_v59 = vadd.f32 %v1287_v55, %v1286_v53  ;;  %v1336_v60 = vadd.f32 %v1335_v56, %v1334_v54  ;;  %v1289_v61 = vpop.f32.mrb[26].mxu0  ;;  %v1337_v62 = vpop.f32.mrb[26].mxu1 }
 0x12d   : > { %v1207_v58 = vpack.c.bf16 %v744_v52, %v743_v49  ;;  %v1290_v63 = vpop.f32.mrb[27].mxu0  ;;  %v1338_v0 = vpop.f32.mrb[27].mxu1 }
 0x12e   : > { %1223 = vst [vmem:[%s1613_s8 + $0x28] sm:$0xff] %v1167_v57   ;;  %v639_v1 = vadd.f32 %v1288_v59, %v1603_v50  ;;  %v703_v2 = vadd.f32 %v1336_v60, %v1603_v50  ;;  %v1291_v3 = vadd.f32 %v1290_v63, %v1289_v61  ;;  %v1339_v4 = vadd.f32 %v1338_v0, %v1337_v62 }
 0x12f   : > { %1231 = vst [vmem:[%s1613_s8 + $0x68] sm:$0xff] %v1207_v58  }
 0x130   : > { %v642_v5 = vadd.f32 %v1291_v3, %v1603_v50  ;;  %v706_v6 = vadd.f32 %v1339_v4, %v1603_v50  ;;  %v729_v7 = vmax.f32 %v639_v1, 0.0  ;;  %v745_v8 = vmax.f32 %v703_v2, 0.0 }
 0x132   : > { %v730_v9 = vmax.f32 %v642_v5, 0.0  ;;  %v746_v10 = vmax.f32 %v706_v6, 0.0  ;;  %v1292_v11 = vpop.f32.mrb[28].mxu0  ;;  %v1340_v12 = vpop.f32.mrb[28].mxu1 }
 0x133   : > { %v1293_v13 = vpop.f32.mrb[29].mxu0  ;;  %v1341_v14 = vpop.f32.mrb[29].mxu1 }
 0x134   : > { %v1172_v15 = vpack.c.bf16 %v730_v9, %v729_v7  ;;  %v1212_v16 = vpack.c.bf16 %v746_v10, %v745_v8  ;;  %v1294_v17 = vadd.f32 %v1293_v13, %v1292_v11  ;;  %v1342_v18 = vadd.f32 %v1341_v14, %v1340_v12  ;;  %v1295_v19 = vpop.f32.mrb[30].mxu0  ;;  %v1343_v20 = vpop.f32.mrb[30].mxu1 }
 0x135   : > { %v1296_v21 = vpop.f32.mrb[31].mxu0  ;;  %v1344_v22 = vpop.f32.mrb[31].mxu1 }
 0x136   : > { %1224 = vst [vmem:[%s1613_s8 + $0x30] sm:$0xff] %v1172_v15   ;;  %1232 = vst [vmem:[%s1613_s8 + $0x70] sm:$0xff] %v1212_v16   ;;  %v647_v23 = vadd.f32 %v1294_v17, %v1603_v50  ;;  %v711_v24 = vadd.f32 %v1342_v18, %v1603_v50  ;;  %v1297_v25 = vadd.f32 %v1296_v21, %v1295_v19 }
 0x137   : > { %v1345_v26 = vadd.f32 %v1344_v22, %v1343_v20 }
 0x138   : > { %v650_v27 = vadd.f32 %v1297_v25, %v1603_v50  ;;  %v731_v29 = vmax.f32 %v647_v23, 0.0  ;;  %v747_v30 = vmax.f32 %v711_v24, 0.0 }
 0x139   : > { %v714_v28 = vadd.f32 %v1345_v26, %v1603_v50 }
 0x13a   : > { %v732_v31 = vmax.f32 %v650_v27, 0.0 }
 0x13b   : > { %v748_v32 = vmax.f32 %v714_v28, 0.0 }
 0x13c   : > { %v1177_v33 = vpack.c.bf16 %v732_v31, %v731_v29 }
 0x13d   : > { %v1217_v34 = vpack.c.bf16 %v748_v32, %v747_v30 }
 0x13e   : > { %1225 = vst [vmem:[%s1613_s8 + $0x38] sm:$0xff] %v1177_v33  }
 0x13f   : > { %1233 = vst [vmem:[%s1613_s8 + $0x78] sm:$0xff] %v1217_v34  }
 0x140 PF: > { %s13_s14 = sadd.s32 1, %s1472_s14   ;;  %s1672_s12 = smov %s1468_s13 }
 0x141   : > { %p10_p5 = scmp.ge.s32.totalorder %s13_s14, 4   ;;  %s1673_s13 = smov %s1675_s15 }
 0x143   :  { %12 = sbr.rel (!%p10_p5) target bundleno = 2 (0x2), region = 68 }

// kernel: _lambda_.63
= control target key start
LH: loop header
LB: loop body
LE: loop exit
PB: predicated region body
PF: predicated region fallthrough
CT: control target
= control target key end

     0   :  { %vm520_vm0 = vcmask 1040384   ;;  %vm2185_vm1 = vcmask 1041409   ;;  %vm2187_vm2 = vcmask 1042434   ;;  %vm2189_vm3 = vcmask 1043459   ;;  %s5950_s0 = inlined_call_operand.vmem [shape: bf16[128,9,128], index: 0, kind: input, shape index: {}]   ;;  %s5951_s1 = inlined_call_operand.vmem [shape: bf16[128,128], index: 1, kind: output, shape index: {}]  }
   0x1   :  { %v2625_v0 = vld [vmem:[%s5950_s0] ss:$8 sps:$4 sm:$0xff]   ;;  %v2630_v1 = vld [vmem:[%s5950_s0 + $0x4] sm:$0x1]  ;;  %v2635_v2 = vld [vmem:[%s5950_s0 + $0xc] sm:$0x1] }
   0x2   :  { %v2640_v3 = vld [vmem:[%s5950_s0 + $0x10] ss:$8 sps:$4 sm:$0xff]   ;;  %v2645_v4 = vld [vmem:[%s5950_s0 + $0x14] sm:$0x1]  ;;  %v2650_v5 = vld [vmem:[%s5950_s0 + $0x1c] sm:$0x1] }
   0x3   :  { %v2659_v10 = vld [vmem:[%s5950_s0 + $0x20] ss:$8 sps:$4 sm:$0xff]   ;;  %v2664_v11 = vld [vmem:[%s5950_s0 + $0x24] sm:$0x1]  ;;  %v2669_v12 = vld [vmem:[%s5950_s0 + $0x2c] sm:$0x1] }
   0x4   :  { %v2678_v17 = vld [vmem:[%s5950_s0 + $0x30] ss:$8 sps:$4 sm:$0xff]   ;;  %v2683_v18 = vld [vmem:[%s5950_s0 + $0x34] sm:$0x1]  ;;  %v2688_v19 = vld [vmem:[%s5950_s0 + $0x3c] sm:$0x1] }
   0x5   :  { %v2697_v24 = vld [vmem:[%s5950_s0 + $0x40] ss:$8 sps:$4 sm:$0xff]   ;;  %v2702_v25 = vld [vmem:[%s5950_s0 + $0x44] sm:$0x1]  ;;  %v2707_v26 = vld [vmem:[%s5950_s0 + $0x4c] sm:$0x1] }
   0x6   :  { %v2716_v31 = vld [vmem:[%s5950_s0 + $0x50] ss:$8 sps:$4 sm:$0xff]   ;;  %v2721_v32 = vld [vmem:[%s5950_s0 + $0x54] sm:$0x1]  ;;  %v2726_v33 = vld [vmem:[%s5950_s0 + $0x5c] sm:$0x1] }
   0x7   :  { %v2735_v38 = vld [vmem:[%s5950_s0 + $0x60] ss:$8 sps:$4 sm:$0xff]   ;;  %v2740_v39 = vld [vmem:[%s5950_s0 + $0x64] sm:$0x1]  ;;  %v2745_v40 = vld [vmem:[%s5950_s0 + $0x6c] sm:$0x1] }
   0x8   :  { %v2754_v45 = vld [vmem:[%s5950_s0 + $0x70] ss:$8 sps:$4 sm:$0xff]   ;;  %v2759_v46 = vld [vmem:[%s5950_s0 + $0x74] sm:$0x1]  ;;  %v2764_v47 = vld [vmem:[%s5950_s0 + $0x7c] sm:$0x1] }
   0x9   :  { %v2773_v52 = vld [vmem:[%s5950_s0 + $0x80] ss:$8 sps:$4 sm:$0xff]   ;;  %v2778_v53 = vld [vmem:[%s5950_s0 + $0x84] sm:$0x1]  ;;  %v2783_v54 = vld [vmem:[%s5950_s0 + $0x8c] sm:$0x1] }
   0xa   :  { %v2792_v59 = vld [vmem:[%s5950_s0 + $0x90] ss:$8 sps:$4 sm:$0xff]   ;;  %v2797_v60 = vld [vmem:[%s5950_s0 + $0x94] sm:$0x1]  ;;  %v2802_v61 = vld [vmem:[%s5950_s0 + $0x9c] sm:$0x1] }
   0xb   :  { %v2811_v50 = vld [vmem:[%s5950_s0 + $0xa0] ss:$8 sps:$4 sm:$0xff]   ;;  %v2816_v48 = vld [vmem:[%s5950_s0 + $0xa4] sm:$0x1]  ;;  %v2821_v62 = vld [vmem:[%s5950_s0 + $0xac] sm:$0x1] }
   0xc   :  { %v2830_v56 = vld [vmem:[%s5950_s0 + $0xb0] ss:$8 sps:$4 sm:$0xff]   ;;  %v2835_v51 = vld [vmem:[%s5950_s0 + $0xb4] sm:$0x1]  ;;  %v2840_v63 = vld [vmem:[%s5950_s0 + $0xbc] sm:$0x1] }
   0xd   :  { %v2849_v43 = vld [vmem:[%s5950_s0 + $0xc0] ss:$8 sps:$4 sm:$0xff]   ;;  %v2854_v41 = vld [vmem:[%s5950_s0 + $0xc4] sm:$0x1]  ;;  %v2859_v57 = vld [vmem:[%s5950_s0 + $0xcc] sm:$0x1] }
   0xe   :  { %6252 = vst [vmem:[#allocation2_spill] sm:$0xff] %v2849_v43  ;;  %v2868_v34 = vld [vmem:[%s5950_s0 + $0xd0] ss:$8 sps:$4 sm:$0xff]   ;;  %v2873_v44 = vld [vmem:[%s5950_s0 + $0xd4] sm:$0x1]  ;;  %vm2191_vm4 = vcmask 1044484  }
   0xf   :  { %6253 = vst [vmem:[#allocation3_spill] sm:$0xff] %v2868_v34  ;;  %v2878_v55 = vld [vmem:[%s5950_s0 + $0xdc] sm:$0x1]  ;;  %v2887_v37 = vld [vmem:[%s5950_s0 + $0xe0] ss:$8 sps:$4 sm:$0xff]   ;;  %vm2193_vm5 = vcmask 1045509  }
  0x10   :  { %6254 = vst [vmem:[#allocation4_spill] sm:$0xff] %v2887_v37  ;;  %v2892_v35 = vld [vmem:[%s5950_s0 + $0xe4] sm:$0x1]  ;;  %v2897_v58 = vld [vmem:[%s5950_s0 + $0xec] sm:$0x1]  ;;  %vm2195_vm6 = vcmask 1046534  }
  0x11   :  { %6255 = vst [vmem:[#allocation5_spill] sm:$0xff] %v2892_v35  ;;  %6256 = vst [vmem:[#allocation6_spill] sm:$0xff] %v2897_v58  ;;  %v2906_v27 = vld [vmem:[%s5950_s0 + $0xf0] ss:$8 sps:$4 sm:$0xff]   ;;  %v2911_v22 = vld [vmem:[%s5950_s0 + $0xf4] sm:$0x1] }
  0x12   :  { %6257 = vst [vmem:[#allocation7_spill] sm:$0xff] %v2906_v27  ;;  %6258 = vst [vmem:[#allocation8_spill] sm:$0xff] %v2911_v22  ;;  %v2916_v49 = vld [vmem:[%s5950_s0 + $0xfc] sm:$0x1]  ;;  %v2925_v30 = vld [vmem:[%s5950_s0 + $0x100] ss:$8 sps:$4 sm:$0xff]  }
  0x13   :  { %6259 = vst [vmem:[#allocation9_spill] sm:$0xff] %v2916_v49  ;;  %6260 = vst [vmem:[#allocation10_spill] sm:$0xff] %v2925_v30  ;;  %v2930_v28 = vld [vmem:[%s5950_s0 + $0x104] sm:$0x1]  ;;  %v2935_v36 = vld [vmem:[%s5950_s0 + $0x10c] sm:$0x1] }
  0x14   :  { %6261 = vst [vmem:[#allocation11_spill] sm:$0xff] %v2930_v28  ;;  %6262 = vst [vmem:[#allocation12_spill] sm:$0xff] %v2935_v36  ;;  %v2944_v21 = vld [vmem:[%s5950_s0 + $0x110] ss:$8 sps:$4 sm:$0xff]   ;;  %v2949_v15 = vld [vmem:[%s5950_s0 + $0x114] sm:$0x1]  ;;  %v6404_v36 = vunpack.c.l.bf16 %v2630_v1 }
  0x15   :  { %6263 = vst [vmem:[#allocation13_spill] sm:$0xff] %v2944_v21  ;;  %6264 = vst [vmem:[#allocation14_spill] sm:$0xff] %v2949_v15  ;;  %v2954_v42 = vld [vmem:[%s5950_s0 + $0x11c] sm:$0x1]  ;;  %v2963_v8 = vld [vmem:[%s5950_s0 + $0x120] ss:$8 sps:$4 sm:$0xff]   ;;  %v6409_v15 = vunpack.c.h.bf16 %v2625_v0 }
  0x16   :  { %6265 = vst [vmem:[#allocation15_spill] sm:$0xff] %v2954_v42  ;;  %6266 = vst [vmem:[#allocation16_spill] sm:$0xff] %v2963_v8  ;;  %v2968_v6 = vld [vmem:[%s5950_s0 + $0x124] sm:$0x1]  ;;  %v2973_v29 = vld [vmem:[%s5950_s0 + $0x12c] sm:$0x1]  ;;  %v6408_v42 = vunpack.c.l.bf16 %v2625_v0  ;;  %v6415_v0 = vunpack.c.l.bf16 %v2688_v19 }
  0x17   :  { %6267 = vst [vmem:[#allocation17_spill] sm:$0xff] %v2968_v6  ;;  %6268 = vst [vmem:[#allocation18_spill] sm:$0xff] %v2973_v29  ;;  %v2982_v14 = vld [vmem:[%s5950_s0 + $0x130] ss:$8 sps:$4 sm:$0xff]   ;;  %v2987_v9 = vld [vmem:[%s5950_s0 + $0x134] sm:$0x1] }
  0x18   :  { %6269 = vst [vmem:[#allocation19_spill] sm:$0xff] %v2982_v14  ;;  %6270 = vst [vmem:[#allocation20_spill] sm:$0xff] %v2987_v9  ;;  %v2992_v20 = vld [vmem:[%s5950_s0 + $0x13c] sm:$0x1]  ;;  %v3001_v21 = vld [vmem:[%s5950_s0 + $0x140] ss:$8 sps:$4 sm:$0xff]  }
  0x19   :  { %6271 = vst [vmem:[#allocation21_spill] sm:$0xff] %v2992_v20  ;;  %6272 = vst [vmem:[#allocation22_spill] sm:$0xff] %v3001_v21  ;;  %v3006_v30 = vld [vmem:[%s5950_s0 + $0x144] sm:$0x1]  ;;  %v3011_v23 = vld [vmem:[%s5950_s0 + $0x14c] sm:$0x1] }
  0x1a   :  { %6273 = vst [vmem:[#allocation23_spill] sm:$0xff] %v3006_v30  ;;  %6274 = vst [vmem:[#allocation24_spill] sm:$0xff] %v3011_v23  ;;  %v3020_v29 = vld [vmem:[%s5950_s0 + $0x150] ss:$8 sps:$4 sm:$0xff]   ;;  %v3025_v6 = vld [vmem:[%s5950_s0 + $0x154] sm:$0x1] }
  0x1b   :  { %6275 = vst [vmem:[#allocation25_spill] sm:$0xff] %v3020_v29  ;;  %6276 = vst [vmem:[#allocation26_spill] sm:$0xff] %v3025_v6  ;;  %v3030_v13 = vld [vmem:[%s5950_s0 + $0x15c] sm:$0x1]  ;;  %v3039_v20 = vld [vmem:[%s5950_s0 + $0x160] ss:$8 sps:$4 sm:$0xff]  }
  0x1c   :  { %6277 = vst [vmem:[#allocation27_spill] sm:$0xff] %v3030_v13  ;;  %6278 = vst [vmem:[#allocation28_spill] sm:$0xff] %v3039_v20  ;;  %v3044_v9 = vld [vmem:[%s5950_s0 + $0x164] sm:$0x1]  ;;  %v3049_v16 = vld [vmem:[%s5950_s0 + $0x16c] sm:$0x1] }
  0x1d   :  { %6279 = vst [vmem:[#allocation29_spill] sm:$0xff] %v3044_v9  ;;  %6280 = vst [vmem:[#allocation30_spill] sm:$0xff] %v3049_v16  ;;  %v3058_v23 = vld [vmem:[%s5950_s0 + $0x170] ss:$8 sps:$4 sm:$0xff]   ;;  %v3063_v30 = vld [vmem:[%s5950_s0 + $0x174] sm:$0x1] }
  0x1e   :  { %6281 = vst [vmem:[#allocation31_spill] sm:$0xff] %v3058_v23  ;;  %6282 = vst [vmem:[#allocation32_spill] sm:$0xff] %v3063_v30  ;;  %v3068_v7 = vld [vmem:[%s5950_s0 + $0x17c] sm:$0x1]  ;;  %v3077_v13 = vld [vmem:[%s5950_s0 + $0x180] ss:$8 sps:$4 sm:$0xff]  }
  0x1f   :  { %6283 = vst [vmem:[#allocation33_spill] sm:$0xff] %v3068_v7  ;;  %6284 = vst [vmem:[#allocation34_spill] sm:$0xff] %v3077_v13  ;;  %v3082_v6 = vld [vmem:[%s5950_s0 + $0x184] sm:$0x1]  ;;  %v3087_v8 = vld [vmem:[%s5950_s0 + $0x18c] sm:$0x1] }
  0x20   :  { %6285 = vst [vmem:[#allocation35_spill] sm:$0xff] %v3082_v6  ;;  %6286 = vst [vmem:[#allocation36_spill] sm:$0xff] %v3087_v8  ;;  %v3096_v16 = vld [vmem:[%s5950_s0 + $0x190] ss:$8 sps:$4 sm:$0xff]   ;;  %v3101_v9 = vld [vmem:[%s5950_s0 + $0x194] sm:$0x1] }
  0x21   :  { %6287 = vst [vmem:[#allocation37_spill] sm:$0xff] %v3096_v16  ;;  %6288 = vst [vmem:[#allocation38_spill] sm:$0xff] %v3101_v9  ;;  %v3106_v14 = vld [vmem:[%s5950_s0 + $0x19c] sm:$0x1]  ;;  %v3115_v7 = vld [vmem:[%s5950_s0 + $0x1a0] ss:$8 sps:$4 sm:$0xff]  }
  0x22   :  { %6289 = vst [vmem:[#allocation39_spill] sm:$0xff] %v3106_v14  ;;  %6290 = vst [vmem:[#allocation40_spill] sm:$0xff] %v3115_v7  ;;  %v3120_v30 = vld [vmem:[%s5950_s0 + $0x1a4] sm:$0x1]  ;;  %v3125_v21 = vld [vmem:[%s5950_s0 + $0x1ac] sm:$0x1] }
  0x23   :  { %6291 = vst [vmem:[#allocation41_spill] sm:$0xff] %v3120_v30  ;;  %6292 = vst [vmem:[#allocation42_spill] sm:$0xff] %v3125_v21  ;;  %v3134_v8 = vld [vmem:[%s5950_s0 + $0x1b0] ss:$8 sps:$4 sm:$0xff]   ;;  %v3139_v6 = vld [vmem:[%s5950_s0 + $0x1b4] sm:$0x1] }
  0x24   :  { %6293 = vst [vmem:[#allocation43_spill] sm:$0xff] %v3134_v8  ;;  %6294 = vst [vmem:[#allocation44_spill] sm:$0xff] %v3139_v6  ;;  %v3144_v29 = vld [vmem:[%s5950_s0 + $0x1bc] sm:$0x1]  ;;  %v3153_v14 = vld [vmem:[%s5950_s0 + $0x1c0] ss:$8 sps:$4 sm:$0xff]  }
  0x25   :  { %6295 = vst [vmem:[#allocation45_spill] sm:$0xff] %v3144_v29  ;;  %6296 = vst [vmem:[#allocation46_spill] sm:$0xff] %v3153_v14  ;;  %v3158_v9 = vld [vmem:[%s5950_s0 + $0x1c4] sm:$0x1]  ;;  %v3163_v20 = vld [vmem:[%s5950_s0 + $0x1cc] sm:$0x1] }
  0x26   :  { %6297 = vst [vmem:[#allocation47_spill] sm:$0xff] %v3158_v9  ;;  %6298 = vst [vmem:[#allocation48_spill] sm:$0xff] %v3163_v20  ;;  %v3172_v21 = vld [vmem:[%s5950_s0 + $0x1d0] ss:$8 sps:$4 sm:$0xff]   ;;  %v3177_v30 = vld [vmem:[%s5950_s0 + $0x1d4] sm:$0x1] }
  0x27   :  { %6299 = vst [vmem:[#allocation49_spill] sm:$0xff] %v3172_v21  ;;  %6300 = vst [vmem:[#allocation50_spill] sm:$0xff] %v3177_v30  ;;  %v3182_v23 = vld [vmem:[%s5950_s0 + $0x1dc] sm:$0x1]  ;;  %v3191_v29 = vld [vmem:[%s5950_s0 + $0x1e0] ss:$8 sps:$4 sm:$0xff]  }
  0x28   :  { %6301 = vst [vmem:[#allocation51_spill] sm:$0xff] %v3182_v23  ;;  %6302 = vst [vmem:[#allocation52_spill] sm:$0xff] %v3191_v29  ;;  %v3196_v6 = vld [vmem:[%s5950_s0 + $0x1e4] sm:$0x1]  ;;  %v3201_v13 = vld [vmem:[%s5950_s0 + $0x1ec] sm:$0x1] }
  0x29   :  { %6303 = vst [vmem:[#allocation53_spill] sm:$0xff] %v3196_v6  ;;  %6304 = vst [vmem:[#allocation54_spill] sm:$0xff] %v3201_v13  ;;  %v3210_v20 = vld [vmem:[%s5950_s0 + $0x1f0] ss:$8 sps:$4 sm:$0xff]   ;;  %v3215_v9 = vld [vmem:[%s5950_s0 + $0x1f4] sm:$0x1] }
  0x2a   :  { %6305 = vst [vmem:[#allocation55_spill] sm:$0xff] %v3210_v20  ;;  %6306 = vst [vmem:[#allocation56_spill] sm:$0xff] %v3215_v9  ;;  %v3220_v16 = vld [vmem:[%s5950_s0 + $0x1fc] sm:$0x1]  ;;  %v3229_v23 = vld [vmem:[%s5950_s0 + $0x200] ss:$8 sps:$4 sm:$0xff]  }
  0x2b   :  { %6307 = vst [vmem:[#allocation57_spill] sm:$0xff] %v3220_v16  ;;  %6308 = vst [vmem:[#allocation58_spill] sm:$0xff] %v3229_v23  ;;  %v3234_v30 = vld [vmem:[%s5950_s0 + $0x204] sm:$0x1]  ;;  %v3239_v7 = vld [vmem:[%s5950_s0 + $0x20c] sm:$0x1] }
  0x2c   :  { %6309 = vst [vmem:[#allocation59_spill] sm:$0xff] %v3234_v30  ;;  %6310 = vst [vmem:[#allocation60_spill] sm:$0xff] %v3239_v7  ;;  %v3248_v13 = vld [vmem:[%s5950_s0 + $0x210] ss:$8 sps:$4 sm:$0xff]   ;;  %v3253_v6 = vld [vmem:[%s5950_s0 + $0x214] sm:$0x1] }
  0x2d   :  { %6311 = vst [vmem:[#allocation61_spill] sm:$0xff] %v3248_v13  ;;  %6312 = vst [vmem:[#allocation62_spill] sm:$0xff] %v3253_v6  ;;  %v3258_v8 = vld [vmem:[%s5950_s0 + $0x21c] sm:$0x1]  ;;  %v3267_v16 = vld [vmem:[%s5950_s0 + $0x220] ss:$8 sps:$4 sm:$0xff]  }
  0x2e   :  { %6313 = vst [vmem:[#allocation63_spill] sm:$0xff] %v3258_v8  ;;  %6314 = vst [vmem:[#allocation64_spill] sm:$0xff] %v3267_v16  ;;  %v3272_v9 = vld [vmem:[%s5950_s0 + $0x224] sm:$0x1]  ;;  %v3277_v14 = vld [vmem:[%s5950_s0 + $0x22c] sm:$0x1] }
  0x2f   :  { %6315 = vst [vmem:[#allocation65_spill] sm:$0xff] %v3272_v9  ;;  %6316 = vst [vmem:[#allocation66_spill] sm:$0xff] %v3277_v14  ;;  %v3286_v7 = vld [vmem:[%s5950_s0 + $0x230] ss:$8 sps:$4 sm:$0xff]   ;;  %v3291_v30 = vld [vmem:[%s5950_s0 + $0x234] sm:$0x1] }
  0x30   :  { %6317 = vst [vmem:[#allocation67_spill] sm:$0xff] %v3286_v7  ;;  %6318 = vst [vmem:[#allocation68_spill] sm:$0xff] %v3291_v30  ;;  %v3296_v21 = vld [vmem:[%s5950_s0 + $0x23c] sm:$0x1]  ;;  %v3305_v8 = vld [vmem:[%s5950_s0 + $0x240] ss:$8 sps:$4 sm:$0xff]  }
  0x31   :  { %6319 = vst [vmem:[#allocation69_spill] sm:$0xff] %v3296_v21  ;;  %6320 = vst [vmem:[#allocation70_spill] sm:$0xff] %v3305_v8  ;;  %v3310_v6 = vld [vmem:[%s5950_s0 + $0x244] sm:$0x1]  ;;  %v3315_v29 = vld [vmem:[%s5950_s0 + $0x24c] sm:$0x1] }
  0x32   :  { %6321 = vst [vmem:[#allocation71_spill] sm:$0xff] %v3310_v6  ;;  %6322 = vst [vmem:[#allocation72_spill] sm:$0xff] %v3315_v29  ;;  %v3324_v14 = vld [vmem:[%s5950_s0 + $0x250] ss:$8 sps:$4 sm:$0xff]   ;;  %v3329_v9 = vld [vmem:[%s5950_s0 + $0x254] sm:$0x1] }
  0x33   :  { %6323 = vst [vmem:[#allocation73_spill] sm:$0xff] %v3324_v14  ;;  %6324 = vst [vmem:[#allocation74_spill] sm:$0xff] %v3329_v9  ;;  %v3334_v20 = vld [vmem:[%s5950_s0 + $0x25c] sm:$0x1]  ;;  %v3343_v21 = vld [vmem:[%s5950_s0 + $0x260] ss:$8 sps:$4 sm:$0xff]  }
  0x34   :  { %6325 = vst [vmem:[#allocation75_spill] sm:$0xff] %v3334_v20  ;;  %6326 = vst [vmem:[#allocation76_spill] sm:$0xff] %v3343_v21  ;;  %v3348_v30 = vld [vmem:[%s5950_s0 + $0x264] sm:$0x1]  ;;  %v3353_v23 = vld [vmem:[%s5950_s0 + $0x26c] sm:$0x1] }
  0x35   :  { %6327 = vst [vmem:[#allocation77_spill] sm:$0xff] %v3348_v30  ;;  %6328 = vst [vmem:[#allocation78_spill] sm:$0xff] %v3353_v23  ;;  %v3362_v29 = vld [vmem:[%s5950_s0 + $0x270] ss:$8 sps:$4 sm:$0xff]   ;;  %v3367_v6 = vld [vmem:[%s5950_s0 + $0x274] sm:$0x1] }
  0x36   :  { %6329 = vst [vmem:[#allocation79_spill] sm:$0xff] %v3362_v29  ;;  %6330 = vst [vmem:[#allocation80_spill] sm:$0xff] %v3367_v6  ;;  %v3372_v13 = vld [vmem:[%s5950_s0 + $0x27c] sm:$0x1]  ;;  %v3381_v20 = vld [vmem:[%s5950_s0 + $0x280] ss:$8 sps:$4 sm:$0xff]  }
  0x37   :  { %6331 = vst [vmem:[#allocation81_spill] sm:$0xff] %v3372_v13  ;;  %6332 = vst [vmem:[#allocation82_spill] sm:$0xff] %v3381_v20  ;;  %v3386_v9 = vld [vmem:[%s5950_s0 + $0x284] sm:$0x1]  ;;  %v3391_v16 = vld [vmem:[%s5950_s0 + $0x28c] sm:$0x1] }
  0x38   :  { %6333 = vst [vmem:[#allocation83_spill] sm:$0xff] %v3386_v9  ;;  %6334 = vst [vmem:[#allocation84_spill] sm:$0xff] %v3391_v16  ;;  %v3400_v23 = vld [vmem:[%s5950_s0 + $0x290] ss:$8 sps:$4 sm:$0xff]   ;;  %v3405_v30 = vld [vmem:[%s5950_s0 + $0x294] sm:$0x1] }
  0x39   :  { %6335 = vst [vmem:[#allocation85_spill] sm:$0xff] %v3400_v23  ;;  %6336 = vst [vmem:[#allocation86_spill] sm:$0xff] %v3405_v30  ;;  %v3410_v7 = vld [vmem:[%s5950_s0 + $0x29c] sm:$0x1]  ;;  %v3419_v13 = vld [vmem:[%s5950_s0 + $0x2a0] ss:$8 sps:$4 sm:$0xff]  }
  0x3a   :  { %6337 = vst [vmem:[#allocation87_spill] sm:$0xff] %v3410_v7  ;;  %6338 = vst [vmem:[#allocation88_spill] sm:$0xff] %v3419_v13  ;;  %v3424_v6 = vld [vmem:[%s5950_s0 + $0x2a4] sm:$0x1]  ;;  %v3429_v8 = vld [vmem:[%s5950_s0 + $0x2ac] sm:$0x1] }
  0x3b   :  { %6339 = vst [vmem:[#allocation89_spill] sm:$0xff] %v3424_v6  ;;  %6340 = vst [vmem:[#allocation90_spill] sm:$0xff] %v3429_v8  ;;  %v3438_v16 = vld [vmem:[%s5950_s0 + $0x2b0] ss:$8 sps:$4 sm:$0xff]   ;;  %v3443_v9 = vld [vmem:[%s5950_s0 + $0x2b4] sm:$0x1] }
  0x3c   :  { %6341 = vst [vmem:[#allocation91_spill] sm:$0xff] %v3438_v16  ;;  %6342 = vst [vmem:[#allocation92_spill] sm:$0xff] %v3443_v9  ;;  %v3448_v14 = vld [vmem:[%s5950_s0 + $0x2bc] sm:$0x1]  ;;  %v3457_v7 = vld [vmem:[%s5950_s0 + $0x2c0] ss:$8 sps:$4 sm:$0xff]  }
  0x3d   :  { %6343 = vst [vmem:[#allocation93_spill] sm:$0xff] %v3448_v14  ;;  %6344 = vst [vmem:[#allocation94_spill] sm:$0xff] %v3457_v7  ;;  %v3462_v30 = vld [vmem:[%s5950_s0 + $0x2c4] sm:$0x1]  ;;  %v3467_v21 = vld [vmem:[%s5950_s0 + $0x2cc] sm:$0x1] }
  0x3e   :  { %6345 = vst [vmem:[#allocation95_spill] sm:$0xff] %v3462_v30  ;;  %6346 = vst [vmem:[#allocation96_spill] sm:$0xff] %v3467_v21  ;;  %v3476_v8 = vld [vmem:[%s5950_s0 + $0x2d0] ss:$8 sps:$4 sm:$0xff]   ;;  %v3481_v6 = vld [vmem:[%s5950_s0 + $0x2d4] sm:$0x1] }
  0x3f   :  { %6347 = vst [vmem:[#allocation97_spill] sm:$0xff] %v3476_v8  ;;  %6348 = vst [vmem:[#allocation98_spill] sm:$0xff] %v3481_v6  ;;  %v3486_v29 = vld [vmem:[%s5950_s0 + $0x2dc] sm:$0x1]  ;;  %v3495_v14 = vld [vmem:[%s5950_s0 + $0x2e0] ss:$8 sps:$4 sm:$0xff]  }
  0x40   :  { %6349 = vst [vmem:[#allocation99_spill] sm:$0xff] %v3486_v29  ;;  %6350 = vst [vmem:[#allocation100_spill] sm:$0xff] %v3495_v14  ;;  %v3500_v9 = vld [vmem:[%s5950_s0 + $0x2e4] sm:$0x1]  ;;  %v3505_v20 = vld [vmem:[%s5950_s0 + $0x2ec] sm:$0x1] }
  0x41   :  { %6351 = vst [vmem:[#allocation101_spill] sm:$0xff] %v3500_v9  ;;  %6352 = vst [vmem:[#allocation102_spill] sm:$0xff] %v3505_v20  ;;  %v3514_v21 = vld [vmem:[%s5950_s0 + $0x2f0] ss:$8 sps:$4 sm:$0xff]   ;;  %v3519_v30 = vld [vmem:[%s5950_s0 + $0x2f4] sm:$0x1] }
  0x42   :  { %6353 = vst [vmem:[#allocation103_spill] sm:$0xff] %v3514_v21  ;;  %6354 = vst [vmem:[#allocation104_spill] sm:$0xff] %v3519_v30  ;;  %v3524_v23 = vld [vmem:[%s5950_s0 + $0x2fc] sm:$0x1]  ;;  %v3533_v29 = vld [vmem:[%s5950_s0 + $0x300] ss:$8 sps:$4 sm:$0xff]  }
  0x43   :  { %6355 = vst [vmem:[#allocation105_spill] sm:$0xff] %v3524_v23  ;;  %6356 = vst [vmem:[#allocation106_spill] sm:$0xff] %v3533_v29  ;;  %v3538_v6 = vld [vmem:[%s5950_s0 + $0x304] sm:$0x1]  ;;  %v3543_v13 = vld [vmem:[%s5950_s0 + $0x30c] sm:$0x1] }
  0x44   :  { %6357 = vst [vmem:[#allocation107_spill] sm:$0xff] %v3538_v6  ;;  %6358 = vst [vmem:[#allocation108_spill] sm:$0xff] %v3543_v13  ;;  %v3552_v20 = vld [vmem:[%s5950_s0 + $0x310] ss:$8 sps:$4 sm:$0xff]   ;;  %v3557_v9 = vld [vmem:[%s5950_s0 + $0x314] sm:$0x1] }
  0x45   :  { %6359 = vst [vmem:[#allocation109_spill] sm:$0xff] %v3552_v20  ;;  %6360 = vst [vmem:[#allocation110_spill] sm:$0xff] %v3557_v9  ;;  %v3562_v16 = vld [vmem:[%s5950_s0 + $0x31c] sm:$0x1]  ;;  %v3571_v23 = vld [vmem:[%s5950_s0 + $0x320] ss:$8 sps:$4 sm:$0xff]  }
  0x46   :  { %6361 = vst [vmem:[#allocation111_spill] sm:$0xff] %v3562_v16  ;;  %6362 = vst [vmem:[#allocation112_spill] sm:$0xff] %v3571_v23  ;;  %v3576_v30 = vld [vmem:[%s5950_s0 + $0x324] sm:$0x1]  ;;  %v3581_v7 = vld [vmem:[%s5950_s0 + $0x32c] sm:$0x1] }
  0x47   :  { %6363 = vst [vmem:[#allocation113_spill] sm:$0xff] %v3576_v30  ;;  %6364 = vst [vmem:[#allocation114_spill] sm:$0xff] %v3581_v7  ;;  %v3590_v13 = vld [vmem:[%s5950_s0 + $0x330] ss:$8 sps:$4 sm:$0xff]   ;;  %v3595_v6 = vld [vmem:[%s5950_s0 + $0x334] sm:$0x1] }
  0x48   :  { %6365 = vst [vmem:[#allocation115_spill] sm:$0xff] %v3590_v13  ;;  %6366 = vst [vmem:[#allocation116_spill] sm:$0xff] %v3595_v6  ;;  %v3600_v8 = vld [vmem:[%s5950_s0 + $0x33c] sm:$0x1]  ;;  %v3609_v16 = vld [vmem:[%s5950_s0 + $0x340] ss:$8 sps:$4 sm:$0xff]  }
  0x49   :  { %6367 = vst [vmem:[#allocation117_spill] sm:$0xff] %v3600_v8  ;;  %6368 = vst [vmem:[#allocation118_spill] sm:$0xff] %v3609_v16  ;;  %v3614_v9 = vld [vmem:[%s5950_s0 + $0x344] sm:$0x1]  ;;  %v3619_v14 = vld [vmem:[%s5950_s0 + $0x34c] sm:$0x1] }
  0x4a   :  { %6369 = vst [vmem:[#allocation119_spill] sm:$0xff] %v3614_v9  ;;  %6370 = vst [vmem:[#allocation120_spill] sm:$0xff] %v3619_v14  ;;  %v3628_v7 = vld [vmem:[%s5950_s0 + $0x350] ss:$8 sps:$4 sm:$0xff]   ;;  %v3633_v30 = vld [vmem:[%s5950_s0 + $0x354] sm:$0x1] }
  0x4b   :  { %6371 = vst [vmem:[#allocation121_spill] sm:$0xff] %v3628_v7  ;;  %6372 = vst [vmem:[#allocation122_spill] sm:$0xff] %v3633_v30  ;;  %v3638_v21 = vld [vmem:[%s5950_s0 + $0x35c] sm:$0x1]  ;;  %v3647_v8 = vld [vmem:[%s5950_s0 + $0x360] ss:$8 sps:$4 sm:$0xff]  }
  0x4c   :  { %6373 = vst [vmem:[#allocation123_spill] sm:$0xff] %v3638_v21  ;;  %6374 = vst [vmem:[#allocation124_spill] sm:$0xff] %v3647_v8  ;;  %v3652_v6 = vld [vmem:[%s5950_s0 + $0x364] sm:$0x1]  ;;  %v3657_v29 = vld [vmem:[%s5950_s0 + $0x36c] sm:$0x1] }
  0x4d   :  { %6375 = vst [vmem:[#allocation125_spill] sm:$0xff] %v3652_v6  ;;  %6376 = vst [vmem:[#allocation126_spill] sm:$0xff] %v3657_v29  ;;  %v3666_v14 = vld [vmem:[%s5950_s0 + $0x370] ss:$8 sps:$4 sm:$0xff]   ;;  %v3671_v9 = vld [vmem:[%s5950_s0 + $0x374] sm:$0x1] }
  0x4e   :  { %6377 = vst [vmem:[#allocation127_spill] sm:$0xff] %v3666_v14  ;;  %6378 = vst [vmem:[#allocation128_spill] sm:$0xff] %v3671_v9  ;;  %v3676_v20 = vld [vmem:[%s5950_s0 + $0x37c] sm:$0x1]  ;;  %v3685_v21 = vld [vmem:[%s5950_s0 + $0x380] ss:$8 sps:$4 sm:$0xff]  }
  0x4f   :  { %6379 = vst [vmem:[#allocation129_spill] sm:$0xff] %v3676_v20  ;;  %6380 = vst [vmem:[#allocation130_spill] sm:$0xff] %v3685_v21  ;;  %v3690_v30 = vld [vmem:[%s5950_s0 + $0x384] sm:$0x1]  ;;  %v3695_v13 = vld [vmem:[%s5950_s0 + $0x38c] sm:$0x1] }
  0x50   :  { %6381 = vst [vmem:[#allocation131_spill] sm:$0xff] %v3690_v30  ;;  %6382 = vst [vmem:[#allocation132_spill] sm:$0xff] %v3695_v13  ;;  %v3704_v29 = vld [vmem:[%s5950_s0 + $0x390] ss:$8 sps:$4 sm:$0xff]   ;;  %v3709_v6 = vld [vmem:[%s5950_s0 + $0x394] sm:$0x1] }
  0x51   :  { %6383 = vst [vmem:[#allocation133_spill] sm:$0xff] %v3704_v29  ;;  %6384 = vst [vmem:[#allocation134_spill] sm:$0xff] %v3709_v6  ;;  %v3714_v16 = vld [vmem:[%s5950_s0 + $0x39c] sm:$0x1]  ;;  %v3723_v20 = vld [vmem:[%s5950_s0 + $0x3a0] ss:$8 sps:$4 sm:$0xff]  }
  0x52   :  { %6385 = vst [vmem:[#allocation135_spill] sm:$0xff] %v3714_v16  ;;  %6386 = vst [vmem:[#allocation136_spill] sm:$0xff] %v3723_v20  ;;  %v3728_v9 = vld [vmem:[%s5950_s0 + $0x3a4] sm:$0x1]  ;;  %v3733_v23 = vld [vmem:[%s5950_s0 + $0x3ac] sm:$0x1]  ;;  %v6405_v20 = vunpack.c.l.bf16 %v2635_v2  ;;  %v6411_v2 = vunpack.c.h.bf16 %v2640_v3 }
  0x53   :  { %6387 = vst [vmem:[#allocation137_spill] sm:$0xff] %v3728_v9  ;;  %6388 = vst [vmem:[#allocation138_spill] sm:$0xff] %v3733_v23  ;;  %v3742_v13 = vld [vmem:[%s5950_s0 + $0x3b0] ss:$8 sps:$4 sm:$0xff]   ;;  %v3747_v30 = vld [vmem:[%s5950_s0 + $0x3b4] sm:$0x1] }
  0x54   :  { %6389 = vst [vmem:[#allocation139_spill] sm:$0xff] %v3742_v13  ;;  %6390 = vst [vmem:[#allocation140_spill] sm:$0xff] %v3747_v30  ;;  %v3752_v7 = vld [vmem:[%s5950_s0 + $0x3bc] sm:$0x1]  ;;  %v3761_v16 = vld [vmem:[%s5950_s0 + $0x3c0] ss:$8 sps:$4 sm:$0xff]  }
  0x55   :  { %6391 = vst [vmem:[#allocation141_spill] sm:$0xff] %v3752_v7  ;;  %6392 = vst [vmem:[#allocation142_spill] sm:$0xff] %v3761_v16  ;;  %v3766_v6 = vld [vmem:[%s5950_s0 + $0x3c4] sm:$0x1]  ;;  %v3771_v8 = vld [vmem:[%s5950_s0 + $0x3cc] sm:$0x1]  ;;  %v6406_v16 = vunpack.c.l.bf16 %v2645_v4  ;;  %v6412_v4 = vunpack.c.l.bf16 %v2664_v11  ;;  %v6416_v11 = vunpack.c.l.bf16 %v2659_v10 }
  0x56   :  { %6393 = vst [vmem:[#allocation143_spill] sm:$0xff] %v3766_v6  ;;  %6394 = vst [vmem:[#allocation144_spill] sm:$0xff] %v3771_v8  ;;  %v3780_v23 = vld [vmem:[%s5950_s0 + $0x3d0] ss:$8 sps:$4 sm:$0xff]   ;;  %v3785_v9 = vld [vmem:[%s5950_s0 + $0x3d4] sm:$0x1] }
  0x57   :  { %6395 = vst [vmem:[#allocation145_spill] sm:$0xff] %v3780_v23  ;;  %6396 = vst [vmem:[#allocation146_spill] sm:$0xff] %v3785_v9  ;;  %v3790_v14 = vld [vmem:[%s5950_s0 + $0x3dc] sm:$0x1]  ;;  %v3799_v7 = vld [vmem:[%s5950_s0 + $0x3e0] ss:$8 sps:$4 sm:$0xff]  }
  0x58   :  { %6397 = vst [vmem:[#allocation147_spill] sm:$0xff] %v3790_v14  ;;  %6398 = vst [vmem:[#allocation148_spill] sm:$0xff] %v3799_v7  ;;  %v3804_v30 = vld [vmem:[%s5950_s0 + $0x3e4] sm:$0x1]  ;;  %v3809_v21 = vld [vmem:[%s5950_s0 + $0x3ec] sm:$0x1]  ;;  %v6407_v14 = vunpack.c.l.bf16 %v2650_v5  ;;  %v6413_v5 = vunpack.c.l.bf16 %v2669_v12 }
  0x59   :  { %6399 = vst [vmem:[#allocation149_spill] sm:$0xff] %v3804_v30  ;;  %6400 = vst [vmem:[#allocation150_spill] sm:$0xff] %v3809_v21  ;;  %v3818_v8 = vld [vmem:[%s5950_s0 + $0x3f0] ss:$8 sps:$4 sm:$0xff]   ;;  %v3823_v6 = vld [vmem:[%s5950_s0 + $0x3f4] sm:$0x1] }
  0x5a   :  { %6401 = vst [vmem:[#allocation151_spill] sm:$0xff] %v3818_v8  ;;  %6402 = vst [vmem:[#allocation152_spill] sm:$0xff] %v3823_v6  ;;  %v3828_v29 = vld [vmem:[%s5950_s0 + $0x3fc] sm:$0x1]  ;;  %v521_v28 = vsel %vm520_vm0, %v6404_v36, -inf  ;;  %v529_v13 = vsel %vm520_vm0, %v6405_v20, -inf  ;;  %v6410_v36 = vunpack.c.l.bf16 %v2640_v3 }
  0x5b   :  { %6403 = vst [vmem:[#allocation153_spill] sm:$0xff] %v3828_v29  ;;  %v537_v23 = vsel %vm520_vm0, %v6406_v16, -inf  ;;  %v545_v9 = vsel %vm520_vm0, %v6407_v14, -inf  ;;  %v522_v8 = vmax.f32 %v6408_v42, %v521_v28  ;;  %v530_v1 = vmax.f32 %v6409_v15, %v529_v13 }
  0x5c   :  { %v538_v7 = vmax.f32 %v6410_v36, %v537_v23  ;;  %v546_v20 = vmax.f32 %v6411_v2, %v545_v9  ;;  %v553_v16 = vsel %vm520_vm0, %v6412_v4, -inf  ;;  %v561_v14 = vsel %vm520_vm0, %v6413_v5, -inf }
  0x5d   :  { %v6414_v29 = vunpack.c.l.bf16 %v2683_v18  ;;  %v577_v13 = vsel %vm520_vm0, %v6415_v0, -inf  ;;  %v523_v15 = vrot.slane %v522_v8, 4  ;;  %v531_v23 = vrot.slane %v530_v1, 4 }
  0x5e   :  { %v539_v3 = vrot.slane %v538_v7, 4  ;;  %v547_v9 = vrot.slane %v546_v20, 4  ;;  %v554_v42 = vmax.f32 %v6416_v11, %v553_v16  ;;  %v6417_v36 = vunpack.c.h.bf16 %v2659_v10 }
  0x5f   :  { %v569_v28 = vsel %vm520_vm0, %v6414_v29, -inf  ;;  %v6418_v2 = vunpack.c.l.bf16 %v2678_v17  ;;  %v6419_v18 = vunpack.c.h.bf16 %v2678_v17  ;;  %v524_v5 = vmax.f32 %v522_v8, %v523_v15 }
  0x60   :  { %v562_v12 = vmax.f32 %v6417_v36, %v561_v14  ;;  %v532_v19 = vmax.f32 %v530_v1, %v531_v23  ;;  %v540_v6 = vmax.f32 %v538_v7, %v539_v3  ;;  %v548_v0 = vmax.f32 %v546_v20, %v547_v9 }
  0x61   :  { %v570_v4 = vmax.f32 %v6418_v2, %v569_v28  ;;  %v578_v29 = vmax.f32 %v6419_v18, %v577_v13  ;;  %v555_v21 = vrot.slane %v554_v42, 4  ;;  %v525_v49 = vrot.slane %v524_v5, 2 }
  0x62   :  { %v563_v30 = vrot.slane %v562_v12, 4  ;;  %v533_v22 = vrot.slane %v532_v19, 2  ;;  %v541_v16 = vrot.slane %v540_v6, 2  ;;  %v549_v11 = vrot.slane %v548_v0, 2 }
  0x63   :  { %v571_v27 = vrot.slane %v570_v4, 4  ;;  %v579_v37 = vrot.slane %v578_v29, 4  ;;  %v556_v10 = vmax.f32 %v554_v42, %v555_v21  ;;  %v526_v28 = vmax.f32 %v524_v5, %v525_v49 }
  0x64   :  { %v564_v14 = vmax.f32 %v562_v12, %v563_v30  ;;  %v534_v2 = vmax.f32 %v532_v19, %v533_v22  ;;  %v542_v17 = vmax.f32 %v540_v6, %v541_v16  ;;  %v550_v13 = vmax.f32 %v548_v0, %v549_v11 }
  0x65   :  { %v572_v36 = vmax.f32 %v570_v4, %v571_v27  ;;  %v580_v58 = vmax.f32 %v578_v29, %v579_v37  ;;  %v557_v8 = vrot.slane %v556_v10, 2  ;;  %v527_v15 = vrot.slane %v526_v28, 1 }
  0x66   :  { %v565_v1 = vrot.slane %v564_v14, 2  ;;  %v535_v23 = vrot.slane %v534_v2, 1  ;;  %v543_v3 = vrot.slane %v542_v17, 1  ;;  %v551_v9 = vrot.slane %v550_v13, 1 }
  0x67   :  { %v573_v7 = vrot.slane %v572_v36, 2  ;;  %v581_v20 = vrot.slane %v580_v58, 2  ;;  %v558_v18 = vmax.f32 %v556_v10, %v557_v8  ;;  %v3878_v21 = vmax.f32 %v526_v28, %v527_v15 }
  0x68   :  { %v566_v35 = vmax.f32 %v564_v14, %v565_v1  ;;  %v3880_v27 = vmax.f32 %v534_v2, %v535_v23  ;;  %v3882_v30 = vmax.f32 %v542_v17, %v543_v3  ;;  %v3884_v6 = vmax.f32 %v550_v13, %v551_v9 }
  0x69   :  { %v574_v34 = vmax.f32 %v572_v36, %v573_v7  ;;  %v582_v43 = vmax.f32 %v580_v58, %v581_v20  ;;  %v559_v22 = vrot.slane %v558_v18, 1  ;;  %v6420_v12 = vunpack.c.l.bf16 %v2702_v25 }
  0x6a   :  { %v567_v37 = vrot.slane %v566_v35, 1  ;;  %v6421_v29 = vunpack.c.l.bf16 %v2707_v26  ;;  %v6422_v5 = vunpack.c.l.bf16 %v2721_v32  ;;  %v6423_v0 = vunpack.c.l.bf16 %v2726_v33 }
  0x6b   :  { %v575_v49 = vrot.slane %v574_v34, 1  ;;  %v583_v42 = vrot.slane %v582_v43, 1  ;;  %v585_v4 = vsel %vm520_vm0, %v6420_v12, -inf  ;;  %v3898_v11 = vmax.f32 %v558_v18, %v559_v22 }
  0x6c   :  { %v593_v58 = vsel %vm520_vm0, %v6421_v29, -inf  ;;  %v601_v19 = vsel %vm520_vm0, %v6422_v5, -inf  ;;  %v609_v16 = vsel %vm520_vm0, %v6423_v0, -inf  ;;  %v3900_v10 = vmax.f32 %v566_v35, %v567_v37 }
  0x6d   :  { %v3902_v14 = vmax.f32 %v574_v34, %v575_v49  ;;  %v3904_v25 = vmax.f32 %v582_v43, %v583_v42  ;;  %v6424_v26 = vunpack.c.l.bf16 %v2697_v24  ;;  %v6425_v28 = vunpack.c.h.bf16 %v2697_v24 }
  0x6e   :  { %v6426_v2 = vunpack.c.l.bf16 %v2716_v31  ;;  %v6427_v33 = vunpack.c.h.bf16 %v2716_v31  ;;  %v6428_v8 = vunpack.c.l.bf16 %v2740_v39  ;;  %v6429_v34 = vunpack.c.l.bf16 %v2745_v40 }
  0x6f   :  { %v586_v36 = vmax.f32 %v6424_v26, %v585_v4  ;;  %v594_v32 = vmax.f32 %v6425_v28, %v593_v58  ;;  %v6430_v1 = vunpack.c.l.bf16 %v2759_v46  ;;  %v6431_v24 = vunpack.c.l.bf16 %v2764_v47 }
  0x70   :  { %v602_v17 = vmax.f32 %v6426_v2, %v601_v19  ;;  %v610_v13 = vmax.f32 %v6427_v33, %v609_v16  ;;  %v617_v35 = vsel %vm520_vm0, %v6428_v8, -inf  ;;  %v625_v43 = vsel %vm520_vm0, %v6429_v34, -inf }
  0x71   :  { %v633_v7 = vsel %vm520_vm0, %v6430_v1, -inf  ;;  %v641_v20 = vsel %vm520_vm0, %v6431_v24, -inf  ;;  %v587_v15 = vrot.slane %v586_v36, 4  ;;  %v595_v23 = vrot.slane %v594_v32, 4 }
  0x72   :  { %v603_v31 = vrot.slane %v602_v17, 4  ;;  %v611_v3 = vrot.slane %v610_v13, 4  ;;  %v6432_v39 = vunpack.c.l.bf16 %v2735_v38  ;;  %v6433_v18 = vunpack.c.h.bf16 %v2735_v38 }
  0x73   :  { %v6434_v22 = vunpack.c.l.bf16 %v2754_v45  ;;  %v6435_v46 = vunpack.c.h.bf16 %v2754_v45  ;;  %v588_v42 = vmax.f32 %v586_v36, %v587_v15  ;;  %v596_v47 = vmax.f32 %v594_v32, %v595_v23 }
  0x74   :  { %v618_v9 = vmax.f32 %v6432_v39, %v617_v35  ;;  %v626_v40 = vmax.f32 %v6433_v18, %v625_v43  ;;  %v604_v12 = vmax.f32 %v602_v17, %v603_v31  ;;  %v612_v4 = vmax.f32 %v610_v13, %v611_v3 }
  0x75   :  { %v634_v37 = vmax.f32 %v6434_v22, %v633_v7  ;;  %v642_v49 = vmax.f32 %v6435_v46, %v641_v20  ;;  %v589_v0 = vrot.slane %v588_v42, 2  ;;  %v597_v16 = vrot.slane %v596_v47, 2 }
  0x76   :  { %v619_v29 = vrot.slane %v618_v9, 4  ;;  %v627_v58 = vrot.slane %v626_v40, 4  ;;  %v605_v26 = vrot.slane %v604_v12, 2  ;;  %v613_v28 = vrot.slane %v612_v4, 2 }
  0x77   :  { %v635_v5 = vrot.slane %v634_v37, 4  ;;  %v643_v19 = vrot.slane %v642_v49, 4  ;;  %v590_v35 = vmax.f32 %v588_v42, %v589_v0  ;;  %v598_v34 = vmax.f32 %v596_v47, %v597_v16 }
  0x78   :  { %v620_v38 = vmax.f32 %v618_v9, %v619_v29  ;;  %v628_v2 = vmax.f32 %v626_v40, %v627_v58  ;;  %v606_v45 = vmax.f32 %v604_v12, %v605_v26  ;;  %v614_v43 = vmax.f32 %v612_v4, %v613_v28 }
  0x79   :  { %v636_v33 = vmax.f32 %v634_v37, %v635_v5  ;;  %v644_v8 = vmax.f32 %v642_v49, %v643_v19  ;;  %v591_v1 = vrot.slane %v590_v35, 1  ;;  %v599_v7 = vrot.slane %v598_v34, 1 }
  0x7a   :  { %v621_v36 = vrot.slane %v620_v38, 2  ;;  %v629_v32 = vrot.slane %v628_v2, 2  ;;  %v607_v24 = vrot.slane %v606_v45, 1  ;;  %v615_v20 = vrot.slane %v614_v43, 1 }
  0x7b   :  { %v637_v17 = vrot.slane %v636_v33, 2  ;;  %v645_v13 = vrot.slane %v644_v8, 2  ;;  %v3934_v39 = vmax.f32 %v590_v35, %v591_v1  ;;  %v3936_v9 = vmax.f32 %v598_v34, %v599_v7 }
  0x7c   :  { %v622_v15 = vmax.f32 %v620_v38, %v621_v36  ;;  %v630_v23 = vmax.f32 %v628_v2, %v629_v32  ;;  %v3938_v18 = vmax.f32 %v606_v45, %v607_v24  ;;  %v3940_v40 = vmax.f32 %v614_v43, %v615_v20 }
  0x7d   :  { %v638_v31 = vmax.f32 %v636_v33, %v637_v17  ;;  %v646_v3 = vmax.f32 %v644_v8, %v645_v13  ;;  %v6436_v42 = vunpack.c.l.bf16 %v2778_v53  ;;  %v6437_v12 = vunpack.c.l.bf16 %v2783_v54 }
  0x7e   :  { %v623_v22 = vrot.slane %v622_v15, 1  ;;  %v631_v37 = vrot.slane %v630_v23, 1  ;;  %v6438_v29 = vunpack.c.l.bf16 %v2797_v60  ;;  %v6439_v5 = vunpack.c.l.bf16 %v2802_v61 }
  0x7f   :  { %v639_v46 = vrot.slane %v638_v31, 1  ;;  %v647_v49 = vrot.slane %v646_v3, 1  ;;  %v649_v47 = vsel %vm520_vm0, %v6436_v42, -inf  ;;  %v657_v4 = vsel %vm520_vm0, %v6437_v12, -inf }
  0x80   :  { %v665_v58 = vsel %vm520_vm0, %v6438_v29, -inf  ;;  %v673_v19 = vsel %vm520_vm0, %v6439_v5, -inf  ;;  %v3954_v0 = vmax.f32 %v622_v15, %v623_v22  ;;  %v3956_v16 = vmax.f32 %v630_v23, %v631_v37 }
  0x81   :  { %v3958_v26 = vmax.f32 %v638_v31, %v639_v46  ;;  %v3960_v53 = vmax.f32 %v646_v3, %v647_v49  ;;  %v6440_v54 = vunpack.c.l.bf16 %v2773_v52  ;;  %v6441_v38 = vunpack.c.h.bf16 %v2773_v52 }
  0x82   :  { %v6442_v2 = vunpack.c.l.bf16 %v2792_v59  ;;  %v6443_v61 = vunpack.c.h.bf16 %v2792_v59  ;;  %v6444_v35 = vunpack.c.l.bf16 %v2816_v48  ;;  %v6445_v45 = vunpack.c.l.bf16 %v2821_v62 }
  0x83   :  { %v650_v28 = vmax.f32 %v6440_v54, %v649_v47  ;;  %v658_v60 = vmax.f32 %v6441_v38, %v657_v4  ;;  %v6446_v36 = vunpack.c.l.bf16 %v2835_v51  ;;  %v6447_v52 = vunpack.c.l.bf16 %v2840_v63 }
  0x84   :  { %v666_v33 = vmax.f32 %v6442_v2, %v665_v58  ;;  %v674_v8 = vmax.f32 %v6443_v61, %v673_v19  ;;  %v681_v34 = vsel %vm520_vm0, %v6444_v35, -inf  ;;  %v689_v43 = vsel %vm520_vm0, %v6445_v45, -inf }
  0x85   :  { %v697_v32 = vsel %vm520_vm0, %v6446_v36, -inf  ;;  %v705_v17 = vsel %vm520_vm0, %v6447_v52, -inf  ;;  %v651_v13 = vrot.slane %v650_v28, 4  ;;  %v659_v1 = vrot.slane %v658_v60, 4 }
  0x86   :  { %v667_v59 = vrot.slane %v666_v33, 4  ;;  %v675_v7 = vrot.slane %v674_v8, 4  ;;  %v6448_v48 = vunpack.c.l.bf16 %v2811_v50  ;;  %v6449_v20 = vunpack.c.h.bf16 %v2811_v50 }
  0x87   :  { %v6450_v15 = vunpack.c.l.bf16 %v2830_v56  ;;  %v6451_v51 = vunpack.c.h.bf16 %v2830_v56  ;;  %v652_v3 = vmax.f32 %v650_v28, %v651_v13  ;;  %v660_v63 = vmax.f32 %v658_v60, %v659_v1 }
  0x88   :  { %v682_v24 = vmax.f32 %v6448_v48, %v681_v34  ;;  %v690_v62 = vmax.f32 %v6449_v20, %v689_v43  ;;  %v668_v22 = vmax.f32 %v666_v33, %v667_v59  ;;  %v676_v37 = vmax.f32 %v674_v8, %v675_v7 }
  0x89   :  { %v698_v23 = vmax.f32 %v6450_v15, %v697_v32  ;;  %v706_v31 = vmax.f32 %v6451_v51, %v705_v17  ;;  %v653_v12 = vrot.slane %v652_v3, 2  ;;  %v661_v4 = vrot.slane %v660_v63, 2 }
  0x8a   :  { %v683_v46 = vrot.slane %v682_v24, 4  ;;  %v691_v49 = vrot.slane %v690_v62, 4  ;;  %v669_v29 = vrot.slane %v668_v22, 2  ;;  %v677_v58 = vrot.slane %v676_v37, 2 }
  0x8b   :  { %v699_v42 = vrot.slane %v698_v23, 4  ;;  %v707_v47 = vrot.slane %v706_v31, 4  ;;  %v654_v38 = vmax.f32 %v652_v3, %v653_v12  ;;  %v662_v2 = vmax.f32 %v660_v63, %v661_v4 }
  0x8c   :  { %v684_v50 = vmax.f32 %v682_v24, %v683_v46  ;;  %v692_v5 = vmax.f32 %v690_v62, %v691_v49  ;;  %v670_v56 = vmax.f32 %v668_v22, %v669_v29  ;;  %v678_v61 = vmax.f32 %v676_v37, %v677_v58  ;;  %v6459_v29 = vld [vmem:[#allocation3_spill] sm:$0xff] }
  0x8d   :  { %v700_v19 = vmax.f32 %v698_v23, %v699_v42  ;;  %v708_v54 = vmax.f32 %v706_v31, %v707_v47  ;;  %v655_v35 = vrot.slane %v654_v38, 1  ;;  %v663_v34 = vrot.slane %v662_v2, 1  ;;  %v6456_v47 = vld [vmem:[#allocation2_spill] sm:$0xff] }
  0x8e   :  { %v685_v28 = vrot.slane %v684_v50, 2  ;;  %v693_v60 = vrot.slane %v692_v5, 2  ;;  %v671_v45 = vrot.slane %v670_v56, 1  ;;  %v679_v43 = vrot.slane %v678_v61, 1 }
  0x8f   :  { %v701_v33 = vrot.slane %v700_v19, 2  ;;  %v709_v8 = vrot.slane %v708_v54, 2  ;;  %v3990_v13 = vmax.f32 %v654_v38, %v655_v35  ;;  %v3992_v1 = vmax.f32 %v662_v2, %v663_v34  ;;  %v6464_v2 = vld [vmem:[#allocation6_spill] sm:$0xff] }
  0x90   :  { %v686_v36 = vmax.f32 %v684_v50, %v685_v28  ;;  %v694_v32 = vmax.f32 %v692_v5, %v693_v60  ;;  %v3994_v59 = vmax.f32 %v670_v56, %v671_v45  ;;  %v3996_v7 = vmax.f32 %v678_v61, %v679_v43  ;;  %v6466_v28 = vld [vmem:[#allocation8_spill] sm:$0xff] }
  0x91   :  { %v702_v52 = vmax.f32 %v700_v19, %v701_v33  ;;  %v710_v17 = vmax.f32 %v708_v54, %v709_v8  ;;  %v6452_v15 = vunpack.c.l.bf16 %v2854_v41  ;;  %v6453_v51 = vunpack.c.l.bf16 %v2859_v57  ;;  %v6462_v19 = vld [vmem:[#allocation5_spill] sm:$0xff] }
  0x92   :  { %v687_v48 = vrot.slane %v686_v36, 1  ;;  %v695_v24 = vrot.slane %v694_v32, 1  ;;  %v6454_v3 = vunpack.c.l.bf16 %v2873_v44  ;;  %v6455_v22 = vunpack.c.l.bf16 %v2878_v55  ;;  %v6468_v8 = vld [vmem:[#allocation9_spill] sm:$0xff] }
  0x93   :  { %v703_v20 = vrot.slane %v702_v52, 1  ;;  %v711_v62 = vrot.slane %v710_v17, 1  ;;  %v713_v23 = vsel %vm520_vm0, %v6452_v15, -inf  ;;  %v721_v31 = vsel %vm520_vm0, %v6453_v51, -inf }
  0x94   :  { %v729_v63 = vsel %vm520_vm0, %v6454_v3, -inf  ;;  %v737_v37 = vsel %vm520_vm0, %v6455_v22, -inf  ;;  %v4010_v46 = vmax.f32 %v686_v36, %v687_v48  ;;  %v4012_v49 = vmax.f32 %v694_v32, %v695_v24 }
  0x95   :  { %v4014_v42 = vmax.f32 %v702_v52, %v703_v20  ;;  %v4016_v41 = vmax.f32 %v710_v17, %v711_v62  ;;  %v6457_v57 = vunpack.c.l.bf16 %v6456_v47  ;;  %v6458_v4 = vunpack.c.h.bf16 %v6456_v47  ;;  %v6470_v52 = vld [vmem:[#allocation4_spill] sm:$0xff]  ;;  %v6473_v62 = vld [vmem:[#allocation7_spill] sm:$0xff] }
  0x96   :  { %v6460_v58 = vunpack.c.l.bf16 %v6459_v29  ;;  %v6461_v55 = vunpack.c.h.bf16 %v6459_v29  ;;  %v6463_v54 = vunpack.c.l.bf16 %v6462_v19  ;;  %v6465_v56 = vunpack.c.l.bf16 %v6464_v2 }
  0x97   :  { %v714_v12 = vmax.f32 %v6457_v57, %v713_v23  ;;  %v722_v44 = vmax.f32 %v6458_v4, %v721_v31  ;;  %v6467_v60 = vunpack.c.l.bf16 %v6466_v28  ;;  %v6469_v35 = vunpack.c.l.bf16 %v6468_v8 }
  0x98   :  { %v730_v50 = vmax.f32 %v6460_v58, %v729_v63  ;;  %v738_v5 = vmax.f32 %v6461_v55, %v737_v37  ;;  %v745_v38 = vsel %vm520_vm0, %v6463_v54, -inf  ;;  %v753_v61 = vsel %vm520_vm0, %v6465_v56, -inf }
  0x99   :  { %v761_v33 = vsel %vm520_vm0, %v6467_v60, -inf  ;;  %v769_v34 = vsel %vm520_vm0, %v6469_v35, -inf  ;;  %v715_v45 = vrot.slane %v714_v12, 4  ;;  %v723_v43 = vrot.slane %v722_v44, 4 }
  0x9a   :  { %v731_v36 = vrot.slane %v730_v50, 4  ;;  %v739_v32 = vrot.slane %v738_v5, 4  ;;  %v6471_v17 = vunpack.c.l.bf16 %v6470_v52  ;;  %v6472_v24 = vunpack.c.h.bf16 %v6470_v52 }
  0x9b   :  { %v6474_v15 = vunpack.c.l.bf16 %v6473_v62  ;;  %v6475_v51 = vunpack.c.h.bf16 %v6473_v62  ;;  %v716_v3 = vmax.f32 %v714_v12, %v715_v45  ;;  %v724_v63 = vmax.f32 %v722_v44, %v723_v43 }
  0x9c   :  { %v746_v48 = vmax.f32 %v6471_v17, %v745_v38  ;;  %v754_v20 = vmax.f32 %v6472_v24, %v753_v61  ;;  %v732_v22 = vmax.f32 %v730_v50, %v731_v36  ;;  %v740_v37 = vmax.f32 %v738_v5, %v739_v32 }
  0x9d   :  { %v762_v23 = vmax.f32 %v6474_v15, %v761_v33  ;;  %v770_v31 = vmax.f32 %v6475_v51, %v769_v34  ;;  %v717_v58 = vrot.slane %v716_v3, 2  ;;  %v725_v55 = vrot.slane %v724_v63, 2 }
  0x9e   :  { %v747_v47 = vrot.slane %v746_v48, 4  ;;  %v755_v57 = vrot.slane %v754_v20, 4  ;;  %v733_v19 = vrot.slane %v732_v22, 2  ;;  %v741_v54 = vrot.slane %v740_v37, 2 }
  0x9f   :  { %v763_v4 = vrot.slane %v762_v23, 4  ;;  %v771_v29 = vrot.slane %v770_v31, 4  ;;  %v718_v28 = vmax.f32 %v716_v3, %v717_v58  ;;  %v726_v60 = vmax.f32 %v724_v63, %v725_v55  ;;  %v6476_v3 = vld [vmem:[#allocation11_spill] sm:$0xff] }
  0xa0   :  { %v748_v38 = vmax.f32 %v746_v48, %v747_v47  ;;  %v756_v2 = vmax.f32 %v754_v20, %v755_v57  ;;  %v734_v33 = vmax.f32 %v732_v22, %v733_v19  ;;  %v742_v8 = vmax.f32 %v740_v37, %v741_v54  ;;  %v6478_v37 = vld [vmem:[#allocation12_spill] sm:$0xff]  ;;  %v6482_v55 = vld [vmem:[#allocation15_spill] sm:$0xff] }
  0xa1   :  { %v764_v56 = vmax.f32 %v762_v23, %v763_v4  ;;  %v772_v61 = vmax.f32 %v770_v31, %v771_v29  ;;  %v719_v35 = vrot.slane %v718_v28, 1  ;;  %v727_v34 = vrot.slane %v726_v60, 1  ;;  %v6480_v4 = vld [vmem:[#allocation14_spill] sm:$0xff] }
  0xa2   :  { %v749_v12 = vrot.slane %v748_v38, 2  ;;  %v757_v44 = vrot.slane %v756_v2, 2  ;;  %v735_v45 = vrot.slane %v734_v33, 1  ;;  %v743_v43 = vrot.slane %v742_v8, 1 }
  0xa3   :  { %v765_v50 = vrot.slane %v764_v56, 2  ;;  %v773_v5 = vrot.slane %v772_v61, 2  ;;  %v4046_v48 = vmax.f32 %v718_v28, %v719_v35  ;;  %v4048_v24 = vmax.f32 %v726_v60, %v727_v34  ;;  %v6488_v28 = vld [vmem:[#allocation10_spill] sm:$0xff] }
  0xa4   :  { %v750_v36 = vmax.f32 %v748_v38, %v749_v12  ;;  %v758_v32 = vmax.f32 %v756_v2, %v757_v44  ;;  %v4050_v20 = vmax.f32 %v734_v33, %v735_v45  ;;  %v4052_v62 = vmax.f32 %v742_v8, %v743_v43  ;;  %v6491_v44 = vld [vmem:[#allocation13_spill] sm:$0xff] }
  0xa5   :  { %v766_v52 = vmax.f32 %v764_v56, %v765_v50  ;;  %v774_v17 = vmax.f32 %v772_v61, %v773_v5  ;;  %v6477_v63 = vunpack.c.l.bf16 %v6476_v3  ;;  %v6479_v47 = vunpack.c.l.bf16 %v6478_v37  ;;  %v6494_v45 = vld [vmem:[#allocation17_spill] sm:$0xff] }
  0xa6   :  { %v751_v15 = vrot.slane %v750_v36, 1  ;;  %v759_v23 = vrot.slane %v758_v32, 1  ;;  %v6481_v29 = vunpack.c.l.bf16 %v6480_v4  ;;  %v6483_v19 = vunpack.c.l.bf16 %v6482_v55  ;;  %v6502_v4 = vld [vmem:[#allocation16_spill] sm:$0xff] }
  0xa7   :  { %v767_v51 = vrot.slane %v766_v52, 1  ;;  %v775_v31 = vrot.slane %v774_v17, 1  ;;  %v777_v22 = vsel %vm520_vm0, %v6477_v63, -inf  ;;  %v785_v57 = vsel %vm520_vm0, %v6479_v47, -inf }
  0xa8   :  { %v793_v58 = vsel %vm520_vm0, %v6481_v29, -inf  ;;  %v801_v54 = vsel %vm520_vm0, %v6483_v19, -inf  ;;  %v4066_v38 = vmax.f32 %v750_v36, %v751_v15  ;;  %v4068_v2 = vmax.f32 %v758_v32, %v759_v23  ;;  %v6496_v32 = vld [vmem:[#allocation18_spill] sm:$0xff]  ;;  %v6498_v15 = vld [vmem:[#allocation20_spill] sm:$0xff] }
  0xa9   :  { %v4070_v56 = vmax.f32 %v766_v52, %v767_v51  ;;  %v4072_v61 = vmax.f32 %v774_v17, %v775_v31  ;;  %v6489_v60 = vunpack.c.l.bf16 %v6488_v28  ;;  %v6490_v8 = vunpack.c.h.bf16 %v6488_v28  ;;  %v6500_v31 = vld [vmem:[#allocation21_spill] sm:$0xff] }
  0xaa   :  { %6484 = vst [vmem:[#allocation2_spill] sm:$0xff] %v4066_v38  ;;  %6485 = vst [vmem:[#allocation3_spill] sm:$0xff] %v4068_v2  ;;  %v6492_v50 = vunpack.c.l.bf16 %v6491_v44  ;;  %v6493_v35 = vunpack.c.h.bf16 %v6491_v44  ;;  %v6495_v43 = vunpack.c.l.bf16 %v6494_v45  ;;  %v6497_v52 = vunpack.c.l.bf16 %v6496_v32 }
  0xab   :  { %6486 = vst [vmem:[#allocation5_spill] sm:$0xff] %v4070_v56  ;;  %6487 = vst [vmem:[#allocation6_spill] sm:$0xff] %v4072_v61  ;;  %v778_v33 = vmax.f32 %v6489_v60, %v777_v22  ;;  %v786_v12 = vmax.f32 %v6490_v8, %v785_v57  ;;  %v6499_v23 = vunpack.c.l.bf16 %v6498_v15  ;;  %v6501_v3 = vunpack.c.l.bf16 %v6500_v31 }
  0xac   :  { %v794_v5 = vmax.f32 %v6492_v50, %v793_v58  ;;  %v802_v34 = vmax.f32 %v6493_v35, %v801_v54  ;;  %v809_v36 = vsel %vm520_vm0, %v6495_v43, -inf  ;;  %v817_v17 = vsel %vm520_vm0, %v6497_v52, -inf  ;;  %v6505_v54 = vld [vmem:[#allocation19_spill] sm:$0xff] }
  0xad   :  { %v825_v51 = vsel %vm520_vm0, %v6499_v23, -inf  ;;  %v833_v63 = vsel %vm520_vm0, %v6501_v3, -inf  ;;  %v779_v22 = vrot.slane %v778_v33, 4  ;;  %v787_v37 = vrot.slane %v786_v12, 4 }
  0xae   :  { %v795_v47 = vrot.slane %v794_v5, 4  ;;  %v803_v57 = vrot.slane %v802_v34, 4  ;;  %v6503_v29 = vunpack.c.l.bf16 %v6502_v4  ;;  %v6504_v55 = vunpack.c.h.bf16 %v6502_v4 }
  0xaf   :  { %v6506_v28 = vunpack.c.l.bf16 %v6505_v54  ;;  %v6507_v8 = vunpack.c.h.bf16 %v6505_v54  ;;  %v780_v50 = vmax.f32 %v778_v33, %v779_v22  ;;  %v788_v35 = vmax.f32 %v786_v12, %v787_v37 }
  0xb0   :  { %v810_v58 = vmax.f32 %v6503_v29, %v809_v36  ;;  %v818_v19 = vmax.f32 %v6504_v55, %v817_v17  ;;  %v796_v45 = vmax.f32 %v794_v5, %v795_v47  ;;  %v804_v43 = vmax.f32 %v802_v34, %v803_v57 }
  0xb1   :  { %v826_v60 = vmax.f32 %v6506_v28, %v825_v51  ;;  %v834_v44 = vmax.f32 %v6507_v8, %v833_v63  ;;  %v781_v31 = vrot.slane %v780_v50, 2  ;;  %v789_v3 = vrot.slane %v788_v35, 2 }
  0xb2   :  { %v811_v32 = vrot.slane %v810_v58, 4  ;;  %v819_v52 = vrot.slane %v818_v19, 4  ;;  %v797_v36 = vrot.slane %v796_v45, 2  ;;  %v805_v29 = vrot.slane %v804_v43, 2 }
  0xb3   :  { %v827_v15 = vrot.slane %v826_v60, 4  ;;  %v835_v23 = vrot.slane %v834_v44, 4  ;;  %v782_v51 = vmax.f32 %v780_v50, %v781_v31  ;;  %v790_v28 = vmax.f32 %v788_v35, %v789_v3  ;;  %v6516_v3 = vld [vmem:[#allocation26_spill] sm:$0xff] }
  0xb4   :  { %v812_v4 = vmax.f32 %v810_v58, %v811_v32  ;;  %v820_v17 = vmax.f32 %v818_v19, %v819_v52  ;;  %v798_v54 = vmax.f32 %v796_v45, %v797_v36  ;;  %v806_v63 = vmax.f32 %v804_v43, %v805_v29  ;;  %v6512_v32 = vld [vmem:[#allocation23_spill] sm:$0xff] }
  0xb5   :  { %v828_v55 = vmax.f32 %v826_v60, %v827_v15  ;;  %v836_v61 = vmax.f32 %v834_v44, %v835_v23  ;;  %v783_v22 = vrot.slane %v782_v51, 1  ;;  %v791_v37 = vrot.slane %v790_v28, 1  ;;  %v6514_v23 = vld [vmem:[#allocation24_spill] sm:$0xff] }
  0xb6   :  { %v813_v33 = vrot.slane %v812_v4, 2  ;;  %v821_v12 = vrot.slane %v820_v17, 2  ;;  %v799_v47 = vrot.slane %v798_v54, 1  ;;  %v807_v57 = vrot.slane %v806_v63, 1 }
  0xb7   :  { %v829_v5 = vrot.slane %v828_v55, 2  ;;  %v837_v34 = vrot.slane %v836_v61, 2  ;;  %v4102_v58 = vmax.f32 %v782_v51, %v783_v22  ;;  %v4104_v19 = vmax.f32 %v790_v28, %v791_v37  ;;  %v6527_v37 = vld [vmem:[#allocation25_spill] sm:$0xff] }
  0xb8   :  { %v814_v8 = vmax.f32 %v812_v4, %v813_v33  ;;  %v822_v56 = vmax.f32 %v820_v17, %v821_v12  ;;  %v4106_v60 = vmax.f32 %v798_v54, %v799_v47  ;;  %v4108_v44 = vmax.f32 %v806_v63, %v807_v57  ;;  %v6518_v4 = vld [vmem:[#allocation27_spill] sm:$0xff]  ;;  %v6524_v33 = vld [vmem:[#allocation22_spill] sm:$0xff] }
  0xb9   :  { %v830_v2 = vmax.f32 %v828_v55, %v829_v5  ;;  %v838_v38 = vmax.f32 %v836_v61, %v837_v34  ;;  %6508 = vst [vmem:[#allocation8_spill] sm:$0xff] %v4102_v58  ;;  %6509 = vst [vmem:[#allocation9_spill] sm:$0xff] %v4104_v19  ;;  %v6513_v52 = vunpack.c.l.bf16 %v6512_v32  ;;  %v6515_v31 = vunpack.c.l.bf16 %v6514_v23  ;;  %v6536_v23 = vld [vmem:[#allocation33_spill] sm:$0xff] }
  0xba   :  { %6510 = vst [vmem:[#allocation4_spill] sm:$0xff] %v4106_v60  ;;  %6511 = vst [vmem:[#allocation7_spill] sm:$0xff] %v4108_v44  ;;  %v815_v50 = vrot.slane %v814_v8, 1  ;;  %v823_v35 = vrot.slane %v822_v56, 1  ;;  %v6517_v36 = vunpack.c.l.bf16 %v6516_v3  ;;  %v6519_v17 = vunpack.c.l.bf16 %v6518_v4 }
  0xbb   :  { %v831_v45 = vrot.slane %v830_v2, 1  ;;  %v839_v43 = vrot.slane %v838_v38, 1  ;;  %v841_v15 = vsel %vm520_vm0, %v6513_v52, -inf  ;;  %v849_v61 = vsel %vm520_vm0, %v6515_v31, -inf }
  0xbc   :  { %v857_v29 = vsel %vm520_vm0, %v6517_v36, -inf  ;;  %v865_v55 = vsel %vm520_vm0, %v6519_v17, -inf  ;;  %v4122_v51 = vmax.f32 %v814_v8, %v815_v50  ;;  %v4124_v28 = vmax.f32 %v822_v56, %v823_v35  ;;  %v6530_v8 = vld [vmem:[#allocation29_spill] sm:$0xff]  ;;  %v6538_v17 = vld [vmem:[#allocation28_spill] sm:$0xff] }
  0xbd   :  { %v4126_v54 = vmax.f32 %v830_v2, %v831_v45  ;;  %v4128_v63 = vmax.f32 %v838_v38, %v839_v43  ;;  %v6525_v12 = vunpack.c.l.bf16 %v6524_v33  ;;  %v6526_v34 = vunpack.c.h.bf16 %v6524_v33  ;;  %v6532_v2 = vld [vmem:[#allocation30_spill] sm:$0xff]  ;;  %v6534_v45 = vld [vmem:[#allocation32_spill] sm:$0xff] }
  0xbe   :  { %6520 = vst [vmem:[#allocation11_spill] sm:$0xff] %v4122_v51  ;;  %6521 = vst [vmem:[#allocation12_spill] sm:$0xff] %v4124_v28  ;;  %v6528_v47 = vunpack.c.l.bf16 %v6527_v37  ;;  %v6529_v32 = vunpack.c.h.bf16 %v6527_v37  ;;  %v6531_v50 = vunpack.c.l.bf16 %v6530_v8  ;;  %v6533_v35 = vunpack.c.l.bf16 %v6532_v2  ;;  %v6541_v37 = vld [vmem:[#allocation31_spill] sm:$0xff] }
  0xbf   :  { %6522 = vst [vmem:[#allocation14_spill] sm:$0xff] %v4126_v54  ;;  %6523 = vst [vmem:[#allocation15_spill] sm:$0xff] %v4128_v63  ;;  %v842_v5 = vmax.f32 %v6525_v12, %v841_v15  ;;  %v850_v22 = vmax.f32 %v6526_v34, %v849_v61  ;;  %v6535_v43 = vunpack.c.l.bf16 %v6534_v45  ;;  %v6537_v31 = vunpack.c.l.bf16 %v6536_v23 }
  0xc0   :  { %v858_v57 = vmax.f32 %v6528_v47, %v857_v29  ;;  %v866_v52 = vmax.f32 %v6529_v32, %v865_v55  ;;  %v873_v56 = vsel %vm520_vm0, %v6531_v50, -inf  ;;  %v881_v38 = vsel %vm520_vm0, %v6533_v35, -inf }
  0xc1   :  { %v889_v15 = vsel %vm520_vm0, %v6535_v43, -inf  ;;  %v897_v61 = vsel %vm520_vm0, %v6537_v31, -inf  ;;  %v843_v3 = vrot.slane %v842_v5, 4  ;;  %v851_v36 = vrot.slane %v850_v22, 4 }
  0xc2   :  { %v859_v29 = vrot.slane %v858_v57, 4  ;;  %v867_v4 = vrot.slane %v866_v52, 4  ;;  %v6539_v55 = vunpack.c.l.bf16 %v6538_v17  ;;  %v6540_v12 = vunpack.c.h.bf16 %v6538_v17 }
  0xc3   :  { %v6542_v47 = vunpack.c.l.bf16 %v6541_v37  ;;  %v6543_v8 = vunpack.c.h.bf16 %v6541_v37  ;;  %v844_v2 = vmax.f32 %v842_v5, %v843_v3  ;;  %v852_v35 = vmax.f32 %v850_v22, %v851_v36 }
  0xc4   :  { %v874_v33 = vmax.f32 %v6539_v55, %v873_v56  ;;  %v882_v34 = vmax.f32 %v6540_v12, %v881_v38  ;;  %v860_v45 = vmax.f32 %v858_v57, %v859_v29  ;;  %v868_v43 = vmax.f32 %v866_v52, %v867_v4 }
  0xc5   :  { %v890_v32 = vmax.f32 %v6542_v47, %v889_v15  ;;  %v898_v50 = vmax.f32 %v6543_v8, %v897_v61  ;;  %v845_v28 = vrot.slane %v844_v2, 2  ;;  %v853_v51 = vrot.slane %v852_v35, 2 }
  0xc6   :  { %v875_v23 = vrot.slane %v874_v33, 4  ;;  %v883_v31 = vrot.slane %v882_v34, 4  ;;  %v861_v56 = vrot.slane %v860_v45, 2  ;;  %v869_v55 = vrot.slane %v868_v43, 2 }
  0xc7   :  { %v891_v63 = vrot.slane %v890_v32, 4  ;;  %v899_v54 = vrot.slane %v898_v50, 4  ;;  %v846_v15 = vmax.f32 %v844_v2, %v845_v28  ;;  %v854_v47 = vmax.f32 %v852_v35, %v853_v51  ;;  %v6548_v2 = vld [vmem:[#allocation35_spill] sm:$0xff] }
  0xc8   :  { %v876_v17 = vmax.f32 %v874_v33, %v875_v23  ;;  %v884_v38 = vmax.f32 %v882_v34, %v883_v31  ;;  %v862_v37 = vmax.f32 %v860_v45, %v861_v56  ;;  %v870_v61 = vmax.f32 %v868_v43, %v869_v55  ;;  %v6550_v43 = vld [vmem:[#allocation36_spill] sm:$0xff]  ;;  %v6552_v31 = vld [vmem:[#allocation38_spill] sm:$0xff] }
  0xc9   :  { %v892_v12 = vmax.f32 %v890_v32, %v891_v63  ;;  %v900_v44 = vmax.f32 %v898_v50, %v899_v54  ;;  %v847_v3 = vrot.slane %v846_v15, 1  ;;  %v855_v36 = vrot.slane %v854_v47, 1 }
  0xca   :  { %v877_v5 = vrot.slane %v876_v17, 2  ;;  %v885_v22 = vrot.slane %v884_v38, 2  ;;  %v863_v29 = vrot.slane %v862_v37, 1  ;;  %v871_v4 = vrot.slane %v870_v61, 1 }
  0xcb   :  { %v893_v57 = vrot.slane %v892_v12, 2  ;;  %v901_v52 = vrot.slane %v900_v44, 2  ;;  %v4158_v33 = vmax.f32 %v846_v15, %v847_v3  ;;  %v4160_v63 = vmax.f32 %v854_v47, %v855_v36  ;;  %v6563_v36 = vld [vmem:[#allocation37_spill] sm:$0xff] }
  0xcc   :  { %v878_v8 = vmax.f32 %v876_v17, %v877_v5  ;;  %v886_v60 = vmax.f32 %v884_v38, %v885_v22  ;;  %v4162_v28 = vmax.f32 %v862_v37, %v863_v29  ;;  %v4164_v51 = vmax.f32 %v870_v61, %v871_v4  ;;  %v6554_v17 = vld [vmem:[#allocation39_spill] sm:$0xff]  ;;  %v6560_v5 = vld [vmem:[#allocation34_spill] sm:$0xff] }
  0xcd   :  { %v894_v19 = vmax.f32 %v892_v12, %v893_v57  ;;  %v902_v58 = vmax.f32 %v900_v44, %v901_v52  ;;  %6544 = vst [vmem:[#allocation10_spill] sm:$0xff] %v4158_v33  ;;  %6545 = vst [vmem:[#allocation13_spill] sm:$0xff] %v4160_v63  ;;  %v6549_v35 = vunpack.c.l.bf16 %v6548_v2  ;;  %v6551_v23 = vunpack.c.l.bf16 %v6550_v43  ;;  %v6572_v43 = vld [vmem:[#allocation45_spill] sm:$0xff] }
  0xce   :  { %6546 = vst [vmem:[#allocation17_spill] sm:$0xff] %v4162_v28  ;;  %6547 = vst [vmem:[#allocation18_spill] sm:$0xff] %v4164_v51  ;;  %v879_v54 = vrot.slane %v878_v8, 1  ;;  %v887_v34 = vrot.slane %v886_v60, 1  ;;  %v6553_v56 = vunpack.c.l.bf16 %v6552_v31  ;;  %v6555_v38 = vunpack.c.l.bf16 %v6554_v17 }
  0xcf   :  { %v895_v32 = vrot.slane %v894_v19, 1  ;;  %v903_v50 = vrot.slane %v902_v58, 1  ;;  %v905_v45 = vsel %vm520_vm0, %v6549_v35, -inf  ;;  %v913_v44 = vsel %vm520_vm0, %v6551_v23, -inf }
  0xd0   :  { %v921_v55 = vsel %vm520_vm0, %v6553_v56, -inf  ;;  %v929_v12 = vsel %vm520_vm0, %v6555_v38, -inf  ;;  %v4178_v15 = vmax.f32 %v878_v8, %v879_v54  ;;  %v4180_v47 = vmax.f32 %v886_v60, %v887_v34  ;;  %v6566_v8 = vld [vmem:[#allocation41_spill] sm:$0xff]  ;;  %v6574_v38 = vld [vmem:[#allocation40_spill] sm:$0xff] }
  0xd1   :  { %v4182_v37 = vmax.f32 %v894_v19, %v895_v32  ;;  %v4184_v61 = vmax.f32 %v902_v58, %v903_v50  ;;  %v6561_v22 = vunpack.c.l.bf16 %v6560_v5  ;;  %v6562_v52 = vunpack.c.h.bf16 %v6560_v5  ;;  %v6568_v19 = vld [vmem:[#allocation42_spill] sm:$0xff]  ;;  %v6570_v32 = vld [vmem:[#allocation44_spill] sm:$0xff] }
  0xd2   :  { %6556 = vst [vmem:[#allocation20_spill] sm:$0xff] %v4178_v15  ;;  %6557 = vst [vmem:[#allocation21_spill] sm:$0xff] %v4180_v47  ;;  %v6564_v29 = vunpack.c.l.bf16 %v6563_v36  ;;  %v6565_v2 = vunpack.c.h.bf16 %v6563_v36  ;;  %v6567_v54 = vunpack.c.l.bf16 %v6566_v8  ;;  %v6569_v34 = vunpack.c.l.bf16 %v6568_v19  ;;  %v6577_v36 = vld [vmem:[#allocation43_spill] sm:$0xff] }
  0xd3   :  { %6558 = vst [vmem:[#allocation16_spill] sm:$0xff] %v4182_v37  ;;  %6559 = vst [vmem:[#allocation19_spill] sm:$0xff] %v4184_v61  ;;  %v906_v57 = vmax.f32 %v6561_v22, %v905_v45  ;;  %v914_v3 = vmax.f32 %v6562_v52, %v913_v44  ;;  %v6571_v50 = vunpack.c.l.bf16 %v6570_v32  ;;  %v6573_v23 = vunpack.c.l.bf16 %v6572_v43 }
  0xd4   :  { %v922_v4 = vmax.f32 %v6564_v29, %v921_v55  ;;  %v930_v35 = vmax.f32 %v6565_v2, %v929_v12  ;;  %v937_v60 = vsel %vm520_vm0, %v6567_v54, -inf  ;;  %v945_v58 = vsel %vm520_vm0, %v6569_v34, -inf }
  0xd5   :  { %v953_v45 = vsel %vm520_vm0, %v6571_v50, -inf  ;;  %v961_v44 = vsel %vm520_vm0, %v6573_v23, -inf  ;;  %v907_v31 = vrot.slane %v906_v57, 4  ;;  %v915_v56 = vrot.slane %v914_v3, 4 }
  0xd6   :  { %v923_v55 = vrot.slane %v922_v4, 4  ;;  %v931_v17 = vrot.slane %v930_v35, 4  ;;  %v6575_v12 = vunpack.c.l.bf16 %v6574_v38  ;;  %v6576_v22 = vunpack.c.h.bf16 %v6574_v38 }
  0xd7   :  { %v6578_v29 = vunpack.c.l.bf16 %v6577_v36  ;;  %v6579_v8 = vunpack.c.h.bf16 %v6577_v36  ;;  %v908_v19 = vmax.f32 %v906_v57, %v907_v31  ;;  %v916_v34 = vmax.f32 %v914_v3, %v915_v56 }
  0xd8   :  { %v938_v5 = vmax.f32 %v6575_v12, %v937_v60  ;;  %v946_v52 = vmax.f32 %v6576_v22, %v945_v58  ;;  %v924_v32 = vmax.f32 %v922_v4, %v923_v55  ;;  %v932_v50 = vmax.f32 %v930_v35, %v931_v17 }
  0xd9   :  { %v954_v2 = vmax.f32 %v6578_v29, %v953_v45  ;;  %v962_v54 = vmax.f32 %v6579_v8, %v961_v44  ;;  %v909_v47 = vrot.slane %v908_v19, 2  ;;  %v917_v15 = vrot.slane %v916_v34, 2 }
  0xda   :  { %v939_v43 = vrot.slane %v938_v5, 4  ;;  %v947_v23 = vrot.slane %v946_v52, 4  ;;  %v925_v60 = vrot.slane %v924_v32, 2  ;;  %v933_v12 = vrot.slane %v932_v50, 2 }
  0xdb   :  { %v955_v61 = vrot.slane %v954_v2, 4  ;;  %v963_v37 = vrot.slane %v962_v54, 4  ;;  %v910_v45 = vmax.f32 %v908_v19, %v909_v47  ;;  %v918_v29 = vmax.f32 %v916_v34, %v917_v15  ;;  %v6584_v19 = vld [vmem:[#allocation47_spill] sm:$0xff] }
  0xdc   :  { %v940_v38 = vmax.f32 %v938_v5, %v939_v43  ;;  %v948_v58 = vmax.f32 %v946_v52, %v947_v23  ;;  %v926_v36 = vmax.f32 %v924_v32, %v925_v60  ;;  %v934_v44 = vmax.f32 %v932_v50, %v933_v12  ;;  %v6586_v50 = vld [vmem:[#allocation48_spill] sm:$0xff]  ;;  %v6588_v23 = vld [vmem:[#allocation50_spill] sm:$0xff] }
  0xdd   :  { %v956_v22 = vmax.f32 %v954_v2, %v955_v61  ;;  %v964_v51 = vmax.f32 %v962_v54, %v963_v37  ;;  %v911_v31 = vrot.slane %v910_v45, 1  ;;  %v919_v56 = vrot.slane %v918_v29, 1 }
  0xde   :  { %v941_v57 = vrot.slane %v940_v38, 2  ;;  %v949_v3 = vrot.slane %v948_v58, 2  ;;  %v927_v55 = vrot.slane %v926_v36, 1  ;;  %v935_v17 = vrot.slane %v934_v44, 1 }
  0xdf   :  { %v957_v4 = vrot.slane %v956_v22, 2  ;;  %v965_v35 = vrot.slane %v964_v51, 2  ;;  %v4214_v5 = vmax.f32 %v910_v45, %v911_v31  ;;  %v4216_v61 = vmax.f32 %v918_v29, %v919_v56  ;;  %v6599_v56 = vld [vmem:[#allocation49_spill] sm:$0xff] }
  0xe0   :  { %v942_v8 = vmax.f32 %v940_v38, %v941_v57  ;;  %v950_v28 = vmax.f32 %v948_v58, %v949_v3  ;;  %v4218_v47 = vmax.f32 %v926_v36, %v927_v55  ;;  %v4220_v15 = vmax.f32 %v934_v44, %v935_v17  ;;  %v6590_v38 = vld [vmem:[#allocation51_spill] sm:$0xff]  ;;  %v6596_v57 = vld [vmem:[#allocation46_spill] sm:$0xff] }
  0xe1   :  { %v958_v63 = vmax.f32 %v956_v22, %v957_v4  ;;  %v966_v33 = vmax.f32 %v964_v51, %v965_v35  ;;  %6580 = vst [vmem:[#allocation23_spill] sm:$0xff] %v4214_v5  ;;  %6581 = vst [vmem:[#allocation24_spill] sm:$0xff] %v4216_v61  ;;  %v6585_v34 = vunpack.c.l.bf16 %v6584_v19  ;;  %v6587_v43 = vunpack.c.l.bf16 %v6586_v50  ;;  %v6608_v50 = vld [vmem:[#allocation57_spill] sm:$0xff] }
  0xe2   :  { %6582 = vst [vmem:[#allocation26_spill] sm:$0xff] %v4218_v47  ;;  %6583 = vst [vmem:[#allocation27_spill] sm:$0xff] %v4220_v15  ;;  %v943_v37 = vrot.slane %v942_v8, 1  ;;  %v951_v52 = vrot.slane %v950_v28, 1  ;;  %v6589_v60 = vunpack.c.l.bf16 %v6588_v23  ;;  %v6591_v58 = vunpack.c.l.bf16 %v6590_v38 }
  0xe3   :  { %v959_v2 = vrot.slane %v958_v63, 1  ;;  %v967_v54 = vrot.slane %v966_v33, 1  ;;  %v969_v32 = vsel %vm520_vm0, %v6585_v34, -inf  ;;  %v977_v51 = vsel %vm520_vm0, %v6587_v43, -inf }
  0xe4   :  { %v985_v12 = vsel %vm520_vm0, %v6589_v60, -inf  ;;  %v993_v22 = vsel %vm520_vm0, %v6591_v58, -inf  ;;  %v4234_v45 = vmax.f32 %v942_v8, %v943_v37  ;;  %v4236_v29 = vmax.f32 %v950_v28, %v951_v52  ;;  %v6602_v8 = vld [vmem:[#allocation53_spill] sm:$0xff]  ;;  %v6610_v58 = vld [vmem:[#allocation52_spill] sm:$0xff] }
  0xe5   :  { %v4238_v36 = vmax.f32 %v958_v63, %v959_v2  ;;  %v4240_v44 = vmax.f32 %v966_v33, %v967_v54  ;;  %v6597_v3 = vunpack.c.l.bf16 %v6596_v57  ;;  %v6598_v35 = vunpack.c.h.bf16 %v6596_v57  ;;  %v6604_v63 = vld [vmem:[#allocation54_spill] sm:$0xff]  ;;  %v6606_v2 = vld [vmem:[#allocation56_spill] sm:$0xff] }
  0xe6   :  { %6592 = vst [vmem:[#allocation22_spill] sm:$0xff] %v4234_v45  ;;  %6593 = vst [vmem:[#allocation25_spill] sm:$0xff] %v4236_v29  ;;  %v6600_v55 = vunpack.c.l.bf16 %v6599_v56  ;;  %v6601_v19 = vunpack.c.h.bf16 %v6599_v56  ;;  %v6603_v37 = vunpack.c.l.bf16 %v6602_v8  ;;  %v6605_v52 = vunpack.c.l.bf16 %v6604_v63  ;;  %v6613_v56 = vld [vmem:[#allocation55_spill] sm:$0xff] }
  0xe7   :  { %6594 = vst [vmem:[#allocation29_spill] sm:$0xff] %v4238_v36  ;;  %6595 = vst [vmem:[#allocation30_spill] sm:$0xff] %v4240_v44  ;;  %v970_v4 = vmax.f32 %v6597_v3, %v969_v32  ;;  %v978_v31 = vmax.f32 %v6598_v35, %v977_v51  ;;  %v6607_v54 = vunpack.c.l.bf16 %v6606_v2  ;;  %v6609_v43 = vunpack.c.l.bf16 %v6608_v50 }
  0xe8   :  { %v986_v17 = vmax.f32 %v6600_v55, %v985_v12  ;;  %v994_v34 = vmax.f32 %v6601_v19, %v993_v22  ;;  %v1001_v28 = vsel %vm520_vm0, %v6603_v37, -inf  ;;  %v1009_v33 = vsel %vm520_vm0, %v6605_v52, -inf }
  0xe9   :  { %v1017_v32 = vsel %vm520_vm0, %v6607_v54, -inf  ;;  %v1025_v51 = vsel %vm520_vm0, %v6609_v43, -inf  ;;  %v971_v23 = vrot.slane %v970_v4, 4  ;;  %v979_v60 = vrot.slane %v978_v31, 4 }
  0xea   :  { %v987_v12 = vrot.slane %v986_v17, 4  ;;  %v995_v38 = vrot.slane %v994_v34, 4  ;;  %v6611_v22 = vunpack.c.l.bf16 %v6610_v58  ;;  %v6612_v3 = vunpack.c.h.bf16 %v6610_v58 }
  0xeb   :  { %v6614_v55 = vunpack.c.l.bf16 %v6613_v56  ;;  %v6615_v8 = vunpack.c.h.bf16 %v6613_v56  ;;  %v972_v63 = vmax.f32 %v970_v4, %v971_v23  ;;  %v980_v52 = vmax.f32 %v978_v31, %v979_v60 }
  0xec   :  { %v1002_v57 = vmax.f32 %v6611_v22, %v1001_v28  ;;  %v1010_v35 = vmax.f32 %v6612_v3, %v1009_v33  ;;  %v988_v2 = vmax.f32 %v986_v17, %v987_v12  ;;  %v996_v54 = vmax.f32 %v994_v34, %v995_v38 }
  0xed   :  { %v1018_v19 = vmax.f32 %v6614_v55, %v1017_v32  ;;  %v1026_v37 = vmax.f32 %v6615_v8, %v1025_v51  ;;  %v973_v29 = vrot.slane %v972_v63, 2  ;;  %v981_v45 = vrot.slane %v980_v52, 2 }
  0xee   :  { %v1003_v50 = vrot.slane %v1002_v57, 4  ;;  %v1011_v43 = vrot.slane %v1010_v35, 4  ;;  %v989_v28 = vrot.slane %v988_v2, 2  ;;  %v997_v22 = vrot.slane %v996_v54, 2 }
  0xef   :  { %v1019_v44 = vrot.slane %v1018_v19, 4  ;;  %v1027_v36 = vrot.slane %v1026_v37, 4  ;;  %v974_v32 = vmax.f32 %v972_v63, %v973_v29  ;;  %v982_v55 = vmax.f32 %v980_v52, %v981_v45  ;;  %v6620_v63 = vld [vmem:[#allocation59_spill] sm:$0xff] }
  0xf0   :  { %v1004_v58 = vmax.f32 %v1002_v57, %v1003_v50  ;;  %v1012_v33 = vmax.f32 %v1010_v35, %v1011_v43  ;;  %v990_v56 = vmax.f32 %v988_v2, %v989_v28  ;;  %v998_v51 = vmax.f32 %v996_v54, %v997_v22  ;;  %v6622_v54 = vld [vmem:[#allocation60_spill] sm:$0xff]  ;;  %v6624_v43 = vld [vmem:[#allocation62_spill] sm:$0xff] }
  0xf1   :  { %v1020_v3 = vmax.f32 %v1018_v19, %v1019_v44  ;;  %v1028_v15 = vmax.f32 %v1026_v37, %v1027_v36  ;;  %v975_v23 = vrot.slane %v974_v32, 1  ;;  %v983_v60 = vrot.slane %v982_v55, 1 }
  0xf2   :  { %v1005_v4 = vrot.slane %v1004_v58, 2  ;;  %v1013_v31 = vrot.slane %v1012_v33, 2  ;;  %v991_v12 = vrot.slane %v990_v56, 1  ;;  %v999_v38 = vrot.slane %v998_v51, 1 }
  0xf3   :  { %v1021_v17 = vrot.slane %v1020_v3, 2  ;;  %v1029_v34 = vrot.slane %v1028_v15, 2  ;;  %v4270_v57 = vmax.f32 %v974_v32, %v975_v23  ;;  %v4272_v44 = vmax.f32 %v982_v55, %v983_v60  ;;  %v6635_v60 = vld [vmem:[#allocation61_spill] sm:$0xff] }
  0xf4   :  { %v1006_v8 = vmax.f32 %v1004_v58, %v1005_v4  ;;  %v1014_v47 = vmax.f32 %v1012_v33, %v1013_v31  ;;  %v4274_v29 = vmax.f32 %v990_v56, %v991_v12  ;;  %v4276_v45 = vmax.f32 %v998_v51, %v999_v38  ;;  %v6626_v58 = vld [vmem:[#allocation63_spill] sm:$0xff]  ;;  %v6632_v4 = vld [vmem:[#allocation58_spill] sm:$0xff] }
  0xf5   :  { %v1022_v61 = vmax.f32 %v1020_v3, %v1021_v17  ;;  %v1030_v5 = vmax.f32 %v1028_v15, %v1029_v34  ;;  %6616 = vst [vmem:[#allocation32_spill] sm:$0xff] %v4270_v57  ;;  %6617 = vst [vmem:[#allocation33_spill] sm:$0xff] %v4272_v44  ;;  %v6621_v52 = vunpack.c.l.bf16 %v6620_v63  ;;  %v6623_v50 = vunpack.c.l.bf16 %v6622_v54  ;;  %v6644_v54 = vld [vmem:[#allocation69_spill] sm:$0xff] }
  0xf6   :  { %6618 = vst [vmem:[#allocation28_spill] sm:$0xff] %v4274_v29  ;;  %6619 = vst [vmem:[#allocation31_spill] sm:$0xff] %v4276_v45  ;;  %v1007_v36 = vrot.slane %v1006_v8, 1  ;;  %v1015_v35 = vrot.slane %v1014_v47, 1  ;;  %v6625_v28 = vunpack.c.l.bf16 %v6624_v43  ;;  %v6627_v33 = vunpack.c.l.bf16 %v6626_v58 }
  0xf7   :  { %v1023_v19 = vrot.slane %v1022_v61, 1  ;;  %v1031_v37 = vrot.slane %v1030_v5, 1  ;;  %v1033_v2 = vsel %vm520_vm0, %v6621_v52, -inf  ;;  %v1041_v15 = vsel %vm520_vm0, %v6623_v50, -inf }
  0xf8   :  { %v1049_v22 = vsel %vm520_vm0, %v6625_v28, -inf  ;;  %v1057_v3 = vsel %vm520_vm0, %v6627_v33, -inf  ;;  %v4290_v32 = vmax.f32 %v1006_v8, %v1007_v36  ;;  %v4292_v55 = vmax.f32 %v1014_v47, %v1015_v35  ;;  %v6638_v8 = vld [vmem:[#allocation65_spill] sm:$0xff]  ;;  %v6646_v33 = vld [vmem:[#allocation64_spill] sm:$0xff] }
  0xf9   :  { %v4294_v56 = vmax.f32 %v1022_v61, %v1023_v19  ;;  %v4296_v51 = vmax.f32 %v1030_v5, %v1031_v37  ;;  %v6633_v31 = vunpack.c.l.bf16 %v6632_v4  ;;  %v6634_v34 = vunpack.c.h.bf16 %v6632_v4  ;;  %v6640_v61 = vld [vmem:[#allocation66_spill] sm:$0xff]  ;;  %v6642_v19 = vld [vmem:[#allocation68_spill] sm:$0xff] }
  0xfa   :  { %6628 = vst [vmem:[#allocation35_spill] sm:$0xff] %v4290_v32  ;;  %6629 = vst [vmem:[#allocation36_spill] sm:$0xff] %v4292_v55  ;;  %v6636_v12 = vunpack.c.l.bf16 %v6635_v60  ;;  %v6637_v63 = vunpack.c.h.bf16 %v6635_v60  ;;  %v6639_v36 = vunpack.c.l.bf16 %v6638_v8  ;;  %v6641_v35 = vunpack.c.l.bf16 %v6640_v61  ;;  %v6649_v60 = vld [vmem:[#allocation67_spill] sm:$0xff] }
  0xfb   :  { %6630 = vst [vmem:[#allocation38_spill] sm:$0xff] %v4294_v56  ;;  %6631 = vst [vmem:[#allocation39_spill] sm:$0xff] %v4296_v51  ;;  %v1034_v17 = vmax.f32 %v6633_v31, %v1033_v2  ;;  %v1042_v23 = vmax.f32 %v6634_v34, %v1041_v15  ;;  %v6643_v37 = vunpack.c.l.bf16 %v6642_v19  ;;  %v6645_v50 = vunpack.c.l.bf16 %v6644_v54 }
  0xfc   :  { %v1050_v38 = vmax.f32 %v6636_v12, %v1049_v22  ;;  %v1058_v52 = vmax.f32 %v6637_v63, %v1057_v3  ;;  %v1065_v47 = vsel %vm520_vm0, %v6639_v36, -inf  ;;  %v1073_v5 = vsel %vm520_vm0, %v6641_v35, -inf }
  0xfd   :  { %v1081_v2 = vsel %vm520_vm0, %v6643_v37, -inf  ;;  %v1089_v15 = vsel %vm520_vm0, %v6645_v50, -inf  ;;  %v1035_v43 = vrot.slane %v1034_v17, 4  ;;  %v1043_v28 = vrot.slane %v1042_v23, 4 }
  0xfe   :  { %v1051_v22 = vrot.slane %v1050_v38, 4  ;;  %v1059_v58 = vrot.slane %v1058_v52, 4  ;;  %v6647_v3 = vunpack.c.l.bf16 %v6646_v33  ;;  %v6648_v31 = vunpack.c.h.bf16 %v6646_v33 }
  0xff   :  { %v6650_v12 = vunpack.c.l.bf16 %v6649_v60  ;;  %v6651_v8 = vunpack.c.h.bf16 %v6649_v60  ;;  %v1036_v61 = vmax.f32 %v1034_v17, %v1035_v43  ;;  %v1044_v35 = vmax.f32 %v1042_v23, %v1043_v28 }
 0x100   :  { %v1066_v4 = vmax.f32 %v6647_v3, %v1065_v47  ;;  %v1074_v34 = vmax.f32 %v6648_v31, %v1073_v5  ;;  %v1052_v19 = vmax.f32 %v1050_v38, %v1051_v22  ;;  %v1060_v37 = vmax.f32 %v1058_v52, %v1059_v58 }
 0x101   :  { %v1082_v63 = vmax.f32 %v6650_v12, %v1081_v2  ;;  %v1090_v36 = vmax.f32 %v6651_v8, %v1089_v15  ;;  %v1037_v55 = vrot.slane %v1036_v61, 2  ;;  %v1045_v32 = vrot.slane %v1044_v35, 2 }
 0x102   :  { %v1067_v54 = vrot.slane %v1066_v4, 4  ;;  %v1075_v50 = vrot.slane %v1074_v34, 4  ;;  %v1053_v47 = vrot.slane %v1052_v19, 2  ;;  %v1061_v3 = vrot.slane %v1060_v37, 2 }
 0x103   :  { %v1083_v51 = vrot.slane %v1082_v63, 4  ;;  %v1091_v56 = vrot.slane %v1090_v36, 4  ;;  %v1038_v2 = vmax.f32 %v1036_v61, %v1037_v55  ;;  %v1046_v12 = vmax.f32 %v1044_v35, %v1045_v32  ;;  %v6656_v61 = vld [vmem:[#allocation71_spill] sm:$0xff] }
 0x104   :  { %v1068_v33 = vmax.f32 %v1066_v4, %v1067_v54  ;;  %v1076_v5 = vmax.f32 %v1074_v34, %v1075_v50  ;;  %v1054_v60 = vmax.f32 %v1052_v19, %v1053_v47  ;;  %v1062_v15 = vmax.f32 %v1060_v37, %v1061_v3  ;;  %v6658_v37 = vld [vmem:[#allocation72_spill] sm:$0xff]  ;;  %v6660_v50 = vld [vmem:[#allocation74_spill] sm:$0xff] }
 0x105   :  { %v1084_v31 = vmax.f32 %v1082_v63, %v1083_v51  ;;  %v1092_v45 = vmax.f32 %v1090_v36, %v1091_v56  ;;  %v1039_v43 = vrot.slane %v1038_v2, 1  ;;  %v1047_v28 = vrot.slane %v1046_v12, 1 }
 0x106   :  { %v1069_v17 = vrot.slane %v1068_v33, 2  ;;  %v1077_v23 = vrot.slane %v1076_v5, 2  ;;  %v1055_v22 = vrot.slane %v1054_v60, 1  ;;  %v1063_v58 = vrot.slane %v1062_v15, 1 }
 0x107   :  { %v1085_v38 = vrot.slane %v1084_v31, 2  ;;  %v1093_v52 = vrot.slane %v1092_v45, 2  ;;  %v4326_v4 = vmax.f32 %v1038_v2, %v1039_v43  ;;  %v4328_v51 = vmax.f32 %v1046_v12, %v1047_v28  ;;  %v6671_v28 = vld [vmem:[#allocation73_spill] sm:$0xff] }
 0x108   :  { %v1070_v8 = vmax.f32 %v1068_v33, %v1069_v17  ;;  %v1078_v29 = vmax.f32 %v1076_v5, %v1077_v23  ;;  %v4330_v55 = vmax.f32 %v1054_v60, %v1055_v22  ;;  %v4332_v32 = vmax.f32 %v1062_v15, %v1063_v58  ;;  %v6662_v33 = vld [vmem:[#allocation75_spill] sm:$0xff]  ;;  %v6668_v17 = vld [vmem:[#allocation70_spill] sm:$0xff] }
 0x109   :  { %v1086_v44 = vmax.f32 %v1084_v31, %v1085_v38  ;;  %v1094_v57 = vmax.f32 %v1092_v45, %v1093_v52  ;;  %6652 = vst [vmem:[#allocation34_spill] sm:$0xff] %v4326_v4  ;;  %6653 = vst [vmem:[#allocation37_spill] sm:$0xff] %v4328_v51  ;;  %v6657_v35 = vunpack.c.l.bf16 %v6656_v61  ;;  %v6659_v54 = vunpack.c.l.bf16 %v6658_v37  ;;  %v6680_v37 = vld [vmem:[#allocation81_spill] sm:$0xff] }
 0x10a   :  { %6654 = vst [vmem:[#allocation41_spill] sm:$0xff] %v4330_v55  ;;  %6655 = vst [vmem:[#allocation42_spill] sm:$0xff] %v4332_v32  ;;  %v1071_v56 = vrot.slane %v1070_v8, 1  ;;  %v1079_v34 = vrot.slane %v1078_v29, 1  ;;  %v6661_v47 = vunpack.c.l.bf16 %v6660_v50  ;;  %v6663_v5 = vunpack.c.l.bf16 %v6662_v33 }
 0x10b   :  { %v1087_v63 = vrot.slane %v1086_v44, 1  ;;  %v1095_v36 = vrot.slane %v1094_v57, 1  ;;  %v1097_v19 = vsel %vm520_vm0, %v6657_v35, -inf  ;;  %v1105_v45 = vsel %vm520_vm0, %v6659_v54, -inf }
 0x10c   :  { %v1113_v3 = vsel %vm520_vm0, %v6661_v47, -inf  ;;  %v1121_v31 = vsel %vm520_vm0, %v6663_v5, -inf  ;;  %v4346_v2 = vmax.f32 %v1070_v8, %v1071_v56  ;;  %v4348_v12 = vmax.f32 %v1078_v29, %v1079_v34  ;;  %v6674_v8 = vld [vmem:[#allocation77_spill] sm:$0xff]  ;;  %v6682_v5 = vld [vmem:[#allocation76_spill] sm:$0xff] }
 0x10d   :  { %v4350_v60 = vmax.f32 %v1086_v44, %v1087_v63  ;;  %v4352_v15 = vmax.f32 %v1094_v57, %v1095_v36  ;;  %v6669_v23 = vunpack.c.l.bf16 %v6668_v17  ;;  %v6670_v52 = vunpack.c.h.bf16 %v6668_v17  ;;  %v6676_v44 = vld [vmem:[#allocation78_spill] sm:$0xff]  ;;  %v6678_v63 = vld [vmem:[#allocation80_spill] sm:$0xff] }
 0x10e   :  { %6664 = vst [vmem:[#allocation44_spill] sm:$0xff] %v4346_v2  ;;  %6665 = vst [vmem:[#allocation45_spill] sm:$0xff] %v4348_v12  ;;  %v6672_v22 = vunpack.c.l.bf16 %v6671_v28  ;;  %v6673_v61 = vunpack.c.h.bf16 %v6671_v28  ;;  %v6675_v56 = vunpack.c.l.bf16 %v6674_v8  ;;  %v6677_v34 = vunpack.c.l.bf16 %v6676_v44  ;;  %v6685_v28 = vld [vmem:[#allocation79_spill] sm:$0xff] }
 0x10f   :  { %6666 = vst [vmem:[#allocation40_spill] sm:$0xff] %v4350_v60  ;;  %6667 = vst [vmem:[#allocation43_spill] sm:$0xff] %v4352_v15  ;;  %v1098_v38 = vmax.f32 %v6669_v23, %v1097_v19  ;;  %v1106_v43 = vmax.f32 %v6670_v52, %v1105_v45  ;;  %v6679_v36 = vunpack.c.l.bf16 %v6678_v63  ;;  %v6681_v54 = vunpack.c.l.bf16 %v6680_v37 }
 0x110   :  { %v1114_v58 = vmax.f32 %v6672_v22, %v1113_v3  ;;  %v1122_v35 = vmax.f32 %v6673_v61, %v1121_v31  ;;  %v1129_v29 = vsel %vm520_vm0, %v6675_v56, -inf  ;;  %v1137_v57 = vsel %vm520_vm0, %v6677_v34, -inf }
 0x111   :  { %v1145_v19 = vsel %vm520_vm0, %v6679_v36, -inf  ;;  %v1153_v45 = vsel %vm520_vm0, %v6681_v54, -inf  ;;  %v1099_v50 = vrot.slane %v1098_v38, 4  ;;  %v1107_v47 = vrot.slane %v1106_v43, 4 }
 0x112   :  { %v1115_v3 = vrot.slane %v1114_v58, 4  ;;  %v1123_v33 = vrot.slane %v1122_v35, 4  ;;  %v6683_v31 = vunpack.c.l.bf16 %v6682_v5  ;;  %v6684_v23 = vunpack.c.h.bf16 %v6682_v5 }
 0x113   :  { %v6686_v22 = vunpack.c.l.bf16 %v6685_v28  ;;  %v6687_v8 = vunpack.c.h.bf16 %v6685_v28  ;;  %v1100_v44 = vmax.f32 %v1098_v38, %v1099_v50  ;;  %v1108_v34 = vmax.f32 %v1106_v43, %v1107_v47 }
 0x114   :  { %v1130_v17 = vmax.f32 %v6683_v31, %v1129_v29  ;;  %v1138_v52 = vmax.f32 %v6684_v23, %v1137_v57  ;;  %v1116_v63 = vmax.f32 %v1114_v58, %v1115_v3  ;;  %v1124_v36 = vmax.f32 %v1122_v35, %v1123_v33 }
 0x115   :  { %v1146_v61 = vmax.f32 %v6686_v22, %v1145_v19  ;;  %v1154_v56 = vmax.f32 %v6687_v8, %v1153_v45  ;;  %v1101_v12 = vrot.slane %v1100_v44, 2  ;;  %v1109_v2 = vrot.slane %v1108_v34, 2 }
 0x116   :  { %v1131_v37 = vrot.slane %v1130_v17, 4  ;;  %v1139_v54 = vrot.slane %v1138_v52, 4  ;;  %v1117_v29 = vrot.slane %v1116_v63, 2  ;;  %v1125_v31 = vrot.slane %v1124_v36, 2 }
 0x117   :  { %v1147_v15 = vrot.slane %v1146_v61, 4  ;;  %v1155_v60 = vrot.slane %v1154_v56, 4  ;;  %v1102_v19 = vmax.f32 %v1100_v44, %v1101_v12  ;;  %v1110_v22 = vmax.f32 %v1108_v34, %v1109_v2  ;;  %v6692_v44 = vld [vmem:[#allocation83_spill] sm:$0xff] }
 0x118   :  { %v1132_v5 = vmax.f32 %v1130_v17, %v1131_v37  ;;  %v1140_v57 = vmax.f32 %v1138_v52, %v1139_v54  ;;  %v1118_v28 = vmax.f32 %v1116_v63, %v1117_v29  ;;  %v1126_v45 = vmax.f32 %v1124_v36, %v1125_v31  ;;  %v6694_v36 = vld [vmem:[#allocation84_spill] sm:$0xff]  ;;  %v6696_v54 = vld [vmem:[#allocation86_spill] sm:$0xff] }
 0x119   :  { %v1148_v23 = vmax.f32 %v1146_v61, %v1147_v15  ;;  %v1156_v32 = vmax.f32 %v1154_v56, %v1155_v60  ;;  %v1103_v50 = vrot.slane %v1102_v19, 1  ;;  %v1111_v47 = vrot.slane %v1110_v22, 1 }
 0x11a   :  { %v1133_v38 = vrot.slane %v1132_v5, 2  ;;  %v1141_v43 = vrot.slane %v1140_v57, 2  ;;  %v1119_v3 = vrot.slane %v1118_v28, 1  ;;  %v1127_v33 = vrot.slane %v1126_v45, 1 }
 0x11b   :  { %v1149_v58 = vrot.slane %v1148_v23, 2  ;;  %v1157_v35 = vrot.slane %v1156_v32, 2  ;;  %v4382_v17 = vmax.f32 %v1102_v19, %v1103_v50  ;;  %v4384_v15 = vmax.f32 %v1110_v22, %v1111_v47  ;;  %v6707_v47 = vld [vmem:[#allocation85_spill] sm:$0xff] }
 0x11c   :  { %v1134_v8 = vmax.f32 %v1132_v5, %v1133_v38  ;;  %v1142_v55 = vmax.f32 %v1140_v57, %v1141_v43  ;;  %v4386_v12 = vmax.f32 %v1118_v28, %v1119_v3  ;;  %v4388_v2 = vmax.f32 %v1126_v45, %v1127_v33  ;;  %v6698_v5 = vld [vmem:[#allocation87_spill] sm:$0xff]  ;;  %v6704_v38 = vld [vmem:[#allocation82_spill] sm:$0xff] }
 0x11d   :  { %v1150_v51 = vmax.f32 %v1148_v23, %v1149_v58  ;;  %v1158_v4 = vmax.f32 %v1156_v32, %v1157_v35  ;;  %6688 = vst [vmem:[#allocation47_spill] sm:$0xff] %v4382_v17  ;;  %6689 = vst [vmem:[#allocation48_spill] sm:$0xff] %v4384_v15  ;;  %v6693_v34 = vunpack.c.l.bf16 %v6692_v44  ;;  %v6695_v37 = vunpack.c.l.bf16 %v6694_v36  ;;  %v6716_v36 = vld [vmem:[#allocation93_spill] sm:$0xff] }
 0x11e   :  { %6690 = vst [vmem:[#allocation50_spill] sm:$0xff] %v4386_v12  ;;  %6691 = vst [vmem:[#allocation51_spill] sm:$0xff] %v4388_v2  ;;  %v1135_v60 = vrot.slane %v1134_v8, 1  ;;  %v1143_v52 = vrot.slane %v1142_v55, 1  ;;  %v6697_v29 = vunpack.c.l.bf16 %v6696_v54  ;;  %v6699_v57 = vunpack.c.l.bf16 %v6698_v5 }
 0x11f   :  { %v1151_v61 = vrot.slane %v1150_v51, 1  ;;  %v1159_v56 = vrot.slane %v1158_v4, 1  ;;  %v1161_v63 = vsel %vm520_vm0, %v6693_v34, -inf  ;;  %v1169_v32 = vsel %vm520_vm0, %v6695_v37, -inf }
 0x120   :  { %v1177_v31 = vsel %vm520_vm0, %v6697_v29, -inf  ;;  %v1185_v23 = vsel %vm520_vm0, %v6699_v57, -inf  ;;  %v4402_v19 = vmax.f32 %v1134_v8, %v1135_v60  ;;  %v4404_v22 = vmax.f32 %v1142_v55, %v1143_v52  ;;  %v6710_v8 = vld [vmem:[#allocation89_spill] sm:$0xff]  ;;  %v6718_v57 = vld [vmem:[#allocation88_spill] sm:$0xff] }
 0x121   :  { %v4406_v28 = vmax.f32 %v1150_v51, %v1151_v61  ;;  %v4408_v45 = vmax.f32 %v1158_v4, %v1159_v56  ;;  %v6705_v43 = vunpack.c.l.bf16 %v6704_v38  ;;  %v6706_v35 = vunpack.c.h.bf16 %v6704_v38  ;;  %v6712_v51 = vld [vmem:[#allocation90_spill] sm:$0xff]  ;;  %v6714_v61 = vld [vmem:[#allocation92_spill] sm:$0xff] }
 0x122   :  { %6700 = vst [vmem:[#allocation46_spill] sm:$0xff] %v4402_v19  ;;  %6701 = vst [vmem:[#allocation49_spill] sm:$0xff] %v4404_v22  ;;  %v6708_v3 = vunpack.c.l.bf16 %v6707_v47  ;;  %v6709_v44 = vunpack.c.h.bf16 %v6707_v47  ;;  %v6711_v60 = vunpack.c.l.bf16 %v6710_v8  ;;  %v6713_v52 = vunpack.c.l.bf16 %v6712_v51  ;;  %v6721_v47 = vld [vmem:[#allocation91_spill] sm:$0xff] }
 0x123   :  { %6702 = vst [vmem:[#allocation53_spill] sm:$0xff] %v4406_v28  ;;  %6703 = vst [vmem:[#allocation54_spill] sm:$0xff] %v4408_v45  ;;  %v1162_v58 = vmax.f32 %v6705_v43, %v1161_v63  ;;  %v1170_v50 = vmax.f32 %v6706_v35, %v1169_v32  ;;  %v6715_v56 = vunpack.c.l.bf16 %v6714_v61  ;;  %v6717_v37 = vunpack.c.l.bf16 %v6716_v36 }
 0x124   :  { %v1178_v33 = vmax.f32 %v6708_v3, %v1177_v31  ;;  %v1186_v34 = vmax.f32 %v6709_v44, %v1185_v23  ;;  %v1193_v55 = vsel %vm520_vm0, %v6711_v60, -inf  ;;  %v1201_v4 = vsel %vm520_vm0, %v6713_v52, -inf }
 0x125   :  { %v1209_v63 = vsel %vm520_vm0, %v6715_v56, -inf  ;;  %v1217_v32 = vsel %vm520_vm0, %v6717_v37, -inf  ;;  %v1163_v54 = vrot.slane %v1162_v58, 4  ;;  %v1171_v29 = vrot.slane %v1170_v50, 4 }
 0x126   :  { %v1179_v31 = vrot.slane %v1178_v33, 4  ;;  %v1187_v5 = vrot.slane %v1186_v34, 4  ;;  %v6719_v23 = vunpack.c.l.bf16 %v6718_v57  ;;  %v6720_v43 = vunpack.c.h.bf16 %v6718_v57 }
 0x127   :  { %v6722_v3 = vunpack.c.l.bf16 %v6721_v47  ;;  %v6723_v8 = vunpack.c.h.bf16 %v6721_v47  ;;  %v1164_v51 = vmax.f32 %v1162_v58, %v1163_v54  ;;  %v1172_v52 = vmax.f32 %v1170_v50, %v1171_v29 }
 0x128   :  { %v1194_v38 = vmax.f32 %v6719_v23, %v1193_v55  ;;  %v1202_v35 = vmax.f32 %v6720_v43, %v1201_v4  ;;  %v1180_v61 = vmax.f32 %v1178_v33, %v1179_v31  ;;  %v1188_v56 = vmax.f32 %v1186_v34, %v1187_v5 }
 0x129   :  { %v1210_v44 = vmax.f32 %v6722_v3, %v1209_v63  ;;  %v1218_v60 = vmax.f32 %v6723_v8, %v1217_v32  ;;  %v1165_v22 = vrot.slane %v1164_v51, 2  ;;  %v1173_v19 = vrot.slane %v1172_v52, 2 }
 0x12a   :  { %v1195_v36 = vrot.slane %v1194_v38, 4  ;;  %v1203_v37 = vrot.slane %v1202_v35, 4  ;;  %v1181_v55 = vrot.slane %v1180_v61, 2  ;;  %v1189_v23 = vrot.slane %v1188_v56, 2 }
 0x12b   :  { %v1211_v45 = vrot.slane %v1210_v44, 4  ;;  %v1219_v28 = vrot.slane %v1218_v60, 4  ;;  %v1166_v63 = vmax.f32 %v1164_v51, %v1165_v22  ;;  %v1174_v3 = vmax.f32 %v1172_v52, %v1173_v19  ;;  %v6728_v51 = vld [vmem:[#allocation95_spill] sm:$0xff] }
 0x12c   :  { %v1196_v57 = vmax.f32 %v1194_v38, %v1195_v36  ;;  %v1204_v4 = vmax.f32 %v1202_v35, %v1203_v37  ;;  %v1182_v47 = vmax.f32 %v1180_v61, %v1181_v55  ;;  %v1190_v32 = vmax.f32 %v1188_v56, %v1189_v23  ;;  %v6730_v56 = vld [vmem:[#allocation96_spill] sm:$0xff]  ;;  %v6732_v37 = vld [vmem:[#allocation98_spill] sm:$0xff] }
 0x12d   :  { %v1212_v43 = vmax.f32 %v1210_v44, %v1211_v45  ;;  %v1220_v2 = vmax.f32 %v1218_v60, %v1219_v28  ;;  %v1167_v54 = vrot.slane %v1166_v63, 1  ;;  %v1175_v29 = vrot.slane %v1174_v3, 1 }
 0x12e   :  { %v1197_v58 = vrot.slane %v1196_v57, 2  ;;  %v1205_v50 = vrot.slane %v1204_v4, 2  ;;  %v1183_v31 = vrot.slane %v1182_v47, 1  ;;  %v1191_v5 = vrot.slane %v1190_v32, 1 }
 0x12f   :  { %v1213_v33 = vrot.slane %v1212_v43, 2  ;;  %v1221_v34 = vrot.slane %v1220_v2, 2  ;;  %v4438_v38 = vmax.f32 %v1166_v63, %v1167_v54  ;;  %v4440_v45 = vmax.f32 %v1174_v3, %v1175_v29  ;;  %v6743_v29 = vld [vmem:[#allocation97_spill] sm:$0xff] }
 0x130   :  { %v1198_v8 = vmax.f32 %v1196_v57, %v1197_v58  ;;  %v1206_v12 = vmax.f32 %v1204_v4, %v1205_v50  ;;  %v4442_v22 = vmax.f32 %v1182_v47, %v1183_v31  ;;  %v4444_v19 = vmax.f32 %v1190_v32, %v1191_v5  ;;  %v6734_v57 = vld [vmem:[#allocation99_spill] sm:$0xff]  ;;  %v6740_v58 = vld [vmem:[#allocation94_spill] sm:$0xff] }
 0x131   :  { %v1214_v15 = vmax.f32 %v1212_v43, %v1213_v33  ;;  %v1222_v17 = vmax.f32 %v1220_v2, %v1221_v34  ;;  %6724 = vst [vmem:[#allocation56_spill] sm:$0xff] %v4438_v38  ;;  %6725 = vst [vmem:[#allocation57_spill] sm:$0xff] %v4440_v45  ;;  %v6729_v52 = vunpack.c.l.bf16 %v6728_v51  ;;  %v6731_v36 = vunpack.c.l.bf16 %v6730_v56  ;;  %v6752_v56 = vld [vmem:[#allocation105_spill] sm:$0xff] }
 0x132   :  { %6726 = vst [vmem:[#allocation52_spill] sm:$0xff] %v4442_v22  ;;  %6727 = vst [vmem:[#allocation55_spill] sm:$0xff] %v4444_v19  ;;  %v1199_v28 = vrot.slane %v1198_v8, 1  ;;  %v1207_v35 = vrot.slane %v1206_v12, 1  ;;  %v6733_v55 = vunpack.c.l.bf16 %v6732_v37  ;;  %v6735_v4 = vunpack.c.l.bf16 %v6734_v57 }
 0x133   :  { %v1215_v44 = vrot.slane %v1214_v15, 1  ;;  %v1223_v60 = vrot.slane %v1222_v17, 1  ;;  %v1225_v61 = vsel %vm520_vm0, %v6729_v52, -inf  ;;  %v1233_v2 = vsel %vm520_vm0, %v6731_v36, -inf }
 0x134   :  { %v1241_v23 = vsel %vm520_vm0, %v6733_v55, -inf  ;;  %v1249_v43 = vsel %vm520_vm0, %v6735_v4, -inf  ;;  %v4458_v63 = vmax.f32 %v1198_v8, %v1199_v28  ;;  %v4460_v3 = vmax.f32 %v1206_v12, %v1207_v35  ;;  %v6746_v8 = vld [vmem:[#allocation101_spill] sm:$0xff]  ;;  %v6754_v4 = vld [vmem:[#allocation100_spill] sm:$0xff] }
 0x135   :  { %v4462_v47 = vmax.f32 %v1214_v15, %v1215_v44  ;;  %v4464_v32 = vmax.f32 %v1222_v17, %v1223_v60  ;;  %v6741_v50 = vunpack.c.l.bf16 %v6740_v58  ;;  %v6742_v34 = vunpack.c.h.bf16 %v6740_v58  ;;  %v6748_v15 = vld [vmem:[#allocation102_spill] sm:$0xff]  ;;  %v6750_v44 = vld [vmem:[#allocation104_spill] sm:$0xff] }
 0x136   :  { %6736 = vst [vmem:[#allocation59_spill] sm:$0xff] %v4458_v63  ;;  %6737 = vst [vmem:[#allocation60_spill] sm:$0xff] %v4460_v3  ;;  %v6744_v31 = vunpack.c.l.bf16 %v6743_v29  ;;  %v6745_v51 = vunpack.c.h.bf16 %v6743_v29  ;;  %v6747_v28 = vunpack.c.l.bf16 %v6746_v8  ;;  %v6749_v35 = vunpack.c.l.bf16 %v6748_v15  ;;  %v6757_v29 = vld [vmem:[#allocation103_spill] sm:$0xff] }
 0x137   :  { %6738 = vst [vmem:[#allocation62_spill] sm:$0xff] %v4462_v47  ;;  %6739 = vst [vmem:[#allocation63_spill] sm:$0xff] %v4464_v32  ;;  %v1226_v33 = vmax.f32 %v6741_v50, %v1225_v61  ;;  %v1234_v54 = vmax.f32 %v6742_v34, %v1233_v2  ;;  %v6751_v60 = vunpack.c.l.bf16 %v6750_v44  ;;  %v6753_v36 = vunpack.c.l.bf16 %v6752_v56 }
 0x138   :  { %v1242_v5 = vmax.f32 %v6744_v31, %v1241_v23  ;;  %v1250_v52 = vmax.f32 %v6745_v51, %v1249_v43  ;;  %v1257_v12 = vsel %vm520_vm0, %v6747_v28, -inf  ;;  %v1265_v17 = vsel %vm520_vm0, %v6749_v35, -inf }
 0x139   :  { %v1273_v61 = vsel %vm520_vm0, %v6751_v60, -inf  ;;  %v1281_v2 = vsel %vm520_vm0, %v6753_v36, -inf  ;;  %v1227_v37 = vrot.slane %v1226_v33, 4  ;;  %v1235_v55 = vrot.slane %v1234_v54, 4 }
 0x13a   :  { %v1243_v23 = vrot.slane %v1242_v5, 4  ;;  %v1251_v57 = vrot.slane %v1250_v52, 4  ;;  %v6755_v43 = vunpack.c.l.bf16 %v6754_v4  ;;  %v6756_v50 = vunpack.c.h.bf16 %v6754_v4 }
 0x13b   :  { %v6758_v31 = vunpack.c.l.bf16 %v6757_v29  ;;  %v6759_v8 = vunpack.c.h.bf16 %v6757_v29  ;;  %v1228_v15 = vmax.f32 %v1226_v33, %v1227_v37  ;;  %v1236_v35 = vmax.f32 %v1234_v54, %v1235_v55 }
 0x13c   :  { %v1258_v58 = vmax.f32 %v6755_v43, %v1257_v12  ;;  %v1266_v34 = vmax.f32 %v6756_v50, %v1265_v17  ;;  %v1244_v44 = vmax.f32 %v1242_v5, %v1243_v23  ;;  %v1252_v60 = vmax.f32 %v1250_v52, %v1251_v57 }
 0x13d   :  { %v1274_v51 = vmax.f32 %v6758_v31, %v1273_v61  ;;  %v1282_v28 = vmax.f32 %v6759_v8, %v1281_v2  ;;  %v1229_v3 = vrot.slane %v1228_v15, 2  ;;  %v1237_v63 = vrot.slane %v1236_v35, 2 }
 0x13e   :  { %v1259_v56 = vrot.slane %v1258_v58, 4  ;;  %v1267_v36 = vrot.slane %v1266_v34, 4  ;;  %v1245_v12 = vrot.slane %v1244_v44, 2  ;;  %v1253_v43 = vrot.slane %v1252_v60, 2 }
 0x13f   :  { %v1275_v32 = vrot.slane %v1274_v51, 4  ;;  %v1283_v47 = vrot.slane %v1282_v28, 4  ;;  %v1230_v61 = vmax.f32 %v1228_v15, %v1229_v3  ;;  %v1238_v31 = vmax.f32 %v1236_v35, %v1237_v63  ;;  %v6764_v15 = vld [vmem:[#allocation107_spill] sm:$0xff] }
 0x140   :  { %v1260_v4 = vmax.f32 %v1258_v58, %v1259_v56  ;;  %v1268_v17 = vmax.f32 %v1266_v34, %v1267_v36  ;;  %v1246_v29 = vmax.f32 %v1244_v44, %v1245_v12  ;;  %v1254_v2 = vmax.f32 %v1252_v60, %v1253_v43  ;;  %v6766_v60 = vld [vmem:[#allocation108_spill] sm:$0xff]  ;;  %v6768_v36 = vld [vmem:[#allocation110_spill] sm:$0xff] }
 0x141   :  { %v1276_v50 = vmax.f32 %v1274_v51, %v1275_v32  ;;  %v1284_v19 = vmax.f32 %v1282_v28, %v1283_v47  ;;  %v1231_v37 = vrot.slane %v1230_v61, 1  ;;  %v1239_v55 = vrot.slane %v1238_v31, 1 }
 0x142   :  { %v1261_v33 = vrot.slane %v1260_v4, 2  ;;  %v1269_v54 = vrot.slane %v1268_v17, 2  ;;  %v1247_v23 = vrot.slane %v1246_v29, 1  ;;  %v1255_v57 = vrot.slane %v1254_v2, 1 }
 0x143   :  { %v1277_v5 = vrot.slane %v1276_v50, 2  ;;  %v1285_v52 = vrot.slane %v1284_v19, 2  ;;  %v4494_v58 = vmax.f32 %v1230_v61, %v1231_v37  ;;  %v4496_v32 = vmax.f32 %v1238_v31, %v1239_v55  ;;  %v6779_v55 = vld [vmem:[#allocation109_spill] sm:$0xff] }
 0x144   :  { %v1262_v8 = vmax.f32 %v1260_v4, %v1261_v33  ;;  %v1270_v22 = vmax.f32 %v1268_v17, %v1269_v54  ;;  %v4498_v3 = vmax.f32 %v1246_v29, %v1247_v23  ;;  %v4500_v63 = vmax.f32 %v1254_v2, %v1255_v57  ;;  %v6770_v4 = vld [vmem:[#allocation111_spill] sm:$0xff]  ;;  %v6776_v33 = vld [vmem:[#allocation106_spill] sm:$0xff] }
 0x145   :  { %v1278_v45 = vmax.f32 %v1276_v50, %v1277_v5  ;;  %v1286_v38 = vmax.f32 %v1284_v19, %v1285_v52  ;;  %6760 = vst [vmem:[#allocation58_spill] sm:$0xff] %v4494_v58  ;;  %6761 = vst [vmem:[#allocation61_spill] sm:$0xff] %v4496_v32  ;;  %v6765_v35 = vunpack.c.l.bf16 %v6764_v15  ;;  %v6767_v56 = vunpack.c.l.bf16 %v6766_v60  ;;  %v6788_v60 = vld [vmem:[#allocation117_spill] sm:$0xff] }
 0x146   :  { %6762 = vst [vmem:[#allocation65_spill] sm:$0xff] %v4498_v3  ;;  %6763 = vst [vmem:[#allocation66_spill] sm:$0xff] %v4500_v63  ;;  %v1263_v47 = vrot.slane %v1262_v8, 1  ;;  %v1271_v34 = vrot.slane %v1270_v22, 1  ;;  %v6769_v12 = vunpack.c.l.bf16 %v6768_v36  ;;  %v6771_v17 = vunpack.c.l.bf16 %v6770_v4 }
 0x147   :  { %v1279_v51 = vrot.slane %v1278_v45, 1  ;;  %v1287_v28 = vrot.slane %v1286_v38, 1  ;;  %v1289_v44 = vsel %vm520_vm0, %v6765_v35, -inf  ;;  %v1297_v19 = vsel %vm520_vm0, %v6767_v56, -inf }
 0x148   :  { %v1305_v43 = vsel %vm520_vm0, %v6769_v12, -inf  ;;  %v1313_v50 = vsel %vm520_vm0, %v6771_v17, -inf  ;;  %v4514_v61 = vmax.f32 %v1262_v8, %v1263_v47  ;;  %v4516_v31 = vmax.f32 %v1270_v22, %v1271_v34  ;;  %v6782_v8 = vld [vmem:[#allocation113_spill] sm:$0xff]  ;;  %v6790_v17 = vld [vmem:[#allocation112_spill] sm:$0xff] }
 0x149   :  { %v4518_v29 = vmax.f32 %v1278_v45, %v1279_v51  ;;  %v4520_v2 = vmax.f32 %v1286_v38, %v1287_v28  ;;  %v6777_v54 = vunpack.c.l.bf16 %v6776_v33  ;;  %v6778_v52 = vunpack.c.h.bf16 %v6776_v33  ;;  %v6784_v45 = vld [vmem:[#allocation114_spill] sm:$0xff]  ;;  %v6786_v51 = vld [vmem:[#allocation116_spill] sm:$0xff] }
 0x14a   :  { %6772 = vst [vmem:[#allocation68_spill] sm:$0xff] %v4514_v61  ;;  %6773 = vst [vmem:[#allocation69_spill] sm:$0xff] %v4516_v31  ;;  %v6780_v23 = vunpack.c.l.bf16 %v6779_v55  ;;  %v6781_v15 = vunpack.c.h.bf16 %v6779_v55  ;;  %v6783_v47 = vunpack.c.l.bf16 %v6782_v8  ;;  %v6785_v34 = vunpack.c.l.bf16 %v6784_v45  ;;  %v6793_v55 = vld [vmem:[#allocation115_spill] sm:$0xff] }
 0x14b   :  { %6774 = vst [vmem:[#allocation64_spill] sm:$0xff] %v4518_v29  ;;  %6775 = vst [vmem:[#allocation67_spill] sm:$0xff] %v4520_v2  ;;  %v1290_v5 = vmax.f32 %v6777_v54, %v1289_v44  ;;  %v1298_v37 = vmax.f32 %v6778_v52, %v1297_v19  ;;  %v6787_v28 = vunpack.c.l.bf16 %v6786_v51  ;;  %v6789_v56 = vunpack.c.l.bf16 %v6788_v60 }
 0x14c   :  { %v1306_v57 = vmax.f32 %v6780_v23, %v1305_v43  ;;  %v1314_v35 = vmax.f32 %v6781_v15, %v1313_v50  ;;  %v1321_v22 = vsel %vm520_vm0, %v6783_v47, -inf  ;;  %v1329_v38 = vsel %vm520_vm0, %v6785_v34, -inf }
 0x14d   :  { %v1337_v44 = vsel %vm520_vm0, %v6787_v28, -inf  ;;  %v1345_v19 = vsel %vm520_vm0, %v6789_v56, -inf  ;;  %v1291_v36 = vrot.slane %v1290_v5, 4  ;;  %v1299_v12 = vrot.slane %v1298_v37, 4 }
 0x14e   :  { %v1307_v43 = vrot.slane %v1306_v57, 4  ;;  %v1315_v4 = vrot.slane %v1314_v35, 4  ;;  %v6791_v50 = vunpack.c.l.bf16 %v6790_v17  ;;  %v6792_v54 = vunpack.c.h.bf16 %v6790_v17 }
 0x14f   :  { %v6794_v23 = vunpack.c.l.bf16 %v6793_v55  ;;  %v6795_v8 = vunpack.c.h.bf16 %v6793_v55  ;;  %v1292_v45 = vmax.f32 %v1290_v5, %v1291_v36  ;;  %v1300_v34 = vmax.f32 %v1298_v37, %v1299_v12 }
 0x150   :  { %v1322_v33 = vmax.f32 %v6791_v50, %v1321_v22  ;;  %v1330_v52 = vmax.f32 %v6792_v54, %v1329_v38  ;;  %v1308_v51 = vmax.f32 %v1306_v57, %v1307_v43  ;;  %v1316_v28 = vmax.f32 %v1314_v35, %v1315_v4 }
 0x151   :  { %v1338_v15 = vmax.f32 %v6794_v23, %v1337_v44  ;;  %v1346_v47 = vmax.f32 %v6795_v8, %v1345_v19  ;;  %v1293_v31 = vrot.slane %v1292_v45, 2  ;;  %v1301_v61 = vrot.slane %v1300_v34, 2 }
 0x152   :  { %v1323_v60 = vrot.slane %v1322_v33, 4  ;;  %v1331_v56 = vrot.slane %v1330_v52, 4  ;;  %v1309_v22 = vrot.slane %v1308_v51, 2  ;;  %v1317_v50 = vrot.slane %v1316_v28, 2 }
 0x153   :  { %v1339_v2 = vrot.slane %v1338_v15, 4  ;;  %v1347_v29 = vrot.slane %v1346_v47, 4  ;;  %v1294_v44 = vmax.f32 %v1292_v45, %v1293_v31  ;;  %v1302_v23 = vmax.f32 %v1300_v34, %v1301_v61  ;;  %v6800_v45 = vld [vmem:[#allocation119_spill] sm:$0xff] }
 0x154   :  { %v1324_v17 = vmax.f32 %v1322_v33, %v1323_v60  ;;  %v1332_v38 = vmax.f32 %v1330_v52, %v1331_v56  ;;  %v1310_v55 = vmax.f32 %v1308_v51, %v1309_v22  ;;  %v1318_v19 = vmax.f32 %v1316_v28, %v1317_v50  ;;  %v6802_v28 = vld [vmem:[#allocation120_spill] sm:$0xff]  ;;  %v6804_v56 = vld [vmem:[#allocation122_spill] sm:$0xff] }
 0x155   :  { %v1340_v54 = vmax.f32 %v1338_v15, %v1339_v2  ;;  %v1348_v63 = vmax.f32 %v1346_v47, %v1347_v29  ;;  %v1295_v36 = vrot.slane %v1294_v44, 1  ;;  %v1303_v12 = vrot.slane %v1302_v23, 1 }
 0x156   :  { %v1325_v5 = vrot.slane %v1324_v17, 2  ;;  %v1333_v37 = vrot.slane %v1332_v38, 2  ;;  %v1311_v43 = vrot.slane %v1310_v55, 1  ;;  %v1319_v4 = vrot.slane %v1318_v19, 1 }
 0x157   :  { %v1341_v57 = vrot.slane %v1340_v54, 2  ;;  %v1349_v35 = vrot.slane %v1348_v63, 2  ;;  %v4550_v33 = vmax.f32 %v1294_v44, %v1295_v36  ;;  %v4552_v2 = vmax.f32 %v1302_v23, %v1303_v12  ;;  %v6815_v12 = vld [vmem:[#allocation121_spill] sm:$0xff] }
 0x158   :  { %v1326_v8 = vmax.f32 %v1324_v17, %v1325_v5  ;;  %v1334_v3 = vmax.f32 %v1332_v38, %v1333_v37  ;;  %v4554_v31 = vmax.f32 %v1310_v55, %v1311_v43  ;;  %v4556_v61 = vmax.f32 %v1318_v19, %v1319_v4  ;;  %v6806_v17 = vld [vmem:[#allocation123_spill] sm:$0xff]  ;;  %v6812_v5 = vld [vmem:[#allocation118_spill] sm:$0xff] }
 0x159   :  { %v1342_v32 = vmax.f32 %v1340_v54, %v1341_v57  ;;  %v1350_v58 = vmax.f32 %v1348_v63, %v1349_v35  ;;  %6796 = vst [vmem:[#allocation71_spill] sm:$0xff] %v4550_v33  ;;  %6797 = vst [vmem:[#allocation72_spill] sm:$0xff] %v4552_v2  ;;  %v6801_v34 = vunpack.c.l.bf16 %v6800_v45  ;;  %v6803_v60 = vunpack.c.l.bf16 %v6802_v28  ;;  %v6824_v28 = vld [vmem:[#allocation129_spill] sm:$0xff] }
 0x15a   :  { %6798 = vst [vmem:[#allocation74_spill] sm:$0xff] %v4554_v31  ;;  %6799 = vst [vmem:[#allocation75_spill] sm:$0xff] %v4556_v61  ;;  %v1327_v29 = vrot.slane %v1326_v8, 1  ;;  %v1335_v52 = vrot.slane %v1334_v3, 1  ;;  %v6805_v22 = vunpack.c.l.bf16 %v6804_v56  ;;  %v6807_v38 = vunpack.c.l.bf16 %v6806_v17 }
 0x15b   :  { %v1343_v15 = vrot.slane %v1342_v32, 1  ;;  %v1351_v47 = vrot.slane %v1350_v58, 1  ;;  %v1353_v51 = vsel %vm520_vm0, %v6801_v34, -inf  ;;  %v1361_v63 = vsel %vm520_vm0, %v6803_v60, -inf }
 0x15c   :  { %v1369_v50 = vsel %vm520_vm0, %v6805_v22, -inf  ;;  %v1377_v54 = vsel %vm520_vm0, %v6807_v38, -inf  ;;  %v4570_v44 = vmax.f32 %v1326_v8, %v1327_v29  ;;  %v4572_v23 = vmax.f32 %v1334_v3, %v1335_v52  ;;  %v6818_v8 = vld [vmem:[#allocation125_spill] sm:$0xff]  ;;  %v6826_v38 = vld [vmem:[#allocation124_spill] sm:$0xff] }
 0x15d   :  { %v4574_v55 = vmax.f32 %v1342_v32, %v1343_v15  ;;  %v4576_v19 = vmax.f32 %v1350_v58, %v1351_v47  ;;  %v6813_v37 = vunpack.c.l.bf16 %v6812_v5  ;;  %v6814_v35 = vunpack.c.h.bf16 %v6812_v5  ;;  %v6820_v32 = vld [vmem:[#allocation126_spill] sm:$0xff]  ;;  %v6822_v15 = vld [vmem:[#allocation128_spill] sm:$0xff] }
 0x15e   :  { %6808 = vst [vmem:[#allocation70_spill] sm:$0xff] %v4570_v44  ;;  %6809 = vst [vmem:[#allocation73_spill] sm:$0xff] %v4572_v23  ;;  %v6816_v43 = vunpack.c.l.bf16 %v6815_v12  ;;  %v6817_v45 = vunpack.c.h.bf16 %v6815_v12  ;;  %v6819_v29 = vunpack.c.l.bf16 %v6818_v8  ;;  %v6821_v52 = vunpack.c.l.bf16 %v6820_v32  ;;  %v6829_v12 = vld [vmem:[#allocation127_spill] sm:$0xff] }
 0x15f   :  { %6810 = vst [vmem:[#allocation77_spill] sm:$0xff] %v4574_v55  ;;  %6811 = vst [vmem:[#allocation78_spill] sm:$0xff] %v4576_v19  ;;  %v1354_v57 = vmax.f32 %v6813_v37, %v1353_v51  ;;  %v1362_v36 = vmax.f32 %v6814_v35, %v1361_v63  ;;  %v6823_v47 = vunpack.c.l.bf16 %v6822_v15  ;;  %v6825_v60 = vunpack.c.l.bf16 %v6824_v28 }
 0x160   :  { %v1370_v4 = vmax.f32 %v6816_v43, %v1369_v50  ;;  %v1378_v34 = vmax.f32 %v6817_v45, %v1377_v54  ;;  %v1385_v3 = vsel %vm520_vm0, %v6819_v29, -inf  ;;  %v1393_v58 = vsel %vm520_vm0, %v6821_v52, -inf }
 0x161   :  { %v1401_v51 = vsel %vm520_vm0, %v6823_v47, -inf  ;;  %v1409_v63 = vsel %vm520_vm0, %v6825_v60, -inf  ;;  %v1355_v56 = vrot.slane %v1354_v57, 4  ;;  %v1363_v22 = vrot.slane %v1362_v36, 4 }
 0x162   :  { %v1371_v50 = vrot.slane %v1370_v4, 4  ;;  %v1379_v17 = vrot.slane %v1378_v34, 4  ;;  %v6827_v54 = vunpack.c.l.bf16 %v6826_v38  ;;  %v6828_v37 = vunpack.c.h.bf16 %v6826_v38 }
 0x163   :  { %v6830_v43 = vunpack.c.l.bf16 %v6829_v12  ;;  %v6831_v8 = vunpack.c.h.bf16 %v6829_v12  ;;  %v1356_v32 = vmax.f32 %v1354_v57, %v1355_v56  ;;  %v1364_v52 = vmax.f32 %v1362_v36, %v1363_v22 }
 0x164   :  { %v1386_v5 = vmax.f32 %v6827_v54, %v1385_v3  ;;  %v1394_v35 = vmax.f32 %v6828_v37, %v1393_v58  ;;  %v1372_v15 = vmax.f32 %v1370_v4, %v1371_v50  ;;  %v1380_v47 = vmax.f32 %v1378_v34, %v1379_v17 }
 0x165   :  { %v1402_v45 = vmax.f32 %v6830_v43, %v1401_v51  ;;  %v1410_v29 = vmax.f32 %v6831_v8, %v1409_v63  ;;  %v1357_v23 = vrot.slane %v1356_v32, 2  ;;  %v1365_v44 = vrot.slane %v1364_v52, 2 }
 0x166   :  { %v1387_v28 = vrot.slane %v1386_v5, 4  ;;  %v1395_v60 = vrot.slane %v1394_v35, 4  ;;  %v1373_v3 = vrot.slane %v1372_v15, 2  ;;  %v1381_v54 = vrot.slane %v1380_v47, 2 }
 0x167   :  { %v1403_v19 = vrot.slane %v1402_v45, 4  ;;  %v1411_v55 = vrot.slane %v1410_v29, 4  ;;  %v1358_v51 = vmax.f32 %v1356_v32, %v1357_v23  ;;  %v1366_v43 = vmax.f32 %v1364_v52, %v1365_v44  ;;  %v6836_v32 = vld [vmem:[#allocation131_spill] sm:$0xff] }
 0x168   :  { %v1388_v38 = vmax.f32 %v1386_v5, %v1387_v28  ;;  %v1396_v58 = vmax.f32 %v1394_v35, %v1395_v60  ;;  %v1374_v12 = vmax.f32 %v1372_v15, %v1373_v3  ;;  %v1382_v63 = vmax.f32 %v1380_v47, %v1381_v54  ;;  %v6838_v47 = vld [vmem:[#allocation132_spill] sm:$0xff]  ;;  %v6840_v60 = vld [vmem:[#allocation134_spill] sm:$0xff] }
 0x169   :  { %v1404_v37 = vmax.f32 %v1402_v45, %v1403_v19  ;;  %v1412_v61 = vmax.f32 %v1410_v29, %v1411_v55  ;;  %v1359_v56 = vrot.slane %v1358_v51, 1  ;;  %v1367_v22 = vrot.slane %v1366_v43, 1 }
 0x16a   :  { %v1389_v57 = vrot.slane %v1388_v38, 2  ;;  %v1397_v36 = vrot.slane %v1396_v58, 2  ;;  %v1375_v50 = vrot.slane %v1374_v12, 1  ;;  %v1383_v17 = vrot.slane %v1382_v63, 1 }
 0x16b   :  { %v1405_v4 = vrot.slane %v1404_v37, 2  ;;  %v1413_v34 = vrot.slane %v1412_v61, 2  ;;  %v4606_v5 = vmax.f32 %v1358_v51, %v1359_v56  ;;  %v4608_v19 = vmax.f32 %v1366_v43, %v1367_v22  ;;  %v6851_v22 = vld [vmem:[#allocation133_spill] sm:$0xff] }
 0x16c   :  { %v1390_v8 = vmax.f32 %v1388_v38, %v1389_v57  ;;  %v1398_v31 = vmax.f32 %v1396_v58, %v1397_v36  ;;  %v4610_v23 = vmax.f32 %v1374_v12, %v1375_v50  ;;  %v4612_v44 = vmax.f32 %v1382_v63, %v1383_v17  ;;  %v6842_v38 = vld [vmem:[#allocation135_spill] sm:$0xff]  ;;  %v6848_v57 = vld [vmem:[#allocation130_spill] sm:$0xff] }
 0x16d   :  { %v1406_v2 = vmax.f32 %v1404_v37, %v1405_v4  ;;  %v1414_v33 = vmax.f32 %v1412_v61, %v1413_v34  ;;  %6832 = vst [vmem:[#allocation80_spill] sm:$0xff] %v4606_v5  ;;  %6833 = vst [vmem:[#allocation81_spill] sm:$0xff] %v4608_v19  ;;  %v6837_v52 = vunpack.c.l.bf16 %v6836_v32  ;;  %v6839_v28 = vunpack.c.l.bf16 %v6838_v47  ;;  %v6860_v47 = vld [vmem:[#allocation141_spill] sm:$0xff] }
 0x16e   :  { %6834 = vst [vmem:[#allocation76_spill] sm:$0xff] %v4610_v23  ;;  %6835 = vst [vmem:[#allocation79_spill] sm:$0xff] %v4612_v44  ;;  %v1391_v55 = vrot.slane %v1390_v8, 1  ;;  %v1399_v35 = vrot.slane %v1398_v31, 1  ;;  %v6841_v3 = vunpack.c.l.bf16 %v6840_v60  ;;  %v6843_v58 = vunpack.c.l.bf16 %v6842_v38 }
 0x16f   :  { %v1407_v45 = vrot.slane %v1406_v2, 1  ;;  %v1415_v29 = vrot.slane %v1414_v33, 1  ;;  %v1417_v15 = vsel %vm520_vm0, %v6837_v52, -inf  ;;  %v1425_v61 = vsel %vm520_vm0, %v6839_v28, -inf }
 0x170   :  { %v1433_v54 = vsel %vm520_vm0, %v6841_v3, -inf  ;;  %v1441_v37 = vsel %vm520_vm0, %v6843_v58, -inf  ;;  %v4626_v51 = vmax.f32 %v1390_v8, %v1391_v55  ;;  %v4628_v43 = vmax.f32 %v1398_v31, %v1399_v35  ;;  %v6854_v8 = vld [vmem:[#allocation137_spill] sm:$0xff]  ;;  %v6862_v58 = vld [vmem:[#allocation136_spill] sm:$0xff] }
 0x171   :  { %v4630_v12 = vmax.f32 %v1406_v2, %v1407_v45  ;;  %v4632_v63 = vmax.f32 %v1414_v33, %v1415_v29  ;;  %v6849_v36 = vunpack.c.l.bf16 %v6848_v57  ;;  %v6850_v34 = vunpack.c.h.bf16 %v6848_v57  ;;  %v6856_v2 = vld [vmem:[#allocation138_spill] sm:$0xff]  ;;  %v6858_v45 = vld [vmem:[#allocation140_spill] sm:$0xff] }
 0x172   :  { %6844 = vst [vmem:[#allocation83_spill] sm:$0xff] %v4626_v51  ;;  %6845 = vst [vmem:[#allocation84_spill] sm:$0xff] %v4628_v43  ;;  %v6852_v50 = vunpack.c.l.bf16 %v6851_v22  ;;  %v6853_v32 = vunpack.c.h.bf16 %v6851_v22  ;;  %v6855_v55 = vunpack.c.l.bf16 %v6854_v8  ;;  %v6857_v35 = vunpack.c.l.bf16 %v6856_v2  ;;  %v6865_v22 = vld [vmem:[#allocation139_spill] sm:$0xff] }
 0x173   :  { %6846 = vst [vmem:[#allocation86_spill] sm:$0xff] %v4630_v12  ;;  %6847 = vst [vmem:[#allocation87_spill] sm:$0xff] %v4632_v63  ;;  %v1418_v4 = vmax.f32 %v6849_v36, %v1417_v15  ;;  %v1426_v56 = vmax.f32 %v6850_v34, %v1425_v61  ;;  %v6859_v29 = vunpack.c.l.bf16 %v6858_v45  ;;  %v6861_v28 = vunpack.c.l.bf16 %v6860_v47 }
 0x174   :  { %v1434_v17 = vmax.f32 %v6852_v50, %v1433_v54  ;;  %v1442_v52 = vmax.f32 %v6853_v32, %v1441_v37  ;;  %v1449_v31 = vsel %vm520_vm0, %v6855_v55, -inf  ;;  %v1457_v33 = vsel %vm520_vm0, %v6857_v35, -inf }
 0x175   :  { %v1465_v15 = vsel %vm520_vm0, %v6859_v29, -inf  ;;  %v1473_v61 = vsel %vm520_vm0, %v6861_v28, -inf  ;;  %v1419_v60 = vrot.slane %v1418_v4, 4  ;;  %v1427_v3 = vrot.slane %v1426_v56, 4 }
 0x176   :  { %v1435_v54 = vrot.slane %v1434_v17, 4  ;;  %v1443_v38 = vrot.slane %v1442_v52, 4  ;;  %v6863_v37 = vunpack.c.l.bf16 %v6862_v58  ;;  %v6864_v36 = vunpack.c.h.bf16 %v6862_v58 }
 0x177   :  { %v6866_v50 = vunpack.c.l.bf16 %v6865_v22  ;;  %v6867_v8 = vunpack.c.h.bf16 %v6865_v22  ;;  %v1420_v2 = vmax.f32 %v1418_v4, %v1419_v60  ;;  %v1428_v35 = vmax.f32 %v1426_v56, %v1427_v3 }
 0x178   :  { %v1450_v57 = vmax.f32 %v6863_v37, %v1449_v31  ;;  %v1458_v34 = vmax.f32 %v6864_v36, %v1457_v33  ;;  %v1436_v45 = vmax.f32 %v1434_v17, %v1435_v54  ;;  %v1444_v29 = vmax.f32 %v1442_v52, %v1443_v38 }
 0x179   :  { %v1466_v32 = vmax.f32 %v6866_v50, %v1465_v15  ;;  %v1474_v55 = vmax.f32 %v6867_v8, %v1473_v61  ;;  %v1421_v43 = vrot.slane %v1420_v2, 2  ;;  %v1429_v51 = vrot.slane %v1428_v35, 2 }
 0x17a   :  { %v1451_v47 = vrot.slane %v1450_v57, 4  ;;  %v1459_v28 = vrot.slane %v1458_v34, 4  ;;  %v1437_v31 = vrot.slane %v1436_v45, 2  ;;  %v1445_v37 = vrot.slane %v1444_v29, 2 }
 0x17b   :  { %v1467_v63 = vrot.slane %v1466_v32, 4  ;;  %v1475_v12 = vrot.slane %v1474_v55, 4  ;;  %v1422_v15 = vmax.f32 %v1420_v2, %v1421_v43  ;;  %v1430_v50 = vmax.f32 %v1428_v35, %v1429_v51  ;;  %v6872_v2 = vld [vmem:[#allocation143_spill] sm:$0xff] }
 0x17c   :  { %v1452_v58 = vmax.f32 %v1450_v57, %v1451_v47  ;;  %v1460_v33 = vmax.f32 %v1458_v34, %v1459_v28  ;;  %v1438_v22 = vmax.f32 %v1436_v45, %v1437_v31  ;;  %v1446_v61 = vmax.f32 %v1444_v29, %v1445_v37  ;;  %v6874_v29 = vld [vmem:[#allocation144_spill] sm:$0xff]  ;;  %v6876_v28 = vld [vmem:[#allocation146_spill] sm:$0xff] }
 0x17d   :  { %v1468_v36 = vmax.f32 %v1466_v32, %v1467_v63  ;;  %v1476_v44 = vmax.f32 %v1474_v55, %v1475_v12  ;;  %v1423_v60 = vrot.slane %v1422_v15, 1  ;;  %v1431_v3 = vrot.slane %v1430_v50, 1 }
 0x17e   :  { %v1453_v4 = vrot.slane %v1452_v58, 2  ;;  %v1461_v56 = vrot.slane %v1460_v33, 2  ;;  %v1439_v54 = vrot.slane %v1438_v22, 1  ;;  %v1447_v38 = vrot.slane %v1446_v61, 1 }
 0x17f   :  { %v1469_v17 = vrot.slane %v1468_v36, 2  ;;  %v1477_v52 = vrot.slane %v1476_v44, 2  ;;  %v4662_v57 = vmax.f32 %v1422_v15, %v1423_v60  ;;  %v4664_v63 = vmax.f32 %v1430_v50, %v1431_v3  ;;  %v6887_v3 = vld [vmem:[#allocation145_spill] sm:$0xff] }
 0x180   :  { %v1454_v8 = vmax.f32 %v1452_v58, %v1453_v4  ;;  %v1462_v23 = vmax.f32 %v1460_v33, %v1461_v56  ;;  %v4666_v43 = vmax.f32 %v1438_v22, %v1439_v54  ;;  %v4668_v51 = vmax.f32 %v1446_v61, %v1447_v38  ;;  %v6878_v58 = vld [vmem:[#allocation147_spill] sm:$0xff]  ;;  %v6884_v4 = vld [vmem:[#allocation142_spill] sm:$0xff] }
 0x181   :  { %v1470_v19 = vmax.f32 %v1468_v36, %v1469_v17  ;;  %v1478_v5 = vmax.f32 %v1476_v44, %v1477_v52  ;;  %6868 = vst [vmem:[#allocation82_spill] sm:$0xff] %v4662_v57  ;;  %6869 = vst [vmem:[#allocation85_spill] sm:$0xff] %v4664_v63  ;;  %v6873_v35 = vunpack.c.l.bf16 %v6872_v2  ;;  %v6875_v47 = vunpack.c.l.bf16 %v6874_v29  ;;  %v6896_v29 = vld [vmem:[#allocation153_spill] sm:$0xff] }
 0x182   :  { %6870 = vst [vmem:[#allocation89_spill] sm:$0xff] %v4666_v43  ;;  %6871 = vst [vmem:[#allocation90_spill] sm:$0xff] %v4668_v51  ;;  %v1455_v12 = vrot.slane %v1454_v8, 1  ;;  %v1463_v34 = vrot.slane %v1462_v23, 1  ;;  %v6877_v31 = vunpack.c.l.bf16 %v6876_v28  ;;  %v6879_v33 = vunpack.c.l.bf16 %v6878_v58 }
 0x183   :  { %v1471_v32 = vrot.slane %v1470_v19, 1  ;;  %v1479_v55 = vrot.slane %v1478_v5, 1  ;;  %v1481_v45 = vsel %vm520_vm0, %v6873_v35, -inf  ;;  %v1489_v44 = vsel %vm520_vm0, %v6875_v47, -inf }
 0x184   :  { %v1497_v37 = vsel %vm520_vm0, %v6877_v31, -inf  ;;  %v1505_v36 = vsel %vm520_vm0, %v6879_v33, -inf  ;;  %v4682_v15 = vmax.f32 %v1454_v8, %v1455_v12  ;;  %v4684_v50 = vmax.f32 %v1462_v23, %v1463_v34  ;;  %v6890_v8 = vld [vmem:[#allocation149_spill] sm:$0xff]  ;;  %v6898_v33 = vld [vmem:[#allocation148_spill] sm:$0xff] }
 0x185   :  { %v4686_v22 = vmax.f32 %v1470_v19, %v1471_v32  ;;  %v4688_v61 = vmax.f32 %v1478_v5, %v1479_v55  ;;  %v6885_v56 = vunpack.c.l.bf16 %v6884_v4  ;;  %v6886_v52 = vunpack.c.h.bf16 %v6884_v4  ;;  %v6892_v19 = vld [vmem:[#allocation150_spill] sm:$0xff]  ;;  %v6894_v32 = vld [vmem:[#allocation152_spill] sm:$0xff] }
 0x186   :  { %6880 = vst [vmem:[#allocation92_spill] sm:$0xff] %v4682_v15  ;;  %6881 = vst [vmem:[#allocation93_spill] sm:$0xff] %v4684_v50  ;;  %v6888_v54 = vunpack.c.l.bf16 %v6887_v3  ;;  %v6889_v2 = vunpack.c.h.bf16 %v6887_v3  ;;  %v6891_v12 = vunpack.c.l.bf16 %v6890_v8  ;;  %v6893_v34 = vunpack.c.l.bf16 %v6892_v19  ;;  %v6901_v3 = vld [vmem:[#allocation151_spill] sm:$0xff] }
 0x187   :  { %6882 = vst [vmem:[#allocation88_spill] sm:$0xff] %v4686_v22  ;;  %6883 = vst [vmem:[#allocation91_spill] sm:$0xff] %v4688_v61  ;;  %v1482_v17 = vmax.f32 %v6885_v56, %v1481_v45  ;;  %v1490_v60 = vmax.f32 %v6886_v52, %v1489_v44  ;;  %v6895_v55 = vunpack.c.l.bf16 %v6894_v32  ;;  %v6897_v47 = vunpack.c.l.bf16 %v6896_v29 }
 0x188   :  { %v1498_v38 = vmax.f32 %v6888_v54, %v1497_v37  ;;  %v1506_v35 = vmax.f32 %v6889_v2, %v1505_v36  ;;  %v1513_v23 = vsel %vm520_vm0, %v6891_v12, -inf  ;;  %v1521_v5 = vsel %vm520_vm0, %v6893_v34, -inf }
 0x189   :  { %v1529_v45 = vsel %vm520_vm0, %v6895_v55, -inf  ;;  %v1537_v44 = vsel %vm520_vm0, %v6897_v47, -inf  ;;  %v1483_v28 = vrot.slane %v1482_v17, 4  ;;  %v1491_v31 = vrot.slane %v1490_v60, 4 }
 0x18a   :  { %v1499_v37 = vrot.slane %v1498_v38, 4  ;;  %v1507_v58 = vrot.slane %v1506_v35, 4  ;;  %v6899_v36 = vunpack.c.l.bf16 %v6898_v33  ;;  %v6900_v56 = vunpack.c.h.bf16 %v6898_v33 }
 0x18b   :  { %v6902_v54 = vunpack.c.l.bf16 %v6901_v3  ;;  %v6903_v8 = vunpack.c.h.bf16 %v6901_v3  ;;  %v1484_v19 = vmax.f32 %v1482_v17, %v1483_v28  ;;  %v1492_v34 = vmax.f32 %v1490_v60, %v1491_v31 }
 0x18c   :  { %v1514_v4 = vmax.f32 %v6899_v36, %v1513_v23  ;;  %v1522_v52 = vmax.f32 %v6900_v56, %v1521_v5  ;;  %v1500_v32 = vmax.f32 %v1498_v38, %v1499_v37  ;;  %v1508_v55 = vmax.f32 %v1506_v35, %v1507_v58 }
 0x18d   :  { %v1530_v2 = vmax.f32 %v6902_v54, %v1529_v45  ;;  %v1538_v12 = vmax.f32 %v6903_v8, %v1537_v44  ;;  %v1485_v50 = vrot.slane %v1484_v19, 2  ;;  %v1493_v15 = vrot.slane %v1492_v34, 2 }
 0x18e   :  { %v1515_v29 = vrot.slane %v1514_v4, 4  ;;  %v1523_v47 = vrot.slane %v1522_v52, 4  ;;  %v1501_v23 = vrot.slane %v1500_v32, 2  ;;  %v1509_v36 = vrot.slane %v1508_v55, 2 }
 0x18f   :  { %v1531_v61 = vrot.slane %v1530_v2, 4  ;;  %v1539_v22 = vrot.slane %v1538_v12, 4  ;;  %v1486_v45 = vmax.f32 %v1484_v19, %v1485_v50  ;;  %v1494_v54 = vmax.f32 %v1492_v34, %v1493_v15  ;;  %v6990_v19 = vld [vmem:[#allocation82_spill] sm:$0xff]  ;;  %v6997_v34 = vld [vmem:[#allocation91_spill] sm:$0xff] }
 0x190   :  { %v1516_v33 = vmax.f32 %v1514_v4, %v1515_v29  ;;  %v1524_v5 = vmax.f32 %v1522_v52, %v1523_v47  ;;  %v1502_v3 = vmax.f32 %v1500_v32, %v1501_v23  ;;  %v1510_v44 = vmax.f32 %v1508_v55, %v1509_v36  ;;  %v6994_v36 = vld [vmem:[#allocation92_spill] sm:$0xff]  ;;  %v6995_v32 = vld [vmem:[#allocation93_spill] sm:$0xff] }
 0x191   :  { %v1532_v56 = vmax.f32 %v1530_v2, %v1531_v61  ;;  %v1540_v51 = vmax.f32 %v1538_v12, %v1539_v22  ;;  %v1487_v28 = vrot.slane %v1486_v45, 1  ;;  %v1495_v31 = vrot.slane %v1494_v54, 1 }
 0x192   :  { %v1517_v17 = vrot.slane %v1516_v33, 2  ;;  %v1525_v60 = vrot.slane %v1524_v5, 2  ;;  %v1503_v37 = vrot.slane %v1502_v3, 1  ;;  %v1511_v58 = vrot.slane %v1510_v44, 1 }
 0x193   :  { %v1533_v38 = vrot.slane %v1532_v56, 2  ;;  %v1541_v35 = vrot.slane %v1540_v51, 2  ;;  %v4718_v4 = vmax.f32 %v1486_v45, %v1487_v28  ;;  %v4720_v61 = vmax.f32 %v1494_v54, %v1495_v31  ;;  %v6906_v31 = vld [vmem:[#allocation2_spill] sm:$0xff]  ;;  %v6907_v28 = vld [vmem:[#allocation3_spill] sm:$0xff]  ;;  %v6915_v45 = vld [vmem:[#allocation12_spill] sm:$0xff] }
 0x194   :  { %v1518_v8 = vmax.f32 %v1516_v33, %v1517_v17  ;;  %v1526_v43 = vmax.f32 %v1524_v5, %v1525_v60  ;;  %v4722_v50 = vmax.f32 %v1502_v3, %v1503_v37  ;;  %v4724_v15 = vmax.f32 %v1510_v44, %v1511_v58  ;;  %v6910_v60 = vld [vmem:[#allocation8_spill] sm:$0xff]  ;;  %v6911_v17 = vld [vmem:[#allocation9_spill] sm:$0xff]  ;;  %v6913_v3 = vld [vmem:[#allocation7_spill] sm:$0xff] }
 0x195   :  { %v1534_v63 = vmax.f32 %v1532_v56, %v1533_v38  ;;  %v1542_v57 = vmax.f32 %v1540_v51, %v1541_v35  ;;  %6904 = vst [vmem:[#allocation95_spill] sm:$0xff] %v4720_v61  ;;  %v6908_v35 = vld [vmem:[#allocation5_spill] sm:$0xff]  ;;  %v6909_v38 = vld [vmem:[#allocation6_spill] sm:$0xff]  ;;  %v6912_v44 = vld [vmem:[#allocation4_spill] sm:$0xff]  ;;  %v7001_v37 = vpack.c.bf16 %v3884_v6, %v3884_v6  ;;  %v7005_v6 = vpack.c.bf16 %v3904_v25, %v3904_v25 }
 0x196   :  { %v1519_v22 = vrot.slane %v1518_v8, 1  ;;  %v1527_v52 = vrot.slane %v1526_v43, 1  ;;  %v6914_v54 = vld [vmem:[#allocation11_spill] sm:$0xff]  ;;  %v6991_v56 = vld [vmem:[#allocation85_spill] sm:$0xff]  ;;  %v6993_v33 = vld [vmem:[#allocation90_spill] sm:$0xff]  ;;  %v7009_v25 = vpack.c.bf16 %v3940_v40, %v3940_v40  ;;  %v7013_v40 = vpack.c.bf16 %v3960_v53, %v3960_v53 }
 0x197   :  { %v1535_v2 = vrot.slane %v1534_v63, 1  ;;  %v1543_v12 = vrot.slane %v1542_v57, 1  ;;  %v6992_v5 = vld [vmem:[#allocation89_spill] sm:$0xff]  ;;  %v6996_v51 = vld [vmem:[#allocation88_spill] sm:$0xff]  ;;  %v7017_v53 = vpack.c.bf16 %v3996_v7, %v3996_v7  ;;  %v7021_v7 = vpack.c.bf16 %v4016_v41, %v4016_v41 }
 0x198   :  { %v4734_v55 = vmax.f32 %v1518_v8, %v1519_v22  ;;  %v4736_v29 = vmax.f32 %v1526_v43, %v1527_v52  ;;  %v6918_v43 = vld [vmem:[#allocation10_spill] sm:$0xff]  ;;  %v6998_v8 = vpack.c.bf16 %v3878_v21, %v3878_v21  ;;  %v6999_v52 = vpack.c.bf16 %v3880_v27, %v3880_v27  ;;  %v7044_v58 = vld [vmem:[#allocation13_spill] sm:$0xff] }
 0x199   :  { %v4738_v47 = vmax.f32 %v1534_v63, %v1535_v2  ;;  %v4740_v23 = vmax.f32 %v1542_v57, %v1543_v12  ;;  %v6916_v57 = vld [vmem:[#allocation14_spill] sm:$0xff]  ;;  %v6917_v63 = vld [vmem:[#allocation15_spill] sm:$0xff]  ;;  %v7000_v2 = vpack.c.bf16 %v3882_v30, %v3882_v30  ;;  %v7002_v21 = vpack.c.bf16 %v3898_v11, %v3898_v11 }
 0x19a   :  { %v4993_v61 = vunpack.c.l.b16 %v6998_v8  ;;  %v4998_v22 = vunpack.c.l.b16 %v6999_v52  ;;  %v7003_v27 = vpack.c.bf16 %v3900_v10, %v3900_v10  ;;  %v7004_v30 = vpack.c.bf16 %v3902_v14, %v3902_v14 }
 0x19b   :  { %6905 = vst [vmem:[#allocation96_spill] sm:$0xff] %v4738_v47  ;;  %v5003_v12 = vunpack.c.l.b16 %v7000_v2  ;;  %v5008_v47 = vunpack.c.l.b16 %v7001_v37  ;;  %v5013_v8 = vunpack.c.l.b16 %v7002_v21  ;;  %v5028_v37 = vunpack.c.l.b16 %v7005_v6 }
 0x19c   :  { %v5018_v52 = vunpack.c.l.b16 %v7003_v27  ;;  %v5023_v2 = vunpack.c.l.b16 %v7004_v30  ;;  %v7006_v11 = vpack.c.bf16 %v3934_v39, %v3934_v39  ;;  %v7007_v10 = vpack.c.bf16 %v3936_v9, %v3936_v9 }
 0x19d   :  { %v7008_v14 = vpack.c.bf16 %v3938_v18, %v3938_v18  ;;  %v5048_v6 = vunpack.c.l.b16 %v7009_v25  ;;  %v7010_v39 = vpack.c.bf16 %v3954_v0, %v3954_v0  ;;  %v7011_v9 = vpack.c.bf16 %v3956_v16, %v3956_v16 }
 0x19e   :  { %v5033_v21 = vunpack.c.l.b16 %v7006_v11  ;;  %v5038_v27 = vunpack.c.l.b16 %v7007_v10  ;;  %v7012_v18 = vpack.c.bf16 %v3958_v26, %v3958_v26  ;;  %v5068_v25 = vunpack.c.l.b16 %v7013_v40 }
 0x19f   :  { %v5043_v30 = vunpack.c.l.b16 %v7008_v14  ;;  %v5053_v11 = vunpack.c.l.b16 %v7010_v39  ;;  %v5058_v10 = vunpack.c.l.b16 %v7011_v9  ;;  %v7014_v0 = vpack.c.bf16 %v3990_v13, %v3990_v13 }
 0x1a0   :  { %v5063_v14 = vunpack.c.l.b16 %v7012_v18  ;;  %v7015_v16 = vpack.c.bf16 %v3992_v1, %v3992_v1  ;;  %v7016_v26 = vpack.c.bf16 %v3994_v59, %v3994_v59  ;;  %v5088_v40 = vunpack.c.l.b16 %v7017_v53 }
 0x1a1   :  { %v5073_v39 = vunpack.c.l.b16 %v7014_v0  ;;  %v7018_v13 = vpack.c.bf16 %v4010_v46, %v4010_v46  ;;  %v7019_v1 = vpack.c.bf16 %v4012_v49, %v4012_v49  ;;  %v7020_v59 = vpack.c.bf16 %v4014_v42, %v4014_v42 }
 0x1a2   :  { %v5078_v9 = vunpack.c.l.b16 %v7015_v16  ;;  %v5083_v18 = vunpack.c.l.b16 %v7016_v26  ;;  %v5108_v53 = vunpack.c.l.b16 %v7021_v7  ;;  %v7022_v46 = vpack.c.bf16 %v4046_v48, %v4046_v48 }
 0x1a3   :  { %v5093_v0 = vunpack.c.l.b16 %v7018_v13  ;;  %v5098_v16 = vunpack.c.l.b16 %v7019_v1  ;;  %v5103_v26 = vunpack.c.l.b16 %v7020_v59  ;;  %v7023_v49 = vpack.c.bf16 %v4048_v24, %v4048_v24 }
 0x1a4   :  { %v5113_v13 = vunpack.c.l.b16 %v7022_v46  ;;  %v7024_v42 = vpack.c.bf16 %v4050_v20, %v4050_v20  ;;  %v7025_v41 = vpack.c.bf16 %v4052_v62, %v4052_v62  ;;  %v7026_v48 = vpack.c.bf16 %v6906_v31, %v6906_v31 }
 0x1a5   :  { %v5118_v1 = vunpack.c.l.b16 %v7023_v49  ;;  %v7027_v24 = vpack.c.bf16 %v6907_v28, %v6907_v28  ;;  %v7028_v20 = vpack.c.bf16 %v6908_v35, %v6908_v35  ;;  %v7029_v62 = vpack.c.bf16 %v6909_v38, %v6909_v38 }
 0x1a6   :  { %v5123_v59 = vunpack.c.l.b16 %v7024_v42  ;;  %v5128_v7 = vunpack.c.l.b16 %v7025_v41  ;;  %v5133_v46 = vunpack.c.l.b16 %v7026_v48  ;;  %v7030_v31 = vpack.c.bf16 %v6910_v60, %v6910_v60 }
 0x1a7   :  { %v5138_v49 = vunpack.c.l.b16 %v7027_v24  ;;  %v5143_v42 = vunpack.c.l.b16 %v7028_v20  ;;  %v5148_v41 = vunpack.c.l.b16 %v7029_v62  ;;  %v7031_v28 = vpack.c.bf16 %v6911_v17, %v6911_v17 }
 0x1a8   :  { %v5153_v48 = vunpack.c.l.b16 %v7030_v31  ;;  %v7032_v35 = vpack.c.bf16 %v6912_v44, %v6912_v44  ;;  %v7033_v38 = vpack.c.bf16 %v6913_v3, %v6913_v3  ;;  %v7035_v60 = vpack.c.bf16 %v6914_v54, %v6914_v54 }
 0x1a9   :  { %v5158_v24 = vunpack.c.l.b16 %v7031_v28  ;;  %v7037_v17 = vpack.c.bf16 %v6915_v45, %v6915_v45  ;;  %v7039_v44 = vpack.c.bf16 %v6916_v57, %v6916_v57  ;;  %v7041_v3 = vpack.c.bf16 %v6917_v63, %v6917_v63 }
 0x1aa   :  { %v5163_v20 = vunpack.c.l.b16 %v7032_v35  ;;  %v5168_v62 = vunpack.c.l.b16 %v7033_v38  ;;  %v5173_v31 = vunpack.c.l.b16 %v7035_v60  ;;  %v7043_v54 = vpack.c.bf16 %v6918_v43, %v6918_v43 }
 0x1ab   :  { %v5178_v28 = vunpack.c.l.b16 %v7037_v17  ;;  %v5183_v35 = vunpack.c.l.b16 %v7039_v44  ;;  %v5188_v38 = vunpack.c.l.b16 %v7041_v3  ;;  %v7045_v45 = vpack.c.bf16 %v7044_v58, %v7044_v58 }
 0x1ac   :  { %7034 = vst [vmem:[#allocation98_spill] sm:$0xff] %v5168_v62  ;;  %7036 = vst [vmem:[#allocation99_spill] sm:$0xff] %v5173_v31  ;;  %v5193_v60 = vunpack.c.l.b16 %v7043_v54  ;;  %v7055_v31 = vld [vmem:[#allocation21_spill] sm:$0xff]  ;;  %v7058_v62 = vld [vmem:[#allocation16_spill] sm:$0xff]  ;;  %vm2197_vm7 = vcmask 1047559  }
 0x1ad   :  { %7038 = vst [vmem:[#allocation94_spill] sm:$0xff] %v5178_v28  ;;  %7040 = vst [vmem:[#allocation97_spill] sm:$0xff] %v5183_v35  ;;  %v5198_v17 = vunpack.c.l.b16 %v7045_v45  ;;  %v7046_v28 = vld [vmem:[#allocation17_spill] sm:$0xff]  ;;  %v7049_v35 = vld [vmem:[#allocation18_spill] sm:$0xff]  ;;  %v7056_v58 = vpack.c.bf16 %v7055_v31, %v7055_v31 }
 0x1ae   :  { %7042 = vst [vmem:[#allocation101_spill] sm:$0xff] %v5188_v38  ;;  %v7047_v57 = vpack.c.bf16 %v7046_v28, %v7046_v28  ;;  %v7050_v63 = vpack.c.bf16 %v7049_v35, %v7049_v35  ;;  %v7052_v38 = vld [vmem:[#allocation20_spill] sm:$0xff]  ;;  %v7059_v28 = vpack.c.bf16 %v7058_v62, %v7058_v62 }
 0x1af   :  { %v7053_v43 = vpack.c.bf16 %v7052_v38, %v7052_v38  ;;  %v5218_v45 = vunpack.c.l.b16 %v7056_v58 }
 0x1b0   :  { %v5203_v44 = vunpack.c.l.b16 %v7047_v57  ;;  %v5208_v3 = vunpack.c.l.b16 %v7050_v63  ;;  %v5223_v57 = vunpack.c.l.b16 %v7059_v28 }
 0x1b1   :  { %v5213_v54 = vunpack.c.l.b16 %v7053_v43  ;;  %7057 = vst [vmem:[#allocation100_spill] sm:$0xff] %v5218_v45  ;;  %v7070_v45 = vld [vmem:[#allocation26_spill] sm:$0xff] }
 0x1b2   :  { %7048 = vst [vmem:[#allocation102_spill] sm:$0xff] %v5203_v44  ;;  %7051 = vst [vmem:[#allocation104_spill] sm:$0xff] %v5208_v3  ;;  %v7061_v44 = vld [vmem:[#allocation19_spill] sm:$0xff]  ;;  %v7071_v62 = vpack.c.bf16 %v7070_v45, %v7070_v45 }
 0x1b3   :  { %7054 = vst [vmem:[#allocation105_spill] sm:$0xff] %v5213_v54  ;;  %7060 = vst [vmem:[#allocation103_spill] sm:$0xff] %v5223_v57  ;;  %v7062_v35 = vpack.c.bf16 %v7061_v44, %v7061_v44  ;;  %v7064_v3 = vld [vmem:[#allocation23_spill] sm:$0xff]  ;;  %v7067_v54 = vld [vmem:[#allocation24_spill] sm:$0xff] }
 0x1b4   :  { %v7065_v38 = vpack.c.bf16 %v7064_v3, %v7064_v3  ;;  %v7068_v31 = vpack.c.bf16 %v7067_v54, %v7067_v54  ;;  %v5243_v28 = vunpack.c.l.b16 %v7071_v62  ;;  %v7073_v57 = vld [vmem:[#allocation27_spill] sm:$0xff] }
 0x1b5   :  { %v5228_v63 = vunpack.c.l.b16 %v7062_v35  ;;  %v7074_v44 = vpack.c.bf16 %v7073_v57, %v7073_v57 }
 0x1b6   :  { %v5233_v43 = vunpack.c.l.b16 %v7065_v38  ;;  %v5238_v58 = vunpack.c.l.b16 %v7068_v31  ;;  %7072 = vst [vmem:[#allocation111_spill] sm:$0xff] %v5243_v28  ;;  %v7085_v28 = vld [vmem:[#allocation30_spill] sm:$0xff] }
 0x1b7   :  { %7063 = vst [vmem:[#allocation107_spill] sm:$0xff] %v5228_v63  ;;  %v5248_v35 = vunpack.c.l.b16 %v7074_v44  ;;  %v7076_v63 = vld [vmem:[#allocation22_spill] sm:$0xff]  ;;  %v7086_v57 = vpack.c.bf16 %v7085_v28, %v7085_v28 }
 0x1b8   :  { %7066 = vst [vmem:[#allocation108_spill] sm:$0xff] %v5233_v43  ;;  %7069 = vst [vmem:[#allocation110_spill] sm:$0xff] %v5238_v58  ;;  %v7077_v3 = vpack.c.bf16 %v7076_v63, %v7076_v63  ;;  %v7079_v43 = vld [vmem:[#allocation25_spill] sm:$0xff] }
 0x1b9   :  { %7075 = vst [vmem:[#allocation106_spill] sm:$0xff] %v5248_v35  ;;  %v7080_v54 = vpack.c.bf16 %v7079_v43, %v7079_v43  ;;  %v7082_v58 = vld [vmem:[#allocation29_spill] sm:$0xff]  ;;  %v5268_v44 = vunpack.c.l.b16 %v7086_v57  ;;  %v7088_v35 = vld [vmem:[#allocation32_spill] sm:$0xff] }
 0x1ba   :  { %v5253_v38 = vunpack.c.l.b16 %v7077_v3  ;;  %v7083_v45 = vpack.c.bf16 %v7082_v58, %v7082_v58  ;;  %v7089_v63 = vpack.c.bf16 %v7088_v35, %v7088_v35 }
 0x1bb   :  { %v5258_v31 = vunpack.c.l.b16 %v7080_v54  ;;  %7087 = vst [vmem:[#allocation116_spill] sm:$0xff] %v5268_v44  ;;  %v7100_v44 = vld [vmem:[#allocation35_spill] sm:$0xff] }
 0x1bc   :  { %7078 = vst [vmem:[#allocation109_spill] sm:$0xff] %v5253_v38  ;;  %v5263_v62 = vunpack.c.l.b16 %v7083_v45  ;;  %v5273_v3 = vunpack.c.l.b16 %v7089_v63  ;;  %v7091_v38 = vld [vmem:[#allocation33_spill] sm:$0xff]  ;;  %v7101_v35 = vpack.c.bf16 %v7100_v44, %v7100_v44 }
 0x1bd   :  { %7081 = vst [vmem:[#allocation113_spill] sm:$0xff] %v5258_v31  ;;  %v7092_v43 = vpack.c.bf16 %v7091_v38, %v7091_v38  ;;  %v7094_v31 = vld [vmem:[#allocation28_spill] sm:$0xff] }
 0x1be   :  { %7084 = vst [vmem:[#allocation114_spill] sm:$0xff] %v5263_v62  ;;  %7090 = vst [vmem:[#allocation117_spill] sm:$0xff] %v5273_v3  ;;  %v7095_v58 = vpack.c.bf16 %v7094_v31, %v7094_v31  ;;  %v7097_v62 = vld [vmem:[#allocation31_spill] sm:$0xff]  ;;  %v5293_v63 = vunpack.c.l.b16 %v7101_v35  ;;  %v7103_v3 = vld [vmem:[#allocation36_spill] sm:$0xff] }
 0x1bf   :  { %v5278_v54 = vunpack.c.l.b16 %v7092_v43  ;;  %v7098_v28 = vpack.c.bf16 %v7097_v62, %v7097_v62  ;;  %v7104_v38 = vpack.c.bf16 %v7103_v3, %v7103_v3 }
 0x1c0   :  { %v5283_v45 = vunpack.c.l.b16 %v7095_v58  ;;  %7102 = vst [vmem:[#allocation120_spill] sm:$0xff] %v5293_v63  ;;  %v7115_v63 = vld [vmem:[#allocation37_spill] sm:$0xff] }
 0x1c1   :  { %7093 = vst [vmem:[#allocation112_spill] sm:$0xff] %v5278_v54  ;;  %v5288_v57 = vunpack.c.l.b16 %v7098_v28  ;;  %v5298_v43 = vunpack.c.l.b16 %v7104_v38  ;;  %v7106_v54 = vld [vmem:[#allocation38_spill] sm:$0xff]  ;;  %v7116_v3 = vpack.c.bf16 %v7115_v63, %v7115_v63 }
 0x1c2   :  { %7096 = vst [vmem:[#allocation115_spill] sm:$0xff] %v5283_v45  ;;  %v7107_v31 = vpack.c.bf16 %v7106_v54, %v7106_v54  ;;  %v7109_v45 = vld [vmem:[#allocation39_spill] sm:$0xff] }
 0x1c3   :  { %7099 = vst [vmem:[#allocation119_spill] sm:$0xff] %v5288_v57  ;;  %7105 = vst [vmem:[#allocation122_spill] sm:$0xff] %v5298_v43  ;;  %v7110_v62 = vpack.c.bf16 %v7109_v45, %v7109_v45  ;;  %v7112_v57 = vld [vmem:[#allocation34_spill] sm:$0xff]  ;;  %v5318_v38 = vunpack.c.l.b16 %v7116_v3  ;;  %v7118_v43 = vld [vmem:[#allocation41_spill] sm:$0xff] }
 0x1c4   :  { %v5303_v58 = vunpack.c.l.b16 %v7107_v31  ;;  %v7113_v44 = vpack.c.bf16 %v7112_v57, %v7112_v57  ;;  %v7119_v54 = vpack.c.bf16 %v7118_v43, %v7118_v43 }
 0x1c5   :  { %v5308_v28 = vunpack.c.l.b16 %v7110_v62  ;;  %7117 = vst [vmem:[#allocation125_spill] sm:$0xff] %v5318_v38  ;;  %v7130_v38 = vld [vmem:[#allocation40_spill] sm:$0xff] }
 0x1c6   :  { %7108 = vst [vmem:[#allocation123_spill] sm:$0xff] %v5303_v58  ;;  %v5313_v35 = vunpack.c.l.b16 %v7113_v44  ;;  %v5323_v31 = vunpack.c.l.b16 %v7119_v54  ;;  %v7121_v58 = vld [vmem:[#allocation42_spill] sm:$0xff]  ;;  %v7131_v43 = vpack.c.bf16 %v7130_v38, %v7130_v38 }
 0x1c7   :  { %7111 = vst [vmem:[#allocation118_spill] sm:$0xff] %v5308_v28  ;;  %v7122_v45 = vpack.c.bf16 %v7121_v58, %v7121_v58  ;;  %v7124_v28 = vld [vmem:[#allocation44_spill] sm:$0xff] }
 0x1c8   :  { %7114 = vst [vmem:[#allocation121_spill] sm:$0xff] %v5313_v35  ;;  %7120 = vst [vmem:[#allocation126_spill] sm:$0xff] %v5323_v31  ;;  %v7125_v57 = vpack.c.bf16 %v7124_v28, %v7124_v28  ;;  %v7127_v35 = vld [vmem:[#allocation45_spill] sm:$0xff]  ;;  %v5343_v54 = vunpack.c.l.b16 %v7131_v43  ;;  %v7133_v31 = vld [vmem:[#allocation43_spill] sm:$0xff] }
 0x1c9   :  { %v5328_v62 = vunpack.c.l.b16 %v7122_v45  ;;  %v7128_v63 = vpack.c.bf16 %v7127_v35, %v7127_v35  ;;  %v7134_v58 = vpack.c.bf16 %v7133_v31, %v7133_v31 }
 0x1ca   :  { %v5333_v44 = vunpack.c.l.b16 %v7125_v57  ;;  %7132 = vst [vmem:[#allocation127_spill] sm:$0xff] %v5343_v54  ;;  %v7145_v54 = vld [vmem:[#allocation51_spill] sm:$0xff] }
 0x1cb   :  { %7123 = vst [vmem:[#allocation128_spill] sm:$0xff] %v5328_v62  ;;  %v5338_v3 = vunpack.c.l.b16 %v7128_v63  ;;  %v5348_v45 = vunpack.c.l.b16 %v7134_v58  ;;  %v7136_v62 = vld [vmem:[#allocation47_spill] sm:$0xff]  ;;  %v7146_v31 = vpack.c.bf16 %v7145_v54, %v7145_v54 }
 0x1cc   :  { %7126 = vst [vmem:[#allocation129_spill] sm:$0xff] %v5333_v44  ;;  %v7137_v28 = vpack.c.bf16 %v7136_v62, %v7136_v62  ;;  %v7139_v44 = vld [vmem:[#allocation48_spill] sm:$0xff] }
 0x1cd   :  { %7129 = vst [vmem:[#allocation124_spill] sm:$0xff] %v5338_v3  ;;  %7135 = vst [vmem:[#allocation131_spill] sm:$0xff] %v5348_v45  ;;  %v7140_v35 = vpack.c.bf16 %v7139_v44, %v7139_v44  ;;  %v7142_v3 = vld [vmem:[#allocation50_spill] sm:$0xff]  ;;  %v5368_v58 = vunpack.c.l.b16 %v7146_v31 }
 0x1ce   :  { %v5353_v57 = vunpack.c.l.b16 %v7137_v28  ;;  %v7143_v38 = vpack.c.bf16 %v7142_v3, %v7142_v3  ;;  %v7148_v45 = vld [vmem:[#allocation46_spill] sm:$0xff] }
 0x1cf   :  { %v5358_v63 = vunpack.c.l.b16 %v7140_v35  ;;  %7147 = vst [vmem:[#allocation130_spill] sm:$0xff] %v5368_v58  ;;  %v7149_v62 = vpack.c.bf16 %v7148_v45, %v7148_v45  ;;  %v7160_v58 = vld [vmem:[#allocation56_spill] sm:$0xff] }
 0x1d0   :  { %7138 = vst [vmem:[#allocation132_spill] sm:$0xff] %v5353_v57  ;;  %v5363_v43 = vunpack.c.l.b16 %v7143_v38  ;;  %v7151_v57 = vld [vmem:[#allocation49_spill] sm:$0xff]  ;;  %v7161_v45 = vpack.c.bf16 %v7160_v58, %v7160_v58 }
 0x1d1   :  { %7141 = vst [vmem:[#allocation134_spill] sm:$0xff] %v5358_v63  ;;  %v5373_v28 = vunpack.c.l.b16 %v7149_v62  ;;  %v7152_v44 = vpack.c.bf16 %v7151_v57, %v7151_v57  ;;  %v7154_v63 = vld [vmem:[#allocation53_spill] sm:$0xff] }
 0x1d2   :  { %7144 = vst [vmem:[#allocation135_spill] sm:$0xff] %v5363_v43  ;;  %v7155_v3 = vpack.c.bf16 %v7154_v63, %v7154_v63  ;;  %v7157_v43 = vld [vmem:[#allocation54_spill] sm:$0xff]  ;;  %v5393_v62 = vunpack.c.l.b16 %v7161_v45 }
 0x1d3   :  { %7150 = vst [vmem:[#allocation133_spill] sm:$0xff] %v5373_v28  ;;  %v5378_v35 = vunpack.c.l.b16 %v7152_v44  ;;  %v7158_v54 = vpack.c.bf16 %v7157_v43, %v7157_v43  ;;  %v7163_v28 = vld [vmem:[#allocation57_spill] sm:$0xff] }
 0x1d4   :  { %v5383_v38 = vunpack.c.l.b16 %v7155_v3  ;;  %7162 = vst [vmem:[#allocation141_spill] sm:$0xff] %v5393_v62  ;;  %v7164_v57 = vpack.c.bf16 %v7163_v28, %v7163_v28  ;;  %v7175_v62 = vld [vmem:[#allocation60_spill] sm:$0xff] }
 0x1d5   :  { %7153 = vst [vmem:[#allocation137_spill] sm:$0xff] %v5378_v35  ;;  %v5388_v31 = vunpack.c.l.b16 %v7158_v54  ;;  %v7166_v35 = vld [vmem:[#allocation52_spill] sm:$0xff]  ;;  %v7176_v28 = vpack.c.bf16 %v7175_v62, %v7175_v62 }
 0x1d6   :  { %7156 = vst [vmem:[#allocation138_spill] sm:$0xff] %v5383_v38  ;;  %v5398_v44 = vunpack.c.l.b16 %v7164_v57  ;;  %v7167_v63 = vpack.c.bf16 %v7166_v35, %v7166_v35  ;;  %v7169_v38 = vld [vmem:[#allocation55_spill] sm:$0xff] }
 0x1d7   :  { %7159 = vst [vmem:[#allocation140_spill] sm:$0xff] %v5388_v31  ;;  %v7170_v43 = vpack.c.bf16 %v7169_v38, %v7169_v38  ;;  %v7172_v31 = vld [vmem:[#allocation59_spill] sm:$0xff]  ;;  %v5418_v57 = vunpack.c.l.b16 %v7176_v28 }
 0x1d8   :  { %7165 = vst [vmem:[#allocation136_spill] sm:$0xff] %v5398_v44  ;;  %v5403_v3 = vunpack.c.l.b16 %v7167_v63  ;;  %v7173_v58 = vpack.c.bf16 %v7172_v31, %v7172_v31  ;;  %v7178_v44 = vld [vmem:[#allocation62_spill] sm:$0xff] }
 0x1d9   :  { %v5408_v54 = vunpack.c.l.b16 %v7170_v43  ;;  %7177 = vst [vmem:[#allocation146_spill] sm:$0xff] %v5418_v57  ;;  %v7179_v35 = vpack.c.bf16 %v7178_v44, %v7178_v44  ;;  %v7190_v57 = vld [vmem:[#allocation65_spill] sm:$0xff] }
 0x1da   :  { %7168 = vst [vmem:[#allocation139_spill] sm:$0xff] %v5403_v3  ;;  %v5413_v45 = vunpack.c.l.b16 %v7173_v58  ;;  %v7181_v3 = vld [vmem:[#allocation63_spill] sm:$0xff]  ;;  %v7191_v44 = vpack.c.bf16 %v7190_v57, %v7190_v57 }
 0x1db   :  { %7171 = vst [vmem:[#allocation143_spill] sm:$0xff] %v5408_v54  ;;  %v5423_v63 = vunpack.c.l.b16 %v7179_v35  ;;  %v7182_v38 = vpack.c.bf16 %v7181_v3, %v7181_v3  ;;  %v7184_v54 = vld [vmem:[#allocation58_spill] sm:$0xff] }
 0x1dc   :  { %7174 = vst [vmem:[#allocation144_spill] sm:$0xff] %v5413_v45  ;;  %v7185_v31 = vpack.c.bf16 %v7184_v54, %v7184_v54  ;;  %v7187_v45 = vld [vmem:[#allocation61_spill] sm:$0xff]  ;;  %v5443_v35 = vunpack.c.l.b16 %v7191_v44 }
 0x1dd   :  { %7180 = vst [vmem:[#allocation147_spill] sm:$0xff] %v5423_v63  ;;  %v5428_v43 = vunpack.c.l.b16 %v7182_v38  ;;  %v7188_v62 = vpack.c.bf16 %v7187_v45, %v7187_v45  ;;  %v7193_v63 = vld [vmem:[#allocation66_spill] sm:$0xff] }
 0x1de   :  { %v5433_v58 = vunpack.c.l.b16 %v7185_v31  ;;  %7192 = vst [vmem:[#allocation150_spill] sm:$0xff] %v5443_v35  ;;  %v7194_v3 = vpack.c.bf16 %v7193_v63, %v7193_v63  ;;  %v7205_v35 = vld [vmem:[#allocation67_spill] sm:$0xff] }
 0x1df   :  { %7183 = vst [vmem:[#allocation142_spill] sm:$0xff] %v5428_v43  ;;  %v5438_v28 = vunpack.c.l.b16 %v7188_v62  ;;  %v7196_v43 = vld [vmem:[#allocation68_spill] sm:$0xff]  ;;  %v7206_v63 = vpack.c.bf16 %v7205_v35, %v7205_v35 }
 0x1e0   :  { %7186 = vst [vmem:[#allocation145_spill] sm:$0xff] %v5433_v58  ;;  %v5448_v38 = vunpack.c.l.b16 %v7194_v3  ;;  %v7197_v54 = vpack.c.bf16 %v7196_v43, %v7196_v43  ;;  %v7199_v58 = vld [vmem:[#allocation69_spill] sm:$0xff] }
 0x1e1   :  { %7189 = vst [vmem:[#allocation149_spill] sm:$0xff] %v5438_v28  ;;  %v7200_v45 = vpack.c.bf16 %v7199_v58, %v7199_v58  ;;  %v7202_v28 = vld [vmem:[#allocation64_spill] sm:$0xff]  ;;  %v5468_v3 = vunpack.c.l.b16 %v7206_v63 }
 0x1e2   :  { %7195 = vst [vmem:[#allocation152_spill] sm:$0xff] %v5448_v38  ;;  %v5453_v31 = vunpack.c.l.b16 %v7197_v54  ;;  %v7203_v57 = vpack.c.bf16 %v7202_v28, %v7202_v28  ;;  %v7208_v38 = vld [vmem:[#allocation71_spill] sm:$0xff] }
 0x1e3   :  { %v5458_v62 = vunpack.c.l.b16 %v7200_v45  ;;  %7207 = vst [vmem:[#allocation2_spill] sm:$0xff] %v5468_v3  ;;  %v7209_v43 = vpack.c.bf16 %v7208_v38, %v7208_v38  ;;  %v7220_v3 = vld [vmem:[#allocation70_spill] sm:$0xff] }
 0x1e4   :  { %7198 = vst [vmem:[#allocation153_spill] sm:$0xff] %v5453_v31  ;;  %v5463_v44 = vunpack.c.l.b16 %v7203_v57  ;;  %v7211_v31 = vld [vmem:[#allocation72_spill] sm:$0xff]  ;;  %v7221_v38 = vpack.c.bf16 %v7220_v3, %v7220_v3 }
 0x1e5   :  { %7201 = vst [vmem:[#allocation148_spill] sm:$0xff] %v5458_v62  ;;  %v5473_v54 = vunpack.c.l.b16 %v7209_v43  ;;  %v7212_v58 = vpack.c.bf16 %v7211_v31, %v7211_v31  ;;  %v7214_v62 = vld [vmem:[#allocation74_spill] sm:$0xff] }
 0x1e6   :  { %7204 = vst [vmem:[#allocation151_spill] sm:$0xff] %v5463_v44  ;;  %v7215_v28 = vpack.c.bf16 %v7214_v62, %v7214_v62  ;;  %v7217_v44 = vld [vmem:[#allocation75_spill] sm:$0xff]  ;;  %v5493_v43 = vunpack.c.l.b16 %v7221_v38 }
 0x1e7   :  { %7210 = vst [vmem:[#allocation3_spill] sm:$0xff] %v5473_v54  ;;  %v5478_v45 = vunpack.c.l.b16 %v7212_v58  ;;  %v7218_v35 = vpack.c.bf16 %v7217_v44, %v7217_v44  ;;  %v7223_v54 = vld [vmem:[#allocation73_spill] sm:$0xff] }
 0x1e8   :  { %v5483_v57 = vunpack.c.l.b16 %v7215_v28  ;;  %7222 = vst [vmem:[#allocation9_spill] sm:$0xff] %v5493_v43  ;;  %v7224_v31 = vpack.c.bf16 %v7223_v54, %v7223_v54  ;;  %v7235_v43 = vld [vmem:[#allocation81_spill] sm:$0xff] }
 0x1e9   :  { %7213 = vst [vmem:[#allocation5_spill] sm:$0xff] %v5478_v45  ;;  %v5488_v63 = vunpack.c.l.b16 %v7218_v35  ;;  %v7226_v45 = vld [vmem:[#allocation77_spill] sm:$0xff]  ;;  %v7236_v54 = vpack.c.bf16 %v7235_v43, %v7235_v43 }
 0x1ea   :  { %7216 = vst [vmem:[#allocation6_spill] sm:$0xff] %v5483_v57  ;;  %v5498_v58 = vunpack.c.l.b16 %v7224_v31  ;;  %v7227_v62 = vpack.c.bf16 %v7226_v45, %v7226_v45  ;;  %v7229_v57 = vld [vmem:[#allocation78_spill] sm:$0xff] }
 0x1eb   :  { %7219 = vst [vmem:[#allocation8_spill] sm:$0xff] %v5488_v63  ;;  %v7230_v44 = vpack.c.bf16 %v7229_v57, %v7229_v57  ;;  %v7232_v63 = vld [vmem:[#allocation80_spill] sm:$0xff]  ;;  %v5518_v31 = vunpack.c.l.b16 %v7236_v54 }
 0x1ec   :  { %7225 = vst [vmem:[#allocation4_spill] sm:$0xff] %v5498_v58  ;;  %v5503_v28 = vunpack.c.l.b16 %v7227_v62  ;;  %v7233_v3 = vpack.c.bf16 %v7232_v63, %v7232_v63  ;;  %v7238_v58 = vld [vmem:[#allocation76_spill] sm:$0xff] }
 0x1ed   :  { %v5508_v35 = vunpack.c.l.b16 %v7230_v44  ;;  %7237 = vst [vmem:[#allocation14_spill] sm:$0xff] %v5518_v31  ;;  %v7239_v45 = vpack.c.bf16 %v7238_v58, %v7238_v58  ;;  %v7247_v31 = vld [vmem:[#allocation86_spill] sm:$0xff] }
 0x1ee   :  { %7228 = vst [vmem:[#allocation7_spill] sm:$0xff] %v5503_v28  ;;  %v5513_v38 = vunpack.c.l.b16 %v7233_v3  ;;  %v7241_v28 = vld [vmem:[#allocation79_spill] sm:$0xff]  ;;  %v7248_v58 = vpack.c.bf16 %v7247_v31, %v7247_v31  ;;  %v7254_v31 = vpack.c.bf16 %v6992_v5, %v6992_v5  ;;  %v7258_v5 = vpack.c.bf16 %v6996_v51, %v6996_v51 }
 0x1ef   :  { %7231 = vst [vmem:[#allocation11_spill] sm:$0xff] %v5508_v35  ;;  %v5523_v62 = vunpack.c.l.b16 %v7239_v45  ;;  %v7242_v57 = vpack.c.bf16 %v7241_v28, %v7241_v28  ;;  %v7243_v35 = vld [vmem:[#allocation83_spill] sm:$0xff]  ;;  %v7264_v51 = vpack.c.bf16 %v4722_v50, %v4722_v50 }
 0x1f0   :  { %7234 = vst [vmem:[#allocation12_spill] sm:$0xff] %v5513_v38  ;;  %v7244_v63 = vpack.c.bf16 %v7243_v35, %v7243_v35  ;;  %v7245_v38 = vld [vmem:[#allocation84_spill] sm:$0xff]  ;;  %v5543_v45 = vunpack.c.l.b16 %v7248_v58  ;;  %v7252_v35 = vpack.c.bf16 %v6990_v19, %v6990_v19  ;;  %v5563_v58 = vunpack.c.l.b16 %v7254_v31 }
 0x1f1   :  { %7240 = vst [vmem:[#allocation15_spill] sm:$0xff] %v5523_v62  ;;  %v5528_v44 = vunpack.c.l.b16 %v7242_v57  ;;  %v7246_v43 = vpack.c.bf16 %v7245_v38, %v7245_v38  ;;  %v7249_v62 = vld [vmem:[#allocation87_spill] sm:$0xff]  ;;  %v7253_v38 = vpack.c.bf16 %v6991_v56, %v6991_v56  ;;  %v7256_v19 = vpack.c.bf16 %v6994_v36, %v6994_v36 }
 0x1f2   :  { %v5533_v3 = vunpack.c.l.b16 %v7244_v63  ;;  %v7250_v28 = vpack.c.bf16 %v7249_v62, %v7249_v62  ;;  %v5553_v63 = vunpack.c.l.b16 %v7252_v35  ;;  %v7255_v62 = vpack.c.bf16 %v6993_v33, %v6993_v33 }
 0x1f3   :  { %v5538_v54 = vunpack.c.l.b16 %v7246_v43  ;;  %v5558_v43 = vunpack.c.l.b16 %v7253_v38  ;;  %v5573_v35 = vunpack.c.l.b16 %v7256_v19  ;;  %v7257_v56 = vpack.c.bf16 %v6995_v32, %v6995_v32 }
 0x1f4   :  { %v5548_v57 = vunpack.c.l.b16 %v7250_v28  ;;  %v5568_v28 = vunpack.c.l.b16 %v7255_v62  ;;  %v5583_v31 = vunpack.c.l.b16 %v7258_v5  ;;  %v7259_v33 = vpack.c.bf16 %v6997_v34, %v6997_v34 }
 0x1f5   :  { %v5578_v38 = vunpack.c.l.b16 %v7257_v56  ;;  %v7261_v36 = vpack.c.bf16 %v4718_v4, %v4718_v4  ;;  %v5603_v5 = vunpack.c.l.b16 %v7264_v51  ;;  %v7265_v34 = vpack.c.bf16 %v4724_v15, %v4724_v15 }
 0x1f6   :  { %7251 = vst [vmem:[#allocation10_spill] sm:$0xff] %v5548_v57  ;;  %v5588_v62 = vunpack.c.l.b16 %v7259_v33  ;;  %v7262_v57 = vld [vmem:[#allocation95_spill] sm:$0xff]  ;;  %v7266_v4 = vpack.c.bf16 %v4734_v55, %v4734_v55  ;;  %v7270_v15 = vpack.c.bf16 %v4740_v23, %v4740_v23  ;;  %v2186_v55 = vsel %vm2185_vm1, %v4998_v22, %v4993_v61 }
 0x1f7   :  { %v5593_v19 = vunpack.c.l.b16 %v7261_v36  ;;  %v7263_v32 = vpack.c.bf16 %v7262_v57, %v7262_v57  ;;  %v5608_v33 = vunpack.c.l.b16 %v7265_v34  ;;  %v7267_v57 = vpack.c.bf16 %v4736_v29, %v4736_v29 }
 0x1f8   :  { %7260 = vst [vmem:[#allocation82_spill] sm:$0xff] %v5588_v62  ;;  %v5613_v36 = vunpack.c.l.b16 %v7266_v4  ;;  %v7268_v62 = vld [vmem:[#allocation96_spill] sm:$0xff]  ;;  %v5628_v34 = vunpack.c.l.b16 %v7270_v15  ;;  %v2188_v29 = vsel %vm2187_vm2, %v5003_v12, %v2186_v55  ;;  %v2199_v23 = vsel %vm2185_vm1, %v5038_v27, %v5033_v21  ;;  %v7276_v15 = vld [vmem:[#allocation102_spill] sm:$0xff]  ;;  %v7278_v55 = vld [vmem:[#allocation115_spill] sm:$0xff] }
 0x1f9   :  { %v5598_v56 = vunpack.c.l.b16 %v7263_v32  ;;  %v5618_v32 = vunpack.c.l.b16 %v7267_v57  ;;  %v7269_v50 = vpack.c.bf16 %v7268_v62, %v7268_v62  ;;  %v2206_v62 = vsel %vm2185_vm1, %v5078_v9, %v5073_v39  ;;  %v7275_v57 = vld [vmem:[#allocation98_spill] sm:$0xff] }
 0x1fa   :  { %v2213_v4 = vsel %vm2185_vm1, %v5118_v1, %v5113_v13  ;;  %v2190_v61 = vsel %vm2189_vm3, %v5008_v47, %v2188_v29  ;;  %v2200_v22 = vsel %vm2187_vm2, %v5043_v30, %v2199_v23  ;;  %v2207_v12 = vsel %vm2187_vm2, %v5083_v18, %v2206_v62  ;;  %v7280_v23 = vld [vmem:[#allocation104_spill] sm:$0xff] }
 0x1fb   :  { %v5623_v51 = vunpack.c.l.b16 %v7269_v50  ;;  %v2214_v21 = vsel %vm2187_vm2, %v5123_v59, %v2213_v4  ;;  %v2192_v27 = vsel %vm2191_vm4, %v5013_v8, %v2190_v61  ;;  %v2201_v39 = vsel %vm2189_vm3, %v5048_v6, %v2200_v22  ;;  %v7281_v4 = vld [vmem:[#allocation106_spill] sm:$0xff]  ;;  %v7282_v22 = vld [vmem:[#allocation119_spill] sm:$0xff] }
 0x1fc   :  { %v2208_v9 = vsel %vm2189_vm3, %v5088_v40, %v2207_v12  ;;  %v2215_v47 = vsel %vm2189_vm3, %v5128_v7, %v2214_v21  ;;  %v2194_v30 = vsel %vm2193_vm5, %v5018_v52, %v2192_v27  ;;  %v2202_v18 = vsel %vm2191_vm4, %v5053_v11, %v2201_v39  ;;  %v7271_v7 = vld [vmem:[#allocation108_spill] sm:$0xff]  ;;  %v7283_v21 = vld [vmem:[#allocation94_spill] sm:$0xff]  ;;  %v7284_v39 = vld [vmem:[#allocation105_spill] sm:$0xff] }
 0x1fd   :  { %v2209_v13 = vsel %vm2191_vm4, %v5093_v0, %v2208_v9  ;;  %v2216_v8 = vsel %vm2191_vm4, %v5133_v46, %v2215_v47  ;;  %v2196_v6 = vsel %vm2195_vm6, %v5023_v2, %v2194_v30  ;;  %v2203_v40 = vsel %vm2193_vm5, %v5058_v10, %v2202_v18  ;;  %v7272_v46 = vld [vmem:[#allocation110_spill] sm:$0xff]  ;;  %v7285_v47 = vld [vmem:[#allocation109_spill] sm:$0xff]  ;;  %v7286_v18 = vld [vmem:[#allocation120_spill] sm:$0xff] }
 0x1fe   :  { %v2210_v1 = vsel %vm2193_vm5, %v5098_v16, %v2209_v13  ;;  %v2217_v52 = vsel %vm2193_vm5, %v5138_v49, %v2216_v8  ;;  %v5678_v11 = vsel %vm2197_vm7, %v5028_v37, %v2196_v6  ;;  %v2204_v0 = vsel %vm2195_vm6, %v5063_v14, %v2203_v40  ;;  %v7273_v49 = vld [vmem:[#allocation117_spill] sm:$0xff]  ;;  %v7288_v40 = vld [vmem:[#allocation100_spill] sm:$0xff] }
 0x1ff   :  { %v2211_v59 = vsel %vm2195_vm6, %v5103_v26, %v2210_v1  ;;  %v2218_v2 = vsel %vm2195_vm6, %v5143_v42, %v2217_v52  ;;  %v5688_v10 = vsel %vm2197_vm7, %v5068_v25, %v2204_v0  ;;  %v2220_v14 = vsel %vm2185_vm1, %v5158_v24, %v5153_v48  ;;  %v7274_v42 = vld [vmem:[#allocation112_spill] sm:$0xff]  ;;  %v7277_v24 = vld [vmem:[#allocation111_spill] sm:$0xff]  ;;  %v7287_v8 = vld [vmem:[#allocation97_spill] sm:$0xff] }
 0x200   :  { %v5692_v16 = vsel %vm2197_vm7, %v5108_v53, %v2211_v59  ;;  %v5696_v37 = vsel %vm2197_vm7, %v5148_v41, %v2218_v2  ;;  %v2221_v26 = vsel %vm2187_vm2, %v5163_v20, %v2220_v14  ;;  %v2227_v25 = vsel %vm2185_vm1, %v5198_v17, %v5193_v60  ;;  %v7279_v17 = vld [vmem:[#allocation99_spill] sm:$0xff]  ;;  %v7289_v52 = vld [vmem:[#allocation113_spill] sm:$0xff]  ;;  %v7290_v59 = vld [vmem:[#allocation122_spill] sm:$0xff] }
 0x201   :  { %v2234_v53 = vsel %vm2185_vm1, %v7272_v46, %v7271_v7  ;;  %v2241_v41 = vsel %vm2185_vm1, %v7274_v42, %v7273_v49  ;;  %v2222_v50 = vsel %vm2189_vm3, %v7275_v57, %v2221_v26  ;;  %v2228_v48 = vsel %vm2187_vm2, %v7276_v15, %v2227_v25  ;;  %v7291_v14 = vld [vmem:[#allocation101_spill] sm:$0xff]  ;;  %v7292_v25 = vld [vmem:[#allocation103_spill] sm:$0xff]  ;;  %v7293_v46 = vld [vmem:[#allocation114_spill] sm:$0xff] }
 0x202   :  { %v2235_v20 = vsel %vm2187_vm2, %v7277_v24, %v2234_v53  ;;  %v2242_v60 = vsel %vm2187_vm2, %v7278_v55, %v2241_v41  ;;  %v2223_v29 = vsel %vm2191_vm4, %v7279_v17, %v2222_v50  ;;  %v2229_v62 = vsel %vm2189_vm3, %v7280_v23, %v2228_v48  ;;  %v7294_v49 = vld [vmem:[#allocation123_spill] sm:$0xff]  ;;  %v7296_v50 = vld [vmem:[#allocation116_spill] sm:$0xff]  ;;  %v7297_v48 = vld [vmem:[#allocation118_spill] sm:$0xff] }
 0x203   :  { %v2236_v61 = vsel %vm2189_vm3, %v7281_v4, %v2235_v20  ;;  %v2243_v12 = vsel %vm2189_vm3, %v7282_v22, %v2242_v60  ;;  %v2224_v27 = vsel %vm2193_vm5, %v7283_v21, %v2223_v29  ;;  %v2230_v9 = vsel %vm2191_vm4, %v7284_v39, %v2229_v62  ;;  %v7295_v41 = vld [vmem:[#allocation107_spill] sm:$0xff]  ;;  %v7298_v20 = vld [vmem:[#allocation121_spill] sm:$0xff]  ;;  %v7300_v17 = vld [vmem:[#allocation126_spill] sm:$0xff] }
 0x204   :  { %v2237_v30 = vsel %vm2191_vm4, %v7285_v47, %v2236_v61  ;;  %v2244_v13 = vsel %vm2191_vm4, %v7286_v18, %v2243_v12  ;;  %v2225_v6 = vsel %vm2195_vm6, %v7287_v8, %v2224_v27  ;;  %v2231_v1 = vsel %vm2193_vm5, %v7288_v40, %v2230_v9  ;;  %v7299_v55 = vld [vmem:[#allocation125_spill] sm:$0xff]  ;;  %v7301_v23 = vld [vmem:[#allocation132_spill] sm:$0xff]  ;;  %v7302_v62 = vld [vmem:[#allocation134_spill] sm:$0xff] }
 0x205   :  { %v2238_v0 = vsel %vm2193_vm5, %v7289_v52, %v2237_v30  ;;  %v2245_v2 = vsel %vm2193_vm5, %v7290_v59, %v2244_v13  ;;  %v5746_v26 = vsel %vm2197_vm7, %v7291_v14, %v2225_v6  ;;  %v2232_v7 = vsel %vm2195_vm6, %v7292_v25, %v2231_v1  ;;  %v7303_v61 = vld [vmem:[#allocation141_spill] sm:$0xff]  ;;  %v7304_v22 = vld [vmem:[#allocation136_spill] sm:$0xff]  ;;  %v7308_v30 = vld [vmem:[#allocation135_spill] sm:$0xff] }
 0x206   :  { %v2239_v53 = vsel %vm2195_vm6, %v7293_v46, %v2238_v0  ;;  %v2246_v42 = vsel %vm2195_vm6, %v7294_v49, %v2245_v2  ;;  %v5756_v57 = vsel %vm2197_vm7, %v7295_v41, %v2232_v7  ;;  %v2248_v60 = vsel %vm2185_vm1, %v7299_v55, %v7298_v20  ;;  %v7305_v21 = vld [vmem:[#allocation145_spill] sm:$0xff]  ;;  %v7307_v9 = vld [vmem:[#allocation128_spill] sm:$0xff]  ;;  %v7309_v13 = vld [vmem:[#allocation139_spill] sm:$0xff] }
 0x207   :  { %v5760_v15 = vsel %vm2197_vm7, %v7296_v50, %v2239_v53  ;;  %v5764_v24 = vsel %vm2197_vm7, %v7297_v48, %v2246_v42  ;;  %v2249_v29 = vsel %vm2187_vm2, %v7300_v17, %v2248_v60  ;;  %v2255_v4 = vsel %vm2185_vm1, %v7302_v62, %v7301_v23  ;;  %v7306_v27 = vld [vmem:[#allocation149_spill] sm:$0xff]  ;;  %v7310_v6 = vld [vmem:[#allocation150_spill] sm:$0xff]  ;;  %v7313_v2 = vld [vmem:[#allocation143_spill] sm:$0xff] }
 0x208   :  { %v2262_v12 = vsel %vm2185_vm1, %v7304_v22, %v7303_v61  ;;  %v2269_v39 = vsel %vm2185_vm1, %v7306_v27, %v7305_v21  ;;  %v2250_v47 = vsel %vm2189_vm3, %v7307_v9, %v2249_v29  ;;  %v2256_v18 = vsel %vm2187_vm2, %v7308_v30, %v2255_v4  ;;  %v7311_v1 = vld [vmem:[#allocation129_spill] sm:$0xff]  ;;  %v7312_v0 = vld [vmem:[#allocation130_spill] sm:$0xff]  ;;  %v7314_v25 = vld [vmem:[#allocation152_spill] sm:$0xff] }
 0x209   :  { %v2263_v8 = vsel %vm2187_vm2, %v7309_v13, %v2262_v12  ;;  %v2270_v40 = vsel %vm2187_vm2, %v7310_v6, %v2269_v39  ;;  %v2251_v52 = vsel %vm2191_vm4, %v7311_v1, %v2250_v47  ;;  %v2257_v59 = vsel %vm2189_vm3, %v7312_v0, %v2256_v18  ;;  %v7315_v46 = vld [vmem:[#allocation124_spill] sm:$0xff]  ;;  %v7316_v49 = vld [vmem:[#allocation133_spill] sm:$0xff]  ;;  %v7319_v55 = vld [vmem:[#allocation127_spill] sm:$0xff] }
 0x20a   :  { %v2264_v14 = vsel %vm2189_vm3, %v7313_v2, %v2263_v8  ;;  %v2271_v7 = vsel %vm2189_vm3, %v7314_v25, %v2270_v40  ;;  %v2252_v53 = vsel %vm2193_vm5, %v7315_v46, %v2251_v52  ;;  %v2258_v42 = vsel %vm2191_vm4, %v7316_v49, %v2257_v59  ;;  %v7317_v41 = vld [vmem:[#allocation144_spill] sm:$0xff]  ;;  %v7318_v48 = vld [vmem:[#allocation153_spill] sm:$0xff]  ;;  %v7321_v23 = vld [vmem:[#allocation146_spill] sm:$0xff] }
 0x20b   :  { %v2265_v50 = vsel %vm2191_vm4, %v7317_v41, %v2264_v14  ;;  %v2272_v20 = vsel %vm2191_vm4, %v7318_v48, %v2271_v7  ;;  %v2253_v60 = vsel %vm2195_vm6, %v7319_v55, %v2252_v53  ;;  %v7320_v17 = vld [vmem:[#allocation137_spill] sm:$0xff]  ;;  %v7322_v4 = vld [vmem:[#allocation148_spill] sm:$0xff]  ;;  %v7323_v22 = vld [vmem:[#allocation131_spill] sm:$0xff]  ;;  %v2290_v53 = vsel %vm2185_vm1, %v5558_v43, %v5553_v63 }
 0x20c   :  { %v2259_v29 = vsel %vm2193_vm5, %v7320_v17, %v2258_v42  ;;  %v2266_v62 = vsel %vm2193_vm5, %v7321_v23, %v2265_v50  ;;  %v2273_v61 = vsel %vm2193_vm5, %v7322_v4, %v2272_v20  ;;  %v2254_v12 = vsel %vm2197_vm7, %v7323_v22, %v2253_v60  ;;  %v7324_v21 = vld [vmem:[#allocation138_spill] sm:$0xff]  ;;  %v7325_v39 = vld [vmem:[#allocation147_spill] sm:$0xff]  ;;  %v7327_v18 = vld [vmem:[#allocation140_spill] sm:$0xff] }
 0x20d   :  { %v2260_v27 = vsel %vm2195_vm6, %v7324_v21, %v2259_v29  ;;  %v2267_v9 = vsel %vm2195_vm6, %v7325_v39, %v2266_v62  ;;  %v7326_v47 = vld [vmem:[#allocation151_spill] sm:$0xff]  ;;  %v7328_v8 = vld [vmem:[#allocation142_spill] sm:$0xff]  ;;  %v7331_v0 = vld [vmem:[#allocation5_spill] sm:$0xff]  ;;  %v2297_v49 = vsel %vm2185_vm1, %v5598_v56, %v5593_v19  ;;  %v2291_v20 = vsel %vm2187_vm2, %v5563_v58, %v2290_v53 }
 0x20e   :  { %v2274_v30 = vsel %vm2195_vm6, %v7326_v47, %v2273_v61  ;;  %v2261_v13 = vsel %vm2197_vm7, %v7327_v18, %v2260_v27  ;;  %v2268_v6 = vsel %vm2197_vm7, %v7328_v8, %v2267_v9  ;;  %v7329_v40 = vld [vmem:[#allocation2_spill] sm:$0xff]  ;;  %v7330_v52 = vld [vmem:[#allocation3_spill] sm:$0xff]  ;;  %v7333_v25 = vld [vmem:[#allocation12_spill] sm:$0xff]  ;;  %v2298_v55 = vsel %vm2187_vm2, %v5603_v5, %v2297_v49 }
 0x20f   :  { %v2275_v1 = vsel %vm2197_vm7, %v7329_v40, %v2274_v30  ;;  %v2276_v59 = vsel %vm2185_vm1, %v7331_v0, %v7330_v52  ;;  %v7332_v2 = vld [vmem:[#allocation6_spill] sm:$0xff]  ;;  %v7335_v42 = vld [vmem:[#allocation8_spill] sm:$0xff]  ;;  %v7336_v50 = vld [vmem:[#allocation15_spill] sm:$0xff]  ;;  %v2292_v43 = vsel %vm2189_vm3, %v5568_v28, %v2291_v20  ;;  %v2299_v19 = vsel %vm2189_vm3, %v5608_v33, %v2298_v55 }
 0x210   :  { %v2277_v14 = vsel %vm2187_vm2, %v7332_v2, %v2276_v59  ;;  %v7334_v7 = vld [vmem:[#allocation14_spill] sm:$0xff]  ;;  %v7337_v60 = vld [vmem:[#allocation9_spill] sm:$0xff]  ;;  %v7338_v56 = vld [vmem:[#allocation4_spill] sm:$0xff]  ;;  %v2293_v5 = vsel %vm2191_vm4, %v5573_v35, %v2292_v43  ;;  %v2300_v23 = vsel %vm2191_vm4, %v5613_v36, %v2299_v19  ;;  %v2304_v39 = vpack.c.b16 %v5678_v11, %v5678_v11 }
 0x211   :  { %v2283_v46 = vsel %vm2185_vm1, %v7334_v7, %v7333_v25  ;;  %v2278_v41 = vsel %vm2189_vm3, %v7335_v42, %v2277_v14  ;;  %v7339_v62 = vld [vmem:[#allocation7_spill] sm:$0xff]  ;;  %v2294_v33 = vsel %vm2193_vm5, %v5578_v38, %v2293_v5  ;;  %v2301_v4 = vsel %vm2193_vm5, %v5618_v32, %v2300_v23  ;;  %v7341_v21 = vld [vmem:[#allocation10_spill] sm:$0xff] }
 0x212   :  { %v2284_v48 = vsel %vm2187_vm2, %v7336_v50, %v2283_v46  ;;  %v2279_v17 = vsel %vm2191_vm4, %v7337_v60, %v2278_v41  ;;  %v7340_v61 = vld [vmem:[#allocation11_spill] sm:$0xff]  ;;  %v2295_v36 = vsel %vm2195_vm6, %v5583_v31, %v2294_v33  ;;  %v2302_v22 = vsel %vm2195_vm6, %v5623_v51, %v2301_v4  ;;  %v7342_v27 = vld [vmem:[#allocation82_spill] sm:$0xff]  ;;  %2336 = vst [vmem:[%s5951_s1] sm:$0xf] %v2304_v39 }
 0x213   :  { %v2285_v63 = vsel %vm2189_vm3, %v5528_v44, %v2284_v48  ;;  %v2280_v29 = vsel %vm2193_vm5, %v7338_v56, %v2279_v17  ;;  %v2296_v38 = vsel %vm2197_vm7, %v7342_v27, %v2295_v36  ;;  %v2303_v32 = vsel %vm2197_vm7, %v5628_v34, %v2302_v22 }
 0x214   :  { %v2286_v58 = vsel %vm2191_vm4, %v5533_v3, %v2285_v63  ;;  %v2281_v44 = vsel %vm2195_vm6, %v7339_v62, %v2280_v29  ;;  %v2306_v31 = vpack.c.b16 %v5692_v16, %v5692_v16  ;;  %v2307_v51 = vpack.c.b16 %v5696_v37, %v5696_v37 }
 0x215   :  { %v2287_v28 = vsel %vm2193_vm5, %v5538_v54, %v2286_v58  ;;  %v2282_v3 = vsel %vm2197_vm7, %v7340_v61, %v2281_v44  ;;  %v2308_v9 = vpack.c.b16 %v5746_v26, %v5746_v26  ;;  %v2309_v47 = vpack.c.b16 %v5756_v57, %v5756_v57 }
 0x216   :  { %v2288_v35 = vsel %vm2195_vm6, %v5543_v45, %v2287_v28  ;;  %v2305_v45 = vpack.c.b16 %v5688_v10, %v5688_v10  ;;  %v2310_v34 = vpack.c.b16 %v5760_v15, %v5760_v15  ;;  %v2311_v11 = vpack.c.b16 %v5764_v24, %v5764_v24  ;;  %2338 = vst [vmem:[%s5951_s1 + $0x8] sm:$0xf] %v2306_v31 }
 0x217   :  { %v2289_v54 = vsel %vm2197_vm7, %v7341_v21, %v2288_v35  ;;  %v2312_v30 = vpack.c.b16 %v2254_v12, %v2254_v12  ;;  %v2313_v10 = vpack.c.b16 %v2261_v13, %v2261_v13  ;;  %v2314_v16 = vpack.c.b16 %v2268_v6, %v2268_v6  ;;  %2339 = vst [vmem:[%s5951_s1 + $0xc] sm:$0xf] %v2307_v51 }
 0x218   :  { %v2315_v37 = vpack.c.b16 %v2275_v1, %v2275_v1  ;;  %v2316_v18 = vpack.c.b16 %v2282_v3, %v2282_v3  ;;  %2337 = vst [vmem:[%s5951_s1 + $0x4] sm:$0xf] %v2305_v45  ;;  %2340 = vst [vmem:[%s5951_s1 + $0x10] sm:$0xf] %v2308_v9  ;;  %v2317_v26 = vpack.c.b16 %v2289_v54, %v2289_v54 }
 0x219   :  { %v2318_v57 = vpack.c.b16 %v2296_v38, %v2296_v38  ;;  %v2319_v15 = vpack.c.b16 %v2303_v32, %v2303_v32  ;;  %2341 = vst [vmem:[%s5951_s1 + $0x14] sm:$0xf] %v2309_v47  ;;  %2342 = vst [vmem:[%s5951_s1 + $0x18] sm:$0xf] %v2310_v34 }
 0x21a   :  { %2343 = vst [vmem:[%s5951_s1 + $0x1c] sm:$0xf] %v2311_v11  ;;  %2344 = vst [vmem:[%s5951_s1 + $0x20] sm:$0xf] %v2312_v30 }
 0x21b   :  { %2345 = vst [vmem:[%s5951_s1 + $0x24] sm:$0xf] %v2313_v10  ;;  %2346 = vst [vmem:[%s5951_s1 + $0x28] sm:$0xf] %v2314_v16 }
 0x21c   :  { %2347 = vst [vmem:[%s5951_s1 + $0x2c] sm:$0xf] %v2315_v37  ;;  %2348 = vst [vmem:[%s5951_s1 + $0x30] sm:$0xf] %v2316_v18 }
 0x21d   :  { %2349 = vst [vmem:[%s5951_s1 + $0x34] sm:$0xf] %v2317_v26  ;;  %2350 = vst [vmem:[%s5951_s1 + $0x38] sm:$0xf] %v2318_v57 }
 0x21e   :  { %2351 = vst [vmem:[%s5951_s1 + $0x3c] sm:$0xf] %v2319_v15 }

// kernel: _lambda_.64
= control target key start
LH: loop header
LB: loop body
LE: loop exit
PB: predicated region body
PF: predicated region fallthrough
CT: control target
= control target key end

     0   :  { %s618_s1 = inlined_call_operand.vmem [shape: bf16[128,128], index: 1, kind: input, shape index: {}]   ;;  %s619_s0 = inlined_call_operand.vmem [shape: bf16[128,128], index: 0, kind: input, shape index: {}]   ;;  %s620_s2 = inlined_call_operand.vmem [shape: f32[1,128], index: 2, kind: input, shape index: {}]   ;;  %s621_s3 = inlined_call_operand.vmem [shape: bf16[128,128], index: 3, kind: output, shape index: {}]  }
   0x1   :  { %v507_v0 = vld [vmem:[%s618_s1] sm:$0xff]   ;;  %v508_v1 = vld [vmem:[%s618_s1 + $0x8] sm:$0xff]   ;;  %v509_v2 = vld [vmem:[%s618_s1 + $0x10] sm:$0xff]  }
   0x2   :  { %459 = vmatprep.subr.bf16.mxu0 %v507_v0  ;;  %491 = vmatprep.subr.bf16.mxu1 %v507_v0  ;;  %v510_v3 = vld [vmem:[%s618_s1 + $0x18] sm:$0xff]   ;;  %v515_v4 = vld [vmem:[%s619_s0] sm:$0xff]   ;;  %v512_v7 = vld [vmem:[%s618_s1 + $0x28] sm:$0xff]  }
   0x3   :  { %460 = vmatpush3.bf16.msra.mxu0 %v507_v0  ;;  %499 = vmatpush3.bf16.msra.mxu1 %v507_v0  ;;  %v516_v5 = vld [vmem:[%s619_s0 + $0x20] sm:$0xff]   ;;  %v513_v8 = vld [vmem:[%s618_s1 + $0x30] sm:$0xff]   ;;  %v514_v9 = vld [vmem:[%s618_s1 + $0x38] sm:$0xff]  }
   0x4   :  { %461 = vmatprep.subr.bf16.mxu0 %v508_v1  ;;  %492 = vmatprep.subr.bf16.mxu1 %v508_v1  ;;  %v511_v6 = vld [vmem:[%s618_s1 + $0x20] sm:$0xff]   ;;  %v517_v10 = vld [vmem:[%s619_s0 + $0x8] sm:$0xff]   ;;  %v519_v12 = vld [vmem:[%s619_s0 + $0x10] sm:$0xff]  }
   0x5   :  { %475 = vmatprep.mubr.bf16.mxu0 %v515_v4  ;;  %483 = vmatprep.mubr.bf16.mxu1 %v516_v5  ;;  %v518_v11 = vld [vmem:[%s619_s0 + $0x28] sm:$0xff]   ;;  %v520_v13 = vld [vmem:[%s619_s0 + $0x30] sm:$0xff]   ;;  %v521_v14 = vld [vmem:[%s619_s0 + $0x18] sm:$0xff]  }
   0x6   :  { %v522_v15 = vld [vmem:[%s619_s0 + $0x38] sm:$0xff]   ;;  %v347_v16 = vld [vmem:[%s620_s2] ss:$0 sm:$0xff] }
   0x7   :  { %462 = vmatpush3.bf16.msra.mxu0 %v508_v1  ;;  %500 = vmatpush3.bf16.msra.mxu1 %v508_v1 }
   0x8   :  { %463 = vmatprep.subr.bf16.mxu0 %v509_v2  ;;  %493 = vmatprep.subr.bf16.mxu1 %v509_v2 }
   0xb   :  { %464 = vmatpush3.bf16.msra.mxu0 %v509_v2  ;;  %501 = vmatpush3.bf16.msra.mxu1 %v509_v2 }
   0xc   :  { %465 = vmatprep.subr.bf16.mxu0 %v510_v3  ;;  %494 = vmatprep.subr.bf16.mxu1 %v510_v3 }
   0xf   :  { %466 = vmatpush3.bf16.msra.mxu0 %v510_v3  ;;  %502 = vmatpush3.bf16.msra.mxu1 %v510_v3 }
  0x10   :  { %467 = vmatprep.subr.bf16.mxu0 %v511_v6  ;;  %495 = vmatprep.subr.bf16.mxu1 %v511_v6 }
  0x13   :  { %468 = vmatpush3.bf16.msra.mxu0 %v511_v6  ;;  %503 = vmatpush3.bf16.msra.mxu1 %v511_v6 }
  0x14   :  { %469 = vmatprep.subr.bf16.mxu0 %v512_v7  ;;  %496 = vmatprep.subr.bf16.mxu1 %v512_v7 }
  0x17   :  { %470 = vmatpush3.bf16.msra.mxu0 %v512_v7  ;;  %504 = vmatpush3.bf16.msra.mxu1 %v512_v7 }
  0x18   :  { %471 = vmatprep.subr.bf16.mxu0 %v513_v8  ;;  %497 = vmatprep.subr.bf16.mxu1 %v513_v8 }
  0x1b   :  { %472 = vmatpush3.bf16.msra.mxu0 %v513_v8  ;;  %505 = vmatpush3.bf16.msra.mxu1 %v513_v8 }
  0x1c   :  { %473 = vmatprep.subr.bf16.mxu0 %v514_v9  ;;  %498 = vmatprep.subr.bf16.mxu1 %v514_v9 }
  0x1f   :  { %474 = vmatpush3.bf16.msra.mxu0 %v514_v9  ;;  %506 = vmatpush3.bf16.msra.mxu1 %v514_v9 }
  0x22   :  { %476 = vmatmul.mubr.bf16.vlgmr.msra.gmra.mrb[0].mxu0 %v517_v10  ;;  %484 = vmatmul.mubr.bf16.vlgmr.msra.gmra.mrb[0].mxu1 %v518_v11 }
  0x23   :  { %479 = vmatprep.mubr.bf16.mxu0 %v519_v12  ;;  %487 = vmatprep.mubr.bf16.mxu1 %v520_v13 }
  0x2a   :  { %480 = vmatmul.mubr.bf16.gmra.mrb[4].mxu0 %v521_v14  ;;  %488 = vmatmul.mubr.bf16.gmra.mrb[4].mxu1 %v522_v15 }
  0xf5   :  { %v477_v17 = vpop.f32.mrb[0].mxu0  ;;  %v485_v18 = vpop.f32.mrb[0].mxu1 }
  0xf6   :  { %v193_v19 = vadd.f32 %v477_v17, %v347_v16  ;;  %v225_v20 = vadd.f32 %v485_v18, %v347_v16  ;;  %v184_v21 = vpop.f32.mrb[1].mxu0  ;;  %v216_v22 = vpop.f32.mrb[1].mxu1 }
  0xf7   :  { %v185_v23 = vadd.f32 %v347_v16, %v184_v21  ;;  %v217_v24 = vadd.f32 %v347_v16, %v216_v22  ;;  %v478_v25 = vpop.f32.mrb[2].mxu0  ;;  %v486_v26 = vpop.f32.mrb[2].mxu1 }
  0xf8   :  { %v196_v27 = vadd.f32 %v478_v25, %v347_v16  ;;  %v228_v28 = vadd.f32 %v486_v26, %v347_v16  ;;  %v187_v29 = vpop.f32.mrb[3].mxu0  ;;  %v219_v30 = vpop.f32.mrb[3].mxu1  ;;  %v249_v33 = vmax.f32 %v193_v19, 0.0  ;;  %v257_v34 = vmax.f32 %v225_v20, 0.0 }
  0xf9   :  { %v188_v31 = vadd.f32 %v347_v16, %v187_v29  ;;  %v220_v32 = vadd.f32 %v347_v16, %v219_v30  ;;  %v247_v37 = vmax.f32 %v185_v23, 0.0  ;;  %v255_v38 = vmax.f32 %v217_v24, 0.0 }
  0xfa   :  { %v250_v35 = vmax.f32 %v196_v27, 0.0  ;;  %v258_v36 = vmax.f32 %v228_v28, 0.0 }
  0xfb   :  { %v248_v39 = vmax.f32 %v188_v31, 0.0  ;;  %v256_v40 = vmax.f32 %v220_v32, 0.0 }
  0xfc   :  { %v404_v41 = vpack.c.bf16 %v250_v35, %v249_v33  ;;  %v424_v42 = vpack.c.bf16 %v258_v36, %v257_v34 }
  0xfd   :  { %v399_v43 = vpack.c.bf16 %v248_v39, %v247_v37  ;;  %v419_v44 = vpack.c.bf16 %v256_v40, %v255_v38  ;;  %v481_v45 = vpop.f32.mrb[4].mxu0  ;;  %v489_v46 = vpop.f32.mrb[4].mxu1 }
  0xfe   :  { %436 = vst [vmem:[%s621_s3 + $0x8] sm:$0xff] %v404_v41   ;;  %440 = vst [vmem:[%s621_s3 + $0x28] sm:$0xff] %v424_v42   ;;  %v209_v47 = vadd.f32 %v481_v45, %v347_v16  ;;  %v241_v48 = vadd.f32 %v489_v46, %v347_v16  ;;  %v200_v49 = vpop.f32.mrb[5].mxu0  ;;  %v232_v50 = vpop.f32.mrb[5].mxu1 }
  0xff   :  { %400 = vst [vmem:[%s621_s3] sm:$0xff] %v399_v43   ;;  %439 = vst [vmem:[%s621_s3 + $0x20] sm:$0xff] %v419_v44   ;;  %v201_v51 = vadd.f32 %v347_v16, %v200_v49  ;;  %v233_v52 = vadd.f32 %v347_v16, %v232_v50  ;;  %v482_v53 = vpop.f32.mrb[6].mxu0  ;;  %v490_v54 = vpop.f32.mrb[6].mxu1 }
 0x100   :  { %v212_v55 = vadd.f32 %v482_v53, %v347_v16  ;;  %v244_v56 = vadd.f32 %v490_v54, %v347_v16  ;;  %v203_v57 = vpop.f32.mrb[7].mxu0  ;;  %v235_v58 = vpop.f32.mrb[7].mxu1  ;;  %v253_v61 = vmax.f32 %v209_v47, 0.0  ;;  %v261_v62 = vmax.f32 %v241_v48, 0.0 }
 0x101   :  { %v204_v59 = vadd.f32 %v347_v16, %v203_v57  ;;  %v236_v60 = vadd.f32 %v347_v16, %v235_v58  ;;  %v251_v1 = vmax.f32 %v201_v51, 0.0  ;;  %v259_v2 = vmax.f32 %v233_v52, 0.0 }
 0x102   :  { %v254_v63 = vmax.f32 %v212_v55, 0.0  ;;  %v262_v0 = vmax.f32 %v244_v56, 0.0 }
 0x103   :  { %v252_v3 = vmax.f32 %v204_v59, 0.0  ;;  %v260_v4 = vmax.f32 %v236_v60, 0.0 }
 0x104   :  { %v414_v5 = vpack.c.bf16 %v254_v63, %v253_v61  ;;  %v434_v6 = vpack.c.bf16 %v262_v0, %v261_v62 }
 0x105   :  { %v409_v7 = vpack.c.bf16 %v252_v3, %v251_v1  ;;  %v429_v8 = vpack.c.bf16 %v260_v4, %v259_v2 }
 0x106   :  { %438 = vst [vmem:[%s621_s3 + $0x18] sm:$0xff] %v414_v5   ;;  %442 = vst [vmem:[%s621_s3 + $0x38] sm:$0xff] %v434_v6  }
 0x107   :  { %437 = vst [vmem:[%s621_s3 + $0x10] sm:$0xff] %v409_v7   ;;  %441 = vst [vmem:[%s621_s3 + $0x30] sm:$0xff] %v429_v8  }

// kernel: _lambda_.66
= control target key start
LH: loop header
LB: loop body
LE: loop exit
PB: predicated region body
PF: predicated region fallthrough
CT: control target
= control target key end

     0   :  { %s602_s1 = inlined_call_operand.vmem [shape: bf16[128,128], index: 1, kind: input, shape index: {}]   ;;  %s603_s0 = inlined_call_operand.vmem [shape: bf16[128,128], index: 0, kind: input, shape index: {}]   ;;  %s604_s2 = inlined_call_operand.vmem [shape: f32[1,128], index: 2, kind: input, shape index: {}]   ;;  %s605_s3 = inlined_call_operand.vmem [shape: bf16[128,128], index: 3, kind: output, shape index: {}]  }
   0x1   :  { %v491_v0 = vld [vmem:[%s602_s1] sm:$0xff]   ;;  %v492_v1 = vld [vmem:[%s602_s1 + $0x8] sm:$0xff]   ;;  %v493_v2 = vld [vmem:[%s602_s1 + $0x10] sm:$0xff]  }
   0x2   :  { %443 = vmatprep.subr.bf16.mxu0 %v491_v0  ;;  %475 = vmatprep.subr.bf16.mxu1 %v491_v0  ;;  %v494_v3 = vld [vmem:[%s602_s1 + $0x18] sm:$0xff]   ;;  %v499_v4 = vld [vmem:[%s603_s0] sm:$0xff]   ;;  %v496_v7 = vld [vmem:[%s602_s1 + $0x28] sm:$0xff]  }
   0x3   :  { %444 = vmatpush3.bf16.msra.mxu0 %v491_v0  ;;  %483 = vmatpush3.bf16.msra.mxu1 %v491_v0  ;;  %v500_v5 = vld [vmem:[%s603_s0 + $0x20] sm:$0xff]   ;;  %v497_v8 = vld [vmem:[%s602_s1 + $0x30] sm:$0xff]   ;;  %v498_v9 = vld [vmem:[%s602_s1 + $0x38] sm:$0xff]  }
   0x4   :  { %445 = vmatprep.subr.bf16.mxu0 %v492_v1  ;;  %476 = vmatprep.subr.bf16.mxu1 %v492_v1  ;;  %v495_v6 = vld [vmem:[%s602_s1 + $0x20] sm:$0xff]   ;;  %v501_v10 = vld [vmem:[%s603_s0 + $0x8] sm:$0xff]   ;;  %v503_v12 = vld [vmem:[%s603_s0 + $0x10] sm:$0xff]  }
   0x5   :  { %459 = vmatprep.mubr.bf16.mxu0 %v499_v4  ;;  %467 = vmatprep.mubr.bf16.mxu1 %v500_v5  ;;  %v502_v11 = vld [vmem:[%s603_s0 + $0x28] sm:$0xff]   ;;  %v504_v13 = vld [vmem:[%s603_s0 + $0x30] sm:$0xff]   ;;  %v505_v14 = vld [vmem:[%s603_s0 + $0x18] sm:$0xff]  }
   0x6   :  { %v506_v15 = vld [vmem:[%s603_s0 + $0x38] sm:$0xff]   ;;  %v331_v17 = vld [vmem:[%s604_s2] ss:$0 sm:$0xff] }
   0x7   :  { %446 = vmatpush3.bf16.msra.mxu0 %v492_v1  ;;  %484 = vmatpush3.bf16.msra.mxu1 %v492_v1 }
   0x8   :  { %447 = vmatprep.subr.bf16.mxu0 %v493_v2  ;;  %477 = vmatprep.subr.bf16.mxu1 %v493_v2 }
   0xb   :  { %448 = vmatpush3.bf16.msra.mxu0 %v493_v2  ;;  %485 = vmatpush3.bf16.msra.mxu1 %v493_v2 }
   0xc   :  { %449 = vmatprep.subr.bf16.mxu0 %v494_v3  ;;  %478 = vmatprep.subr.bf16.mxu1 %v494_v3 }
   0xf   :  { %450 = vmatpush3.bf16.msra.mxu0 %v494_v3  ;;  %486 = vmatpush3.bf16.msra.mxu1 %v494_v3 }
  0x10   :  { %451 = vmatprep.subr.bf16.mxu0 %v495_v6  ;;  %479 = vmatprep.subr.bf16.mxu1 %v495_v6 }
  0x13   :  { %452 = vmatpush3.bf16.msra.mxu0 %v495_v6  ;;  %487 = vmatpush3.bf16.msra.mxu1 %v495_v6 }
  0x14   :  { %453 = vmatprep.subr.bf16.mxu0 %v496_v7  ;;  %480 = vmatprep.subr.bf16.mxu1 %v496_v7 }
  0x17   :  { %454 = vmatpush3.bf16.msra.mxu0 %v496_v7  ;;  %488 = vmatpush3.bf16.msra.mxu1 %v496_v7 }
  0x18   :  { %455 = vmatprep.subr.bf16.mxu0 %v497_v8  ;;  %481 = vmatprep.subr.bf16.mxu1 %v497_v8 }
  0x1b   :  { %456 = vmatpush3.bf16.msra.mxu0 %v497_v8  ;;  %489 = vmatpush3.bf16.msra.mxu1 %v497_v8 }
  0x1c   :  { %457 = vmatprep.subr.bf16.mxu0 %v498_v9  ;;  %482 = vmatprep.subr.bf16.mxu1 %v498_v9 }
  0x1f   :  { %458 = vmatpush3.bf16.msra.mxu0 %v498_v9  ;;  %490 = vmatpush3.bf16.msra.mxu1 %v498_v9 }
  0x22   :  { %460 = vmatmul.mubr.bf16.vlgmr.msra.gmra.mrb[0].mxu0 %v501_v10  ;;  %468 = vmatmul.mubr.bf16.vlgmr.msra.gmra.mrb[0].mxu1 %v502_v11 }
  0x23   :  { %463 = vmatprep.mubr.bf16.mxu0 %v503_v12  ;;  %471 = vmatprep.mubr.bf16.mxu1 %v504_v13 }
  0x2a   :  { %464 = vmatmul.mubr.bf16.gmra.mrb[4].mxu0 %v505_v14  ;;  %472 = vmatmul.mubr.bf16.gmra.mrb[4].mxu1 %v506_v15 }
  0xf5   :  { %v461_v16 = vpop.f32.mrb[0].mxu0  ;;  %v469_v18 = vpop.f32.mrb[0].mxu1 }
  0xf6   :  { %v184_v19 = vpop.f32.mrb[1].mxu0  ;;  %v216_v20 = vpop.f32.mrb[1].mxu1  ;;  %v193_v23 = vadd.f32 %v461_v16, %v331_v17  ;;  %v225_v24 = vadd.f32 %v469_v18, %v331_v17 }
  0xf7   :  { %v462_v21 = vpop.f32.mrb[2].mxu0  ;;  %v470_v22 = vpop.f32.mrb[2].mxu1  ;;  %v185_v29 = vadd.f32 %v331_v17, %v184_v19  ;;  %v217_v30 = vadd.f32 %v331_v17, %v216_v20 }
  0xf8   :  { %v196_v25 = vadd.f32 %v462_v21, %v331_v17  ;;  %v228_v26 = vadd.f32 %v470_v22, %v331_v17  ;;  %v187_v27 = vpop.f32.mrb[3].mxu0  ;;  %v219_v28 = vpop.f32.mrb[3].mxu1 }
  0xf9   :  { %v188_v31 = vadd.f32 %v331_v17, %v187_v27  ;;  %v220_v32 = vadd.f32 %v331_v17, %v219_v28 }
  0xfa   :  { %v388_v33 = vpack.c.bf16 %v196_v25, %v193_v23  ;;  %v408_v34 = vpack.c.bf16 %v228_v26, %v225_v24 }
  0xfb   :  { %v383_v35 = vpack.c.bf16 %v188_v31, %v185_v29  ;;  %v403_v36 = vpack.c.bf16 %v220_v32, %v217_v30 }
  0xfc   :  { %420 = vst [vmem:[%s605_s3 + $0x8] sm:$0xff] %v388_v33   ;;  %424 = vst [vmem:[%s605_s3 + $0x28] sm:$0xff] %v408_v34  }
  0xfd   :  { %384 = vst [vmem:[%s605_s3] sm:$0xff] %v383_v35   ;;  %423 = vst [vmem:[%s605_s3 + $0x20] sm:$0xff] %v403_v36   ;;  %v465_v37 = vpop.f32.mrb[4].mxu0  ;;  %v473_v38 = vpop.f32.mrb[4].mxu1 }
  0xfe   :  { %v200_v39 = vpop.f32.mrb[5].mxu0  ;;  %v232_v40 = vpop.f32.mrb[5].mxu1  ;;  %v209_v43 = vadd.f32 %v465_v37, %v331_v17  ;;  %v241_v44 = vadd.f32 %v473_v38, %v331_v17 }
  0xff   :  { %v466_v41 = vpop.f32.mrb[6].mxu0  ;;  %v474_v42 = vpop.f32.mrb[6].mxu1  ;;  %v201_v49 = vadd.f32 %v331_v17, %v200_v39  ;;  %v233_v50 = vadd.f32 %v331_v17, %v232_v40 }
 0x100   :  { %v212_v45 = vadd.f32 %v466_v41, %v331_v17  ;;  %v244_v46 = vadd.f32 %v474_v42, %v331_v17  ;;  %v203_v47 = vpop.f32.mrb[7].mxu0  ;;  %v235_v48 = vpop.f32.mrb[7].mxu1 }
 0x101   :  { %v204_v51 = vadd.f32 %v331_v17, %v203_v47  ;;  %v236_v52 = vadd.f32 %v331_v17, %v235_v48 }
 0x102   :  { %v398_v53 = vpack.c.bf16 %v212_v45, %v209_v43  ;;  %v418_v54 = vpack.c.bf16 %v244_v46, %v241_v44 }
 0x103   :  { %v393_v55 = vpack.c.bf16 %v204_v51, %v201_v49  ;;  %v413_v56 = vpack.c.bf16 %v236_v52, %v233_v50 }
 0x104   :  { %422 = vst [vmem:[%s605_s3 + $0x18] sm:$0xff] %v398_v53   ;;  %426 = vst [vmem:[%s605_s3 + $0x38] sm:$0xff] %v418_v54  }
 0x105   :  { %421 = vst [vmem:[%s605_s3 + $0x10] sm:$0xff] %v393_v55   ;;  %425 = vst [vmem:[%s605_s3 + $0x30] sm:$0xff] %v413_v56  }

// kernel: _lambda_.67
= control target key start
LH: loop header
LB: loop body
LE: loop exit
PB: predicated region body
PF: predicated region fallthrough
CT: control target
= control target key end

     0   :  { %s771_s1 = inlined_call_operand.vmem [shape: bf16[128,128], index: 1, kind: input, shape index: {}]   ;;  %s772_s0 = inlined_call_operand.vmem [shape: bf16[128,128], index: 0, kind: input, shape index: {}]   ;;  %s773_s3 = inlined_call_operand.vmem [shape: bf16[128,128], index: 3, kind: input, shape index: {}]   ;;  %s774_s2 = inlined_call_operand.vmem [shape: f32[1,128], index: 2, kind: input, shape index: {}]   ;;  %s775_s4 = inlined_call_operand.vmem [shape: bf16[128,128], index: 4, kind: output, shape index: {}]  }
   0x1   :  { %v597_v0 = vld [vmem:[%s771_s1] sm:$0xff]   ;;  %v598_v1 = vld [vmem:[%s771_s1 + $0x8] sm:$0xff]   ;;  %v599_v2 = vld [vmem:[%s771_s1 + $0x10] sm:$0xff]  }
   0x2   :  { %549 = vmatprep.subr.bf16.mxu0 %v597_v0  ;;  %581 = vmatprep.subr.bf16.mxu1 %v597_v0  ;;  %v600_v3 = vld [vmem:[%s771_s1 + $0x18] sm:$0xff]   ;;  %v605_v4 = vld [vmem:[%s772_s0] sm:$0xff]   ;;  %v602_v7 = vld [vmem:[%s771_s1 + $0x28] sm:$0xff]  }
   0x3   :  { %550 = vmatpush3.bf16.msra.mxu0 %v597_v0  ;;  %589 = vmatpush3.bf16.msra.mxu1 %v597_v0  ;;  %v606_v5 = vld [vmem:[%s772_s0 + $0x20] sm:$0xff]   ;;  %v603_v8 = vld [vmem:[%s771_s1 + $0x30] sm:$0xff]   ;;  %v604_v9 = vld [vmem:[%s771_s1 + $0x38] sm:$0xff]  }
   0x4   :  { %551 = vmatprep.subr.bf16.mxu0 %v598_v1  ;;  %582 = vmatprep.subr.bf16.mxu1 %v598_v1  ;;  %v601_v6 = vld [vmem:[%s771_s1 + $0x20] sm:$0xff]   ;;  %v607_v10 = vld [vmem:[%s772_s0 + $0x8] sm:$0xff]   ;;  %v609_v12 = vld [vmem:[%s772_s0 + $0x10] sm:$0xff]  }
   0x5   :  { %565 = vmatprep.mubr.bf16.mxu0 %v605_v4  ;;  %573 = vmatprep.mubr.bf16.mxu1 %v606_v5  ;;  %v608_v11 = vld [vmem:[%s772_s0 + $0x28] sm:$0xff]   ;;  %v610_v13 = vld [vmem:[%s772_s0 + $0x30] sm:$0xff]   ;;  %v611_v14 = vld [vmem:[%s772_s0 + $0x18] sm:$0xff]  }
   0x6   :  { %v612_v15 = vld [vmem:[%s772_s0 + $0x38] sm:$0xff]   ;;  %v519_v16 = vld [vmem:[%s773_s3 + $0x8] sm:$0xff]   ;;  %v448_v18 = vld [vmem:[%s773_s3] sm:$0xff]  }
   0x7   :  { %552 = vmatpush3.bf16.msra.mxu0 %v598_v1  ;;  %590 = vmatpush3.bf16.msra.mxu1 %v598_v1  ;;  %v523_v17 = vld [vmem:[%s773_s3 + $0x28] sm:$0xff]   ;;  %v522_v19 = vld [vmem:[%s773_s3 + $0x20] sm:$0xff]   ;;  %v706_v21 = vld [vmem:[%s773_s3 + $0x18] sm:$0xff]   ;;  %v453_v23 = vunpack.c.l.bf16 %v519_v16  ;;  %v449_v25 = vunpack.c.l.bf16 %v448_v18  ;;  %v454_v31 = vunpack.c.h.bf16 %v519_v16  ;;  %v450_v33 = vunpack.c.h.bf16 %v448_v18 }
   0x8   :  { %553 = vmatprep.subr.bf16.mxu0 %v599_v2  ;;  %583 = vmatprep.subr.bf16.mxu1 %v599_v2  ;;  %v701_v20 = vld [vmem:[%s774_s2] ss:$0 sm:$0xff]  ;;  %v711_v22 = vld [vmem:[%s773_s3 + $0x38] sm:$0xff]   ;;  %v469_v24 = vunpack.c.l.bf16 %v523_v17  ;;  %v465_v26 = vunpack.c.l.bf16 %v522_v19  ;;  %v716_v27 = vld [vmem:[%s773_s3 + $0x10] sm:$0xff]   ;;  %v470_v32 = vunpack.c.h.bf16 %v523_v17  ;;  %v466_v34 = vunpack.c.h.bf16 %v522_v19 }
   0x9   :  { %v721_v28 = vld [vmem:[%s773_s3 + $0x30] sm:$0xff]   ;;  %v461_v39 = vunpack.c.l.bf16 %v706_v21  ;;  %v477_v40 = vunpack.c.l.bf16 %v711_v22  ;;  %v457_v45 = vunpack.c.l.bf16 %v716_v27  ;;  %v462_v59 = vunpack.c.h.bf16 %v706_v21 }
   0xa   :  { %v473_v46 = vunpack.c.l.bf16 %v721_v28  ;;  %v478_v60 = vunpack.c.h.bf16 %v711_v22  ;;  %v458_v63 = vunpack.c.h.bf16 %v716_v27  ;;  %v474_v0 = vunpack.c.h.bf16 %v721_v28 }
   0xb   :  { %554 = vmatpush3.bf16.msra.mxu0 %v599_v2  ;;  %591 = vmatpush3.bf16.msra.mxu1 %v599_v2 }
   0xc   :  { %555 = vmatprep.subr.bf16.mxu0 %v600_v3  ;;  %584 = vmatprep.subr.bf16.mxu1 %v600_v3 }
   0xf   :  { %556 = vmatpush3.bf16.msra.mxu0 %v600_v3  ;;  %592 = vmatpush3.bf16.msra.mxu1 %v600_v3 }
  0x10   :  { %557 = vmatprep.subr.bf16.mxu0 %v601_v6  ;;  %585 = vmatprep.subr.bf16.mxu1 %v601_v6 }
  0x13   :  { %558 = vmatpush3.bf16.msra.mxu0 %v601_v6  ;;  %593 = vmatpush3.bf16.msra.mxu1 %v601_v6 }
  0x14   :  { %559 = vmatprep.subr.bf16.mxu0 %v602_v7  ;;  %586 = vmatprep.subr.bf16.mxu1 %v602_v7 }
  0x17   :  { %560 = vmatpush3.bf16.msra.mxu0 %v602_v7  ;;  %594 = vmatpush3.bf16.msra.mxu1 %v602_v7 }
  0x18   :  { %561 = vmatprep.subr.bf16.mxu0 %v603_v8  ;;  %587 = vmatprep.subr.bf16.mxu1 %v603_v8 }
  0x1b   :  { %562 = vmatpush3.bf16.msra.mxu0 %v603_v8  ;;  %595 = vmatpush3.bf16.msra.mxu1 %v603_v8 }
  0x1c   :  { %563 = vmatprep.subr.bf16.mxu0 %v604_v9  ;;  %588 = vmatprep.subr.bf16.mxu1 %v604_v9 }
  0x1f   :  { %564 = vmatpush3.bf16.msra.mxu0 %v604_v9  ;;  %596 = vmatpush3.bf16.msra.mxu1 %v604_v9 }
  0x22   :  { %566 = vmatmul.mubr.bf16.vlgmr.msra.gmra.mrb[0].mxu0 %v607_v10  ;;  %574 = vmatmul.mubr.bf16.vlgmr.msra.gmra.mrb[0].mxu1 %v608_v11 }
  0x23   :  { %569 = vmatprep.mubr.bf16.mxu0 %v609_v12  ;;  %577 = vmatprep.mubr.bf16.mxu1 %v610_v13 }
  0x2a   :  { %570 = vmatmul.mubr.bf16.gmra.mrb[4].mxu0 %v611_v14  ;;  %578 = vmatmul.mubr.bf16.gmra.mrb[4].mxu1 %v612_v15 }
  0xf5   :  { %v567_v29 = vpop.f32.mrb[0].mxu0  ;;  %v575_v30 = vpop.f32.mrb[0].mxu1 }
  0xf6   :  { %v196_v35 = vadd.f32 %v567_v29, %v701_v20  ;;  %v228_v36 = vadd.f32 %v575_v30, %v701_v20  ;;  %v187_v37 = vpop.f32.mrb[1].mxu0  ;;  %v219_v38 = vpop.f32.mrb[1].mxu1 }
  0xf7   :  { %v188_v41 = vadd.f32 %v701_v20, %v187_v37  ;;  %v220_v42 = vadd.f32 %v701_v20, %v219_v38  ;;  %v568_v43 = vpop.f32.mrb[2].mxu0  ;;  %v576_v44 = vpop.f32.mrb[2].mxu1 }
  0xf8   :  { %v284_v47 = vadd.f32 %v453_v23, %v196_v35  ;;  %v292_v48 = vadd.f32 %v469_v24, %v228_v36  ;;  %v199_v49 = vadd.f32 %v568_v43, %v701_v20  ;;  %v231_v50 = vadd.f32 %v576_v44, %v701_v20  ;;  %v190_v51 = vpop.f32.mrb[3].mxu0  ;;  %v222_v52 = vpop.f32.mrb[3].mxu1 }
  0xf9   :  { %v282_v53 = vadd.f32 %v449_v25, %v188_v41  ;;  %v290_v54 = vadd.f32 %v465_v26, %v220_v42  ;;  %v191_v55 = vadd.f32 %v701_v20, %v190_v51  ;;  %v223_v56 = vadd.f32 %v701_v20, %v222_v52 }
  0xfa   :  { %v285_v57 = vadd.f32 %v454_v31, %v199_v49  ;;  %v293_v58 = vadd.f32 %v470_v32, %v231_v50  ;;  %v300_v1 = vmax.f32 %v284_v47, 0.0  ;;  %v308_v2 = vmax.f32 %v292_v48, 0.0 }
  0xfb   :  { %v283_v61 = vadd.f32 %v450_v33, %v191_v55  ;;  %v291_v62 = vadd.f32 %v466_v34, %v223_v56  ;;  %v298_v5 = vmax.f32 %v282_v53, 0.0  ;;  %v306_v6 = vmax.f32 %v290_v54, 0.0 }
  0xfc   :  { %v301_v3 = vmax.f32 %v285_v57, 0.0  ;;  %v309_v4 = vmax.f32 %v293_v58, 0.0 }
  0xfd   :  { %v299_v7 = vmax.f32 %v283_v61, 0.0  ;;  %v307_v8 = vmax.f32 %v291_v62, 0.0  ;;  %v571_v9 = vpop.f32.mrb[4].mxu0  ;;  %v579_v10 = vpop.f32.mrb[4].mxu1 }
  0xfe   :  { %v487_v11 = vpack.c.bf16 %v301_v3, %v300_v1  ;;  %v507_v12 = vpack.c.bf16 %v309_v4, %v308_v2  ;;  %v212_v13 = vadd.f32 %v571_v9, %v701_v20  ;;  %v244_v14 = vadd.f32 %v579_v10, %v701_v20  ;;  %v203_v15 = vpop.f32.mrb[5].mxu0  ;;  %v235_v16 = vpop.f32.mrb[5].mxu1 }
  0xff   :  { %v482_v17 = vpack.c.bf16 %v299_v7, %v298_v5  ;;  %v502_v18 = vpack.c.bf16 %v307_v8, %v306_v6  ;;  %v204_v19 = vadd.f32 %v701_v20, %v203_v15  ;;  %v236_v21 = vadd.f32 %v701_v20, %v235_v16  ;;  %v572_v22 = vpop.f32.mrb[6].mxu0  ;;  %v580_v23 = vpop.f32.mrb[6].mxu1 }
 0x100   :  { %526 = vst [vmem:[%s775_s4 + $0x8] sm:$0xff] %v487_v11   ;;  %530 = vst [vmem:[%s775_s4 + $0x28] sm:$0xff] %v507_v12   ;;  %v288_v24 = vadd.f32 %v461_v39, %v212_v13  ;;  %v296_v25 = vadd.f32 %v477_v40, %v244_v14  ;;  %v215_v26 = vadd.f32 %v572_v22, %v701_v20  ;;  %v206_v28 = vpop.f32.mrb[7].mxu0  ;;  %v238_v29 = vpop.f32.mrb[7].mxu1 }
 0x101   :  { %v247_v27 = vadd.f32 %v580_v23, %v701_v20  ;;  %483 = vst [vmem:[%s775_s4] sm:$0xff] %v482_v17   ;;  %529 = vst [vmem:[%s775_s4 + $0x20] sm:$0xff] %v502_v18   ;;  %v286_v30 = vadd.f32 %v457_v45, %v204_v19  ;;  %v294_v31 = vadd.f32 %v473_v46, %v236_v21 }
 0x102   :  { %v207_v32 = vadd.f32 %v701_v20, %v206_v28  ;;  %v239_v33 = vadd.f32 %v701_v20, %v238_v29  ;;  %v289_v34 = vadd.f32 %v462_v59, %v215_v26  ;;  %v304_v38 = vmax.f32 %v288_v24, 0.0 }
 0x103   :  { %v297_v35 = vadd.f32 %v478_v60, %v247_v27  ;;  %v312_v39 = vmax.f32 %v296_v25, 0.0  ;;  %v302_v42 = vmax.f32 %v286_v30, 0.0  ;;  %v310_v43 = vmax.f32 %v294_v31, 0.0 }
 0x104   :  { %v287_v36 = vadd.f32 %v458_v63, %v207_v32  ;;  %v295_v37 = vadd.f32 %v474_v0, %v239_v33  ;;  %v305_v40 = vmax.f32 %v289_v34, 0.0 }
 0x105   :  { %v313_v41 = vmax.f32 %v297_v35, 0.0 }
 0x106   :  { %v303_v44 = vmax.f32 %v287_v36, 0.0  ;;  %v311_v47 = vmax.f32 %v295_v37, 0.0  ;;  %v497_v48 = vpack.c.bf16 %v305_v40, %v304_v38 }
 0x107   :  { %v517_v49 = vpack.c.bf16 %v313_v41, %v312_v39 }
 0x108   :  { %v492_v45 = vpack.c.bf16 %v303_v44, %v302_v42  ;;  %v512_v46 = vpack.c.bf16 %v311_v47, %v310_v43  ;;  %528 = vst [vmem:[%s775_s4 + $0x18] sm:$0xff] %v497_v48  }
 0x109   :  { %532 = vst [vmem:[%s775_s4 + $0x38] sm:$0xff] %v517_v49  }
 0x10a   :  { %527 = vst [vmem:[%s775_s4 + $0x10] sm:$0xff] %v492_v45   ;;  %531 = vst [vmem:[%s775_s4 + $0x30] sm:$0xff] %v512_v46  }

// kernel: _lambda_.75
= control target key start
LH: loop header
LB: loop body
LE: loop exit
PB: predicated region body
PF: predicated region fallthrough
CT: control target
= control target key end

     0   :  { %s446_s1 = inlined_call_operand.vmem [shape: bf16[256,128], index: 1, kind: input, shape index: {}]   ;;  %s447_s0 = inlined_call_operand.vmem [shape: bf16[32,256], index: 0, kind: input, shape index: {}]   ;;  %s448_s2 = inlined_call_operand.vmem [shape: f32[1,128], index: 2, kind: input, shape index: {}]   ;;  %s449_s3 = inlined_call_operand.vmem [shape: bf16[32,128], index: 3, kind: output, shape index: {}]  }
   0x1   :  { %v335_v0 = vld [vmem:[%s446_s1 + $0x40] sm:$0xff]   ;;  %v337_v2 = vld [vmem:[%s446_s1 + $0x48] sm:$0xff]   ;;  %v339_v4 = vld [vmem:[%s446_s1 + $0x50] sm:$0xff]  }
   0x2   :  { %v336_v1 = vld [vmem:[%s446_s1] sm:$0xff]   ;;  %291 = vmatprep.subr.bf16.mxu0 %v335_v0  ;;  %319 = vmatprep.subr.bf16.mxu1 %v335_v0  ;;  %v338_v3 = vld [vmem:[%s446_s1 + $0x8] sm:$0xff]   ;;  %v340_v5 = vld [vmem:[%s446_s1 + $0x10] sm:$0xff]  }
   0x3   :  { %292 = vmatpush3.bf16.msra.mxu0 %v336_v1  ;;  %327 = vmatpush3.bf16.msra.mxu1 %v336_v1  ;;  %v341_v6 = vld [vmem:[%s446_s1 + $0x58] sm:$0xff]   ;;  %v343_v8 = vld [vmem:[%s446_s1 + $0x60] sm:$0xff]   ;;  %v345_v10 = vld [vmem:[%s446_s1 + $0x68] sm:$0xff]  }
   0x4   :  { %293 = vmatprep.subr.bf16.mxu0 %v337_v2  ;;  %320 = vmatprep.subr.bf16.mxu1 %v337_v2  ;;  %v342_v7 = vld [vmem:[%s446_s1 + $0x18] sm:$0xff]   ;;  %v344_v9 = vld [vmem:[%s446_s1 + $0x20] sm:$0xff]   ;;  %v346_v13 = vld [vmem:[%s446_s1 + $0x28] sm:$0xff]  }
   0x5   :  { %v353_v11 = vld [vmem:[%s447_s0 + $0x4] ss:$8 sps:$4 sm:$0xff]   ;;  %v356_v12 = vld [vmem:[%s447_s0 + $0x14] ss:$8 sps:$4 sm:$0xff]   ;;  %v351_v18 = vld [vmem:[%s447_s0] ss:$8 sps:$4 sm:$0xff]  }
   0x6   :  { %v347_v14 = vld [vmem:[%s446_s1 + $0x70] sm:$0xff]   ;;  %206 = vmatprep.mubr.bf16.mxu0 %v353_v11  ;;  %214 = vmatprep.mubr.bf16.mxu1 %v356_v12  ;;  %v349_v16 = vld [vmem:[%s446_s1 + $0x78] sm:$0xff]   ;;  %v251_v22 = vld [vmem:[%s448_s2] ss:$0 sm:$0xff] }
   0x7   :  { %294 = vmatpush3.bf16.msra.mxu0 %v338_v3  ;;  %328 = vmatpush3.bf16.msra.mxu1 %v338_v3  ;;  %v348_v15 = vld [vmem:[%s446_s1 + $0x30] sm:$0xff]   ;;  %v350_v17 = vld [vmem:[%s446_s1 + $0x38] sm:$0xff]  }
   0x8   :  { %295 = vmatprep.subr.bf16.mxu0 %v339_v4  ;;  %321 = vmatprep.subr.bf16.mxu1 %v339_v4  ;;  %v354_v19 = vld [vmem:[%s447_s0 + $0x10] ss:$8 sps:$4 sm:$0xff]  }
   0xb   :  { %296 = vmatpush3.bf16.msra.mxu0 %v340_v5  ;;  %329 = vmatpush3.bf16.msra.mxu1 %v340_v5 }
   0xc   :  { %297 = vmatprep.subr.bf16.mxu0 %v341_v6  ;;  %322 = vmatprep.subr.bf16.mxu1 %v341_v6 }
   0xf   :  { %298 = vmatpush3.bf16.msra.mxu0 %v342_v7  ;;  %330 = vmatpush3.bf16.msra.mxu1 %v342_v7 }
  0x10   :  { %299 = vmatprep.subr.bf16.mxu0 %v343_v8  ;;  %323 = vmatprep.subr.bf16.mxu1 %v343_v8 }
  0x13   :  { %300 = vmatpush3.bf16.msra.mxu0 %v344_v9  ;;  %331 = vmatpush3.bf16.msra.mxu1 %v344_v9 }
  0x14   :  { %301 = vmatprep.subr.bf16.mxu0 %v345_v10  ;;  %324 = vmatprep.subr.bf16.mxu1 %v345_v10 }
  0x17   :  { %302 = vmatpush3.bf16.msra.mxu0 %v346_v13  ;;  %332 = vmatpush3.bf16.msra.mxu1 %v346_v13 }
  0x18   :  { %303 = vmatprep.subr.bf16.mxu0 %v347_v14  ;;  %325 = vmatprep.subr.bf16.mxu1 %v347_v14 }
  0x1b   :  { %304 = vmatpush3.bf16.msra.mxu0 %v348_v15  ;;  %333 = vmatpush3.bf16.msra.mxu1 %v348_v15 }
  0x1c   :  { %305 = vmatprep.subr.bf16.mxu0 %v349_v16  ;;  %326 = vmatprep.subr.bf16.mxu1 %v349_v16 }
  0x1f   :  { %306 = vmatpush3.bf16.msra.mxu0 %v350_v17  ;;  %334 = vmatpush3.bf16.msra.mxu1 %v350_v17 }
  0x22   :  { %207 = vmatmul.mubr.bf16.vlgmr.msra.gmra.mrb[0].mxu0 %v351_v18  ;;  %215 = vmatmul.mubr.bf16.vlgmr.msra.gmra.mrb[0].mxu1 %v354_v19 }
  0xf5   :  { %v307_v20 = vpop.f32.mrb[0].mxu0  ;;  %v313_v21 = vpop.f32.mrb[0].mxu1 }
  0xf6   :  { %v308_v23 = vpop.f32.mrb[1].mxu0  ;;  %v314_v24 = vpop.f32.mrb[1].mxu1 }
  0xf7   :  { %v309_v25 = vadd.f32 %v308_v23, %v307_v20  ;;  %v315_v26 = vadd.f32 %v314_v24, %v313_v21  ;;  %v310_v27 = vpop.f32.mrb[2].mxu0  ;;  %v316_v28 = vpop.f32.mrb[2].mxu1 }
  0xf8   :  { %v311_v29 = vpop.f32.mrb[3].mxu0  ;;  %v317_v30 = vpop.f32.mrb[3].mxu1 }
  0xf9   :  { %v209_v31 = vadd.f32 %v309_v25, %v251_v22  ;;  %v217_v32 = vadd.f32 %v315_v26, %v251_v22  ;;  %v312_v33 = vadd.f32 %v311_v29, %v310_v27  ;;  %v318_v34 = vadd.f32 %v317_v30, %v316_v28 }
  0xfb   :  { %v212_v35 = vadd.f32 %v312_v33, %v251_v22  ;;  %v220_v36 = vadd.f32 %v318_v34, %v251_v22  ;;  %v223_v37 = vmax.f32 %v209_v31, 0.0  ;;  %v225_v38 = vmax.f32 %v217_v32, 0.0 }
  0xfd   :  { %v224_v39 = vmax.f32 %v212_v35, 0.0  ;;  %v226_v40 = vmax.f32 %v220_v36, 0.0 }
  0xff   :  { %v283_v41 = vpack.c.bf16 %v224_v39, %v223_v37  ;;  %v288_v42 = vpack.c.bf16 %v226_v40, %v225_v38 }
 0x101   :  { %284 = vst [vmem:[%s449_s3] sm:$0xff] %v283_v41   ;;  %290 = vst [vmem:[%s449_s3 + $0x8] sm:$0xff] %v288_v42  }

// kernel: _lambda_.76
= control target key start
LH: loop header
LB: loop body
LE: loop exit
PB: predicated region body
PF: predicated region fallthrough
CT: control target
= control target key end

     0   :  { %s304_s1 = inlined_call_operand.vmem [shape: bf16[128,128], index: 1, kind: input, shape index: {}]   ;;  %s305_s0 = inlined_call_operand.vmem [shape: bf16[32,128], index: 0, kind: input, shape index: {}]   ;;  %s306_s2 = inlined_call_operand.vmem [shape: f32[1,128], index: 2, kind: input, shape index: {}]   ;;  %s307_s3 = inlined_call_operand.vmem [shape: bf16[32,128], index: 3, kind: output, shape index: {}]  }
   0x1   :  { %v235_v0 = vld [vmem:[%s304_s1] sm:$0xff]   ;;  %v236_v1 = vld [vmem:[%s304_s1 + $0x8] sm:$0xff]   ;;  %v237_v2 = vld [vmem:[%s304_s1 + $0x10] sm:$0xff]  }
   0x2   :  { %215 = vmatprep.subr.bf16.mxu0 %v235_v0  ;;  %v238_v3 = vld [vmem:[%s304_s1 + $0x18] sm:$0xff]   ;;  %v243_v4 = vld [vmem:[%s305_s0] sm:$0xff]   ;;  %v240_v6 = vld [vmem:[%s304_s1 + $0x28] sm:$0xff]  }
   0x3   :  { %216 = vmatpush3.bf16.msra.mxu0 %v235_v0  ;;  %231 = vmatprep.mubr.bf16.mxu0 %v243_v4  ;;  %v239_v5 = vld [vmem:[%s304_s1 + $0x20] sm:$0xff]   ;;  %v241_v7 = vld [vmem:[%s304_s1 + $0x30] sm:$0xff]   ;;  %v242_v8 = vld [vmem:[%s304_s1 + $0x38] sm:$0xff]  }
   0x4   :  { %217 = vmatprep.subr.bf16.mxu0 %v236_v1  ;;  %v244_v9 = vld [vmem:[%s305_s0 + $0x8] sm:$0xff]   ;;  %v175_v11 = vld [vmem:[%s306_s2] ss:$0 sm:$0xff] }
   0x7   :  { %218 = vmatpush3.bf16.msra.mxu0 %v236_v1 }
   0x8   :  { %219 = vmatprep.subr.bf16.mxu0 %v237_v2 }
   0xb   :  { %220 = vmatpush3.bf16.msra.mxu0 %v237_v2 }
   0xc   :  { %221 = vmatprep.subr.bf16.mxu0 %v238_v3 }
   0xf   :  { %222 = vmatpush3.bf16.msra.mxu0 %v238_v3 }
  0x10   :  { %223 = vmatprep.subr.bf16.mxu0 %v239_v5 }
  0x13   :  { %224 = vmatpush3.bf16.msra.mxu0 %v239_v5 }
  0x14   :  { %225 = vmatprep.subr.bf16.mxu0 %v240_v6 }
  0x17   :  { %226 = vmatpush3.bf16.msra.mxu0 %v240_v6 }
  0x18   :  { %227 = vmatprep.subr.bf16.mxu0 %v241_v7 }
  0x1b   :  { %228 = vmatpush3.bf16.msra.mxu0 %v241_v7 }
  0x1c   :  { %229 = vmatprep.subr.bf16.mxu0 %v242_v8 }
  0x1f   :  { %230 = vmatpush3.bf16.msra.mxu0 %v242_v8 }
  0x22   :  { %232 = vmatmul.mubr.bf16.vlgmr.msra.gmra.mrb[0].mxu0 %v244_v9 }
  0xf5   :  { %v233_v10 = vpop.f32.mrb[0].mxu0 }
  0xf6   :  { %v136_v12 = vpop.f32.mrb[1].mxu0  ;;  %v145_v14 = vadd.f32 %v233_v10, %v175_v11 }
  0xf7   :  { %v234_v13 = vpop.f32.mrb[2].mxu0  ;;  %v137_v17 = vadd.f32 %v175_v11, %v136_v12 }
  0xf8   :  { %v148_v15 = vadd.f32 %v234_v13, %v175_v11  ;;  %v139_v16 = vpop.f32.mrb[3].mxu0 }
  0xf9   :  { %v140_v18 = vadd.f32 %v175_v11, %v139_v16 }
  0xfa   :  { %v202_v19 = vpack.c.bf16 %v148_v15, %v145_v14 }
  0xfb   :  { %v197_v20 = vpack.c.bf16 %v140_v18, %v137_v17 }
  0xfc   :  { %204 = vst [vmem:[%s307_s3 + $0x8] sm:$0xff] %v202_v19  }
  0xfd   :  { %198 = vst [vmem:[%s307_s3] sm:$0xff] %v197_v20  }

// kernel: _lambda_.77
= control target key start
LH: loop header
LB: loop body
LE: loop exit
PB: predicated region body
PF: predicated region fallthrough
CT: control target
= control target key end

     0   :  { %s343_s1 = inlined_call_operand.vmem [shape: bf16[128,128], index: 1, kind: input, shape index: {}]   ;;  %s344_s0 = inlined_call_operand.vmem [shape: bf16[32,128], index: 0, kind: input, shape index: {}]   ;;  %s345_s3 = inlined_call_operand.vmem [shape: bf16[32,128], index: 3, kind: input, shape index: {}]   ;;  %s346_s2 = inlined_call_operand.vmem [shape: f32[1,128], index: 2, kind: input, shape index: {}]   ;;  %s347_s4 = inlined_call_operand.vmem [shape: bf16[32,128], index: 4, kind: output, shape index: {}]  }
   0x1   :  { %v263_v0 = vld [vmem:[%s343_s1] sm:$0xff]   ;;  %v264_v1 = vld [vmem:[%s343_s1 + $0x8] sm:$0xff]   ;;  %v265_v2 = vld [vmem:[%s343_s1 + $0x10] sm:$0xff]  }
   0x2   :  { %243 = vmatprep.subr.bf16.mxu0 %v263_v0  ;;  %v266_v3 = vld [vmem:[%s343_s1 + $0x18] sm:$0xff]   ;;  %v271_v4 = vld [vmem:[%s344_s0] sm:$0xff]   ;;  %v268_v6 = vld [vmem:[%s343_s1 + $0x28] sm:$0xff]  }
   0x3   :  { %244 = vmatpush3.bf16.msra.mxu0 %v263_v0  ;;  %259 = vmatprep.mubr.bf16.mxu0 %v271_v4  ;;  %v267_v5 = vld [vmem:[%s343_s1 + $0x20] sm:$0xff]   ;;  %v269_v7 = vld [vmem:[%s343_s1 + $0x30] sm:$0xff]   ;;  %v270_v8 = vld [vmem:[%s343_s1 + $0x38] sm:$0xff]  }
   0x4   :  { %245 = vmatprep.subr.bf16.mxu0 %v264_v1  ;;  %v272_v9 = vld [vmem:[%s344_s0 + $0x8] sm:$0xff]   ;;  %v214_v11 = vld [vmem:[%s345_s3] sm:$0xff]  }
   0x5   :  { %v231_v10 = vld [vmem:[%s345_s3 + $0x8] sm:$0xff]   ;;  %v194_v12 = vld [vmem:[%s346_s2] ss:$0 sm:$0xff]  ;;  %v215_v15 = vunpack.c.l.bf16 %v214_v11  ;;  %v216_v21 = vunpack.c.h.bf16 %v214_v11 }
   0x6   :  { %v219_v13 = vunpack.c.l.bf16 %v231_v10  ;;  %v220_v18 = vunpack.c.h.bf16 %v231_v10 }
   0x7   :  { %246 = vmatpush3.bf16.msra.mxu0 %v264_v1 }
   0x8   :  { %247 = vmatprep.subr.bf16.mxu0 %v265_v2 }
   0xb   :  { %248 = vmatpush3.bf16.msra.mxu0 %v265_v2 }
   0xc   :  { %249 = vmatprep.subr.bf16.mxu0 %v266_v3 }
   0xf   :  { %250 = vmatpush3.bf16.msra.mxu0 %v266_v3 }
  0x10   :  { %251 = vmatprep.subr.bf16.mxu0 %v267_v5 }
  0x13   :  { %252 = vmatpush3.bf16.msra.mxu0 %v267_v5 }
  0x14   :  { %253 = vmatprep.subr.bf16.mxu0 %v268_v6 }
  0x17   :  { %254 = vmatpush3.bf16.msra.mxu0 %v268_v6 }
  0x18   :  { %255 = vmatprep.subr.bf16.mxu0 %v269_v7 }
  0x1b   :  { %256 = vmatpush3.bf16.msra.mxu0 %v269_v7 }
  0x1c   :  { %257 = vmatprep.subr.bf16.mxu0 %v270_v8 }
  0x1f   :  { %258 = vmatpush3.bf16.msra.mxu0 %v270_v8 }
  0x22   :  { %260 = vmatmul.mubr.bf16.vlgmr.msra.gmra.mrb[0].mxu0 %v272_v9 }
  0xf5   :  { %v261_v14 = vpop.f32.mrb[0].mxu0 }
  0xf6   :  { %v148_v16 = vadd.f32 %v261_v14, %v194_v12  ;;  %v139_v17 = vpop.f32.mrb[1].mxu0 }
  0xf7   :  { %v140_v19 = vadd.f32 %v194_v12, %v139_v17  ;;  %v262_v20 = vpop.f32.mrb[2].mxu0 }
  0xf8   :  { %v164_v22 = vadd.f32 %v219_v13, %v148_v16  ;;  %v151_v23 = vadd.f32 %v262_v20, %v194_v12  ;;  %v142_v24 = vpop.f32.mrb[3].mxu0 }
  0xf9   :  { %v162_v25 = vadd.f32 %v215_v15, %v140_v19  ;;  %v143_v26 = vadd.f32 %v194_v12, %v142_v24 }
  0xfa   :  { %v165_v27 = vadd.f32 %v220_v18, %v151_v23  ;;  %v168_v29 = vmax.f32 %v164_v22, 0.0 }
  0xfb   :  { %v163_v28 = vadd.f32 %v216_v21, %v143_v26  ;;  %v166_v31 = vmax.f32 %v162_v25, 0.0 }
  0xfc   :  { %v169_v30 = vmax.f32 %v165_v27, 0.0 }
  0xfd   :  { %v167_v32 = vmax.f32 %v163_v28, 0.0 }
  0xfe   :  { %v229_v33 = vpack.c.bf16 %v169_v30, %v168_v29 }
  0xff   :  { %v224_v34 = vpack.c.bf16 %v167_v32, %v166_v31 }
 0x100   :  { %232 = vst [vmem:[%s347_s4 + $0x8] sm:$0xff] %v229_v33  }
 0x101   :  { %225 = vst [vmem:[%s347_s4] sm:$0xff] %v224_v34  }

// kernel: _lambda_.78
= control target key start
LH: loop header
LB: loop body
LE: loop exit
PB: predicated region body
PF: predicated region fallthrough
CT: control target
= control target key end

     0   :  { %s308_s1 = inlined_call_operand.vmem [shape: bf16[128,128], index: 1, kind: input, shape index: {}]   ;;  %s309_s0 = inlined_call_operand.vmem [shape: bf16[32,128], index: 0, kind: input, shape index: {}]   ;;  %s310_s2 = inlined_call_operand.vmem [shape: f32[1,128], index: 2, kind: input, shape index: {}]   ;;  %s311_s3 = inlined_call_operand.vmem [shape: bf16[32,128], index: 3, kind: output, shape index: {}]  }
   0x1   :  { %v239_v0 = vld [vmem:[%s308_s1] sm:$0xff]   ;;  %v240_v1 = vld [vmem:[%s308_s1 + $0x8] sm:$0xff]   ;;  %v241_v2 = vld [vmem:[%s308_s1 + $0x10] sm:$0xff]  }
   0x2   :  { %219 = vmatprep.subr.bf16.mxu0 %v239_v0  ;;  %v242_v3 = vld [vmem:[%s308_s1 + $0x18] sm:$0xff]   ;;  %v247_v4 = vld [vmem:[%s309_s0] sm:$0xff]   ;;  %v244_v6 = vld [vmem:[%s308_s1 + $0x28] sm:$0xff]  }
   0x3   :  { %220 = vmatpush3.bf16.msra.mxu0 %v239_v0  ;;  %235 = vmatprep.mubr.bf16.mxu0 %v247_v4  ;;  %v243_v5 = vld [vmem:[%s308_s1 + $0x20] sm:$0xff]   ;;  %v245_v7 = vld [vmem:[%s308_s1 + $0x30] sm:$0xff]   ;;  %v246_v8 = vld [vmem:[%s308_s1 + $0x38] sm:$0xff]  }
   0x4   :  { %221 = vmatprep.subr.bf16.mxu0 %v240_v1  ;;  %v248_v9 = vld [vmem:[%s309_s0 + $0x8] sm:$0xff]   ;;  %v179_v10 = vld [vmem:[%s310_s2] ss:$0 sm:$0xff] }
   0x7   :  { %222 = vmatpush3.bf16.msra.mxu0 %v240_v1 }
   0x8   :  { %223 = vmatprep.subr.bf16.mxu0 %v241_v2 }
   0xb   :  { %224 = vmatpush3.bf16.msra.mxu0 %v241_v2 }
   0xc   :  { %225 = vmatprep.subr.bf16.mxu0 %v242_v3 }
   0xf   :  { %226 = vmatpush3.bf16.msra.mxu0 %v242_v3 }
  0x10   :  { %227 = vmatprep.subr.bf16.mxu0 %v243_v5 }
  0x13   :  { %228 = vmatpush3.bf16.msra.mxu0 %v243_v5 }
  0x14   :  { %229 = vmatprep.subr.bf16.mxu0 %v244_v6 }
  0x17   :  { %230 = vmatpush3.bf16.msra.mxu0 %v244_v6 }
  0x18   :  { %231 = vmatprep.subr.bf16.mxu0 %v245_v7 }
  0x1b   :  { %232 = vmatpush3.bf16.msra.mxu0 %v245_v7 }
  0x1c   :  { %233 = vmatprep.subr.bf16.mxu0 %v246_v8 }
  0x1f   :  { %234 = vmatpush3.bf16.msra.mxu0 %v246_v8 }
  0x22   :  { %236 = vmatmul.mubr.bf16.vlgmr.msra.gmra.mrb[0].mxu0 %v248_v9 }
  0xf5   :  { %v237_v11 = vpop.f32.mrb[0].mxu0 }
  0xf6   :  { %v145_v12 = vadd.f32 %v237_v11, %v179_v10  ;;  %v136_v13 = vpop.f32.mrb[1].mxu0 }
  0xf7   :  { %v137_v14 = vadd.f32 %v179_v10, %v136_v13  ;;  %v238_v15 = vpop.f32.mrb[2].mxu0 }
  0xf8   :  { %v148_v16 = vadd.f32 %v238_v15, %v179_v10  ;;  %v139_v17 = vpop.f32.mrb[3].mxu0  ;;  %v153_v19 = vmax.f32 %v145_v12, 0.0 }
  0xf9   :  { %v140_v18 = vadd.f32 %v179_v10, %v139_v17  ;;  %v151_v21 = vmax.f32 %v137_v14, 0.0 }
  0xfa   :  { %v154_v20 = vmax.f32 %v148_v16, 0.0 }
  0xfb   :  { %v152_v22 = vmax.f32 %v140_v18, 0.0 }
  0xfc   :  { %v206_v23 = vpack.c.bf16 %v154_v20, %v153_v19 }
  0xfd   :  { %v201_v24 = vpack.c.bf16 %v152_v22, %v151_v21 }
  0xfe   :  { %208 = vst [vmem:[%s311_s3 + $0x8] sm:$0xff] %v206_v23  }
  0xff   :  { %202 = vst [vmem:[%s311_s3] sm:$0xff] %v201_v24  }

// kernel: _lambda_.89
= control target key start
LH: loop header
LB: loop body
LE: loop exit
PB: predicated region body
PF: predicated region fallthrough
CT: control target
= control target key end

     0   :  { %8 = vsyncpa [#allocation3], 0  ;;  %s246_s12 = smov [#allocation2]   ;;  %s311_s0 = inlined_call_operand.vmem [shape: bf16[16,128], index: 0, kind: input, shape index: {}]   ;;  %s312_s1 = inlined_call_operand.vmem [shape: bf16[128,128], index: 1, kind: input, shape index: {}]   ;;  %s313_s2 = inlined_call_operand.hbm [shape: f32[1,128], index: 2, kind: input, shape index: {}]   ;;  %s314_s3 = inlined_call_operand.vmem [shape: bf16[16,128], index: 3, kind: output, shape index: {}]  }
   0x1   :  { %s19_s13 = sshll.u32 %s246_s12, 4  ;;  %s222_s16 = scalar_lea.hbm %s313_s2, 16  ;;  %s20_s13 = int_to_ptr.vmem [resolvable:$true] %s19_s13 }
   0x2   :  { %p223_p0 = scmp.ne.s32.totalorder %s313_s2, %s222_s16  ;;  %p226_p1 = scmp.lt.u32.totalorder %s222_s16, %s313_s2 }
   0x4   :  { %p228_p2 = pnand %p226_p1, %p223_p0 }
   0x6   :  { %231 = shalt.err (!%p228_p2)
}
   0x7   :  { %s232_s21 = scalar_lea.vmem %s20_s13, 16  ;;  %s236_s22 = scalar_lea.vmem %s20_s13, 32 }
   0x8   :  { %p233_p3 = scmp.ne.s32.totalorder %s20_s13, %s232_s21  ;;  %p237_p4 = scmp.lt.s32.totalorder %s20_s13, %s20_s13 }
   0x9   :  { %p238_p5 = scmp.lt.s32.totalorder %s236_s22, %s232_s21 }
   0xb   :  { %p239_p6 = por %p238_p5, %p237_p4 }
   0xd   :  { %p240_p7 = pnand %p239_p6, %p233_p3 }
   0xf   :  { %243 = shalt.err (!%p240_p7)
}
  0x10   :  { %22 = dma.hbm_to_vmem [thread:$0]  %s313_s2, 16, %s20_s13, [#allocation3]  }
  0x11   :  { %244 = dma.done.wait [#allocation3], 16  }
  0x12   :  { %245 = vsyncadd [#allocation3], 4294967280  ;;  %v247_v0 = vmov 0.0   ;;  %vm248_vm0 = vmmov 0   ;;  %v213_v1 = vld [vmem:[%s312_s1] sm:$0xff]   ;;  %v214_v2 = vld [vmem:[%s312_s1 + $0x8] sm:$0xff]  }
  0x13   :  { %190 = vmatprep.subr.bf16.mxu0 %v247_v0  ;;  %206 = vmatprep.mubr.msk.bf16.mxu0 %vm248_vm0, %v247_v0  ;;  %v215_v3 = vld [vmem:[%s312_s1 + $0x10] sm:$0xff]   ;;  %v216_v4 = vld [vmem:[%s312_s1 + $0x18] sm:$0xff]   ;;  %v217_v5 = vld [vmem:[%s312_s1 + $0x20] sm:$0xff]  }
  0x14   :  { %191 = vmatpush3.bf16.msra.mxu0 %v213_v1  ;;  %v218_v6 = vld [vmem:[%s312_s1 + $0x28] sm:$0xff]   ;;  %v219_v7 = vld [vmem:[%s312_s1 + $0x30] sm:$0xff]   ;;  %v220_v8 = vld [vmem:[%s312_s1 + $0x38] sm:$0xff]  }
  0x15   :  { %192 = vmatprep.subr.bf16.mxu0 %v247_v0  ;;  %v221_v9 = vld [vmem:[%s311_s0] sm:$0xff]  }
  0x16   :  { %v162_v10 = vld [vmem:[#allocation2] ss:$0 sm:$0xff] }
  0x18   :  { %193 = vmatpush3.bf16.msra.mxu0 %v214_v2 }
  0x19   :  { %194 = vmatprep.subr.bf16.mxu0 %v247_v0 }
  0x1c   :  { %195 = vmatpush3.bf16.msra.mxu0 %v215_v3 }
  0x1d   :  { %196 = vmatprep.subr.bf16.mxu0 %v247_v0 }
  0x20   :  { %197 = vmatpush3.bf16.msra.mxu0 %v216_v4 }
  0x21   :  { %198 = vmatprep.subr.bf16.mxu0 %v247_v0 }
  0x24   :  { %199 = vmatpush3.bf16.msra.mxu0 %v217_v5 }
  0x25   :  { %200 = vmatprep.subr.bf16.mxu0 %v247_v0 }
  0x28   :  { %201 = vmatpush3.bf16.msra.mxu0 %v218_v6 }
  0x29   :  { %202 = vmatprep.subr.bf16.mxu0 %v247_v0 }
  0x2c   :  { %203 = vmatpush3.bf16.msra.mxu0 %v219_v7 }
  0x2d   :  { %204 = vmatprep.subr.bf16.mxu0 %v247_v0 }
  0x30   :  { %205 = vmatpush3.bf16.msra.mxu0 %v220_v8 }
  0x33   :  { %207 = vmatmul.mubr.bf16.vlgmr.msra.gmra.mrb[0].mxu0 %v221_v9 }
 0x106   :  { %v140_v11 = vpop.f32.mrb[0].mxu0 }
 0x107   :  { %v208_v12 = vpop.f32.mrb[1].mxu0  ;;  %v141_v14 = vadd.f32 %v162_v10, %v140_v11 }
 0x108   :  { %v143_v13 = vpop.f32.mrb[2].mxu0 }
 0x109   :  { %v144_v15 = vadd.f32 %v162_v10, %v143_v13  ;;  %v209_v16 = vpop.f32.mrb[3].mxu0 }
 0x10b   :  { %v179_v17 = vpack.c.bf16 %v144_v15, %v141_v14 }
 0x10d   :  { %180 = vst [vmem:[%s314_s3] sm:$0xff] %v179_v17  }
 0x10e   :  { %161 = vsyncpa [#allocation3], 1 }

// kernel: _lambda_.88
= control target key start
LH: loop header
LB: loop body
LE: loop exit
PB: predicated region body
PF: predicated region fallthrough
CT: control target
= control target key end

     0   :  { %v450_v1 = vmov 0.0   ;;  %vm451_vm0 = vmmov 0   ;;  %s559_s1 = inlined_call_operand.vmem [shape: bf16[384,128], index: 1, kind: input, shape index: {}]   ;;  %s560_s0 = inlined_call_operand.vmem [shape: bf16[16,384], index: 0, kind: input, shape index: {}]   ;;  %s561_s2 = inlined_call_operand.vmem [shape: f32[1,128], index: 2, kind: input, shape index: {}]   ;;  %s562_s3 = inlined_call_operand.vmem [shape: bf16[16,128], index: 3, kind: output, shape index: {}]  }
   0x1   :  { %v422_v0 = vld [vmem:[%s559_s1 + $0x40] sm:$0xff]   ;;  %400 = vmatprep.subr.bf16.mxu1 %v450_v1  ;;  %416 = vmatprep.mubr.msk.bf16.mxu1 %vm451_vm0, %v450_v1  ;;  %v425_v4 = vld [vmem:[%s559_s1 + $0x48] sm:$0xff]   ;;  %v428_v7 = vld [vmem:[%s559_s1 + $0x50] sm:$0xff]  }
   0x2   :  { %v423_v2 = vld [vmem:[%s559_s1] sm:$0xff]   ;;  %369 = vmatprep.subr.bf16.mxu0 %v422_v0  ;;  %v426_v5 = vld [vmem:[%s559_s1 + $0x8] sm:$0xff]   ;;  %v429_v8 = vld [vmem:[%s559_s1 + $0x10] sm:$0xff]  }
   0x3   :  { %v424_v3 = vld [vmem:[%s559_s1 + $0x80] sm:$0xff]   ;;  %370 = vmatpush3.bf16.msra.mxu0 %v423_v2  ;;  %v427_v6 = vld [vmem:[%s559_s1 + $0x88] sm:$0xff]   ;;  %v430_v9 = vld [vmem:[%s559_s1 + $0x90] sm:$0xff]  }
   0x4   :  { %401 = vmatpush3.bf16.msra.mxu1 %v424_v3  ;;  %371 = vmatprep.subr.bf16.mxu0 %v425_v4  ;;  %v431_v10 = vld [vmem:[%s559_s1 + $0x58] sm:$0xff]   ;;  %v434_v13 = vld [vmem:[%s559_s1 + $0x60] sm:$0xff]   ;;  %v437_v16 = vld [vmem:[%s559_s1 + $0x68] sm:$0xff]  }
   0x5   :  { %402 = vmatprep.subr.bf16.mxu1 %v450_v1  ;;  %v432_v11 = vld [vmem:[%s559_s1 + $0x18] sm:$0xff]   ;;  %v435_v14 = vld [vmem:[%s559_s1 + $0x20] sm:$0xff]   ;;  %v438_v17 = vld [vmem:[%s559_s1 + $0x28] sm:$0xff]  }
   0x6   :  { %v433_v12 = vld [vmem:[%s559_s1 + $0x98] sm:$0xff]   ;;  %v436_v15 = vld [vmem:[%s559_s1 + $0xa0] sm:$0xff]   ;;  %v439_v18 = vld [vmem:[%s559_s1 + $0xa8] sm:$0xff]  }
   0x7   :  { %372 = vmatpush3.bf16.msra.mxu0 %v426_v5  ;;  %v440_v19 = vld [vmem:[%s559_s1 + $0x70] sm:$0xff]   ;;  %v443_v22 = vld [vmem:[%s559_s1 + $0x78] sm:$0xff]   ;;  %v445_v26 = vld [vmem:[%s560_s0] ss:$12 sps:$4 sm:$0xff]  }
   0x8   :  { %403 = vmatpush3.bf16.msra.mxu1 %v427_v6  ;;  %373 = vmatprep.subr.bf16.mxu0 %v428_v7  ;;  %v441_v20 = vld [vmem:[%s559_s1 + $0x30] sm:$0xff]   ;;  %v444_v24 = vld [vmem:[%s559_s1 + $0x38] sm:$0xff]   ;;  %v332_v30 = vld [vmem:[%s561_s2] ss:$0 sm:$0xff] }
   0x9   :  { %404 = vmatprep.subr.bf16.mxu1 %v450_v1  ;;  %v442_v21 = vld [vmem:[%s559_s1 + $0xb0] sm:$0xff]   ;;  %v448_v25 = vld [vmem:[%s559_s1 + $0xb8] sm:$0xff]  }
   0xa   :  { %v447_v23 = vld [vmem:[%s560_s0 + $0x4] ss:$12 sps:$4 sm:$0xff]   ;;  %v449_v27 = vld [vmem:[%s560_s0 + $0x8] ss:$12 sps:$4 sm:$0xff]  }
   0xb   :  { %374 = vmatpush3.bf16.msra.mxu0 %v429_v8  ;;  %266 = vmatprep.mubr.bf16.mxu0 %v447_v23 }
   0xc   :  { %405 = vmatpush3.bf16.msra.mxu1 %v430_v9  ;;  %375 = vmatprep.subr.bf16.mxu0 %v431_v10 }
   0xd   :  { %406 = vmatprep.subr.bf16.mxu1 %v450_v1 }
   0xf   :  { %376 = vmatpush3.bf16.msra.mxu0 %v432_v11 }
  0x10   :  { %407 = vmatpush3.bf16.msra.mxu1 %v433_v12  ;;  %377 = vmatprep.subr.bf16.mxu0 %v434_v13 }
  0x11   :  { %408 = vmatprep.subr.bf16.mxu1 %v450_v1 }
  0x13   :  { %378 = vmatpush3.bf16.msra.mxu0 %v435_v14 }
  0x14   :  { %409 = vmatpush3.bf16.msra.mxu1 %v436_v15  ;;  %379 = vmatprep.subr.bf16.mxu0 %v437_v16 }
  0x15   :  { %410 = vmatprep.subr.bf16.mxu1 %v450_v1 }
  0x17   :  { %380 = vmatpush3.bf16.msra.mxu0 %v438_v17 }
  0x18   :  { %411 = vmatpush3.bf16.msra.mxu1 %v439_v18  ;;  %381 = vmatprep.subr.bf16.mxu0 %v440_v19 }
  0x19   :  { %412 = vmatprep.subr.bf16.mxu1 %v450_v1 }
  0x1b   :  { %382 = vmatpush3.bf16.msra.mxu0 %v441_v20 }
  0x1c   :  { %413 = vmatpush3.bf16.msra.mxu1 %v442_v21  ;;  %383 = vmatprep.subr.bf16.mxu0 %v443_v22 }
  0x1d   :  { %414 = vmatprep.subr.bf16.mxu1 %v450_v1 }
  0x1f   :  { %384 = vmatpush3.bf16.msra.mxu0 %v444_v24 }
  0x20   :  { %415 = vmatpush3.bf16.msra.mxu1 %v448_v25 }
  0x22   :  { %267 = vmatmul.mubr.bf16.vlgmr.msra.gmra.mrb[0].mxu0 %v445_v26 }
  0x23   :  { %417 = vmatmul.mubr.bf16.vlgmr.msra.gmra.mrb[0].mxu1 %v449_v27 }
  0xf5   :  { %v385_v28 = vpop.f32.mrb[0].mxu0 }
  0xf6   :  { %v386_v29 = vpop.f32.mrb[1].mxu0  ;;  %v309_v31 = vpop.f32.mrb[0].mxu1 }
  0xf7   :  { %v387_v32 = vadd.f32 %v386_v29, %v385_v28  ;;  %v388_v33 = vpop.f32.mrb[2].mxu0  ;;  %v418_v34 = vpop.f32.mrb[1].mxu1 }
  0xf8   :  { %v389_v35 = vpop.f32.mrb[3].mxu0  ;;  %v312_v36 = vpop.f32.mrb[2].mxu1 }
  0xf9   :  { %v269_v37 = vadd.f32 %v387_v32, %v332_v30  ;;  %v390_v38 = vadd.f32 %v389_v35, %v388_v33  ;;  %v419_v39 = vpop.f32.mrb[3].mxu1 }
  0xfb   :  { %v310_v40 = vadd.f32 %v309_v31, %v269_v37  ;;  %v272_v41 = vadd.f32 %v390_v38, %v332_v30 }
  0xfd   :  { %v313_v42 = vadd.f32 %v312_v36, %v272_v41  ;;  %v316_v43 = vmax.f32 %v310_v40, 0.0 }
  0xff   :  { %v317_v44 = vmax.f32 %v313_v42, 0.0 }
 0x101   :  { %v367_v45 = vpack.c.bf16 %v317_v44, %v316_v43 }
 0x103   :  { %368 = vst [vmem:[%s562_s3] sm:$0xff] %v367_v45  }

// kernel: _lambda_.90
= control target key start
LH: loop header
LB: loop body
LE: loop exit
PB: predicated region body
PF: predicated region fallthrough
CT: control target
= control target key end

     0   :  { %v223_v0 = vmov 0.0   ;;  %vm224_vm0 = vmmov 0   ;;  %s286_s1 = inlined_call_operand.vmem [shape: bf16[128,128], index: 1, kind: input, shape index: {}]   ;;  %s287_s0 = inlined_call_operand.vmem [shape: bf16[16,128], index: 0, kind: input, shape index: {}]   ;;  %s288_s3 = inlined_call_operand.vmem [shape: bf16[16,128], index: 3, kind: input, shape index: {}]   ;;  %s289_s2 = inlined_call_operand.vmem [shape: f32[1,128], index: 2, kind: input, shape index: {}]   ;;  %s290_s4 = inlined_call_operand.vmem [shape: bf16[16,128], index: 4, kind: output, shape index: {}]  }
   0x1   :  { %192 = vmatprep.subr.bf16.mxu0 %v223_v0  ;;  %v214_v1 = vld [vmem:[%s286_s1] sm:$0xff]   ;;  %208 = vmatprep.mubr.msk.bf16.mxu0 %vm224_vm0, %v223_v0  ;;  %v215_v2 = vld [vmem:[%s286_s1 + $0x8] sm:$0xff]   ;;  %v216_v3 = vld [vmem:[%s286_s1 + $0x10] sm:$0xff]  }
   0x2   :  { %193 = vmatpush3.bf16.msra.mxu0 %v214_v1  ;;  %v217_v4 = vld [vmem:[%s286_s1 + $0x18] sm:$0xff]   ;;  %v218_v5 = vld [vmem:[%s286_s1 + $0x20] sm:$0xff]   ;;  %v219_v6 = vld [vmem:[%s286_s1 + $0x28] sm:$0xff]  }
   0x3   :  { %194 = vmatprep.subr.bf16.mxu0 %v223_v0  ;;  %v220_v7 = vld [vmem:[%s286_s1 + $0x30] sm:$0xff]   ;;  %v221_v8 = vld [vmem:[%s286_s1 + $0x38] sm:$0xff]   ;;  %v222_v9 = vld [vmem:[%s287_s0] sm:$0xff]  }
   0x4   :  { %v175_v10 = vld [vmem:[%s288_s3] sm:$0xff]  }
   0x5   :  { %v160_v11 = vld [vmem:[%s289_s2] ss:$0 sm:$0xff]  ;;  %v176_v12 = vunpack.c.l.bf16 %v175_v10  ;;  %v177_v16 = vunpack.c.h.bf16 %v175_v10 }
   0x6   :  { %195 = vmatpush3.bf16.msra.mxu0 %v215_v2 }
   0x7   :  { %196 = vmatprep.subr.bf16.mxu0 %v223_v0 }
   0xa   :  { %197 = vmatpush3.bf16.msra.mxu0 %v216_v3 }
   0xb   :  { %198 = vmatprep.subr.bf16.mxu0 %v223_v0 }
   0xe   :  { %199 = vmatpush3.bf16.msra.mxu0 %v217_v4 }
   0xf   :  { %200 = vmatprep.subr.bf16.mxu0 %v223_v0 }
  0x12   :  { %201 = vmatpush3.bf16.msra.mxu0 %v218_v5 }
  0x13   :  { %202 = vmatprep.subr.bf16.mxu0 %v223_v0 }
  0x16   :  { %203 = vmatpush3.bf16.msra.mxu0 %v219_v6 }
  0x17   :  { %204 = vmatprep.subr.bf16.mxu0 %v223_v0 }
  0x1a   :  { %205 = vmatpush3.bf16.msra.mxu0 %v220_v7 }
  0x1b   :  { %206 = vmatprep.subr.bf16.mxu0 %v223_v0 }
  0x1e   :  { %207 = vmatpush3.bf16.msra.mxu0 %v221_v8 }
  0x21   :  { %209 = vmatmul.mubr.bf16.vlgmr.msra.gmra.mrb[0].mxu0 %v222_v9 }
  0xf4   :  { %v131_v13 = vpop.f32.mrb[0].mxu0 }
  0xf5   :  { %v132_v14 = vadd.f32 %v160_v11, %v131_v13  ;;  %v210_v15 = vpop.f32.mrb[1].mxu0 }
  0xf6   :  { %v134_v17 = vpop.f32.mrb[2].mxu0 }
  0xf7   :  { %v142_v18 = vadd.f32 %v176_v12, %v132_v14  ;;  %v135_v19 = vadd.f32 %v160_v11, %v134_v17  ;;  %v211_v20 = vpop.f32.mrb[3].mxu0 }
  0xf9   :  { %v143_v21 = vadd.f32 %v177_v16, %v135_v19  ;;  %v144_v22 = vmax.f32 %v142_v18, 0.0 }
  0xfb   :  { %v145_v23 = vmax.f32 %v143_v21, 0.0 }
  0xfd   :  { %v181_v24 = vpack.c.bf16 %v145_v23, %v144_v22 }
  0xff   :  { %182 = vst [vmem:[%s290_s4] sm:$0xff] %v181_v24  }

// kernel: _lambda_.91
= control target key start
LH: loop header
LB: loop body
LE: loop exit
PB: predicated region body
PF: predicated region fallthrough
CT: control target
= control target key end

     0   :  { %8 = vsyncpa [#allocation3], 0  ;;  %s248_s12 = smov [#allocation2]   ;;  %s313_s0 = inlined_call_operand.vmem [shape: bf16[16,128], index: 0, kind: input, shape index: {}]   ;;  %s314_s1 = inlined_call_operand.vmem [shape: bf16[128,128], index: 1, kind: input, shape index: {}]   ;;  %s315_s2 = inlined_call_operand.hbm [shape: f32[1,128], index: 2, kind: input, shape index: {}]   ;;  %s316_s3 = inlined_call_operand.vmem [shape: bf16[16,128], index: 3, kind: output, shape index: {}]  }
   0x1   :  { %s19_s13 = sshll.u32 %s248_s12, 4  ;;  %s224_s16 = scalar_lea.hbm %s315_s2, 16  ;;  %s20_s13 = int_to_ptr.vmem [resolvable:$true] %s19_s13 }
   0x2   :  { %p225_p0 = scmp.ne.s32.totalorder %s315_s2, %s224_s16  ;;  %p228_p1 = scmp.lt.u32.totalorder %s224_s16, %s315_s2 }
   0x4   :  { %p230_p2 = pnand %p228_p1, %p225_p0 }
   0x6   :  { %233 = shalt.err (!%p230_p2)
}
   0x7   :  { %s234_s21 = scalar_lea.vmem %s20_s13, 16  ;;  %s238_s22 = scalar_lea.vmem %s20_s13, 32 }
   0x8   :  { %p235_p3 = scmp.ne.s32.totalorder %s20_s13, %s234_s21  ;;  %p239_p4 = scmp.lt.s32.totalorder %s20_s13, %s20_s13 }
   0x9   :  { %p240_p5 = scmp.lt.s32.totalorder %s238_s22, %s234_s21 }
   0xb   :  { %p241_p6 = por %p240_p5, %p239_p4 }
   0xd   :  { %p242_p7 = pnand %p241_p6, %p235_p3 }
   0xf   :  { %245 = shalt.err (!%p242_p7)
}
  0x10   :  { %22 = dma.hbm_to_vmem [thread:$0]  %s315_s2, 16, %s20_s13, [#allocation3]  }
  0x11   :  { %246 = dma.done.wait [#allocation3], 16  }
  0x12   :  { %247 = vsyncadd [#allocation3], 4294967280  ;;  %v249_v0 = vmov 0.0   ;;  %vm250_vm0 = vmmov 0   ;;  %v215_v1 = vld [vmem:[%s314_s1] sm:$0xff]   ;;  %v216_v2 = vld [vmem:[%s314_s1 + $0x8] sm:$0xff]  }
  0x13   :  { %192 = vmatprep.subr.bf16.mxu0 %v249_v0  ;;  %208 = vmatprep.mubr.msk.bf16.mxu0 %vm250_vm0, %v249_v0  ;;  %v217_v3 = vld [vmem:[%s314_s1 + $0x10] sm:$0xff]   ;;  %v218_v4 = vld [vmem:[%s314_s1 + $0x18] sm:$0xff]   ;;  %v219_v5 = vld [vmem:[%s314_s1 + $0x20] sm:$0xff]  }
  0x14   :  { %193 = vmatpush3.bf16.msra.mxu0 %v215_v1  ;;  %v220_v6 = vld [vmem:[%s314_s1 + $0x28] sm:$0xff]   ;;  %v221_v7 = vld [vmem:[%s314_s1 + $0x30] sm:$0xff]   ;;  %v222_v8 = vld [vmem:[%s314_s1 + $0x38] sm:$0xff]  }
  0x15   :  { %194 = vmatprep.subr.bf16.mxu0 %v249_v0  ;;  %v223_v9 = vld [vmem:[%s313_s0] sm:$0xff]  }
  0x16   :  { %v164_v10 = vld [vmem:[#allocation2] ss:$0 sm:$0xff] }
  0x18   :  { %195 = vmatpush3.bf16.msra.mxu0 %v216_v2 }
  0x19   :  { %196 = vmatprep.subr.bf16.mxu0 %v249_v0 }
  0x1c   :  { %197 = vmatpush3.bf16.msra.mxu0 %v217_v3 }
  0x1d   :  { %198 = vmatprep.subr.bf16.mxu0 %v249_v0 }
  0x20   :  { %199 = vmatpush3.bf16.msra.mxu0 %v218_v4 }
  0x21   :  { %200 = vmatprep.subr.bf16.mxu0 %v249_v0 }
  0x24   :  { %201 = vmatpush3.bf16.msra.mxu0 %v219_v5 }
  0x25   :  { %202 = vmatprep.subr.bf16.mxu0 %v249_v0 }
  0x28   :  { %203 = vmatpush3.bf16.msra.mxu0 %v220_v6 }
  0x29   :  { %204 = vmatprep.subr.bf16.mxu0 %v249_v0 }
  0x2c   :  { %205 = vmatpush3.bf16.msra.mxu0 %v221_v7 }
  0x2d   :  { %206 = vmatprep.subr.bf16.mxu0 %v249_v0 }
  0x30   :  { %207 = vmatpush3.bf16.msra.mxu0 %v222_v8 }
  0x33   :  { %209 = vmatmul.mubr.bf16.vlgmr.msra.gmra.mrb[0].mxu0 %v223_v9 }
 0x106   :  { %v140_v11 = vpop.f32.mrb[0].mxu0 }
 0x107   :  { %v141_v12 = vadd.f32 %v164_v10, %v140_v11  ;;  %v210_v13 = vpop.f32.mrb[1].mxu0 }
 0x108   :  { %v143_v14 = vpop.f32.mrb[2].mxu0 }
 0x109   :  { %v144_v15 = vadd.f32 %v164_v10, %v143_v14  ;;  %v211_v16 = vpop.f32.mrb[3].mxu0  ;;  %v147_v17 = vmax.f32 %v141_v12, 0.0 }
 0x10b   :  { %v148_v18 = vmax.f32 %v144_v15, 0.0 }
 0x10d   :  { %v181_v19 = vpack.c.bf16 %v148_v18, %v147_v17 }
 0x10f   :  { %182 = vst [vmem:[%s316_s3] sm:$0xff] %v181_v19  }
 0x110   :  { %163 = vsyncpa [#allocation3], 1 }

// kernel: _lambda_.95
= control target key start
LH: loop header
LB: loop body
LE: loop exit
PB: predicated region body
PF: predicated region fallthrough
CT: control target
= control target key end

     0   :  { %8 = vsyncpa [#allocation3], 0  ;;  %s488_s12 = smov [#allocation2]   ;;  %s607_s0 = inlined_call_operand.vmem [shape: bf16[16,384], index: 0, kind: input, shape index: {}]   ;;  %s608_s1 = inlined_call_operand.vmem [shape: bf16[384,128], index: 1, kind: input, shape index: {}]   ;;  %s609_s2 = inlined_call_operand.hbm [shape: f32[1,128], index: 2, kind: input, shape index: {}]   ;;  %s610_s3 = inlined_call_operand.vmem [shape: bf16[16,128], index: 3, kind: output, shape index: {}]  }
   0x1   :  { %s19_s13 = sshll.u32 %s488_s12, 4  ;;  %s464_s16 = scalar_lea.hbm %s609_s2, 16  ;;  %s20_s13 = int_to_ptr.vmem [resolvable:$true] %s19_s13 }
   0x2   :  { %p465_p0 = scmp.ne.s32.totalorder %s609_s2, %s464_s16  ;;  %p468_p1 = scmp.lt.u32.totalorder %s464_s16, %s609_s2 }
   0x4   :  { %p470_p2 = pnand %p468_p1, %p465_p0 }
   0x6   :  { %473 = shalt.err (!%p470_p2)
}
   0x7   :  { %s474_s21 = scalar_lea.vmem %s20_s13, 16  ;;  %s478_s22 = scalar_lea.vmem %s20_s13, 32 }
   0x8   :  { %p475_p3 = scmp.ne.s32.totalorder %s20_s13, %s474_s21  ;;  %p479_p4 = scmp.lt.s32.totalorder %s20_s13, %s20_s13 }
   0x9   :  { %p480_p5 = scmp.lt.s32.totalorder %s478_s22, %s474_s21 }
   0xb   :  { %p481_p6 = por %p480_p5, %p479_p4 }
   0xd   :  { %p482_p7 = pnand %p481_p6, %p475_p3 }
   0xf   :  { %485 = shalt.err (!%p482_p7)
}
  0x10   :  { %22 = dma.hbm_to_vmem [thread:$0]  %s609_s2, 16, %s20_s13, [#allocation3]  }
  0x11   :  { %486 = dma.done.wait [#allocation3], 16  }
  0x12   :  { %487 = vsyncadd [#allocation3], 4294967280  ;;  %v489_v0 = vmov 0.0   ;;  %vm490_vm0 = vmmov 0   ;;  %v436_v1 = vld [vmem:[%s608_s1 + $0x40] sm:$0xff]   ;;  %v439_v4 = vld [vmem:[%s608_s1 + $0x48] sm:$0xff]  }
  0x13   :  { %413 = vmatprep.subr.bf16.mxu1 %v489_v0  ;;  %429 = vmatprep.mubr.msk.bf16.mxu1 %vm490_vm0, %v489_v0  ;;  %v437_v2 = vld [vmem:[%s608_s1] sm:$0xff]   ;;  %v440_v5 = vld [vmem:[%s608_s1 + $0x8] sm:$0xff]   ;;  %v442_v7 = vld [vmem:[%s608_s1 + $0x50] sm:$0xff]  }
  0x14   :  { %382 = vmatprep.subr.bf16.mxu0 %v436_v1  ;;  %v438_v3 = vld [vmem:[%s608_s1 + $0x80] sm:$0xff]   ;;  %v441_v6 = vld [vmem:[%s608_s1 + $0x88] sm:$0xff]   ;;  %v443_v8 = vld [vmem:[%s608_s1 + $0x10] sm:$0xff]  }
  0x15   :  { %383 = vmatpush3.bf16.msra.mxu0 %v437_v2  ;;  %414 = vmatpush3.bf16.msra.mxu1 %v438_v3  ;;  %v444_v9 = vld [vmem:[%s608_s1 + $0x90] sm:$0xff]   ;;  %v445_v10 = vld [vmem:[%s608_s1 + $0x58] sm:$0xff]   ;;  %v448_v13 = vld [vmem:[%s608_s1 + $0x60] sm:$0xff]  }
  0x16   :  { %384 = vmatprep.subr.bf16.mxu0 %v439_v4  ;;  %415 = vmatprep.subr.bf16.mxu1 %v489_v0  ;;  %v446_v11 = vld [vmem:[%s608_s1 + $0x18] sm:$0xff]   ;;  %v449_v14 = vld [vmem:[%s608_s1 + $0x20] sm:$0xff]   ;;  %v451_v16 = vld [vmem:[%s608_s1 + $0x68] sm:$0xff]  }
  0x17   :  { %v447_v12 = vld [vmem:[%s608_s1 + $0x98] sm:$0xff]   ;;  %v450_v15 = vld [vmem:[%s608_s1 + $0xa0] sm:$0xff]   ;;  %v452_v17 = vld [vmem:[%s608_s1 + $0x28] sm:$0xff]  }
  0x18   :  { %v453_v18 = vld [vmem:[%s608_s1 + $0xa8] sm:$0xff]   ;;  %v454_v19 = vld [vmem:[%s608_s1 + $0x70] sm:$0xff]   ;;  %v457_v22 = vld [vmem:[%s608_s1 + $0x78] sm:$0xff]  }
  0x19   :  { %385 = vmatpush3.bf16.msra.mxu0 %v440_v5  ;;  %416 = vmatpush3.bf16.msra.mxu1 %v441_v6  ;;  %v455_v20 = vld [vmem:[%s608_s1 + $0x30] sm:$0xff]   ;;  %v458_v24 = vld [vmem:[%s608_s1 + $0x38] sm:$0xff]   ;;  %v459_v26 = vld [vmem:[%s607_s0] ss:$12 sps:$4 sm:$0xff]  }
  0x1a   :  { %386 = vmatprep.subr.bf16.mxu0 %v442_v7  ;;  %417 = vmatprep.subr.bf16.mxu1 %v489_v0  ;;  %v456_v21 = vld [vmem:[%s608_s1 + $0xb0] sm:$0xff]   ;;  %v462_v25 = vld [vmem:[%s608_s1 + $0xb8] sm:$0xff]   ;;  %v345_v30 = vld [vmem:[#allocation2] ss:$0 sm:$0xff] }
  0x1b   :  { %v461_v23 = vld [vmem:[%s607_s0 + $0x4] ss:$12 sps:$4 sm:$0xff]   ;;  %v463_v27 = vld [vmem:[%s607_s0 + $0x8] ss:$12 sps:$4 sm:$0xff]  }
  0x1c   :  { %278 = vmatprep.mubr.bf16.mxu0 %v461_v23 }
  0x1d   :  { %387 = vmatpush3.bf16.msra.mxu0 %v443_v8  ;;  %418 = vmatpush3.bf16.msra.mxu1 %v444_v9 }
  0x1e   :  { %388 = vmatprep.subr.bf16.mxu0 %v445_v10  ;;  %419 = vmatprep.subr.bf16.mxu1 %v489_v0 }
  0x21   :  { %389 = vmatpush3.bf16.msra.mxu0 %v446_v11  ;;  %420 = vmatpush3.bf16.msra.mxu1 %v447_v12 }
  0x22   :  { %390 = vmatprep.subr.bf16.mxu0 %v448_v13  ;;  %421 = vmatprep.subr.bf16.mxu1 %v489_v0 }
  0x25   :  { %391 = vmatpush3.bf16.msra.mxu0 %v449_v14  ;;  %422 = vmatpush3.bf16.msra.mxu1 %v450_v15 }
  0x26   :  { %392 = vmatprep.subr.bf16.mxu0 %v451_v16  ;;  %423 = vmatprep.subr.bf16.mxu1 %v489_v0 }
  0x29   :  { %393 = vmatpush3.bf16.msra.mxu0 %v452_v17  ;;  %424 = vmatpush3.bf16.msra.mxu1 %v453_v18 }
  0x2a   :  { %394 = vmatprep.subr.bf16.mxu0 %v454_v19  ;;  %425 = vmatprep.subr.bf16.mxu1 %v489_v0 }
  0x2d   :  { %395 = vmatpush3.bf16.msra.mxu0 %v455_v20  ;;  %426 = vmatpush3.bf16.msra.mxu1 %v456_v21 }
  0x2e   :  { %396 = vmatprep.subr.bf16.mxu0 %v457_v22  ;;  %427 = vmatprep.subr.bf16.mxu1 %v489_v0 }
  0x31   :  { %397 = vmatpush3.bf16.msra.mxu0 %v458_v24  ;;  %428 = vmatpush3.bf16.msra.mxu1 %v462_v25 }
  0x34   :  { %279 = vmatmul.mubr.bf16.vlgmr.msra.gmra.mrb[0].mxu0 %v459_v26  ;;  %430 = vmatmul.mubr.bf16.vlgmr.msra.gmra.mrb[0].mxu1 %v463_v27 }
 0x107   :  { %v398_v28 = vpop.f32.mrb[0].mxu0  ;;  %v321_v31 = vpop.f32.mrb[0].mxu1 }
 0x108   :  { %v399_v29 = vpop.f32.mrb[1].mxu0  ;;  %v431_v34 = vpop.f32.mrb[1].mxu1 }
 0x109   :  { %v400_v32 = vadd.f32 %v399_v29, %v398_v28  ;;  %v401_v33 = vpop.f32.mrb[2].mxu0  ;;  %v324_v36 = vpop.f32.mrb[2].mxu1 }
 0x10a   :  { %v402_v35 = vpop.f32.mrb[3].mxu0  ;;  %v432_v39 = vpop.f32.mrb[3].mxu1 }
 0x10b   :  { %v281_v37 = vadd.f32 %v400_v32, %v345_v30  ;;  %v403_v38 = vadd.f32 %v402_v35, %v401_v33 }
 0x10d   :  { %v322_v40 = vadd.f32 %v321_v31, %v281_v37  ;;  %v284_v41 = vadd.f32 %v403_v38, %v345_v30 }
 0x10f   :  { %v325_v42 = vadd.f32 %v324_v36, %v284_v41  ;;  %v328_v43 = vmax.f32 %v322_v40, 0.0 }
 0x111   :  { %v329_v44 = vmax.f32 %v325_v42, 0.0 }
 0x113   :  { %v380_v45 = vpack.c.bf16 %v329_v44, %v328_v43 }
 0x115   :  { %381 = vst [vmem:[%s610_s3] sm:$0xff] %v380_v45  }
 0x116   :  { %344 = vsyncpa [#allocation3], 1 }

// kernel: _lambda_.99
= control target key start
LH: loop header
LB: loop body
LE: loop exit
PB: predicated region body
PF: predicated region fallthrough
CT: control target
= control target key end

     0   :  { %9 = vsyncpa [#allocation3], 0  ;;  %s261_s15 = smov [#allocation2]   ;;  %s334_s0 = inlined_call_operand.vmem [shape: bf16[16,128], index: 0, kind: input, shape index: {}]   ;;  %s335_s1 = inlined_call_operand.vmem [shape: bf16[128,128], index: 1, kind: input, shape index: {}]   ;;  %s336_s2 = inlined_call_operand.hbm [shape: f32[1,128], index: 2, kind: input, shape index: {}]   ;;  %s337_s3 = inlined_call_operand.vmem [shape: bf16[16,128], index: 3, kind: input, shape index: {}]   ;;  %s338_s4 = inlined_call_operand.vmem [shape: bf16[16,128], index: 4, kind: output, shape index: {}]  }
   0x1   :  { %s20_s16 = sshll.u32 %s261_s15, 4  ;;  %s237_s19 = scalar_lea.hbm %s336_s2, 16  ;;  %s21_s16 = int_to_ptr.vmem [resolvable:$true] %s20_s16 }
   0x2   :  { %p238_p0 = scmp.ne.s32.totalorder %s336_s2, %s237_s19  ;;  %p241_p1 = scmp.lt.u32.totalorder %s237_s19, %s336_s2 }
   0x4   :  { %p243_p2 = pnand %p241_p1, %p238_p0 }
   0x6   :  { %246 = shalt.err (!%p243_p2)
}
   0x7   :  { %s247_s24 = scalar_lea.vmem %s21_s16, 16  ;;  %s251_s25 = scalar_lea.vmem %s21_s16, 32 }
   0x8   :  { %p248_p3 = scmp.ne.s32.totalorder %s21_s16, %s247_s24  ;;  %p252_p4 = scmp.lt.s32.totalorder %s21_s16, %s21_s16 }
   0x9   :  { %p253_p5 = scmp.lt.s32.totalorder %s251_s25, %s247_s24 }
   0xb   :  { %p254_p6 = por %p253_p5, %p252_p4 }
   0xd   :  { %p255_p7 = pnand %p254_p6, %p248_p3 }
   0xf   :  { %258 = shalt.err (!%p255_p7)
}
  0x10   :  { %23 = dma.hbm_to_vmem [thread:$0]  %s336_s2, 16, %s21_s16, [#allocation3]  }
  0x11   :  { %259 = dma.done.wait [#allocation3], 16  }
  0x12   :  { %260 = vsyncadd [#allocation3], 4294967280  ;;  %v262_v0 = vmov 0.0   ;;  %vm263_vm0 = vmmov 0   ;;  %v228_v1 = vld [vmem:[%s335_s1] sm:$0xff]   ;;  %v229_v2 = vld [vmem:[%s335_s1 + $0x8] sm:$0xff]  }
  0x13   :  { %205 = vmatprep.subr.bf16.mxu0 %v262_v0  ;;  %221 = vmatprep.mubr.msk.bf16.mxu0 %vm263_vm0, %v262_v0  ;;  %v230_v3 = vld [vmem:[%s335_s1 + $0x10] sm:$0xff]   ;;  %v231_v4 = vld [vmem:[%s335_s1 + $0x18] sm:$0xff]   ;;  %v232_v5 = vld [vmem:[%s335_s1 + $0x20] sm:$0xff]  }
  0x14   :  { %206 = vmatpush3.bf16.msra.mxu0 %v228_v1  ;;  %v233_v6 = vld [vmem:[%s335_s1 + $0x28] sm:$0xff]   ;;  %v234_v7 = vld [vmem:[%s335_s1 + $0x30] sm:$0xff]   ;;  %v235_v8 = vld [vmem:[%s335_s1 + $0x38] sm:$0xff]  }
  0x15   :  { %207 = vmatprep.subr.bf16.mxu0 %v262_v0  ;;  %v236_v9 = vld [vmem:[%s334_s0] sm:$0xff]  }
  0x16   :  { %v188_v10 = vld [vmem:[%s337_s3] sm:$0xff]  }
  0x17   :  { %v173_v11 = vld [vmem:[#allocation2] ss:$0 sm:$0xff]  ;;  %v189_v12 = vunpack.c.l.bf16 %v188_v10  ;;  %v190_v16 = vunpack.c.h.bf16 %v188_v10 }
  0x18   :  { %208 = vmatpush3.bf16.msra.mxu0 %v229_v2 }
  0x19   :  { %209 = vmatprep.subr.bf16.mxu0 %v262_v0 }
  0x1c   :  { %210 = vmatpush3.bf16.msra.mxu0 %v230_v3 }
  0x1d   :  { %211 = vmatprep.subr.bf16.mxu0 %v262_v0 }
  0x20   :  { %212 = vmatpush3.bf16.msra.mxu0 %v231_v4 }
  0x21   :  { %213 = vmatprep.subr.bf16.mxu0 %v262_v0 }
  0x24   :  { %214 = vmatpush3.bf16.msra.mxu0 %v232_v5 }
  0x25   :  { %215 = vmatprep.subr.bf16.mxu0 %v262_v0 }
  0x28   :  { %216 = vmatpush3.bf16.msra.mxu0 %v233_v6 }
  0x29   :  { %217 = vmatprep.subr.bf16.mxu0 %v262_v0 }
  0x2c   :  { %218 = vmatpush3.bf16.msra.mxu0 %v234_v7 }
  0x2d   :  { %219 = vmatprep.subr.bf16.mxu0 %v262_v0 }
  0x30   :  { %220 = vmatpush3.bf16.msra.mxu0 %v235_v8 }
  0x33   :  { %222 = vmatmul.mubr.bf16.vlgmr.msra.gmra.mrb[0].mxu0 %v236_v9 }
 0x106   :  { %v143_v13 = vpop.f32.mrb[0].mxu0 }
 0x107   :  { %v144_v14 = vadd.f32 %v173_v11, %v143_v13  ;;  %v223_v15 = vpop.f32.mrb[1].mxu0 }
 0x108   :  { %v146_v17 = vpop.f32.mrb[2].mxu0 }
 0x109   :  { %v154_v18 = vadd.f32 %v189_v12, %v144_v14  ;;  %v147_v19 = vadd.f32 %v173_v11, %v146_v17  ;;  %v224_v20 = vpop.f32.mrb[3].mxu0 }
 0x10b   :  { %v155_v21 = vadd.f32 %v190_v16, %v147_v19  ;;  %v156_v22 = vmax.f32 %v154_v18, 0.0 }
 0x10d   :  { %v157_v23 = vmax.f32 %v155_v21, 0.0 }
 0x10f   :  { %v194_v24 = vpack.c.bf16 %v157_v23, %v156_v22 }
 0x111   :  { %195 = vst [vmem:[%s338_s4] sm:$0xff] %v194_v24  }
 0x112   :  { %172 = vsyncpa [#allocation3], 1 }

// kernel: _lambda_.108
= control target key start
LH: loop header
LB: loop body
LE: loop exit
PB: predicated region body
PF: predicated region fallthrough
CT: control target
= control target key end

     0   :  { %v239_v1 = vmov 0   ;;  %v35_v18 = vlaneseq  ;;  %s320_s1 = inlined_call_operand.vmem [shape: bf16[128,256], index: 1, kind: input, shape index: {}]   ;;  %s321_s0 = inlined_call_operand.vmem [shape: bf16[16,128], index: 0, kind: input, shape index: {}]   ;;  %s322_s2 = inlined_call_operand.vmem [shape: f32[1,256], index: 2, kind: input, shape index: {}]   ;;  %s323_s3 = inlined_call_operand.vmem [shape: bf16[16,256], index: 3, kind: output, shape index: {}]  }
   0x1   :  { %v214_v0 = vld [vmem:[%s320_s1 + $0x4] ss:$8 sps:$4 sm:$0xff]   ;;  %163 = vmatprep.mubr.bf16.mxu0 %v239_v1  ;;  %v216_v2 = vld [vmem:[%s320_s1] ss:$8 sps:$4 sm:$0xff]   ;;  %v217_v3 = vld [vmem:[%s320_s1 + $0x14] ss:$8 sps:$4 sm:$0xff]  }
   0x2   :  { %131 = vmatprep.subr.bf16.mxu0 %v214_v0  ;;  %v219_v4 = vld [vmem:[%s320_s1 + $0x10] ss:$8 sps:$4 sm:$0xff]   ;;  %v220_v5 = vld [vmem:[%s320_s1 + $0x24] ss:$8 sps:$4 sm:$0xff]   ;;  %v222_v6 = vld [vmem:[%s320_s1 + $0x20] ss:$8 sps:$4 sm:$0xff]  }
   0x3   :  { %132 = vmatpush1.bf16.msra.mxu0 %v216_v2  ;;  %v223_v7 = vld [vmem:[%s320_s1 + $0x34] ss:$8 sps:$4 sm:$0xff]   ;;  %v225_v8 = vld [vmem:[%s320_s1 + $0x30] ss:$8 sps:$4 sm:$0xff]   ;;  %v226_v9 = vld [vmem:[%s320_s1 + $0x44] ss:$8 sps:$4 sm:$0xff]  }
   0x4   :  { %133 = vmatprep.subr.bf16.mxu0 %v217_v3  ;;  %v228_v10 = vld [vmem:[%s320_s1 + $0x40] ss:$8 sps:$4 sm:$0xff]   ;;  %v229_v11 = vld [vmem:[%s320_s1 + $0x54] ss:$8 sps:$4 sm:$0xff]   ;;  %v231_v12 = vld [vmem:[%s320_s1 + $0x50] ss:$8 sps:$4 sm:$0xff]  }
   0x5   :  { %v232_v13 = vld [vmem:[%s320_s1 + $0x64] ss:$8 sps:$4 sm:$0xff]   ;;  %v234_v14 = vld [vmem:[%s320_s1 + $0x60] ss:$8 sps:$4 sm:$0xff]   ;;  %v235_v15 = vld [vmem:[%s320_s1 + $0x74] ss:$8 sps:$4 sm:$0xff]  }
   0x6   :  { %v237_v16 = vld [vmem:[%s320_s1 + $0x70] ss:$8 sps:$4 sm:$0xff]   ;;  %v238_v17 = vld [vmem:[%s321_s0] sm:$0xff]   ;;  %v36_v19 = vshrl.u32 %v35_v18, 7 }
   0x7   :  { %134 = vmatpush1.bf16.msra.mxu0 %v219_v4  ;;  %v33_v21 = vld [vmem:[%s322_s2] sm:$0x3] }
   0x8   :  { %135 = vmatprep.subr.bf16.mxu0 %v220_v5  ;;  %v37_v20 = vsub.s32 0, %v36_v19  ;;  %v41_v22 = vsub.s32 1, %v36_v19 }
   0xa   :  { %v38_v23 = vrot.slane %v33_v21, %v37_v20  ;;  %v42_v24 = vrot.slane %v33_v21, %v41_v22 }
   0xb   :  { %136 = vmatpush1.bf16.msra.mxu0 %v222_v6 }
   0xc   :  { %137 = vmatprep.subr.bf16.mxu0 %v223_v7 }
   0xf   :  { %138 = vmatpush1.bf16.msra.mxu0 %v225_v8 }
  0x10   :  { %139 = vmatprep.subr.bf16.mxu0 %v226_v9 }
  0x13   :  { %140 = vmatpush1.bf16.msra.mxu0 %v228_v10 }
  0x14   :  { %141 = vmatprep.subr.bf16.mxu0 %v229_v11 }
  0x17   :  { %142 = vmatpush1.bf16.msra.mxu0 %v231_v12 }
  0x18   :  { %143 = vmatprep.subr.bf16.mxu0 %v232_v13 }
  0x1b   :  { %144 = vmatpush1.bf16.msra.mxu0 %v234_v14 }
  0x1c   :  { %145 = vmatprep.subr.bf16.mxu0 %v235_v15 }
  0x1f   :  { %146 = vmatpush1.bf16.msra.mxu0 %v237_v16 }
  0x22   :  { %164 = vmatmul.mubr.bf16.vlgmr.msra.gmra.mrb[0].mxu0 %v238_v17 }
  0xf5   :  { %v165_v25 = vpop.f32.mrb[0].mxu0 }
  0xf6   :  { %v166_v26 = vadd.f32 %v165_v25, %v38_v23  ;;  %v167_v27 = vpop.f32.mrb[1].mxu0 }
  0xf7   :  { %v168_v28 = vadd.f32 %v167_v27, %v42_v24  ;;  %v169_v29 = vpop.f32.mrb[2].mxu0 }
  0xf8   :  { %v170_v30 = vadd.f32 %v169_v29, %v38_v23  ;;  %v171_v31 = vpop.f32.mrb[3].mxu0 }
  0xf9   :  { %v211_v32 = vpack.c.bf16 %v168_v28, %v166_v26  ;;  %v172_v33 = vadd.f32 %v171_v31, %v42_v24 }
  0xfb   :  { %186 = vst [vmem:[%s323_s3] sm:$0xff] %v211_v32  ;;  %v212_v34 = vpack.c.bf16 %v172_v33, %v170_v30 }
  0xfd   :  { %187 = vst [vmem:[%s323_s3 + $0x8] sm:$0xff] %v212_v34 }

// kernel: _lambda_.106
= control target key start
LH: loop header
LB: loop body
LE: loop exit
PB: predicated region body
PF: predicated region fallthrough
CT: control target
= control target key end

     0   :  { %v210_v0 = vmov 0.0   ;;  %vm211_vm0 = vmmov 0   ;;  %s265_s1 = inlined_call_operand.vmem [shape: bf16[128,128], index: 1, kind: input, shape index: {}]   ;;  %s266_s0 = inlined_call_operand.vmem [shape: bf16[16,128], index: 0, kind: input, shape index: {}]   ;;  %s267_s2 = inlined_call_operand.vmem [shape: f32[1,128], index: 2, kind: input, shape index: {}]   ;;  %s268_s3 = inlined_call_operand.vmem [shape: bf16[16,128], index: 3, kind: output, shape index: {}]  }
   0x1   :  { %179 = vmatprep.subr.bf16.mxu0 %v210_v0  ;;  %v201_v1 = vld [vmem:[%s265_s1] sm:$0xff]   ;;  %195 = vmatprep.mubr.msk.bf16.mxu0 %vm211_vm0, %v210_v0  ;;  %v202_v2 = vld [vmem:[%s265_s1 + $0x8] sm:$0xff]   ;;  %v203_v3 = vld [vmem:[%s265_s1 + $0x10] sm:$0xff]  }
   0x2   :  { %180 = vmatpush3.bf16.msra.mxu0 %v201_v1  ;;  %v204_v4 = vld [vmem:[%s265_s1 + $0x18] sm:$0xff]   ;;  %v205_v5 = vld [vmem:[%s265_s1 + $0x20] sm:$0xff]   ;;  %v206_v6 = vld [vmem:[%s265_s1 + $0x28] sm:$0xff]  }
   0x3   :  { %181 = vmatprep.subr.bf16.mxu0 %v210_v0  ;;  %v207_v7 = vld [vmem:[%s265_s1 + $0x30] sm:$0xff]   ;;  %v208_v8 = vld [vmem:[%s265_s1 + $0x38] sm:$0xff]   ;;  %v209_v9 = vld [vmem:[%s266_s0] sm:$0xff]  }
   0x4   :  { %v151_v10 = vld [vmem:[%s267_s2] ss:$0 sm:$0xff] }
   0x6   :  { %182 = vmatpush3.bf16.msra.mxu0 %v202_v2 }
   0x7   :  { %183 = vmatprep.subr.bf16.mxu0 %v210_v0 }
   0xa   :  { %184 = vmatpush3.bf16.msra.mxu0 %v203_v3 }
   0xb   :  { %185 = vmatprep.subr.bf16.mxu0 %v210_v0 }
   0xe   :  { %186 = vmatpush3.bf16.msra.mxu0 %v204_v4 }
   0xf   :  { %187 = vmatprep.subr.bf16.mxu0 %v210_v0 }
  0x12   :  { %188 = vmatpush3.bf16.msra.mxu0 %v205_v5 }
  0x13   :  { %189 = vmatprep.subr.bf16.mxu0 %v210_v0 }
  0x16   :  { %190 = vmatpush3.bf16.msra.mxu0 %v206_v6 }
  0x17   :  { %191 = vmatprep.subr.bf16.mxu0 %v210_v0 }
  0x1a   :  { %192 = vmatpush3.bf16.msra.mxu0 %v207_v7 }
  0x1b   :  { %193 = vmatprep.subr.bf16.mxu0 %v210_v0 }
  0x1e   :  { %194 = vmatpush3.bf16.msra.mxu0 %v208_v8 }
  0x21   :  { %196 = vmatmul.mubr.bf16.vlgmr.msra.gmra.mrb[0].mxu0 %v209_v9 }
  0xf4   :  { %v128_v11 = vpop.f32.mrb[0].mxu0 }
  0xf5   :  { %v129_v12 = vadd.f32 %v151_v10, %v128_v11  ;;  %v197_v13 = vpop.f32.mrb[1].mxu0 }
  0xf6   :  { %v131_v14 = vpop.f32.mrb[2].mxu0 }
  0xf7   :  { %v132_v15 = vadd.f32 %v151_v10, %v131_v14  ;;  %v198_v16 = vpop.f32.mrb[3].mxu0  ;;  %v135_v17 = vmax.f32 %v129_v12, 0.0 }
  0xf9   :  { %v136_v18 = vmax.f32 %v132_v15, 0.0 }
  0xfb   :  { %v168_v19 = vpack.c.bf16 %v136_v18, %v135_v17 }
  0xfd   :  { %169 = vst [vmem:[%s268_s3] sm:$0xff] %v168_v19  }

// kernel: _lambda_.109
= control target key start
LH: loop header
LB: loop body
LE: loop exit
PB: predicated region body
PF: predicated region fallthrough
CT: control target
= control target key end

     0   :  { %v256_v1 = vmov 0   ;;  %v38_v18 = vlaneseq  ;;  %s348_s1 = inlined_call_operand.vmem [shape: bf16[128,256], index: 1, kind: input, shape index: {}]   ;;  %s349_s0 = inlined_call_operand.vmem [shape: bf16[16,128], index: 0, kind: input, shape index: {}]   ;;  %s350_s2 = inlined_call_operand.vmem [shape: f32[1,256], index: 2, kind: input, shape index: {}]   ;;  %s351_s3 = inlined_call_operand.vmem [shape: bf16[16,256], index: 3, kind: input, shape index: {}]   ;;  %s352_s4 = inlined_call_operand.vmem [shape: bf16[16,256], index: 4, kind: output, shape index: {}]  }
   0x1   :  { %v231_v0 = vld [vmem:[%s348_s1 + $0x4] ss:$8 sps:$4 sm:$0xff]   ;;  %166 = vmatprep.mubr.bf16.mxu0 %v256_v1  ;;  %v233_v2 = vld [vmem:[%s348_s1] ss:$8 sps:$4 sm:$0xff]   ;;  %v234_v3 = vld [vmem:[%s348_s1 + $0x14] ss:$8 sps:$4 sm:$0xff]  }
   0x2   :  { %134 = vmatprep.subr.bf16.mxu0 %v231_v0  ;;  %v236_v4 = vld [vmem:[%s348_s1 + $0x10] ss:$8 sps:$4 sm:$0xff]   ;;  %v237_v5 = vld [vmem:[%s348_s1 + $0x24] ss:$8 sps:$4 sm:$0xff]   ;;  %v239_v6 = vld [vmem:[%s348_s1 + $0x20] ss:$8 sps:$4 sm:$0xff]  }
   0x3   :  { %135 = vmatpush1.bf16.msra.mxu0 %v233_v2  ;;  %v240_v7 = vld [vmem:[%s348_s1 + $0x34] ss:$8 sps:$4 sm:$0xff]   ;;  %v242_v8 = vld [vmem:[%s348_s1 + $0x30] ss:$8 sps:$4 sm:$0xff]   ;;  %v243_v9 = vld [vmem:[%s348_s1 + $0x44] ss:$8 sps:$4 sm:$0xff]  }
   0x4   :  { %136 = vmatprep.subr.bf16.mxu0 %v234_v3  ;;  %v245_v10 = vld [vmem:[%s348_s1 + $0x40] ss:$8 sps:$4 sm:$0xff]   ;;  %v246_v11 = vld [vmem:[%s348_s1 + $0x54] ss:$8 sps:$4 sm:$0xff]   ;;  %v248_v12 = vld [vmem:[%s348_s1 + $0x50] ss:$8 sps:$4 sm:$0xff]  }
   0x5   :  { %v249_v13 = vld [vmem:[%s348_s1 + $0x64] ss:$8 sps:$4 sm:$0xff]   ;;  %v251_v14 = vld [vmem:[%s348_s1 + $0x60] ss:$8 sps:$4 sm:$0xff]   ;;  %v252_v15 = vld [vmem:[%s348_s1 + $0x74] ss:$8 sps:$4 sm:$0xff]  }
   0x6   :  { %v254_v16 = vld [vmem:[%s348_s1 + $0x70] ss:$8 sps:$4 sm:$0xff]   ;;  %v255_v17 = vld [vmem:[%s349_s0] sm:$0xff]   ;;  %v39_v19 = vshrl.u32 %v38_v18, 7  ;;  %v178_v26 = vld [vmem:[%s351_s3 + $0x8] sm:$0xff] }
   0x7   :  { %137 = vmatpush1.bf16.msra.mxu0 %v236_v4  ;;  %v36_v21 = vld [vmem:[%s350_s2] sm:$0x3]  ;;  %v181_v32 = vunpack.c.l.bf16 %v178_v26  ;;  %v182_v35 = vunpack.c.h.bf16 %v178_v26 }
   0x8   :  { %138 = vmatprep.subr.bf16.mxu0 %v237_v5  ;;  %v40_v20 = vsub.s32 0, %v39_v19  ;;  %v44_v22 = vsub.s32 1, %v39_v19  ;;  %v177_v23 = vld [vmem:[%s351_s3] sm:$0xff] }
   0x9   :  { %v179_v27 = vunpack.c.l.bf16 %v177_v23  ;;  %v180_v29 = vunpack.c.h.bf16 %v177_v23 }
   0xa   :  { %v41_v24 = vrot.slane %v36_v21, %v40_v20  ;;  %v45_v25 = vrot.slane %v36_v21, %v44_v22 }
   0xb   :  { %139 = vmatpush1.bf16.msra.mxu0 %v239_v6 }
   0xc   :  { %140 = vmatprep.subr.bf16.mxu0 %v240_v7 }
   0xf   :  { %141 = vmatpush1.bf16.msra.mxu0 %v242_v8 }
  0x10   :  { %142 = vmatprep.subr.bf16.mxu0 %v243_v9 }
  0x13   :  { %143 = vmatpush1.bf16.msra.mxu0 %v245_v10 }
  0x14   :  { %144 = vmatprep.subr.bf16.mxu0 %v246_v11 }
  0x17   :  { %145 = vmatpush1.bf16.msra.mxu0 %v248_v12 }
  0x18   :  { %146 = vmatprep.subr.bf16.mxu0 %v249_v13 }
  0x1b   :  { %147 = vmatpush1.bf16.msra.mxu0 %v251_v14 }
  0x1c   :  { %148 = vmatprep.subr.bf16.mxu0 %v252_v15 }
  0x1f   :  { %149 = vmatpush1.bf16.msra.mxu0 %v254_v16 }
  0x22   :  { %167 = vmatmul.mubr.bf16.vlgmr.msra.gmra.mrb[0].mxu0 %v255_v17 }
  0xf5   :  { %v168_v28 = vpop.f32.mrb[0].mxu0 }
  0xf6   :  { %v169_v30 = vadd.f32 %v168_v28, %v41_v24  ;;  %v170_v31 = vpop.f32.mrb[1].mxu0 }
  0xf7   :  { %v171_v33 = vadd.f32 %v170_v31, %v45_v25  ;;  %v172_v34 = vpop.f32.mrb[2].mxu0 }
  0xf8   :  { %v183_v36 = vadd.f32 %v179_v27, %v169_v30  ;;  %v173_v37 = vadd.f32 %v172_v34, %v41_v24  ;;  %v174_v38 = vpop.f32.mrb[3].mxu0 }
  0xf9   :  { %v184_v39 = vadd.f32 %v180_v29, %v171_v33  ;;  %v175_v40 = vadd.f32 %v174_v38, %v45_v25 }
  0xfa   :  { %v187_v41 = vmax.f32 %v183_v36, 0.0  ;;  %v185_v42 = vadd.f32 %v181_v32, %v173_v37 }
  0xfb   :  { %v188_v43 = vmax.f32 %v184_v39, 0.0  ;;  %v186_v44 = vadd.f32 %v182_v35, %v175_v40 }
  0xfc   :  { %v189_v45 = vmax.f32 %v185_v42, 0.0 }
  0xfd   :  { %v228_v46 = vpack.c.bf16 %v188_v43, %v187_v41  ;;  %v190_v47 = vmax.f32 %v186_v44, 0.0 }
  0xff   :  { %203 = vst [vmem:[%s352_s4] sm:$0xff] %v228_v46  ;;  %v229_v48 = vpack.c.bf16 %v190_v47, %v189_v45 }
 0x101   :  { %204 = vst [vmem:[%s352_s4 + $0x8] sm:$0xff] %v229_v48 }

// kernel: _lambda_.107
= control target key start
LH: loop header
LB: loop body
LE: loop exit
PB: predicated region body
PF: predicated region fallthrough
CT: control target
= control target key end

     0   :  { %v690_v33 = vmov 0.0   ;;  %vm691_vm0 = vmmov 0   ;;  %s853_s1 = inlined_call_operand.vmem [shape: bf16[640,128], index: 1, kind: input, shape index: {}]   ;;  %s854_s0 = inlined_call_operand.vmem [shape: bf16[16,640], index: 0, kind: input, shape index: {}]   ;;  %s855_s2 = inlined_call_operand.vmem [shape: f32[1,128], index: 2, kind: input, shape index: {}]   ;;  %s856_s3 = inlined_call_operand.vmem [shape: bf16[16,128], index: 3, kind: output, shape index: {}]  }
   0x1   :  { %v643_v0 = vld [vmem:[%s853_s1 + $0x40] sm:$0xff]   ;;  %v647_v4 = vld [vmem:[%s853_s1 + $0x48] sm:$0xff]   ;;  %v651_v8 = vld [vmem:[%s853_s1 + $0x50] sm:$0xff]  }
   0x2   :  { %v644_v1 = vld [vmem:[%s853_s1] sm:$0xff]   ;;  %568 = vmatprep.subr.bf16.mxu0 %v643_v0  ;;  %v648_v5 = vld [vmem:[%s853_s1 + $0x8] sm:$0xff]   ;;  %v652_v9 = vld [vmem:[%s853_s1 + $0x10] sm:$0xff]  }
   0x3   :  { %v645_v2 = vld [vmem:[%s853_s1 + $0xc0] sm:$0xff]   ;;  %569 = vmatpush3.bf16.msra.mxu0 %v644_v1  ;;  %v649_v6 = vld [vmem:[%s853_s1 + $0xc8] sm:$0xff]   ;;  %v653_v10 = vld [vmem:[%s853_s1 + $0xd0] sm:$0xff]  }
   0x4   :  { %v646_v3 = vld [vmem:[%s853_s1 + $0x80] sm:$0xff]   ;;  %590 = vmatprep.subr.bf16.mxu1 %v645_v2  ;;  %570 = vmatprep.subr.bf16.mxu0 %v647_v4  ;;  %v650_v7 = vld [vmem:[%s853_s1 + $0x88] sm:$0xff]   ;;  %v654_v11 = vld [vmem:[%s853_s1 + $0x90] sm:$0xff]  }
   0x5   :  { %591 = vmatpush3.bf16.msra.mxu1 %v646_v3  ;;  %v655_v12 = vld [vmem:[%s853_s1 + $0x58] sm:$0xff]   ;;  %v659_v16 = vld [vmem:[%s853_s1 + $0x60] sm:$0xff]   ;;  %v663_v20 = vld [vmem:[%s853_s1 + $0x68] sm:$0xff]  }
   0x6   :  { %592 = vmatprep.subr.bf16.mxu1 %v649_v6  ;;  %v656_v13 = vld [vmem:[%s853_s1 + $0x18] sm:$0xff]   ;;  %v660_v17 = vld [vmem:[%s853_s1 + $0x20] sm:$0xff]   ;;  %v664_v21 = vld [vmem:[%s853_s1 + $0x28] sm:$0xff]  }
   0x7   :  { %571 = vmatpush3.bf16.msra.mxu0 %v648_v5  ;;  %v657_v14 = vld [vmem:[%s853_s1 + $0xd8] sm:$0xff]   ;;  %v661_v18 = vld [vmem:[%s853_s1 + $0xe0] sm:$0xff]   ;;  %v665_v22 = vld [vmem:[%s853_s1 + $0xe8] sm:$0xff]  }
   0x8   :  { %572 = vmatprep.subr.bf16.mxu0 %v651_v8  ;;  %v658_v15 = vld [vmem:[%s853_s1 + $0x98] sm:$0xff]   ;;  %v662_v19 = vld [vmem:[%s853_s1 + $0xa0] sm:$0xff]   ;;  %v666_v23 = vld [vmem:[%s853_s1 + $0xa8] sm:$0xff]  }
   0x9   :  { %593 = vmatpush3.bf16.msra.mxu1 %v650_v7  ;;  %v667_v24 = vld [vmem:[%s853_s1 + $0x70] sm:$0xff]   ;;  %v671_v28 = vld [vmem:[%s853_s1 + $0x78] sm:$0xff]   ;;  %v680_v36 = vld [vmem:[%s854_s0 + $0xc] ss:$20 sps:$4 sm:$0xff]  }
   0xa   :  { %594 = vmatprep.subr.bf16.mxu1 %v653_v10  ;;  %v668_v25 = vld [vmem:[%s853_s1 + $0x30] sm:$0xff]   ;;  %v672_v29 = vld [vmem:[%s853_s1 + $0x38] sm:$0xff]   ;;  %v681_v37 = vld [vmem:[%s853_s1 + $0x100] sm:$0xff]   ;;  %447 = vmatprep.mubr.bf16.mxu1 %v680_v36 }
   0xb   :  { %573 = vmatpush3.bf16.msra.mxu0 %v652_v9  ;;  %v669_v26 = vld [vmem:[%s853_s1 + $0xf0] sm:$0xff]   ;;  %v673_v30 = vld [vmem:[%s853_s1 + $0xf8] sm:$0xff]   ;;  %v682_v38 = vld [vmem:[%s853_s1 + $0x108] sm:$0xff]  }
   0xc   :  { %574 = vmatprep.subr.bf16.mxu0 %v655_v12  ;;  %v670_v27 = vld [vmem:[%s853_s1 + $0xb0] sm:$0xff]   ;;  %v676_v32 = vld [vmem:[%s854_s0 + $0x4] ss:$20 sps:$4 sm:$0xff]   ;;  %v678_v35 = vld [vmem:[%s854_s0 + $0x8] ss:$20 sps:$4 sm:$0xff]  }
   0xd   :  { %595 = vmatpush3.bf16.msra.mxu1 %v654_v11  ;;  %v674_v31 = vld [vmem:[%s854_s0] ss:$20 sps:$4 sm:$0xff]   ;;  %v677_v34 = vld [vmem:[%s853_s1 + $0xb8] sm:$0xff]   ;;  %406 = vmatprep.mubr.bf16.mxu0 %v676_v32  ;;  %v686_v42 = vld [vmem:[%s853_s1 + $0x128] sm:$0xff]  }
   0xe   :  { %596 = vmatprep.subr.bf16.mxu1 %v657_v14  ;;  %v683_v39 = vld [vmem:[%s853_s1 + $0x110] sm:$0xff]   ;;  %v684_v40 = vld [vmem:[%s853_s1 + $0x118] sm:$0xff]   ;;  %v685_v41 = vld [vmem:[%s853_s1 + $0x120] sm:$0xff]  }
   0xf   :  { %575 = vmatpush3.bf16.msra.mxu0 %v656_v13  ;;  %v687_v43 = vld [vmem:[%s853_s1 + $0x130] sm:$0xff]   ;;  %v688_v44 = vld [vmem:[%s853_s1 + $0x138] sm:$0xff]   ;;  %v513_v47 = vld [vmem:[%s855_s2] ss:$0 sm:$0xff] }
  0x10   :  { %576 = vmatprep.subr.bf16.mxu0 %v659_v16  ;;  %v689_v45 = vld [vmem:[%s854_s0 + $0x10] ss:$20 sps:$4 sm:$0xff]  }
  0x11   :  { %597 = vmatpush3.bf16.msra.mxu1 %v658_v15 }
  0x12   :  { %598 = vmatprep.subr.bf16.mxu1 %v661_v18 }
  0x13   :  { %577 = vmatpush3.bf16.msra.mxu0 %v660_v17 }
  0x14   :  { %578 = vmatprep.subr.bf16.mxu0 %v663_v20 }
  0x15   :  { %599 = vmatpush3.bf16.msra.mxu1 %v662_v19 }
  0x16   :  { %600 = vmatprep.subr.bf16.mxu1 %v665_v22 }
  0x17   :  { %579 = vmatpush3.bf16.msra.mxu0 %v664_v21 }
  0x18   :  { %580 = vmatprep.subr.bf16.mxu0 %v667_v24 }
  0x19   :  { %601 = vmatpush3.bf16.msra.mxu1 %v666_v23 }
  0x1a   :  { %602 = vmatprep.subr.bf16.mxu1 %v669_v26 }
  0x1b   :  { %581 = vmatpush3.bf16.msra.mxu0 %v668_v25 }
  0x1c   :  { %582 = vmatprep.subr.bf16.mxu0 %v671_v28 }
  0x1d   :  { %603 = vmatpush3.bf16.msra.mxu1 %v670_v27 }
  0x1e   :  { %604 = vmatprep.subr.bf16.mxu1 %v673_v30 }
  0x1f   :  { %583 = vmatpush3.bf16.msra.mxu0 %v672_v29 }
  0x20   :  { %621 = vmatprep.subr.bf16.mxu0 %v690_v33 }
  0x21   :  { %605 = vmatpush3.bf16.msra.mxu1 %v677_v34 }
  0x22   :  { %407 = vmatmul.mubr.bf16.vlgmr.msra.gmra.mrb[0].mxu0 %v674_v31 }
  0x23   :  { %637 = vmatprep.mubr.msk.bf16.mxu0 %vm691_vm0, %v690_v33  ;;  %622 = vmatpush3.bf16.msra.mxu0 %v681_v37 }
  0x24   :  { %448 = vmatmul.mubr.bf16.vlgmr.msra.gmra.mrb[0].mxu1 %v678_v35  ;;  %623 = vmatprep.subr.bf16.mxu0 %v690_v33 }
  0x27   :  { %624 = vmatpush3.bf16.msra.mxu0 %v682_v38 }
  0x28   :  { %625 = vmatprep.subr.bf16.mxu0 %v690_v33 }
  0x2b   :  { %626 = vmatpush3.bf16.msra.mxu0 %v683_v39 }
  0x2c   :  { %627 = vmatprep.subr.bf16.mxu0 %v690_v33 }
  0x2f   :  { %628 = vmatpush3.bf16.msra.mxu0 %v684_v40 }
  0x30   :  { %629 = vmatprep.subr.bf16.mxu0 %v690_v33 }
  0x33   :  { %630 = vmatpush3.bf16.msra.mxu0 %v685_v41 }
  0x34   :  { %631 = vmatprep.subr.bf16.mxu0 %v690_v33 }
  0x37   :  { %632 = vmatpush3.bf16.msra.mxu0 %v686_v42 }
  0x38   :  { %633 = vmatprep.subr.bf16.mxu0 %v690_v33 }
  0x3b   :  { %634 = vmatpush3.bf16.msra.mxu0 %v687_v43 }
  0x3c   :  { %635 = vmatprep.subr.bf16.mxu0 %v690_v33 }
  0x3f   :  { %636 = vmatpush3.bf16.msra.mxu0 %v688_v44 }
  0x42   :  { %638 = vmatmul.mubr.bf16.vlgmr.msra.gmra.mrb[4].mxu0 %v689_v45 }
  0xf5   :  { %v584_v46 = vpop.f32.mrb[0].mxu0 }
  0xf6   :  { %v585_v48 = vpop.f32.mrb[1].mxu0 }
  0xf7   :  { %v586_v49 = vadd.f32 %v585_v48, %v584_v46  ;;  %v587_v50 = vpop.f32.mrb[2].mxu0  ;;  %v606_v51 = vpop.f32.mrb[0].mxu1 }
  0xf8   :  { %v588_v52 = vpop.f32.mrb[3].mxu0  ;;  %v607_v55 = vpop.f32.mrb[1].mxu1 }
  0xf9   :  { %v409_v53 = vadd.f32 %v586_v49, %v513_v47  ;;  %v589_v54 = vadd.f32 %v588_v52, %v587_v50  ;;  %v608_v56 = vadd.f32 %v607_v55, %v606_v51  ;;  %v609_v57 = vpop.f32.mrb[2].mxu1 }
  0xfa   :  { %v610_v59 = vpop.f32.mrb[3].mxu1 }
  0xfb   :  { %v412_v58 = vadd.f32 %v589_v54, %v513_v47  ;;  %v611_v60 = vadd.f32 %v610_v59, %v609_v57  ;;  %v450_v61 = vadd.f32 %v608_v56, %v409_v53 }
  0xfd   :  { %v453_v62 = vadd.f32 %v611_v60, %v412_v58 }
 0x115   :  { %v490_v63 = vpop.f32.mrb[4].mxu0 }
 0x116   :  { %v491_v0 = vadd.f32 %v490_v63, %v450_v61  ;;  %v639_v1 = vpop.f32.mrb[5].mxu0 }
 0x117   :  { %v493_v2 = vpop.f32.mrb[6].mxu0 }
 0x118   :  { %v494_v3 = vadd.f32 %v493_v2, %v453_v62  ;;  %v640_v4 = vpop.f32.mrb[7].mxu0  ;;  %v497_v5 = vmax.f32 %v491_v0, 0.0 }
 0x11a   :  { %v498_v6 = vmax.f32 %v494_v3, 0.0 }
 0x11c   :  { %v566_v7 = vpack.c.bf16 %v498_v6, %v497_v5 }
 0x11e   :  { %567 = vst [vmem:[%s856_s3] sm:$0xff] %v566_v7  }

// kernel: _lambda_.110
= control target key start
LH: loop header
LB: loop body
LE: loop exit
PB: predicated region body
PF: predicated region fallthrough
CT: control target
= control target key end

     0   :  { %s368_s1 = inlined_call_operand.vmem [shape: bf16[256,128], index: 1, kind: input, shape index: {}]   ;;  %s369_s0 = inlined_call_operand.vmem [shape: bf16[16,256], index: 0, kind: input, shape index: {}]   ;;  %s370_s2 = inlined_call_operand.vmem [shape: f32[1,128], index: 2, kind: input, shape index: {}]   ;;  %s371_s3 = inlined_call_operand.vmem [shape: bf16[16,128], index: 3, kind: output, shape index: {}]  }
   0x1   :  { %v269_v0 = vld [vmem:[%s368_s1 + $0x40] sm:$0xff]   ;;  %v271_v2 = vld [vmem:[%s368_s1 + $0x48] sm:$0xff]   ;;  %v273_v4 = vld [vmem:[%s368_s1 + $0x50] sm:$0xff]  }
   0x2   :  { %v270_v1 = vld [vmem:[%s368_s1] sm:$0xff]   ;;  %247 = vmatprep.subr.bf16.mxu0 %v269_v0  ;;  %v272_v3 = vld [vmem:[%s368_s1 + $0x8] sm:$0xff]   ;;  %v274_v5 = vld [vmem:[%s368_s1 + $0x10] sm:$0xff]  }
   0x3   :  { %248 = vmatpush3.bf16.msra.mxu0 %v270_v1  ;;  %v275_v6 = vld [vmem:[%s368_s1 + $0x58] sm:$0xff]   ;;  %v277_v8 = vld [vmem:[%s368_s1 + $0x60] sm:$0xff]   ;;  %v279_v10 = vld [vmem:[%s368_s1 + $0x68] sm:$0xff]  }
   0x4   :  { %249 = vmatprep.subr.bf16.mxu0 %v271_v2  ;;  %v276_v7 = vld [vmem:[%s368_s1 + $0x18] sm:$0xff]   ;;  %v278_v9 = vld [vmem:[%s368_s1 + $0x20] sm:$0xff]   ;;  %v280_v12 = vld [vmem:[%s368_s1 + $0x28] sm:$0xff]  }
   0x5   :  { %v287_v11 = vld [vmem:[%s369_s0 + $0x4] ss:$8 sps:$4 sm:$0xff]   ;;  %v281_v13 = vld [vmem:[%s368_s1 + $0x70] sm:$0xff]   ;;  %v283_v15 = vld [vmem:[%s368_s1 + $0x78] sm:$0xff]  }
   0x6   :  { %194 = vmatprep.mubr.bf16.mxu0 %v287_v11  ;;  %v282_v14 = vld [vmem:[%s368_s1 + $0x30] sm:$0xff]   ;;  %v284_v16 = vld [vmem:[%s368_s1 + $0x38] sm:$0xff]   ;;  %v285_v17 = vld [vmem:[%s369_s0] ss:$8 sps:$4 sm:$0xff]  }
   0x7   :  { %250 = vmatpush3.bf16.msra.mxu0 %v272_v3  ;;  %v219_v19 = vld [vmem:[%s370_s2] ss:$0 sm:$0xff] }
   0x8   :  { %251 = vmatprep.subr.bf16.mxu0 %v273_v4 }
   0xb   :  { %252 = vmatpush3.bf16.msra.mxu0 %v274_v5 }
   0xc   :  { %253 = vmatprep.subr.bf16.mxu0 %v275_v6 }
   0xf   :  { %254 = vmatpush3.bf16.msra.mxu0 %v276_v7 }
  0x10   :  { %255 = vmatprep.subr.bf16.mxu0 %v277_v8 }
  0x13   :  { %256 = vmatpush3.bf16.msra.mxu0 %v278_v9 }
  0x14   :  { %257 = vmatprep.subr.bf16.mxu0 %v279_v10 }
  0x17   :  { %258 = vmatpush3.bf16.msra.mxu0 %v280_v12 }
  0x18   :  { %259 = vmatprep.subr.bf16.mxu0 %v281_v13 }
  0x1b   :  { %260 = vmatpush3.bf16.msra.mxu0 %v282_v14 }
  0x1c   :  { %261 = vmatprep.subr.bf16.mxu0 %v283_v15 }
  0x1f   :  { %262 = vmatpush3.bf16.msra.mxu0 %v284_v16 }
  0x22   :  { %195 = vmatmul.mubr.bf16.vlgmr.msra.gmra.mrb[0].mxu0 %v285_v17 }
  0xf5   :  { %v263_v18 = vpop.f32.mrb[0].mxu0 }
  0xf6   :  { %v264_v20 = vpop.f32.mrb[1].mxu0 }
  0xf7   :  { %v265_v21 = vadd.f32 %v264_v20, %v263_v18  ;;  %v266_v22 = vpop.f32.mrb[2].mxu0 }
  0xf8   :  { %v267_v23 = vpop.f32.mrb[3].mxu0 }
  0xf9   :  { %v197_v24 = vadd.f32 %v265_v21, %v219_v19  ;;  %v268_v25 = vadd.f32 %v267_v23, %v266_v22 }
  0xfb   :  { %v200_v26 = vadd.f32 %v268_v25, %v219_v19  ;;  %v203_v27 = vmax.f32 %v197_v24, 0.0 }
  0xfd   :  { %v204_v28 = vmax.f32 %v200_v26, 0.0 }
  0xff   :  { %v245_v29 = vpack.c.bf16 %v204_v28, %v203_v27 }
 0x101   :  { %246 = vst [vmem:[%s371_s3] sm:$0xff] %v245_v29  }

// kernel: _lambda_.116
= control target key start
LH: loop header
LB: loop body
LE: loop exit
PB: predicated region body
PF: predicated region fallthrough
CT: control target
= control target key end

     0   :  { %v16_v0 = vlaneseq  ;;  %v137_v3 = vmov 1966171168   ;;  %v138_v5 = vmov 1935823168   ;;  %vm107_vm0 = vcmask 1041409   ;;  %s158_s0 = inlined_call_operand.vmem [shape: bf16[2,1,256], index: 0, kind: input, shape index: {}]   ;;  %s159_s1 = inlined_call_operand.vmem [shape: bf16[2,256], index: 1, kind: output, shape index: {}]  }
   0x1   :  { %v8_v1 = vld [vmem:[%s158_s0] sm:$0x3]  ;;  %v9_v2 = vld [vmem:[%s158_s0 + $0x2] sm:$0x3]  ;;  %v46_v4 = vunpack.c.l.s4 %v137_v3  ;;  %v75_v6 = vunpack.c.l.s4 %v138_v5 }
   0x2   :  { %v10_v7 = vunpack.c.l.bf16 %v8_v1  ;;  %v11_v8 = vunpack.c.l.bf16 %v9_v2  ;;  %v17_v9 = vshrl.u32 %v16_v0, 7 }
   0x3   :  { %v47_v10 = vunpack.c.0.s8 %v46_v4  ;;  %v76_v14 = vunpack.c.0.s8 %v75_v6 }
   0x4   :  { %v18_v11 = vsub.s32 0, %v17_v9  ;;  %v22_v12 = vsub.s32 2, %v17_v9 }
   0x5   :  { %v50_v13 = vsub.s32 %v47_v10, %v17_v9  ;;  %v79_v23 = vsub.s32 %v76_v14, %v17_v9 }
   0x6   :  { %v19_v15 = vrot.slane %v10_v7, %v18_v11  ;;  %v23_v16 = vrot.slane %v10_v7, %v22_v12  ;;  %v27_v17 = vrot.slane %v11_v8, %v18_v11  ;;  %v31_v18 = vrot.slane %v11_v8, %v22_v12 }
   0x8   :  { %v132_v19 = vpack.c.bf16 %v23_v16, %v19_v15  ;;  %v133_v20 = vpack.c.bf16 %v31_v18, %v27_v17 }
   0xa   :  { %v51_v21 = vrot.slane %v132_v19, %v50_v13  ;;  %v66_v22 = vrot.slane %v133_v20, %v50_v13 }
   0xc   :  { %v58_v24 = vrot.slane %v51_v21, %v50_v13  ;;  %v73_v25 = vrot.slane %v66_v22, %v50_v13 }
   0xe   :  { %v80_v26 = vrot.slane %v58_v24, %v79_v23  ;;  %v94_v27 = vrot.slane %v73_v25, %v79_v23 }
  0x10   :  { %v87_v28 = vrot.slane %v80_v26, %v79_v23  ;;  %v101_v29 = vrot.slane %v94_v27, %v79_v23 }
  0x12   :  { %v102_v30 = vunpack.c.l.b16 %v87_v28  ;;  %v103_v31 = vunpack.c.h.b16 %v87_v28  ;;  %v104_v32 = vunpack.c.l.b16 %v101_v29  ;;  %v105_v33 = vunpack.c.h.b16 %v101_v29 }
  0x14   :  { %v106_v34 = vrot.slane %v104_v32, 7  ;;  %v109_v35 = vrot.slane %v105_v33, 7 }
  0x16   :  { %v108_v36 = vsel %vm107_vm0, %v106_v34, %v102_v30  ;;  %v110_v37 = vsel %vm107_vm0, %v109_v35, %v103_v31 }
  0x17   :  { %v111_v38 = vpack.c.b16 %v110_v37, %v108_v36 }
  0x19   :  { %v118_v39 = vrot.slane %v111_v38, %v50_v13 }
  0x1b   :  { %134 = vst.sshfl [vmem:[%s159_s1] sm:$0x5 pattern:$0x73625140] %v118_v39 }

// kernel: _lambda_.117
= control target key start
LH: loop header
LB: loop body
LE: loop exit
PB: predicated region body
PF: predicated region fallthrough
CT: control target
= control target key end

     0   :  { %v50_v34 = vlaneseq  ;;  %s503_s1 = inlined_call_operand.vmem [shape: bf16[256,256], index: 1, kind: input, shape index: {}]   ;;  %s504_s0 = inlined_call_operand.vmem [shape: bf16[16,256], index: 0, kind: input, shape index: {}]   ;;  %s505_s2 = inlined_call_operand.vmem [shape: f32[1,256], index: 2, kind: input, shape index: {}]   ;;  %s506_s3 = inlined_call_operand.vmem [shape: f32[16,256], index: 3, kind: output, shape index: {}]  }
   0x1   :  { %v315_v0 = vld [vmem:[%s503_s1 + $0x4] ss:$8 sps:$4 sm:$0xff]   ;;  %v317_v1 = vld [vmem:[%s503_s1] ss:$8 sps:$4 sm:$0xff]   ;;  %v318_v2 = vld [vmem:[%s503_s1 + $0x14] ss:$8 sps:$4 sm:$0xff]  }
   0x2   :  { %230 = vmatprep.subr.bf16.mxu0 %v315_v0  ;;  %v320_v3 = vld [vmem:[%s503_s1 + $0x10] ss:$8 sps:$4 sm:$0xff]   ;;  %v321_v4 = vld [vmem:[%s503_s1 + $0x24] ss:$8 sps:$4 sm:$0xff]   ;;  %v323_v5 = vld [vmem:[%s503_s1 + $0x20] ss:$8 sps:$4 sm:$0xff]  }
   0x3   :  { %231 = vmatpush1.bf16.msra.mxu0 %v317_v1  ;;  %v324_v6 = vld [vmem:[%s503_s1 + $0x34] ss:$8 sps:$4 sm:$0xff]   ;;  %v326_v7 = vld [vmem:[%s503_s1 + $0x30] ss:$8 sps:$4 sm:$0xff]   ;;  %v327_v8 = vld [vmem:[%s503_s1 + $0x44] ss:$8 sps:$4 sm:$0xff]  }
   0x4   :  { %232 = vmatprep.subr.bf16.mxu0 %v318_v2  ;;  %v329_v9 = vld [vmem:[%s503_s1 + $0x40] ss:$8 sps:$4 sm:$0xff]   ;;  %v330_v10 = vld [vmem:[%s503_s1 + $0x54] ss:$8 sps:$4 sm:$0xff]   ;;  %v332_v11 = vld [vmem:[%s503_s1 + $0x50] ss:$8 sps:$4 sm:$0xff]  }
   0x5   :  { %v333_v12 = vld [vmem:[%s503_s1 + $0x64] ss:$8 sps:$4 sm:$0xff]   ;;  %v335_v14 = vld [vmem:[%s503_s1 + $0x60] ss:$8 sps:$4 sm:$0xff]   ;;  %v336_v15 = vld [vmem:[%s503_s1 + $0x74] ss:$8 sps:$4 sm:$0xff]  }
   0x6   :  { %v365_v13 = vld [vmem:[%s504_s0 + $0x4] ss:$8 sps:$4 sm:$0xff]   ;;  %v338_v16 = vld [vmem:[%s503_s1 + $0x70] ss:$8 sps:$4 sm:$0xff]   ;;  %v341_v18 = vld [vmem:[%s503_s1 + $0x80] ss:$8 sps:$4 sm:$0xff]  }
   0x7   :  { %233 = vmatpush1.bf16.msra.mxu0 %v320_v3  ;;  %262 = vmatprep.mubr.bf16.mxu0 %v365_v13  ;;  %v339_v17 = vld [vmem:[%s503_s1 + $0x84] ss:$8 sps:$4 sm:$0xff]   ;;  %v342_v19 = vld [vmem:[%s503_s1 + $0x94] ss:$8 sps:$4 sm:$0xff]   ;;  %v344_v20 = vld [vmem:[%s503_s1 + $0x90] ss:$8 sps:$4 sm:$0xff]  }
   0x8   :  { %234 = vmatprep.subr.bf16.mxu0 %v321_v4  ;;  %v345_v21 = vld [vmem:[%s503_s1 + $0xa4] ss:$8 sps:$4 sm:$0xff]   ;;  %v347_v22 = vld [vmem:[%s503_s1 + $0xa0] ss:$8 sps:$4 sm:$0xff]   ;;  %v348_v23 = vld [vmem:[%s503_s1 + $0xb4] ss:$8 sps:$4 sm:$0xff]  }
   0x9   :  { %v350_v24 = vld [vmem:[%s503_s1 + $0xb0] ss:$8 sps:$4 sm:$0xff]   ;;  %v351_v25 = vld [vmem:[%s503_s1 + $0xc4] ss:$8 sps:$4 sm:$0xff]   ;;  %v353_v26 = vld [vmem:[%s503_s1 + $0xc0] ss:$8 sps:$4 sm:$0xff]  }
   0xa   :  { %v354_v27 = vld [vmem:[%s503_s1 + $0xd4] ss:$8 sps:$4 sm:$0xff]   ;;  %v356_v28 = vld [vmem:[%s503_s1 + $0xd0] ss:$8 sps:$4 sm:$0xff]   ;;  %v357_v29 = vld [vmem:[%s503_s1 + $0xe4] ss:$8 sps:$4 sm:$0xff]  }
   0xb   :  { %235 = vmatpush1.bf16.msra.mxu0 %v323_v5  ;;  %v359_v30 = vld [vmem:[%s503_s1 + $0xe0] ss:$8 sps:$4 sm:$0xff]   ;;  %v360_v31 = vld [vmem:[%s503_s1 + $0xf4] ss:$8 sps:$4 sm:$0xff]   ;;  %v362_v32 = vld [vmem:[%s503_s1 + $0xf0] ss:$8 sps:$4 sm:$0xff]  }
   0xc   :  { %236 = vmatprep.subr.bf16.mxu0 %v324_v6  ;;  %v363_v33 = vld [vmem:[%s504_s0] ss:$8 sps:$4 sm:$0xff]   ;;  %v51_v35 = vshrl.u32 %v50_v34, 7 }
   0xd   :  { %v48_v37 = vld [vmem:[%s505_s2] sm:$0x3] }
   0xe   :  { %v52_v36 = vsub.s32 0, %v51_v35  ;;  %v56_v38 = vsub.s32 1, %v51_v35 }
   0xf   :  { %237 = vmatpush1.bf16.msra.mxu0 %v326_v7 }
  0x10   :  { %238 = vmatprep.subr.bf16.mxu0 %v327_v8  ;;  %v53_v39 = vrot.slane %v48_v37, %v52_v36  ;;  %v57_v40 = vrot.slane %v48_v37, %v56_v38 }
  0x13   :  { %239 = vmatpush1.bf16.msra.mxu0 %v329_v9 }
  0x14   :  { %240 = vmatprep.subr.bf16.mxu0 %v330_v10 }
  0x17   :  { %241 = vmatpush1.bf16.msra.mxu0 %v332_v11 }
  0x18   :  { %242 = vmatprep.subr.bf16.mxu0 %v333_v12 }
  0x1b   :  { %243 = vmatpush1.bf16.msra.mxu0 %v335_v14 }
  0x1c   :  { %244 = vmatprep.subr.bf16.mxu0 %v336_v15 }
  0x1f   :  { %245 = vmatpush1.bf16.msra.mxu0 %v338_v16 }
  0x20   :  { %246 = vmatprep.subr.bf16.mxu0 %v339_v17 }
  0x23   :  { %247 = vmatpush1.bf16.msra.mxu0 %v341_v18 }
  0x24   :  { %248 = vmatprep.subr.bf16.mxu0 %v342_v19 }
  0x27   :  { %249 = vmatpush1.bf16.msra.mxu0 %v344_v20 }
  0x28   :  { %250 = vmatprep.subr.bf16.mxu0 %v345_v21 }
  0x2b   :  { %251 = vmatpush1.bf16.msra.mxu0 %v347_v22 }
  0x2c   :  { %252 = vmatprep.subr.bf16.mxu0 %v348_v23 }
  0x2f   :  { %253 = vmatpush1.bf16.msra.mxu0 %v350_v24 }
  0x30   :  { %254 = vmatprep.subr.bf16.mxu0 %v351_v25 }
  0x33   :  { %255 = vmatpush1.bf16.msra.mxu0 %v353_v26 }
  0x34   :  { %256 = vmatprep.subr.bf16.mxu0 %v354_v27 }
  0x37   :  { %257 = vmatpush1.bf16.msra.mxu0 %v356_v28 }
  0x38   :  { %258 = vmatprep.subr.bf16.mxu0 %v357_v29 }
  0x3b   :  { %259 = vmatpush1.bf16.msra.mxu0 %v359_v30 }
  0x3c   :  { %260 = vmatprep.subr.bf16.mxu0 %v360_v31 }
  0x3f   :  { %261 = vmatpush1.bf16.msra.mxu0 %v362_v32 }
  0x42   :  { %263 = vmatmul.mubr.bf16.vlgmr.msra.gmra.mrb[0].mxu0 %v363_v33 }
 0x115   :  { %v264_v41 = vpop.f32.mrb[0].mxu0 }
 0x116   :  { %v265_v42 = vadd.f32 %v264_v41, %v53_v39  ;;  %v266_v43 = vpop.f32.mrb[1].mxu0 }
 0x117   :  { %v267_v44 = vadd.f32 %v266_v43, %v57_v40  ;;  %v268_v45 = vpop.f32.mrb[2].mxu0 }
 0x118   :  { %273 = vst [vmem:[%s506_s3] sm:$0xff] %v265_v42  ;;  %v269_v46 = vadd.f32 %v268_v45, %v53_v39  ;;  %v270_v47 = vpop.f32.mrb[3].mxu0 }
 0x119   :  { %274 = vst [vmem:[%s506_s3 + $0x8] sm:$0xff] %v267_v44  ;;  %v271_v48 = vadd.f32 %v270_v47, %v57_v40 }
 0x11a   :  { %275 = vst [vmem:[%s506_s3 + $0x10] sm:$0xff] %v269_v46 }
 0x11b   :  { %276 = vst [vmem:[%s506_s3 + $0x18] sm:$0xff] %v271_v48 }

// kernel: _lambda_.118
= control target key start
LH: loop header
LB: loop body
LE: loop exit
PB: predicated region body
PF: predicated region fallthrough
CT: control target
= control target key end

     0   :  { %s1257_s12 = smov 0   ;;  %s1259_s13 = smov 0   ;;  %s1394_s0 = inlined_call_operand.vmem [shape: bf16[512,128], index: 0, kind: input, shape index: {}]   ;;  %s1395_s1 = inlined_call_operand.vmem [shape: bf16[128,128], index: 1, kind: input, shape index: {}]   ;;  %s1396_s2 = inlined_call_operand.vmem [shape: f32[1,128], index: 2, kind: input, shape index: {}]   ;;  %s1397_s3 = inlined_call_operand.vmem [shape: bf16[512,128], index: 3, kind: output, shape index: {}]  }
   0x1   :  { %s1261_s14 = smov 0  }
   0x2 LB: > { %s25_s15 = sadd.s32 1, %s1231_s13  ;;  %p886_p0 = scmp.ge.s32.totalorder %s1235_s14, 1  ;;  %s1235_s14 = sphi %s1261_s14, %s13_s14   ;;  %s1231_s13 = sphi %s1259_s13, %s1399_s13   ;;  %s1227_s12 = sphi %s1257_s12, %s1398_s12  }
   0x3   : > { %p27_p1 = scmp.ge.s32.totalorder %s25_s15, 2  ;;  %p169_p2 = scmp.lt.s32.totalorder %s1235_s14, 3 }
   0x5   : > { %s1401_s15 = smov (%p27_p1, %s25_s15), 0  ;;  %p170_p3 = pnand %p886_p0, %p169_p2 }
   0x6   : > { %v1189_v0 = vld [vmem:[%s1395_s1] sm:$0xff] (!%p170_p3)   ;;  %s887_s18 = sshll.u32 (!%p170_p3), %s1227_s12, 5  ;;  %v1190_v1 = vld [vmem:[%s1395_s1 + $0x8] sm:$0xff] (!%p170_p3)   ;;  %v1191_v2 = vld [vmem:[%s1395_s1 + $0x10] sm:$0xff] (!%p170_p3)  }
   0x7   : > { %173 = sbr.rel (%p170_p3) target bundleno = 285 (0x11d), region = 32  ;;  %p204_p4 = scmp.lt.s32.totalorder (!%p170_p3), %s887_s18, 63  ;;  %1101 = vmatprep.subr.bf16.mxu0 (!%p170_p3), %v1189_v0  ;;  %1149 = vmatprep.subr.bf16.mxu1 (!%p170_p3), %v1189_v0  ;;  %v1192_v3 = vld [vmem:[%s1395_s1 + $0x18] sm:$0xff] (!%p170_p3)   ;;  %v1193_v6 = vld [vmem:[%s1395_s1 + $0x20] sm:$0xff] (!%p170_p3)   ;;  %v1194_v7 = vld [vmem:[%s1395_s1 + $0x28] sm:$0xff] (!%p170_p3)  }
   0x8   : > { %1102 = vmatpush3.bf16.msra.mxu0 (!%p170_p3), %v1189_v0  ;;  %1157 = vmatpush3.bf16.msra.mxu1 (!%p170_p3), %v1189_v0  ;;  %v1195_v8 = vld [vmem:[%s1395_s1 + $0x30] sm:$0xff] (!%p170_p3)   ;;  %v1196_v9 = vld [vmem:[%s1395_s1 + $0x38] sm:$0xff] (!%p170_p3)   ;;  %v1328_v24 = vld [vmem:[%s1396_s2] ss:$0 sm:$0xff] (!%p170_p3) }
   0x9   : > { %1103 = vmatprep.subr.bf16.mxu0 (!%p170_p3), %v1190_v1  ;;  %1150 = vmatprep.subr.bf16.mxu1 (!%p170_p3), %v1190_v1 }
   0xc   : > { %1104 = vmatpush3.bf16.msra.mxu0 (!%p170_p3), %v1190_v1  ;;  %1158 = vmatpush3.bf16.msra.mxu1 (!%p170_p3), %v1190_v1 }
   0xd   : > { %1105 = vmatprep.subr.bf16.mxu0 (!%p170_p3), %v1191_v2  ;;  %1151 = vmatprep.subr.bf16.mxu1 (!%p170_p3), %v1191_v2 }
   0xe   : > { %s1403_s18 = smov (!%p204_p4, %s887_s18), 63 }
   0xf   : > { %s888_s23 = sshll.u32 %s1403_s18, 2 }
  0x10   : > { %s1292_s26 = scalar_lea.vmem %s1394_s0, %s888_s23  ;;  %1106 = vmatpush3.bf16.msra.mxu0 %v1191_v2  ;;  %1159 = vmatpush3.bf16.msra.mxu1 %v1191_v2  ;;  %s1343_s17 = scalar_lea.vmem %s1397_s3, %s888_s23 }
  0x11   : > { %v1197_v4 = vld [vmem:[%s1292_s26] sm:$0xff]   ;;  %1107 = vmatprep.subr.bf16.mxu0 %v1192_v3  ;;  %1152 = vmatprep.subr.bf16.mxu1 %v1192_v3  ;;  %v1199_v10 = vld [vmem:[%s1292_s26 + $0x8] sm:$0xff]   ;;  %v1201_v12 = vld [vmem:[%s1292_s26 + $0x10] sm:$0xff]  }
  0x12   : > { %v1198_v5 = vld [vmem:[%s1292_s26 + $0x40] sm:$0xff]   ;;  %1117 = vmatprep.mubr.bf16.mxu0 %v1197_v4  ;;  %v1200_v11 = vld [vmem:[%s1292_s26 + $0x48] sm:$0xff]   ;;  %v1202_v13 = vld [vmem:[%s1292_s26 + $0x50] sm:$0xff]  }
  0x13   : > { %1133 = vmatprep.mubr.bf16.mxu1 %v1198_v5  ;;  %v1203_v14 = vld [vmem:[%s1292_s26 + $0x18] sm:$0xff]   ;;  %v1205_v16 = vld [vmem:[%s1292_s26 + $0x20] sm:$0xff]   ;;  %v1207_v18 = vld [vmem:[%s1292_s26 + $0x28] sm:$0xff]  }
  0x14   : > { %1108 = vmatpush3.bf16.msra.mxu0 %v1192_v3  ;;  %1160 = vmatpush3.bf16.msra.mxu1 %v1192_v3  ;;  %v1204_v15 = vld [vmem:[%s1292_s26 + $0x58] sm:$0xff]   ;;  %v1206_v17 = vld [vmem:[%s1292_s26 + $0x60] sm:$0xff]   ;;  %v1208_v19 = vld [vmem:[%s1292_s26 + $0x68] sm:$0xff]  }
  0x15   : > { %1109 = vmatprep.subr.bf16.mxu0 %v1193_v6  ;;  %1153 = vmatprep.subr.bf16.mxu1 %v1193_v6  ;;  %v1209_v20 = vld [vmem:[%s1292_s26 + $0x30] sm:$0xff]   ;;  %v1211_v22 = vld [vmem:[%s1292_s26 + $0x38] sm:$0xff]  }
  0x16   : > { %v1210_v21 = vld [vmem:[%s1292_s26 + $0x70] sm:$0xff]   ;;  %v1212_v23 = vld [vmem:[%s1292_s26 + $0x78] sm:$0xff]  }
  0x18   : > { %1110 = vmatpush3.bf16.msra.mxu0 %v1193_v6  ;;  %1161 = vmatpush3.bf16.msra.mxu1 %v1193_v6 }
  0x19   : > { %1111 = vmatprep.subr.bf16.mxu0 %v1194_v7  ;;  %1154 = vmatprep.subr.bf16.mxu1 %v1194_v7 }
  0x1c   : > { %1112 = vmatpush3.bf16.msra.mxu0 %v1194_v7  ;;  %1162 = vmatpush3.bf16.msra.mxu1 %v1194_v7 }
  0x1d   : > { %1113 = vmatprep.subr.bf16.mxu0 %v1195_v8  ;;  %1155 = vmatprep.subr.bf16.mxu1 %v1195_v8 }
  0x20   : > { %1114 = vmatpush3.bf16.msra.mxu0 %v1195_v8  ;;  %1163 = vmatpush3.bf16.msra.mxu1 %v1195_v8 }
  0x21   : > { %1115 = vmatprep.subr.bf16.mxu0 %v1196_v9  ;;  %1156 = vmatprep.subr.bf16.mxu1 %v1196_v9 }
  0x24   : > { %1116 = vmatpush3.bf16.msra.mxu0 %v1196_v9  ;;  %1164 = vmatpush3.bf16.msra.mxu1 %v1196_v9 }
  0x27   : > { %1118 = vmatmul.mubr.bf16.vlgmr.msra.gmra.mrb[0].mxu0 %v1199_v10  ;;  %1134 = vmatmul.mubr.bf16.vlgmr.msra.gmra.mrb[0].mxu1 %v1200_v11 }
  0x28   : > { %1121 = vmatprep.mubr.bf16.mxu0 %v1201_v12  ;;  %1137 = vmatprep.mubr.bf16.mxu1 %v1202_v13 }
  0x2f   : > { %1122 = vmatmul.mubr.bf16.gmra.mrb[4].mxu0 %v1203_v14  ;;  %1138 = vmatmul.mubr.bf16.gmra.mrb[4].mxu1 %v1204_v15 }
  0x30   : > { %1125 = vmatprep.mubr.bf16.mxu0 %v1205_v16  ;;  %1141 = vmatprep.mubr.bf16.mxu1 %v1206_v17 }
  0x37   : > { %1126 = vmatmul.mubr.bf16.gmra.mrb[8].mxu0 %v1207_v18  ;;  %1142 = vmatmul.mubr.bf16.gmra.mrb[8].mxu1 %v1208_v19 }
  0x38   : > { %1129 = vmatprep.mubr.bf16.mxu0 %v1209_v20  ;;  %1145 = vmatprep.mubr.bf16.mxu1 %v1210_v21 }
  0x3f   : > { %1130 = vmatmul.mubr.bf16.gmra.mrb[12].mxu0 %v1211_v22  ;;  %1146 = vmatmul.mubr.bf16.gmra.mrb[12].mxu1 %v1212_v23 }
  0xfa   : > { %v1119_v25 = vpop.f32.mrb[0].mxu0  ;;  %v1135_v26 = vpop.f32.mrb[0].mxu1 }
  0xfb   : > { %v468_v27 = vadd.f32 %v1119_v25, %v1328_v24  ;;  %v532_v28 = vadd.f32 %v1135_v26, %v1328_v24  ;;  %v459_v29 = vpop.f32.mrb[1].mxu0  ;;  %v523_v30 = vpop.f32.mrb[1].mxu1 }
  0xfc   : > { %v460_v31 = vadd.f32 %v1328_v24, %v459_v29  ;;  %v524_v32 = vadd.f32 %v1328_v24, %v523_v30  ;;  %v1120_v33 = vpop.f32.mrb[2].mxu0  ;;  %v1136_v34 = vpop.f32.mrb[2].mxu1 }
  0xfd   : > { %v471_v35 = vadd.f32 %v1120_v33, %v1328_v24  ;;  %v535_v36 = vadd.f32 %v1136_v34, %v1328_v24  ;;  %v462_v37 = vpop.f32.mrb[3].mxu0  ;;  %v526_v38 = vpop.f32.mrb[3].mxu1  ;;  %v588_v41 = vmax.f32 %v468_v27, 0.0  ;;  %v604_v42 = vmax.f32 %v532_v28, 0.0 }
  0xfe   : > { %v463_v39 = vadd.f32 %v1328_v24, %v462_v37  ;;  %v527_v40 = vadd.f32 %v1328_v24, %v526_v38  ;;  %v586_v45 = vmax.f32 %v460_v31, 0.0  ;;  %v602_v46 = vmax.f32 %v524_v32, 0.0 }
  0xff   : > { %v589_v43 = vmax.f32 %v471_v35, 0.0  ;;  %v605_v44 = vmax.f32 %v535_v36, 0.0 }
 0x100   : > { %v587_v47 = vmax.f32 %v463_v39, 0.0  ;;  %v603_v48 = vmax.f32 %v527_v40, 0.0 }
 0x101   : > { %v990_v49 = vpack.c.bf16 %v589_v43, %v588_v41  ;;  %v1030_v50 = vpack.c.bf16 %v605_v44, %v604_v42 }
 0x102   : > { %v985_v51 = vpack.c.bf16 %v587_v47, %v586_v45  ;;  %v1025_v52 = vpack.c.bf16 %v603_v48, %v602_v46  ;;  %v1123_v53 = vpop.f32.mrb[4].mxu0  ;;  %v1139_v54 = vpop.f32.mrb[4].mxu1 }
 0x103   : > { %1062 = vst [vmem:[%s1343_s17 + $0x8] sm:$0xff] %v990_v49   ;;  %1070 = vst [vmem:[%s1343_s17 + $0x48] sm:$0xff] %v1030_v50   ;;  %v484_v55 = vadd.f32 %v1123_v53, %v1328_v24  ;;  %v548_v56 = vadd.f32 %v1139_v54, %v1328_v24  ;;  %v475_v57 = vpop.f32.mrb[5].mxu0  ;;  %v539_v58 = vpop.f32.mrb[5].mxu1 }
 0x104   : > { %986 = vst [vmem:[%s1343_s17] sm:$0xff] %v985_v51   ;;  %1069 = vst [vmem:[%s1343_s17 + $0x40] sm:$0xff] %v1025_v52   ;;  %v476_v59 = vadd.f32 %v1328_v24, %v475_v57  ;;  %v540_v60 = vadd.f32 %v1328_v24, %v539_v58  ;;  %v1124_v61 = vpop.f32.mrb[6].mxu0  ;;  %v1140_v62 = vpop.f32.mrb[6].mxu1 }
 0x105   : > { %v487_v63 = vadd.f32 %v1124_v61, %v1328_v24  ;;  %v551_v0 = vadd.f32 %v1140_v62, %v1328_v24  ;;  %v478_v1 = vpop.f32.mrb[7].mxu0  ;;  %v542_v2 = vpop.f32.mrb[7].mxu1  ;;  %v592_v5 = vmax.f32 %v484_v55, 0.0  ;;  %v608_v6 = vmax.f32 %v548_v56, 0.0 }
 0x106   : > { %v479_v3 = vadd.f32 %v1328_v24, %v478_v1  ;;  %v543_v4 = vadd.f32 %v1328_v24, %v542_v2  ;;  %v590_v9 = vmax.f32 %v476_v59, 0.0  ;;  %v606_v10 = vmax.f32 %v540_v60, 0.0 }
 0x107   : > { %v593_v7 = vmax.f32 %v487_v63, 0.0  ;;  %v609_v8 = vmax.f32 %v551_v0, 0.0 }
 0x108   : > { %v591_v11 = vmax.f32 %v479_v3, 0.0  ;;  %v607_v12 = vmax.f32 %v543_v4, 0.0 }
 0x109   : > { %v1000_v13 = vpack.c.bf16 %v593_v7, %v592_v5  ;;  %v1040_v14 = vpack.c.bf16 %v609_v8, %v608_v6 }
 0x10a   : > { %v995_v15 = vpack.c.bf16 %v591_v11, %v590_v9  ;;  %v1035_v16 = vpack.c.bf16 %v607_v12, %v606_v10  ;;  %v1127_v17 = vpop.f32.mrb[8].mxu0  ;;  %v1143_v18 = vpop.f32.mrb[8].mxu1 }
 0x10b   : > { %1064 = vst [vmem:[%s1343_s17 + $0x18] sm:$0xff] %v1000_v13   ;;  %1072 = vst [vmem:[%s1343_s17 + $0x58] sm:$0xff] %v1040_v14   ;;  %v500_v19 = vadd.f32 %v1127_v17, %v1328_v24  ;;  %v564_v20 = vadd.f32 %v1143_v18, %v1328_v24  ;;  %v491_v21 = vpop.f32.mrb[9].mxu0  ;;  %v555_v22 = vpop.f32.mrb[9].mxu1 }
 0x10c   : > { %1063 = vst [vmem:[%s1343_s17 + $0x10] sm:$0xff] %v995_v15   ;;  %1071 = vst [vmem:[%s1343_s17 + $0x50] sm:$0xff] %v1035_v16   ;;  %v492_v23 = vadd.f32 %v1328_v24, %v491_v21  ;;  %v556_v25 = vadd.f32 %v1328_v24, %v555_v22  ;;  %v1128_v26 = vpop.f32.mrb[10].mxu0  ;;  %v1144_v27 = vpop.f32.mrb[10].mxu1 }
 0x10d   : > { %v503_v28 = vadd.f32 %v1128_v26, %v1328_v24  ;;  %v567_v29 = vadd.f32 %v1144_v27, %v1328_v24  ;;  %v494_v30 = vpop.f32.mrb[11].mxu0  ;;  %v558_v31 = vpop.f32.mrb[11].mxu1  ;;  %v596_v34 = vmax.f32 %v500_v19, 0.0  ;;  %v612_v35 = vmax.f32 %v564_v20, 0.0 }
 0x10e   : > { %v495_v32 = vadd.f32 %v1328_v24, %v494_v30  ;;  %v559_v33 = vadd.f32 %v1328_v24, %v558_v31  ;;  %v594_v38 = vmax.f32 %v492_v23, 0.0  ;;  %v610_v39 = vmax.f32 %v556_v25, 0.0 }
 0x10f   : > { %v597_v36 = vmax.f32 %v503_v28, 0.0  ;;  %v613_v37 = vmax.f32 %v567_v29, 0.0 }
 0x110   : > { %v595_v40 = vmax.f32 %v495_v32, 0.0  ;;  %v611_v41 = vmax.f32 %v559_v33, 0.0 }
 0x111   : > { %v1010_v42 = vpack.c.bf16 %v597_v36, %v596_v34  ;;  %v1050_v43 = vpack.c.bf16 %v613_v37, %v612_v35 }
 0x112   : > { %v1005_v44 = vpack.c.bf16 %v595_v40, %v594_v38  ;;  %v1045_v45 = vpack.c.bf16 %v611_v41, %v610_v39  ;;  %v1131_v46 = vpop.f32.mrb[12].mxu0  ;;  %v1147_v47 = vpop.f32.mrb[12].mxu1 }
 0x113   : > { %1066 = vst [vmem:[%s1343_s17 + $0x28] sm:$0xff] %v1010_v42   ;;  %1074 = vst [vmem:[%s1343_s17 + $0x68] sm:$0xff] %v1050_v43   ;;  %v516_v48 = vadd.f32 %v1131_v46, %v1328_v24  ;;  %v580_v49 = vadd.f32 %v1147_v47, %v1328_v24  ;;  %v507_v50 = vpop.f32.mrb[13].mxu0  ;;  %v571_v51 = vpop.f32.mrb[13].mxu1 }
 0x114   : > { %1065 = vst [vmem:[%s1343_s17 + $0x20] sm:$0xff] %v1005_v44   ;;  %1073 = vst [vmem:[%s1343_s17 + $0x60] sm:$0xff] %v1045_v45   ;;  %v508_v52 = vadd.f32 %v1328_v24, %v507_v50  ;;  %v572_v53 = vadd.f32 %v1328_v24, %v571_v51  ;;  %v1132_v54 = vpop.f32.mrb[14].mxu0  ;;  %v1148_v55 = vpop.f32.mrb[14].mxu1 }
 0x115   : > { %v519_v56 = vadd.f32 %v1132_v54, %v1328_v24  ;;  %v583_v57 = vadd.f32 %v1148_v55, %v1328_v24  ;;  %v510_v58 = vpop.f32.mrb[15].mxu0  ;;  %v574_v59 = vpop.f32.mrb[15].mxu1  ;;  %v600_v62 = vmax.f32 %v516_v48, 0.0  ;;  %v616_v63 = vmax.f32 %v580_v49, 0.0 }
 0x116   : > { %v511_v60 = vadd.f32 %v1328_v24, %v510_v58  ;;  %v575_v61 = vadd.f32 %v1328_v24, %v574_v59  ;;  %v598_v2 = vmax.f32 %v508_v52, 0.0  ;;  %v614_v3 = vmax.f32 %v572_v53, 0.0 }
 0x117   : > { %v601_v0 = vmax.f32 %v519_v56, 0.0  ;;  %v617_v1 = vmax.f32 %v583_v57, 0.0 }
 0x118   : > { %v599_v4 = vmax.f32 %v511_v60, 0.0  ;;  %v615_v5 = vmax.f32 %v575_v61, 0.0 }
 0x119   : > { %v1020_v6 = vpack.c.bf16 %v601_v0, %v600_v62  ;;  %v1060_v7 = vpack.c.bf16 %v617_v1, %v616_v63 }
 0x11a   : > { %v1015_v8 = vpack.c.bf16 %v599_v4, %v598_v2  ;;  %v1055_v9 = vpack.c.bf16 %v615_v5, %v614_v3 }
 0x11b   : > { %1068 = vst [vmem:[%s1343_s17 + $0x38] sm:$0xff] %v1020_v6   ;;  %1076 = vst [vmem:[%s1343_s17 + $0x78] sm:$0xff] %v1060_v7  }
 0x11c   : > { %1067 = vst [vmem:[%s1343_s17 + $0x30] sm:$0xff] %v1015_v8   ;;  %1075 = vst [vmem:[%s1343_s17 + $0x70] sm:$0xff] %v1055_v9  }
 0x11d PF: > { %s13_s14 = sadd.s32 1, %s1235_s14   ;;  %s1398_s12 = smov %s1231_s13 }
 0x11e   : > { %p10_p5 = scmp.ge.s32.totalorder %s13_s14, 4   ;;  %s1399_s13 = smov %s1401_s15 }
 0x120   :  { %12 = sbr.rel (!%p10_p5) target bundleno = 2 (0x2), region = 68 }

// kernel: _lambda_.119
= control target key start
LH: loop header
LB: loop body
LE: loop exit
PB: predicated region body
PF: predicated region fallthrough
CT: control target
= control target key end

     0   :  { %v1362_v1 = vmov 0.0   ;;  %vm1363_vm0 = vmmov 0   ;;  %s1677_s1 = inlined_call_operand.vmem [shape: bf16[384,128], index: 1, kind: input, shape index: {}]   ;;  %s1678_s0 = inlined_call_operand.vmem [shape: bf16[208,384], index: 0, kind: input, shape index: {}]   ;;  %s1679_s2 = inlined_call_operand.vmem [shape: f32[1,128], index: 2, kind: input, shape index: {}]   ;;  %s1680_s3 = inlined_call_operand.vmem [shape: bf16[208,128], index: 3, kind: output, shape index: {}]  }
   0x1   :  { %v1286_v0 = vld [vmem:[%s1677_s1 + $0x40] sm:$0xff]   ;;  %1216 = vmatprep.subr.bf16.mxu1 %v1362_v1  ;;  %1232 = vmatprep.mubr.msk.bf16.mxu1 %vm1363_vm0, %v1362_v1  ;;  %v1289_v4 = vld [vmem:[%s1677_s1 + $0x48] sm:$0xff]   ;;  %v1292_v7 = vld [vmem:[%s1677_s1 + $0x50] sm:$0xff]  }
   0x2   :  { %v1287_v2 = vld [vmem:[%s1677_s1] sm:$0xff]   ;;  %1101 = vmatprep.subr.bf16.mxu0 %v1286_v0  ;;  %v1290_v5 = vld [vmem:[%s1677_s1 + $0x8] sm:$0xff]   ;;  %v1293_v8 = vld [vmem:[%s1677_s1 + $0x10] sm:$0xff]  }
   0x3   :  { %v1288_v3 = vld [vmem:[%s1677_s1 + $0x80] sm:$0xff]   ;;  %1102 = vmatpush3.bf16.msra.mxu0 %v1287_v2  ;;  %v1291_v6 = vld [vmem:[%s1677_s1 + $0x88] sm:$0xff]   ;;  %v1294_v9 = vld [vmem:[%s1677_s1 + $0x90] sm:$0xff]  }
   0x4   :  { %1217 = vmatpush3.bf16.msra.mxu1 %v1288_v3  ;;  %1103 = vmatprep.subr.bf16.mxu0 %v1289_v4  ;;  %v1295_v10 = vld [vmem:[%s1677_s1 + $0x58] sm:$0xff]   ;;  %v1298_v13 = vld [vmem:[%s1677_s1 + $0x60] sm:$0xff]   ;;  %v1301_v16 = vld [vmem:[%s1677_s1 + $0x68] sm:$0xff]  }
   0x5   :  { %1218 = vmatprep.subr.bf16.mxu1 %v1362_v1  ;;  %v1296_v11 = vld [vmem:[%s1677_s1 + $0x18] sm:$0xff]   ;;  %v1299_v14 = vld [vmem:[%s1677_s1 + $0x20] sm:$0xff]   ;;  %v1302_v17 = vld [vmem:[%s1677_s1 + $0x28] sm:$0xff]  }
   0x6   :  { %v1297_v12 = vld [vmem:[%s1677_s1 + $0x98] sm:$0xff]   ;;  %v1300_v15 = vld [vmem:[%s1677_s1 + $0xa0] sm:$0xff]   ;;  %v1303_v18 = vld [vmem:[%s1677_s1 + $0xa8] sm:$0xff]  }
   0x7   :  { %1104 = vmatpush3.bf16.msra.mxu0 %v1290_v5  ;;  %v1304_v19 = vld [vmem:[%s1677_s1 + $0x70] sm:$0xff]   ;;  %v1307_v22 = vld [vmem:[%s1677_s1 + $0x78] sm:$0xff]   ;;  %v1309_v26 = vld [vmem:[%s1678_s0] ss:$12 sps:$4 sm:$0xff]  }
   0x8   :  { %1219 = vmatpush3.bf16.msra.mxu1 %v1291_v6  ;;  %1105 = vmatprep.subr.bf16.mxu0 %v1292_v7  ;;  %v1305_v20 = vld [vmem:[%s1677_s1 + $0x30] sm:$0xff]   ;;  %v1308_v24 = vld [vmem:[%s1677_s1 + $0x38] sm:$0xff]   ;;  %v1317_v30 = vld [vmem:[%s1678_s0 + $0x20] ss:$12 sps:$4 sm:$0xff]  }
   0x9   :  { %1220 = vmatprep.subr.bf16.mxu1 %v1362_v1  ;;  %v1306_v21 = vld [vmem:[%s1677_s1 + $0xb0] sm:$0xff]   ;;  %v1312_v25 = vld [vmem:[%s1677_s1 + $0xb8] sm:$0xff]   ;;  %v1328_v38 = vld [vmem:[%s1678_s0 + $0x60] ss:$12 sps:$4 sm:$0xff]  }
   0xa   :  { %v1311_v23 = vld [vmem:[%s1678_s0 + $0x4] ss:$12 sps:$4 sm:$0xff]   ;;  %v1313_v27 = vld [vmem:[%s1678_s0 + $0x8] ss:$12 sps:$4 sm:$0xff]   ;;  %v1322_v34 = vld [vmem:[%s1678_s0 + $0x4c] ss:$12 sps:$4 sm:$0xff]  }
   0xb   :  { %1106 = vmatpush3.bf16.msra.mxu0 %v1293_v8  ;;  %506 = vmatprep.mubr.bf16.mxu0 %v1311_v23  ;;  %v1314_v28 = vld [vmem:[%s1678_s0 + $0x1c] ss:$12 sps:$4 sm:$0xff]   ;;  %v1316_v29 = vld [vmem:[%s1678_s0 + $0x18] ss:$12 sps:$4 sm:$0xff]   ;;  %v1318_v31 = vld [vmem:[%s1678_s0 + $0x34] ss:$12 sps:$4 sm:$0xff]  }
   0xc   :  { %1221 = vmatpush3.bf16.msra.mxu1 %v1294_v9  ;;  %1107 = vmatprep.subr.bf16.mxu0 %v1295_v10  ;;  %v1320_v32 = vld [vmem:[%s1678_s0 + $0x30] ss:$12 sps:$4 sm:$0xff]   ;;  %v1321_v33 = vld [vmem:[%s1678_s0 + $0x38] ss:$12 sps:$4 sm:$0xff]   ;;  %v1324_v35 = vld [vmem:[%s1678_s0 + $0x48] ss:$12 sps:$4 sm:$0xff]  }
   0xd   :  { %1222 = vmatprep.subr.bf16.mxu1 %v1362_v1  ;;  %v1325_v36 = vld [vmem:[%s1678_s0 + $0x50] ss:$12 sps:$4 sm:$0xff]   ;;  %v1329_v39 = vld [vmem:[%s1678_s0 + $0x68] ss:$12 sps:$4 sm:$0xff]   ;;  %v1332_v41 = vld [vmem:[%s1678_s0 + $0x78] ss:$12 sps:$4 sm:$0xff]  }
   0xe   :  { %v1326_v37 = vld [vmem:[%s1678_s0 + $0x64] ss:$12 sps:$4 sm:$0xff]   ;;  %v1330_v40 = vld [vmem:[%s1678_s0 + $0x7c] ss:$12 sps:$4 sm:$0xff]   ;;  %v1333_v42 = vld [vmem:[%s1678_s0 + $0x80] ss:$12 sps:$4 sm:$0xff]  }
   0xf   :  { %1108 = vmatpush3.bf16.msra.mxu0 %v1296_v11  ;;  %v1334_v43 = vld [vmem:[%s1678_s0 + $0x94] ss:$12 sps:$4 sm:$0xff]   ;;  %v1336_v44 = vld [vmem:[%s1678_s0 + $0x90] ss:$12 sps:$4 sm:$0xff]   ;;  %v1337_v45 = vld [vmem:[%s1678_s0 + $0x98] ss:$12 sps:$4 sm:$0xff]  }
  0x10   :  { %1223 = vmatpush3.bf16.msra.mxu1 %v1297_v12  ;;  %1109 = vmatprep.subr.bf16.mxu0 %v1298_v13  ;;  %v1338_v46 = vld [vmem:[%s1678_s0 + $0xac] ss:$12 sps:$4 sm:$0xff]   ;;  %v1340_v47 = vld [vmem:[%s1678_s0 + $0xa8] ss:$12 sps:$4 sm:$0xff]   ;;  %v1341_v48 = vld [vmem:[%s1678_s0 + $0xb0] ss:$12 sps:$4 sm:$0xff]  }
  0x11   :  { %1224 = vmatprep.subr.bf16.mxu1 %v1362_v1  ;;  %v1342_v49 = vld [vmem:[%s1678_s0 + $0xc4] ss:$12 sps:$4 sm:$0xff]   ;;  %v1344_v50 = vld [vmem:[%s1678_s0 + $0xc0] ss:$12 sps:$4 sm:$0xff]   ;;  %v1345_v51 = vld [vmem:[%s1678_s0 + $0xc8] ss:$12 sps:$4 sm:$0xff]  }
  0x12   :  { %v1346_v52 = vld [vmem:[%s1678_s0 + $0xdc] ss:$12 sps:$4 sm:$0xff]   ;;  %v1348_v53 = vld [vmem:[%s1678_s0 + $0xd8] ss:$12 sps:$4 sm:$0xff]   ;;  %v1349_v54 = vld [vmem:[%s1678_s0 + $0xe0] ss:$12 sps:$4 sm:$0xff]  }
  0x13   :  { %1110 = vmatpush3.bf16.msra.mxu0 %v1299_v14  ;;  %v1350_v55 = vld [vmem:[%s1678_s0 + $0xf4] ss:$12 sps:$4 sm:$0xff]   ;;  %v1352_v56 = vld [vmem:[%s1678_s0 + $0xf0] ss:$12 sps:$4 sm:$0xff]   ;;  %v1353_v57 = vld [vmem:[%s1678_s0 + $0xf8] ss:$12 sps:$4 sm:$0xff]  }
  0x14   :  { %1225 = vmatpush3.bf16.msra.mxu1 %v1300_v15  ;;  %1111 = vmatprep.subr.bf16.mxu0 %v1301_v16  ;;  %v1354_v58 = vld [vmem:[%s1678_s0 + $0x10c] ss:$12 sps:$4 sm:$0xff]   ;;  %v1356_v59 = vld [vmem:[%s1678_s0 + $0x108] ss:$12 sps:$4 sm:$0xff]   ;;  %v1357_v60 = vld [vmem:[%s1678_s0 + $0x110] ss:$12 sps:$4 sm:$0xff]  }
  0x15   :  { %1226 = vmatprep.subr.bf16.mxu1 %v1362_v1  ;;  %v1358_v61 = vld [vmem:[%s1678_s0 + $0x124] ss:$12 sps:$4 sm:$0xff]   ;;  %v1360_v62 = vld [vmem:[%s1678_s0 + $0x120] ss:$12 sps:$4 sm:$0xff]   ;;  %v1361_v63 = vld [vmem:[%s1678_s0 + $0x128] ss:$12 sps:$4 sm:$0xff]  }
  0x16   :  { %v1610_v3 = vld [vmem:[%s1679_s2] ss:$0 sm:$0xff] }
  0x17   :  { %1112 = vmatpush3.bf16.msra.mxu0 %v1302_v17 }
  0x18   :  { %1227 = vmatpush3.bf16.msra.mxu1 %v1303_v18  ;;  %1113 = vmatprep.subr.bf16.mxu0 %v1304_v19 }
  0x19   :  { %1228 = vmatprep.subr.bf16.mxu1 %v1362_v1 }
  0x1b   :  { %1114 = vmatpush3.bf16.msra.mxu0 %v1305_v20 }
  0x1c   :  { %1229 = vmatpush3.bf16.msra.mxu1 %v1306_v21  ;;  %1115 = vmatprep.subr.bf16.mxu0 %v1307_v22 }
  0x1d   :  { %1230 = vmatprep.subr.bf16.mxu1 %v1362_v1 }
  0x1f   :  { %1116 = vmatpush3.bf16.msra.mxu0 %v1308_v24 }
  0x20   :  { %1231 = vmatpush3.bf16.msra.mxu1 %v1312_v25 }
  0x22   :  { %507 = vmatmul.mubr.bf16.vlgmr.msra.gmra.mrb[0].mxu0 %v1309_v26 }
  0x23   :  { %1233 = vmatmul.mubr.bf16.vlgmr.msra.gmra.mrb[0].mxu1 %v1313_v27  ;;  %514 = vmatprep.mubr.bf16.mxu0 %v1314_v28 }
  0x24   :  { %1236 = vmatprep.mubr.msk.bf16.mxu1 %vm1363_vm0, %v1362_v1 }
  0x2a   :  { %515 = vmatmul.mubr.bf16.gmra.mrb[4].mxu0 %v1316_v29 }
  0x2b   :  { %1237 = vmatmul.mubr.bf16.gmra.mrb[4].mxu1 %v1317_v30  ;;  %522 = vmatprep.mubr.bf16.mxu0 %v1318_v31 }
  0x2c   :  { %1240 = vmatprep.mubr.msk.bf16.mxu1 %vm1363_vm0, %v1362_v1 }
  0x32   :  { %523 = vmatmul.mubr.bf16.gmra.mrb[8].mxu0 %v1320_v32 }
  0x33   :  { %1241 = vmatmul.mubr.bf16.gmra.mrb[8].mxu1 %v1321_v33  ;;  %530 = vmatprep.mubr.bf16.mxu0 %v1322_v34 }
  0x34   :  { %1244 = vmatprep.mubr.msk.bf16.mxu1 %vm1363_vm0, %v1362_v1 }
  0x3a   :  { %531 = vmatmul.mubr.bf16.gmra.mrb[12].mxu0 %v1324_v35 }
  0x3b   :  { %1245 = vmatmul.mubr.bf16.gmra.mrb[12].mxu1 %v1325_v36  ;;  %538 = vmatprep.mubr.bf16.mxu0 %v1326_v37 }
  0x3c   :  { %1248 = vmatprep.mubr.msk.bf16.mxu1 %vm1363_vm0, %v1362_v1 }
  0x42   :  { %539 = vmatmul.mubr.bf16.gmra.mrb[16].mxu0 %v1328_v38 }
  0x43   :  { %1249 = vmatmul.mubr.bf16.gmra.mrb[16].mxu1 %v1329_v39  ;;  %546 = vmatprep.mubr.bf16.mxu0 %v1330_v40 }
  0x44   :  { %1252 = vmatprep.mubr.msk.bf16.mxu1 %vm1363_vm0, %v1362_v1 }
  0x4a   :  { %547 = vmatmul.mubr.bf16.gmra.mrb[20].mxu0 %v1332_v41 }
  0x4b   :  { %1253 = vmatmul.mubr.bf16.gmra.mrb[20].mxu1 %v1333_v42  ;;  %554 = vmatprep.mubr.bf16.mxu0 %v1334_v43 }
  0x4c   :  { %1256 = vmatprep.mubr.msk.bf16.mxu1 %vm1363_vm0, %v1362_v1 }
  0x52   :  { %555 = vmatmul.mubr.bf16.gmra.mrb[24].mxu0 %v1336_v44 }
  0x53   :  { %1257 = vmatmul.mubr.bf16.gmra.mrb[24].mxu1 %v1337_v45  ;;  %562 = vmatprep.mubr.bf16.mxu0 %v1338_v46 }
  0x54   :  { %1260 = vmatprep.mubr.msk.bf16.mxu1 %vm1363_vm0, %v1362_v1 }
  0x5a   :  { %563 = vmatmul.mubr.bf16.gmra.mrb[28].mxu0 %v1340_v47 }
  0x5b   :  { %1261 = vmatmul.mubr.bf16.gmra.mrb[28].mxu1 %v1341_v48  ;;  %570 = vmatprep.mubr.bf16.mxu0 %v1342_v49 }
  0x5c   :  { %1264 = vmatprep.mubr.msk.bf16.mxu1 %vm1363_vm0, %v1362_v1 }
  0x62   :  { %571 = vmatmul.mubr.bf16.gmra.mrb[32].mxu0 %v1344_v50 }
  0x63   :  { %1265 = vmatmul.mubr.bf16.gmra.mrb[32].mxu1 %v1345_v51  ;;  %578 = vmatprep.mubr.bf16.mxu0 %v1346_v52 }
  0x64   :  { %1268 = vmatprep.mubr.msk.bf16.mxu1 %vm1363_vm0, %v1362_v1 }
  0x6a   :  { %579 = vmatmul.mubr.bf16.gmra.mrb[36].mxu0 %v1348_v53 }
  0x6b   :  { %1269 = vmatmul.mubr.bf16.gmra.mrb[36].mxu1 %v1349_v54  ;;  %586 = vmatprep.mubr.bf16.mxu0 %v1350_v55 }
  0x6c   :  { %1272 = vmatprep.mubr.msk.bf16.mxu1 %vm1363_vm0, %v1362_v1 }
  0x72   :  { %587 = vmatmul.mubr.bf16.gmra.mrb[40].mxu0 %v1352_v56 }
  0x73   :  { %1273 = vmatmul.mubr.bf16.gmra.mrb[40].mxu1 %v1353_v57  ;;  %594 = vmatprep.mubr.bf16.mxu0 %v1354_v58 }
  0x74   :  { %1276 = vmatprep.mubr.msk.bf16.mxu1 %vm1363_vm0, %v1362_v1 }
  0x7a   :  { %595 = vmatmul.mubr.bf16.gmra.mrb[44].mxu0 %v1356_v59 }
  0x7b   :  { %1277 = vmatmul.mubr.bf16.gmra.mrb[44].mxu1 %v1357_v60  ;;  %602 = vmatprep.mubr.bf16.mxu0 %v1358_v61 }
  0x7c   :  { %1280 = vmatprep.mubr.msk.bf16.mxu1 %vm1363_vm0, %v1362_v1 }
  0x82   :  { %603 = vmatmul.mubr.bf16.gmra.mrb[48].mxu0 %v1360_v62 }
  0x83   :  { %1281 = vmatmul.mubr.bf16.gmra.mrb[48].mxu1 %v1361_v63 }
  0xf5   :  { %v1117_v0 = vpop.f32.mrb[0].mxu0 }
  0xf6   :  { %v1118_v2 = vpop.f32.mrb[1].mxu0  ;;  %v645_v4 = vpop.f32.mrb[0].mxu1 }
  0xf7   :  { %v1119_v5 = vadd.f32 %v1118_v2, %v1117_v0  ;;  %v1120_v1 = vpop.f32.mrb[2].mxu0  ;;  %v1234_v6 = vpop.f32.mrb[1].mxu1 }
  0xf8   :  { %v1121_v7 = vpop.f32.mrb[3].mxu0  ;;  %v648_v8 = vpop.f32.mrb[2].mxu1 }
  0xf9   :  { %v509_v9 = vadd.f32 %v1119_v5, %v1610_v3  ;;  %v1122_v10 = vadd.f32 %v1121_v7, %v1120_v1  ;;  %v1235_v11 = vpop.f32.mrb[3].mxu1 }
  0xfb   :  { %v646_v12 = vadd.f32 %v645_v4, %v509_v9  ;;  %v512_v13 = vadd.f32 %v1122_v10, %v1610_v3 }
  0xfd   :  { %v649_v14 = vadd.f32 %v648_v8, %v512_v13  ;;  %v1123_v15 = vpop.f32.mrb[4].mxu0  ;;  %v748_v18 = vmax.f32 %v646_v12, 0.0 }
  0xfe   :  { %v1124_v16 = vpop.f32.mrb[5].mxu0  ;;  %v653_v17 = vpop.f32.mrb[4].mxu1 }
  0xff   :  { %v749_v19 = vmax.f32 %v649_v14, 0.0  ;;  %v1125_v20 = vadd.f32 %v1124_v16, %v1123_v15  ;;  %v1126_v21 = vpop.f32.mrb[6].mxu0  ;;  %v1238_v22 = vpop.f32.mrb[5].mxu1 }
 0x100   :  { %v1127_v23 = vpop.f32.mrb[7].mxu0  ;;  %v656_v24 = vpop.f32.mrb[6].mxu1 }
 0x101   :  { %v1027_v25 = vpack.c.bf16 %v749_v19, %v748_v18  ;;  %v517_v26 = vadd.f32 %v1125_v20, %v1610_v3  ;;  %v1128_v27 = vadd.f32 %v1127_v23, %v1126_v21  ;;  %v1239_v28 = vpop.f32.mrb[7].mxu1 }
 0x103   :  { %1028 = vst [vmem:[%s1680_s3] sm:$0xff] %v1027_v25   ;;  %v654_v29 = vadd.f32 %v653_v17, %v517_v26  ;;  %v520_v30 = vadd.f32 %v1128_v27, %v1610_v3 }
 0x105   :  { %v657_v31 = vadd.f32 %v656_v24, %v520_v30  ;;  %v1129_v32 = vpop.f32.mrb[8].mxu0  ;;  %v750_v35 = vmax.f32 %v654_v29, 0.0 }
 0x106   :  { %v1130_v33 = vpop.f32.mrb[9].mxu0  ;;  %v661_v34 = vpop.f32.mrb[8].mxu1 }
 0x107   :  { %v751_v36 = vmax.f32 %v657_v31, 0.0  ;;  %v1131_v37 = vadd.f32 %v1130_v33, %v1129_v32  ;;  %v1132_v38 = vpop.f32.mrb[10].mxu0  ;;  %v1242_v39 = vpop.f32.mrb[9].mxu1 }
 0x108   :  { %v1133_v40 = vpop.f32.mrb[11].mxu0  ;;  %v664_v41 = vpop.f32.mrb[10].mxu1 }
 0x109   :  { %v1032_v42 = vpack.c.bf16 %v751_v36, %v750_v35  ;;  %v525_v43 = vadd.f32 %v1131_v37, %v1610_v3  ;;  %v1134_v44 = vadd.f32 %v1133_v40, %v1132_v38  ;;  %v1243_v45 = vpop.f32.mrb[11].mxu1 }
 0x10b   :  { %1089 = vst [vmem:[%s1680_s3 + $0x8] sm:$0xff] %v1032_v42   ;;  %v662_v46 = vadd.f32 %v661_v34, %v525_v43  ;;  %v528_v47 = vadd.f32 %v1134_v44, %v1610_v3 }
 0x10d   :  { %v665_v48 = vadd.f32 %v664_v41, %v528_v47  ;;  %v1135_v49 = vpop.f32.mrb[12].mxu0  ;;  %v752_v52 = vmax.f32 %v662_v46, 0.0 }
 0x10e   :  { %v1136_v50 = vpop.f32.mrb[13].mxu0  ;;  %v669_v51 = vpop.f32.mrb[12].mxu1 }
 0x10f   :  { %v753_v53 = vmax.f32 %v665_v48, 0.0  ;;  %v1137_v54 = vadd.f32 %v1136_v50, %v1135_v49  ;;  %v1138_v55 = vpop.f32.mrb[14].mxu0  ;;  %v1246_v56 = vpop.f32.mrb[13].mxu1 }
 0x110   :  { %v1139_v57 = vpop.f32.mrb[15].mxu0  ;;  %v672_v58 = vpop.f32.mrb[14].mxu1 }
 0x111   :  { %v1037_v59 = vpack.c.bf16 %v753_v53, %v752_v52  ;;  %v533_v60 = vadd.f32 %v1137_v54, %v1610_v3  ;;  %v1140_v61 = vadd.f32 %v1139_v57, %v1138_v55  ;;  %v1247_v62 = vpop.f32.mrb[15].mxu1 }
 0x113   :  { %1090 = vst [vmem:[%s1680_s3 + $0x10] sm:$0xff] %v1037_v59   ;;  %v670_v63 = vadd.f32 %v669_v51, %v533_v60  ;;  %v536_v0 = vadd.f32 %v1140_v61, %v1610_v3 }
 0x115   :  { %v673_v2 = vadd.f32 %v672_v58, %v536_v0  ;;  %v1141_v4 = vpop.f32.mrb[16].mxu0  ;;  %v754_v6 = vmax.f32 %v670_v63, 0.0 }
 0x116   :  { %v1142_v5 = vpop.f32.mrb[17].mxu0  ;;  %v677_v1 = vpop.f32.mrb[16].mxu1 }
 0x117   :  { %v755_v7 = vmax.f32 %v673_v2, 0.0  ;;  %v1143_v8 = vadd.f32 %v1142_v5, %v1141_v4  ;;  %v1144_v9 = vpop.f32.mrb[18].mxu0  ;;  %v1250_v10 = vpop.f32.mrb[17].mxu1 }
 0x118   :  { %v1145_v11 = vpop.f32.mrb[19].mxu0  ;;  %v680_v12 = vpop.f32.mrb[18].mxu1 }
 0x119   :  { %v1042_v13 = vpack.c.bf16 %v755_v7, %v754_v6  ;;  %v541_v14 = vadd.f32 %v1143_v8, %v1610_v3  ;;  %v1146_v15 = vadd.f32 %v1145_v11, %v1144_v9  ;;  %v1251_v16 = vpop.f32.mrb[19].mxu1 }
 0x11b   :  { %1091 = vst [vmem:[%s1680_s3 + $0x18] sm:$0xff] %v1042_v13   ;;  %v678_v17 = vadd.f32 %v677_v1, %v541_v14  ;;  %v544_v18 = vadd.f32 %v1146_v15, %v1610_v3 }
 0x11d   :  { %v681_v19 = vadd.f32 %v680_v12, %v544_v18  ;;  %v1147_v20 = vpop.f32.mrb[20].mxu0  ;;  %v756_v23 = vmax.f32 %v678_v17, 0.0 }
 0x11e   :  { %v1148_v21 = vpop.f32.mrb[21].mxu0  ;;  %v685_v22 = vpop.f32.mrb[20].mxu1 }
 0x11f   :  { %v757_v24 = vmax.f32 %v681_v19, 0.0  ;;  %v1149_v25 = vadd.f32 %v1148_v21, %v1147_v20  ;;  %v1150_v26 = vpop.f32.mrb[22].mxu0  ;;  %v1254_v27 = vpop.f32.mrb[21].mxu1 }
 0x120   :  { %v1151_v28 = vpop.f32.mrb[23].mxu0  ;;  %v688_v29 = vpop.f32.mrb[22].mxu1 }
 0x121   :  { %v1047_v30 = vpack.c.bf16 %v757_v24, %v756_v23  ;;  %v549_v31 = vadd.f32 %v1149_v25, %v1610_v3  ;;  %v1152_v32 = vadd.f32 %v1151_v28, %v1150_v26  ;;  %v1255_v33 = vpop.f32.mrb[23].mxu1 }
 0x123   :  { %1092 = vst [vmem:[%s1680_s3 + $0x20] sm:$0xff] %v1047_v30   ;;  %v686_v34 = vadd.f32 %v685_v22, %v549_v31  ;;  %v552_v35 = vadd.f32 %v1152_v32, %v1610_v3 }
 0x125   :  { %v689_v36 = vadd.f32 %v688_v29, %v552_v35  ;;  %v1153_v37 = vpop.f32.mrb[24].mxu0  ;;  %v758_v40 = vmax.f32 %v686_v34, 0.0 }
 0x126   :  { %v1154_v38 = vpop.f32.mrb[25].mxu0  ;;  %v693_v39 = vpop.f32.mrb[24].mxu1 }
 0x127   :  { %v759_v41 = vmax.f32 %v689_v36, 0.0  ;;  %v1155_v42 = vadd.f32 %v1154_v38, %v1153_v37  ;;  %v1156_v43 = vpop.f32.mrb[26].mxu0  ;;  %v1258_v44 = vpop.f32.mrb[25].mxu1 }
 0x128   :  { %v1157_v45 = vpop.f32.mrb[27].mxu0  ;;  %v696_v46 = vpop.f32.mrb[26].mxu1 }
 0x129   :  { %v1052_v47 = vpack.c.bf16 %v759_v41, %v758_v40  ;;  %v557_v48 = vadd.f32 %v1155_v42, %v1610_v3  ;;  %v1158_v49 = vadd.f32 %v1157_v45, %v1156_v43  ;;  %v1259_v50 = vpop.f32.mrb[27].mxu1 }
 0x12b   :  { %1093 = vst [vmem:[%s1680_s3 + $0x28] sm:$0xff] %v1052_v47   ;;  %v694_v51 = vadd.f32 %v693_v39, %v557_v48  ;;  %v560_v52 = vadd.f32 %v1158_v49, %v1610_v3 }
 0x12d   :  { %v697_v53 = vadd.f32 %v696_v46, %v560_v52  ;;  %v1159_v54 = vpop.f32.mrb[28].mxu0  ;;  %v760_v57 = vmax.f32 %v694_v51, 0.0 }
 0x12e   :  { %v1160_v55 = vpop.f32.mrb[29].mxu0  ;;  %v701_v56 = vpop.f32.mrb[28].mxu1 }
 0x12f   :  { %v761_v58 = vmax.f32 %v697_v53, 0.0  ;;  %v1161_v59 = vadd.f32 %v1160_v55, %v1159_v54  ;;  %v1162_v60 = vpop.f32.mrb[30].mxu0  ;;  %v1262_v61 = vpop.f32.mrb[29].mxu1 }
 0x130   :  { %v1163_v62 = vpop.f32.mrb[31].mxu0  ;;  %v704_v63 = vpop.f32.mrb[30].mxu1 }
 0x131   :  { %v1057_v0 = vpack.c.bf16 %v761_v58, %v760_v57  ;;  %v565_v2 = vadd.f32 %v1161_v59, %v1610_v3  ;;  %v1164_v4 = vadd.f32 %v1163_v62, %v1162_v60  ;;  %v1263_v5 = vpop.f32.mrb[31].mxu1 }
 0x133   :  { %1094 = vst [vmem:[%s1680_s3 + $0x30] sm:$0xff] %v1057_v0   ;;  %v702_v1 = vadd.f32 %v701_v56, %v565_v2  ;;  %v568_v6 = vadd.f32 %v1164_v4, %v1610_v3 }
 0x135   :  { %v705_v7 = vadd.f32 %v704_v63, %v568_v6  ;;  %v1165_v8 = vpop.f32.mrb[32].mxu0  ;;  %v762_v11 = vmax.f32 %v702_v1, 0.0 }
 0x136   :  { %v1166_v9 = vpop.f32.mrb[33].mxu0  ;;  %v709_v10 = vpop.f32.mrb[32].mxu1 }
 0x137   :  { %v763_v12 = vmax.f32 %v705_v7, 0.0  ;;  %v1167_v13 = vadd.f32 %v1166_v9, %v1165_v8  ;;  %v1168_v14 = vpop.f32.mrb[34].mxu0  ;;  %v1266_v15 = vpop.f32.mrb[33].mxu1 }
 0x138   :  { %v1169_v16 = vpop.f32.mrb[35].mxu0  ;;  %v712_v17 = vpop.f32.mrb[34].mxu1 }
 0x139   :  { %v1062_v18 = vpack.c.bf16 %v763_v12, %v762_v11  ;;  %v573_v19 = vadd.f32 %v1167_v13, %v1610_v3  ;;  %v1170_v20 = vadd.f32 %v1169_v16, %v1168_v14  ;;  %v1267_v21 = vpop.f32.mrb[35].mxu1 }
 0x13b   :  { %1095 = vst [vmem:[%s1680_s3 + $0x38] sm:$0xff] %v1062_v18   ;;  %v710_v22 = vadd.f32 %v709_v10, %v573_v19  ;;  %v576_v23 = vadd.f32 %v1170_v20, %v1610_v3 }
 0x13d   :  { %v713_v24 = vadd.f32 %v712_v17, %v576_v23  ;;  %v1171_v25 = vpop.f32.mrb[36].mxu0  ;;  %v764_v28 = vmax.f32 %v710_v22, 0.0 }
 0x13e   :  { %v1172_v26 = vpop.f32.mrb[37].mxu0  ;;  %v717_v27 = vpop.f32.mrb[36].mxu1 }
 0x13f   :  { %v765_v29 = vmax.f32 %v713_v24, 0.0  ;;  %v1173_v30 = vadd.f32 %v1172_v26, %v1171_v25  ;;  %v1174_v31 = vpop.f32.mrb[38].mxu0  ;;  %v1270_v32 = vpop.f32.mrb[37].mxu1 }
 0x140   :  { %v1175_v33 = vpop.f32.mrb[39].mxu0  ;;  %v720_v34 = vpop.f32.mrb[38].mxu1 }
 0x141   :  { %v1067_v35 = vpack.c.bf16 %v765_v29, %v764_v28  ;;  %v581_v36 = vadd.f32 %v1173_v30, %v1610_v3  ;;  %v1176_v37 = vadd.f32 %v1175_v33, %v1174_v31  ;;  %v1271_v38 = vpop.f32.mrb[39].mxu1 }
 0x143   :  { %1096 = vst [vmem:[%s1680_s3 + $0x40] sm:$0xff] %v1067_v35   ;;  %v718_v39 = vadd.f32 %v717_v27, %v581_v36  ;;  %v584_v40 = vadd.f32 %v1176_v37, %v1610_v3 }
 0x145   :  { %v721_v41 = vadd.f32 %v720_v34, %v584_v40  ;;  %v1177_v42 = vpop.f32.mrb[40].mxu0  ;;  %v766_v45 = vmax.f32 %v718_v39, 0.0 }
 0x146   :  { %v1178_v43 = vpop.f32.mrb[41].mxu0  ;;  %v725_v44 = vpop.f32.mrb[40].mxu1 }
 0x147   :  { %v767_v46 = vmax.f32 %v721_v41, 0.0  ;;  %v1179_v47 = vadd.f32 %v1178_v43, %v1177_v42  ;;  %v1180_v48 = vpop.f32.mrb[42].mxu0  ;;  %v1274_v49 = vpop.f32.mrb[41].mxu1 }
 0x148   :  { %v1181_v50 = vpop.f32.mrb[43].mxu0  ;;  %v728_v51 = vpop.f32.mrb[42].mxu1 }
 0x149   :  { %v1072_v52 = vpack.c.bf16 %v767_v46, %v766_v45  ;;  %v589_v53 = vadd.f32 %v1179_v47, %v1610_v3  ;;  %v1182_v54 = vadd.f32 %v1181_v50, %v1180_v48  ;;  %v1275_v55 = vpop.f32.mrb[43].mxu1 }
 0x14b   :  { %1097 = vst [vmem:[%s1680_s3 + $0x48] sm:$0xff] %v1072_v52   ;;  %v726_v56 = vadd.f32 %v725_v44, %v589_v53  ;;  %v592_v57 = vadd.f32 %v1182_v54, %v1610_v3 }
 0x14d   :  { %v729_v58 = vadd.f32 %v728_v51, %v592_v57  ;;  %v1183_v59 = vpop.f32.mrb[44].mxu0  ;;  %v768_v62 = vmax.f32 %v726_v56, 0.0 }
 0x14e   :  { %v1184_v60 = vpop.f32.mrb[45].mxu0  ;;  %v733_v61 = vpop.f32.mrb[44].mxu1 }
 0x14f   :  { %v769_v63 = vmax.f32 %v729_v58, 0.0  ;;  %v1185_v0 = vadd.f32 %v1184_v60, %v1183_v59  ;;  %v1186_v2 = vpop.f32.mrb[46].mxu0  ;;  %v1278_v4 = vpop.f32.mrb[45].mxu1 }
 0x150   :  { %v1187_v5 = vpop.f32.mrb[47].mxu0  ;;  %v736_v1 = vpop.f32.mrb[46].mxu1 }
 0x151   :  { %v1077_v6 = vpack.c.bf16 %v769_v63, %v768_v62  ;;  %v597_v7 = vadd.f32 %v1185_v0, %v1610_v3  ;;  %v1188_v8 = vadd.f32 %v1187_v5, %v1186_v2  ;;  %v1279_v9 = vpop.f32.mrb[47].mxu1 }
 0x153   :  { %1098 = vst [vmem:[%s1680_s3 + $0x50] sm:$0xff] %v1077_v6   ;;  %v734_v10 = vadd.f32 %v733_v61, %v597_v7  ;;  %v600_v11 = vadd.f32 %v1188_v8, %v1610_v3 }
 0x155   :  { %v737_v12 = vadd.f32 %v736_v1, %v600_v11  ;;  %v1189_v13 = vpop.f32.mrb[48].mxu0  ;;  %v770_v16 = vmax.f32 %v734_v10, 0.0 }
 0x156   :  { %v1190_v14 = vpop.f32.mrb[49].mxu0  ;;  %v741_v15 = vpop.f32.mrb[48].mxu1 }
 0x157   :  { %v771_v17 = vmax.f32 %v737_v12, 0.0  ;;  %v1191_v18 = vadd.f32 %v1190_v14, %v1189_v13  ;;  %v1192_v19 = vpop.f32.mrb[50].mxu0  ;;  %v1282_v20 = vpop.f32.mrb[49].mxu1 }
 0x158   :  { %v1193_v21 = vpop.f32.mrb[51].mxu0  ;;  %v744_v22 = vpop.f32.mrb[50].mxu1 }
 0x159   :  { %v1082_v23 = vpack.c.bf16 %v771_v17, %v770_v16  ;;  %v605_v24 = vadd.f32 %v1191_v18, %v1610_v3  ;;  %v1194_v25 = vadd.f32 %v1193_v21, %v1192_v19  ;;  %v1283_v26 = vpop.f32.mrb[51].mxu1 }
 0x15b   :  { %1099 = vst [vmem:[%s1680_s3 + $0x58] sm:$0xff] %v1082_v23   ;;  %v742_v27 = vadd.f32 %v741_v15, %v605_v24  ;;  %v608_v28 = vadd.f32 %v1194_v25, %v1610_v3 }
 0x15d   :  { %v745_v29 = vadd.f32 %v744_v22, %v608_v28  ;;  %v772_v30 = vmax.f32 %v742_v27, 0.0 }
 0x15f   :  { %v773_v31 = vmax.f32 %v745_v29, 0.0 }
 0x161   :  { %v1087_v32 = vpack.c.bf16 %v773_v31, %v772_v30 }
 0x163   :  { %1100 = vst [vmem:[%s1680_s3 + $0x60] sm:$0xff] %v1087_v32  }

// kernel: _lambda_.121
= control target key start
LH: loop header
LB: loop body
LE: loop exit
PB: predicated region body
PF: predicated region fallthrough
CT: control target
= control target key end

     0   :  { %vm48_vm0 = vcmask 1046528   ;;  %vm168_vm1 = vcmask 1041409   ;;  %s253_s0 = inlined_call_operand.vmem [shape: bf16[2,47,256], index: 0, kind: input, shape index: {}]   ;;  %s254_s1 = inlined_call_operand.vmem [shape: bf16[2,256], index: 1, kind: output, shape index: {}]  }
   0x1   :  { %v8_v0 = vld [vmem:[%s253_s0] sm:$0xff]  ;;  %v9_v1 = vld [vmem:[%s253_s0 + $0x8] sm:$0xff]  ;;  %v10_v2 = vld [vmem:[%s253_s0 + $0x10] sm:$0xff] }
   0x2   :  { %v11_v3 = vld [vmem:[%s253_s0 + $0x18] sm:$0xff]  ;;  %v14_v4 = vld [vmem:[%s253_s0 + $0x30] sm:$0xff]  ;;  %v12_v6 = vld [vmem:[%s253_s0 + $0x20] sm:$0xff]  ;;  %v20_v8 = vunpack.c.l.bf16 %v8_v0  ;;  %v21_v9 = vunpack.c.h.bf16 %v8_v0  ;;  %v22_v10 = vunpack.c.l.bf16 %v9_v1  ;;  %v23_v11 = vunpack.c.h.bf16 %v9_v1 }
   0x3   :  { %v15_v5 = vld [vmem:[%s253_s0 + $0x38] sm:$0xff]  ;;  %v16_v7 = vld [vmem:[%s253_s0 + $0x40] sm:$0xff]  ;;  %v13_v12 = vld [vmem:[%s253_s0 + $0x28] sm:$0xff]  ;;  %v32_v13 = vunpack.c.l.bf16 %v14_v4  ;;  %v33_v14 = vunpack.c.h.bf16 %v14_v4  ;;  %v24_v18 = vunpack.c.l.bf16 %v10_v2  ;;  %v25_v19 = vunpack.c.h.bf16 %v10_v2 }
   0x4   :  { %v34_v15 = vunpack.c.l.bf16 %v15_v5  ;;  %v35_v16 = vunpack.c.h.bf16 %v15_v5  ;;  %v17_v17 = vld [vmem:[%s253_s0 + $0x48] sm:$0xff]  ;;  %v26_v20 = vunpack.c.l.bf16 %v11_v3  ;;  %v27_v21 = vunpack.c.h.bf16 %v11_v3  ;;  %v19_v22 = vld [vmem:[%s253_s0 + $0x58] sm:$0xff]  ;;  %v18_v27 = vld [vmem:[%s253_s0 + $0x50] sm:$0xff] }
   0x5   :  { %v28_v23 = vunpack.c.l.bf16 %v12_v6  ;;  %v29_v24 = vunpack.c.h.bf16 %v12_v6  ;;  %v36_v25 = vunpack.c.l.bf16 %v16_v7  ;;  %v37_v26 = vunpack.c.h.bf16 %v16_v7 }
   0x6   :  { %v30_v28 = vunpack.c.l.bf16 %v13_v12  ;;  %v31_v29 = vunpack.c.h.bf16 %v13_v12  ;;  %v44_v30 = vadd.f32 %v22_v10, %v20_v8  ;;  %v57_v31 = vadd.f32 %v23_v11, %v21_v9 }
   0x7   :  { %v38_v32 = vunpack.c.l.bf16 %v17_v17  ;;  %v39_v33 = vunpack.c.h.bf16 %v17_v17  ;;  %v69_v34 = vadd.f32 %v34_v15, %v32_v13  ;;  %v81_v35 = vadd.f32 %v35_v16, %v33_v14 }
   0x8   :  { %v42_v36 = vunpack.c.l.bf16 %v19_v22  ;;  %v43_v37 = vunpack.c.h.bf16 %v19_v22  ;;  %v45_v38 = vadd.f32 %v44_v30, %v24_v18  ;;  %v58_v39 = vadd.f32 %v57_v31, %v25_v19 }
   0x9   :  { %v40_v40 = vunpack.c.l.bf16 %v18_v27  ;;  %v41_v41 = vunpack.c.h.bf16 %v18_v27  ;;  %v70_v42 = vadd.f32 %v69_v34, %v36_v25  ;;  %v82_v43 = vadd.f32 %v81_v35, %v37_v26 }
   0xa   :  { %v46_v44 = vadd.f32 %v45_v38, %v26_v20  ;;  %v59_v45 = vadd.f32 %v58_v39, %v27_v21  ;;  %v49_v46 = vsel %vm48_vm0, %v30_v28, 0.0  ;;  %v61_v47 = vsel %vm48_vm0, %v31_v29, 0.0 }
   0xb   :  { %v71_v48 = vadd.f32 %v70_v42, %v38_v32  ;;  %v83_v49 = vadd.f32 %v82_v43, %v39_v33  ;;  %v73_v52 = vsel %vm48_vm0, %v42_v36, 0.0  ;;  %v85_v53 = vsel %vm48_vm0, %v43_v37, 0.0 }
   0xc   :  { %v47_v50 = vadd.f32 %v46_v44, %v28_v23  ;;  %v60_v51 = vadd.f32 %v59_v45, %v29_v24  ;;  %v109_v6 = vlaneseq  ;;  %v198_v9 = vmov 1966171168  }
   0xd   :  { %v72_v54 = vadd.f32 %v71_v48, %v40_v40  ;;  %v84_v55 = vadd.f32 %v83_v49, %v41_v41  ;;  %v107_v10 = vunpack.c.l.s4 %v198_v9  ;;  %v199_v17 = vmov 1935823168  }
   0xe   :  { %v50_v56 = vadd.f32 %v49_v46, %v47_v50  ;;  %v62_v57 = vadd.f32 %v61_v47, %v60_v51  ;;  %v136_v18 = vunpack.c.l.s4 %v199_v17  ;;  %v110_v22 = vshrl.u32 %v109_v6, 7 }
   0xf   :  { %v74_v58 = vadd.f32 %v73_v52, %v72_v54  ;;  %v86_v59 = vadd.f32 %v85_v53, %v84_v55  ;;  %v108_v21 = vunpack.c.0.s8 %v107_v10 }
  0x10   :  { %v51_v60 = vrot.slane %v50_v56, 4  ;;  %v63_v61 = vrot.slane %v62_v57, 4  ;;  %v137_v32 = vunpack.c.0.s8 %v136_v18 }
  0x11   :  { %v75_v62 = vrot.slane %v74_v58, 4  ;;  %v87_v63 = vrot.slane %v86_v59, 4  ;;  %v111_v31 = vsub.s32 %v108_v21, %v110_v22 }
  0x12   :  { %v52_v0 = vadd.f32 %v51_v60, %v50_v56  ;;  %v64_v1 = vadd.f32 %v63_v61, %v62_v57  ;;  %v140_v37 = vsub.s32 %v137_v32, %v110_v22 }
  0x13   :  { %v76_v2 = vadd.f32 %v75_v62, %v74_v58  ;;  %v88_v3 = vadd.f32 %v87_v63, %v86_v59 }
  0x14   :  { %v53_v4 = vrot.slane %v52_v0, 2  ;;  %v65_v5 = vrot.slane %v64_v1, 2 }
  0x15   :  { %v77_v7 = vrot.slane %v76_v2, 2  ;;  %v89_v8 = vrot.slane %v88_v3, 2 }
  0x16   :  { %v54_v11 = vadd.f32 %v53_v4, %v52_v0  ;;  %v66_v12 = vadd.f32 %v65_v5, %v64_v1 }
  0x17   :  { %v78_v13 = vadd.f32 %v77_v7, %v76_v2  ;;  %v90_v14 = vadd.f32 %v89_v8, %v88_v3 }
  0x18   :  { %v55_v15 = vrot.slane %v54_v11, 1  ;;  %v67_v16 = vrot.slane %v66_v12, 1 }
  0x19   :  { %v79_v19 = vrot.slane %v78_v13, 1  ;;  %v91_v20 = vrot.slane %v90_v14, 1 }
  0x1a   :  { %v56_v23 = vadd.f32 %v55_v15, %v54_v11  ;;  %v68_v24 = vadd.f32 %v67_v16, %v66_v12 }
  0x1b   :  { %v80_v25 = vadd.f32 %v79_v19, %v78_v13  ;;  %v92_v26 = vadd.f32 %v91_v20, %v90_v14 }
  0x1c   :  { %v93_v27 = vmul.f32 0.021276595, %v56_v23  ;;  %v94_v28 = vmul.f32 0.021276595, %v68_v24 }
  0x1d   :  { %v95_v29 = vmul.f32 0.021276595, %v80_v25  ;;  %v96_v30 = vmul.f32 0.021276595, %v92_v26 }
  0x1e   :  { %v193_v33 = vpack.c.bf16 %v94_v28, %v93_v27 }
  0x1f   :  { %v194_v34 = vpack.c.bf16 %v96_v30, %v95_v29 }
  0x20   :  { %v112_v35 = vrot.slane %v193_v33, %v111_v31 }
  0x21   :  { %v127_v36 = vrot.slane %v194_v34, %v111_v31 }
  0x22   :  { %v119_v38 = vrot.slane %v112_v35, %v111_v31 }
  0x23   :  { %v134_v39 = vrot.slane %v127_v36, %v111_v31 }
  0x24   :  { %v141_v40 = vrot.slane %v119_v38, %v140_v37 }
  0x25   :  { %v155_v41 = vrot.slane %v134_v39, %v140_v37 }
  0x26   :  { %v148_v42 = vrot.slane %v141_v40, %v140_v37 }
  0x27   :  { %v162_v43 = vrot.slane %v155_v41, %v140_v37 }
  0x28   :  { %v163_v44 = vunpack.c.l.b16 %v148_v42  ;;  %v164_v45 = vunpack.c.h.b16 %v148_v42 }
  0x29   :  { %v165_v46 = vunpack.c.l.b16 %v162_v43  ;;  %v166_v47 = vunpack.c.h.b16 %v162_v43 }
  0x2b   :  { %v167_v48 = vrot.slane %v165_v46, 7  ;;  %v170_v49 = vrot.slane %v166_v47, 7 }
  0x2d   :  { %v169_v50 = vsel %vm168_vm1, %v167_v48, %v163_v44  ;;  %v171_v51 = vsel %vm168_vm1, %v170_v49, %v164_v45 }
  0x2e   :  { %v172_v52 = vpack.c.b16 %v171_v51, %v169_v50 }
  0x30   :  { %v179_v53 = vrot.slane %v172_v52, %v111_v31 }
  0x32   :  { %195 = vst.sshfl [vmem:[%s254_s1] sm:$0x5 pattern:$0x73625140] %v179_v53 }

// kernel: _lambda_.120
= control target key start
LH: loop header
LB: loop body
LE: loop exit
PB: predicated region body
PF: predicated region fallthrough
CT: control target
= control target key end

     0   :  { %s1953_s1 = inlined_call_operand.vmem [shape: bf16[640,256], index: 1, kind: input, shape index: {}]   ;;  %s1954_s0 = inlined_call_operand.vmem [shape: bf16[96,640], index: 0, kind: input, shape index: {}]   ;;  %s1955_s2 = inlined_call_operand.vmem [shape: f32[1,256], index: 2, kind: input, shape index: {}]   ;;  %s1956_s3 = inlined_call_operand.vmem [shape: bf16[96,256], index: 3, kind: output, shape index: {}]  }
   0x1   :  { %v1313_v0 = vld [vmem:[%s1953_s1 + $0x4] ss:$8 sps:$4 sm:$0xff]   ;;  %v1317_v2 = vld [vmem:[%s1953_s1] ss:$8 sps:$4 sm:$0xff]   ;;  %v1319_v4 = vld [vmem:[%s1953_s1 + $0x14] ss:$8 sps:$4 sm:$0xff]  }
   0x2   :  { %v1315_v1 = vld [vmem:[%s1953_s1 + $0x104] ss:$8 sps:$4 sm:$0xff]   ;;  %699 = vmatprep.subr.bf16.mxu1 %v1313_v0  ;;  %v1318_v3 = vld [vmem:[%s1953_s1 + $0x100] ss:$8 sps:$4 sm:$0xff]   ;;  %v1321_v5 = vld [vmem:[%s1953_s1 + $0x114] ss:$8 sps:$4 sm:$0xff]  }
   0x3   :  { %792 = vmatprep.subr.bf16.mxu0 %v1315_v1  ;;  %700 = vmatpush1.bf16.msra.mxu1 %v1317_v2  ;;  %v1323_v6 = vld [vmem:[%s1953_s1 + $0x10] ss:$8 sps:$4 sm:$0xff]   ;;  %v1325_v8 = vld [vmem:[%s1953_s1 + $0x24] ss:$8 sps:$4 sm:$0xff]   ;;  %v1329_v10 = vld [vmem:[%s1953_s1 + $0x20] ss:$8 sps:$4 sm:$0xff]  }
   0x4   :  { %793 = vmatpush1.bf16.msra.mxu0 %v1318_v3  ;;  %701 = vmatprep.subr.bf16.mxu1 %v1319_v4  ;;  %v1324_v7 = vld [vmem:[%s1953_s1 + $0x110] ss:$8 sps:$4 sm:$0xff]   ;;  %v1327_v9 = vld [vmem:[%s1953_s1 + $0x124] ss:$8 sps:$4 sm:$0xff]   ;;  %v1330_v11 = vld [vmem:[%s1953_s1 + $0x120] ss:$8 sps:$4 sm:$0xff]  }
   0x5   :  { %794 = vmatprep.subr.bf16.mxu0 %v1321_v5  ;;  %v1331_v12 = vld [vmem:[%s1953_s1 + $0x34] ss:$8 sps:$4 sm:$0xff]   ;;  %v1335_v14 = vld [vmem:[%s1953_s1 + $0x30] ss:$8 sps:$4 sm:$0xff]   ;;  %v1337_v16 = vld [vmem:[%s1953_s1 + $0x44] ss:$8 sps:$4 sm:$0xff]  }
   0x6   :  { %v1333_v13 = vld [vmem:[%s1953_s1 + $0x134] ss:$8 sps:$4 sm:$0xff]   ;;  %v1336_v15 = vld [vmem:[%s1953_s1 + $0x130] ss:$8 sps:$4 sm:$0xff]   ;;  %v1339_v17 = vld [vmem:[%s1953_s1 + $0x144] ss:$8 sps:$4 sm:$0xff]  }
   0x7   :  { %702 = vmatpush1.bf16.msra.mxu1 %v1323_v6  ;;  %v1341_v18 = vld [vmem:[%s1953_s1 + $0x40] ss:$8 sps:$4 sm:$0xff]   ;;  %v1343_v20 = vld [vmem:[%s1953_s1 + $0x54] ss:$8 sps:$4 sm:$0xff]   ;;  %v1347_v22 = vld [vmem:[%s1953_s1 + $0x50] ss:$8 sps:$4 sm:$0xff]  }
   0x8   :  { %795 = vmatpush1.bf16.msra.mxu0 %v1324_v7  ;;  %703 = vmatprep.subr.bf16.mxu1 %v1325_v8  ;;  %v1342_v19 = vld [vmem:[%s1953_s1 + $0x140] ss:$8 sps:$4 sm:$0xff]   ;;  %v1345_v21 = vld [vmem:[%s1953_s1 + $0x154] ss:$8 sps:$4 sm:$0xff]   ;;  %v1348_v23 = vld [vmem:[%s1953_s1 + $0x150] ss:$8 sps:$4 sm:$0xff]  }
   0x9   :  { %796 = vmatprep.subr.bf16.mxu0 %v1327_v9  ;;  %v1349_v24 = vld [vmem:[%s1953_s1 + $0x64] ss:$8 sps:$4 sm:$0xff]   ;;  %v1353_v26 = vld [vmem:[%s1953_s1 + $0x60] ss:$8 sps:$4 sm:$0xff]   ;;  %v1355_v28 = vld [vmem:[%s1953_s1 + $0x74] ss:$8 sps:$4 sm:$0xff]  }
   0xa   :  { %v1351_v25 = vld [vmem:[%s1953_s1 + $0x164] ss:$8 sps:$4 sm:$0xff]   ;;  %v1354_v27 = vld [vmem:[%s1953_s1 + $0x160] ss:$8 sps:$4 sm:$0xff]   ;;  %v1357_v29 = vld [vmem:[%s1953_s1 + $0x174] ss:$8 sps:$4 sm:$0xff]  }
   0xb   :  { %704 = vmatpush1.bf16.msra.mxu1 %v1329_v10  ;;  %v1359_v30 = vld [vmem:[%s1953_s1 + $0x70] ss:$8 sps:$4 sm:$0xff]   ;;  %v1361_v32 = vld [vmem:[%s1953_s1 + $0x84] ss:$8 sps:$4 sm:$0xff]   ;;  %v1365_v34 = vld [vmem:[%s1953_s1 + $0x80] ss:$8 sps:$4 sm:$0xff]  }
   0xc   :  { %797 = vmatpush1.bf16.msra.mxu0 %v1330_v11  ;;  %705 = vmatprep.subr.bf16.mxu1 %v1331_v12  ;;  %v1360_v31 = vld [vmem:[%s1953_s1 + $0x170] ss:$8 sps:$4 sm:$0xff]   ;;  %v1363_v33 = vld [vmem:[%s1953_s1 + $0x184] ss:$8 sps:$4 sm:$0xff]   ;;  %v1366_v35 = vld [vmem:[%s1953_s1 + $0x180] ss:$8 sps:$4 sm:$0xff]  }
   0xd   :  { %798 = vmatprep.subr.bf16.mxu0 %v1333_v13  ;;  %v1367_v36 = vld [vmem:[%s1953_s1 + $0x94] ss:$8 sps:$4 sm:$0xff]   ;;  %v1371_v38 = vld [vmem:[%s1953_s1 + $0x90] ss:$8 sps:$4 sm:$0xff]   ;;  %v1373_v40 = vld [vmem:[%s1953_s1 + $0xa4] ss:$8 sps:$4 sm:$0xff]  }
   0xe   :  { %v1369_v37 = vld [vmem:[%s1953_s1 + $0x194] ss:$8 sps:$4 sm:$0xff]   ;;  %v1372_v39 = vld [vmem:[%s1953_s1 + $0x190] ss:$8 sps:$4 sm:$0xff]   ;;  %v1375_v41 = vld [vmem:[%s1953_s1 + $0x1a4] ss:$8 sps:$4 sm:$0xff]  }
   0xf   :  { %706 = vmatpush1.bf16.msra.mxu1 %v1335_v14  ;;  %v1377_v42 = vld [vmem:[%s1953_s1 + $0xa0] ss:$8 sps:$4 sm:$0xff]   ;;  %v1379_v44 = vld [vmem:[%s1953_s1 + $0xb4] ss:$8 sps:$4 sm:$0xff]   ;;  %v1383_v46 = vld [vmem:[%s1953_s1 + $0xb0] ss:$8 sps:$4 sm:$0xff]  }
  0x10   :  { %799 = vmatpush1.bf16.msra.mxu0 %v1336_v15  ;;  %707 = vmatprep.subr.bf16.mxu1 %v1337_v16  ;;  %v1378_v43 = vld [vmem:[%s1953_s1 + $0x1a0] ss:$8 sps:$4 sm:$0xff]   ;;  %v1381_v45 = vld [vmem:[%s1953_s1 + $0x1b4] ss:$8 sps:$4 sm:$0xff]   ;;  %v1384_v47 = vld [vmem:[%s1953_s1 + $0x1b0] ss:$8 sps:$4 sm:$0xff]  }
  0x11   :  { %800 = vmatprep.subr.bf16.mxu0 %v1339_v17  ;;  %v1385_v48 = vld [vmem:[%s1953_s1 + $0xc4] ss:$8 sps:$4 sm:$0xff]   ;;  %v1389_v52 = vld [vmem:[%s1953_s1 + $0xc0] ss:$8 sps:$4 sm:$0xff]   ;;  %v1391_v54 = vld [vmem:[%s1953_s1 + $0xd4] ss:$8 sps:$4 sm:$0xff]  }
  0x12   :  { %v1411_v49 = vld [vmem:[%s1954_s0 + $0x4] ss:$20 sps:$4 sm:$0xff]   ;;  %v1414_v51 = vld [vmem:[%s1954_s0 + $0xc] ss:$20 sps:$4 sm:$0xff]   ;;  %v1393_v55 = vld [vmem:[%s1953_s1 + $0x1d4] ss:$8 sps:$4 sm:$0xff]  }
  0x13   :  { %708 = vmatpush1.bf16.msra.mxu1 %v1341_v18  ;;  %v1387_v50 = vld [vmem:[%s1953_s1 + $0x1c4] ss:$8 sps:$4 sm:$0xff]   ;;  %731 = vmatprep.mubr.bf16.mxu1 %v1411_v49  ;;  %v1390_v53 = vld [vmem:[%s1953_s1 + $0x1c0] ss:$8 sps:$4 sm:$0xff]   ;;  %v1395_v56 = vld [vmem:[%s1953_s1 + $0xd0] ss:$8 sps:$4 sm:$0xff]  }
  0x14   :  { %801 = vmatpush1.bf16.msra.mxu0 %v1342_v19  ;;  %709 = vmatprep.subr.bf16.mxu1 %v1343_v20  ;;  %v1396_v57 = vld [vmem:[%s1953_s1 + $0x1d0] ss:$8 sps:$4 sm:$0xff]   ;;  %v1397_v58 = vld [vmem:[%s1953_s1 + $0xe4] ss:$8 sps:$4 sm:$0xff]   ;;  %v1401_v60 = vld [vmem:[%s1953_s1 + $0xe0] ss:$8 sps:$4 sm:$0xff]  }
  0x15   :  { %802 = vmatprep.subr.bf16.mxu0 %v1345_v21  ;;  %824 = vmatprep.mubr.bf16.mxu0 %v1414_v51  ;;  %v1399_v59 = vld [vmem:[%s1953_s1 + $0x1e4] ss:$8 sps:$4 sm:$0xff]   ;;  %v1402_v61 = vld [vmem:[%s1953_s1 + $0x1e0] ss:$8 sps:$4 sm:$0xff]   ;;  %v1403_v62 = vld [vmem:[%s1953_s1 + $0xf4] ss:$8 sps:$4 sm:$0xff]  }
  0x16   :  { %v1405_v63 = vld [vmem:[%s1953_s1 + $0x1f4] ss:$8 sps:$4 sm:$0xff]   ;;  %v1407_v0 = vld [vmem:[%s1953_s1 + $0xf0] ss:$8 sps:$4 sm:$0xff]   ;;  %v1417_v2 = vld [vmem:[%s1953_s1 + $0x204] ss:$8 sps:$4 sm:$0xff]  }
  0x17   :  { %710 = vmatpush1.bf16.msra.mxu1 %v1347_v22  ;;  %v1408_v1 = vld [vmem:[%s1953_s1 + $0x1f0] ss:$8 sps:$4 sm:$0xff]   ;;  %v1409_v3 = vld [vmem:[%s1954_s0] ss:$20 sps:$4 sm:$0xff]   ;;  %v1412_v4 = vld [vmem:[%s1954_s0 + $0x8] ss:$20 sps:$4 sm:$0xff]  }
  0x18   :  { %803 = vmatpush1.bf16.msra.mxu0 %v1348_v23  ;;  %711 = vmatprep.subr.bf16.mxu1 %v1349_v24  ;;  %v1415_v5 = vld [vmem:[%s1953_s1 + $0x200] ss:$8 sps:$4 sm:$0xff]   ;;  %v1420_v6 = vld [vmem:[%s1953_s1 + $0x214] ss:$8 sps:$4 sm:$0xff]   ;;  %v1418_v9 = vld [vmem:[%s1953_s1 + $0x210] ss:$8 sps:$4 sm:$0xff]  }
  0x19   :  { %804 = vmatprep.subr.bf16.mxu0 %v1351_v25  ;;  %v1421_v7 = vld [vmem:[%s1954_s0 + $0x2c] ss:$20 sps:$4 sm:$0xff]   ;;  %v1423_v8 = vld [vmem:[%s1954_s0 + $0x34] ss:$20 sps:$4 sm:$0xff]   ;;  %v1426_v12 = vld [vmem:[%s1954_s0 + $0x30] ss:$20 sps:$4 sm:$0xff]  }
  0x1a   :  { %v1425_v10 = vld [vmem:[%s1954_s0 + $0x28] ss:$20 sps:$4 sm:$0xff]   ;;  %v1429_v11 = vld [vmem:[%s1953_s1 + $0x224] ss:$8 sps:$4 sm:$0xff]   ;;  %v1436_v17 = vld [vmem:[%s1953_s1 + $0x230] ss:$8 sps:$4 sm:$0xff]  }
  0x1b   :  { %712 = vmatpush1.bf16.msra.mxu1 %v1353_v26  ;;  %v1427_v13 = vld [vmem:[%s1953_s1 + $0x220] ss:$8 sps:$4 sm:$0xff]   ;;  %v1432_v15 = vld [vmem:[%s1954_s0 + $0x5c] ss:$20 sps:$4 sm:$0xff]   ;;  %v1447_v18 = vld [vmem:[%s1953_s1 + $0x244] ss:$8 sps:$4 sm:$0xff]  }
  0x1c   :  { %805 = vmatpush1.bf16.msra.mxu0 %v1354_v27  ;;  %713 = vmatprep.subr.bf16.mxu1 %v1355_v28  ;;  %v1430_v14 = vld [vmem:[%s1954_s0 + $0x54] ss:$20 sps:$4 sm:$0xff]   ;;  %v1434_v19 = vld [vmem:[%s1954_s0 + $0x50] ss:$20 sps:$4 sm:$0xff]   ;;  %v1435_v20 = vld [vmem:[%s1954_s0 + $0x58] ss:$20 sps:$4 sm:$0xff]  }
  0x1d   :  { %806 = vmatprep.subr.bf16.mxu0 %v1357_v29  ;;  %v1438_v16 = vld [vmem:[%s1953_s1 + $0x234] ss:$8 sps:$4 sm:$0xff]   ;;  %v1441_v22 = vld [vmem:[%s1954_s0 + $0x84] ss:$20 sps:$4 sm:$0xff]   ;;  %v1445_v23 = vld [vmem:[%s1953_s1 + $0x240] ss:$8 sps:$4 sm:$0xff]  }
  0x1e   :  { %v1439_v21 = vld [vmem:[%s1954_s0 + $0x7c] ss:$20 sps:$4 sm:$0xff]   ;;  %v1459_v26 = vld [vmem:[%s1953_s1 + $0x264] ss:$8 sps:$4 sm:$0xff]   ;;  %v1444_v28 = vld [vmem:[%s1954_s0 + $0x80] ss:$20 sps:$4 sm:$0xff]  }
  0x1f   :  { %714 = vmatpush1.bf16.msra.mxu1 %v1359_v30  ;;  %v1450_v24 = vld [vmem:[%s1953_s1 + $0x254] ss:$8 sps:$4 sm:$0xff]   ;;  %v1448_v25 = vld [vmem:[%s1953_s1 + $0x250] ss:$8 sps:$4 sm:$0xff]   ;;  %v1453_v30 = vld [vmem:[%s1954_s0 + $0xac] ss:$20 sps:$4 sm:$0xff]  }
  0x20   :  { %807 = vmatpush1.bf16.msra.mxu0 %v1360_v31  ;;  %715 = vmatprep.subr.bf16.mxu1 %v1361_v32  ;;  %v1443_v27 = vld [vmem:[%s1954_s0 + $0x78] ss:$20 sps:$4 sm:$0xff]   ;;  %v1457_v31 = vld [vmem:[%s1953_s1 + $0x260] ss:$8 sps:$4 sm:$0xff]   ;;  %v1468_v32 = vld [vmem:[%s1953_s1 + $0x274] ss:$8 sps:$4 sm:$0xff]  }
  0x21   :  { %808 = vmatprep.subr.bf16.mxu0 %v1363_v33  ;;  %v1451_v29 = vld [vmem:[%s1954_s0 + $0xa4] ss:$20 sps:$4 sm:$0xff]  }
  0x22   :  { %v1466_v33 = vld [vmem:[%s1953_s1 + $0x270] ss:$8 sps:$4 sm:$0xff]  }
  0x23   :  { %716 = vmatpush1.bf16.msra.mxu1 %v1365_v34  ;;  %v1455_v34 = vld [vmem:[%s1954_s0 + $0xa0] ss:$20 sps:$4 sm:$0xff]  }
  0x24   :  { %809 = vmatpush1.bf16.msra.mxu0 %v1366_v35  ;;  %717 = vmatprep.subr.bf16.mxu1 %v1367_v36  ;;  %v1456_v35 = vld [vmem:[%s1954_s0 + $0xa8] ss:$20 sps:$4 sm:$0xff]   ;;  %v1460_v36 = vld [vmem:[%s1954_s0 + $0xcc] ss:$20 sps:$4 sm:$0xff]  }
  0x25   :  { %810 = vmatprep.subr.bf16.mxu0 %v1369_v37  ;;  %v1462_v37 = vld [vmem:[%s1954_s0 + $0xd4] ss:$20 sps:$4 sm:$0xff]  }
  0x27   :  { %718 = vmatpush1.bf16.msra.mxu1 %v1371_v38  ;;  %v1464_v38 = vld [vmem:[%s1954_s0 + $0xc8] ss:$20 sps:$4 sm:$0xff]  }
  0x28   :  { %811 = vmatpush1.bf16.msra.mxu0 %v1372_v39  ;;  %719 = vmatprep.subr.bf16.mxu1 %v1373_v40  ;;  %v1465_v39 = vld [vmem:[%s1954_s0 + $0xd0] ss:$20 sps:$4 sm:$0xff]   ;;  %v1475_v40 = vmov 0  }
  0x29   :  { %812 = vmatprep.subr.bf16.mxu0 %v1375_v41  ;;  %v1469_v41 = vld [vmem:[%s1954_s0 + $0x10] ss:$20 sps:$4 sm:$0xff]  }
  0x2b   :  { %720 = vmatpush1.bf16.msra.mxu1 %v1377_v42  ;;  %v1470_v42 = vld [vmem:[%s1954_s0 + $0x88] ss:$20 sps:$4 sm:$0xff]  }
  0x2c   :  { %813 = vmatpush1.bf16.msra.mxu0 %v1378_v43  ;;  %721 = vmatprep.subr.bf16.mxu1 %v1379_v44  ;;  %v1471_v43 = vld [vmem:[%s1954_s0 + $0x38] ss:$20 sps:$4 sm:$0xff]   ;;  %v1472_v44 = vld [vmem:[%s1954_s0 + $0xb0] ss:$20 sps:$4 sm:$0xff]  }
  0x2d   :  { %814 = vmatprep.subr.bf16.mxu0 %v1381_v45  ;;  %v1473_v45 = vld [vmem:[%s1954_s0 + $0x60] ss:$20 sps:$4 sm:$0xff]  }
  0x2f   :  { %722 = vmatpush1.bf16.msra.mxu1 %v1383_v46  ;;  %v1474_v46 = vld [vmem:[%s1954_s0 + $0xd8] ss:$20 sps:$4 sm:$0xff]  }
  0x30   :  { %815 = vmatpush1.bf16.msra.mxu0 %v1384_v47  ;;  %723 = vmatprep.subr.bf16.mxu1 %v1385_v48 }
  0x31   :  { %816 = vmatprep.subr.bf16.mxu0 %v1387_v50 }
  0x33   :  { %724 = vmatpush1.bf16.msra.mxu1 %v1389_v52 }
  0x34   :  { %817 = vmatpush1.bf16.msra.mxu0 %v1390_v53  ;;  %725 = vmatprep.subr.bf16.mxu1 %v1391_v54  ;;  %v133_v54 = vlaneseq }
  0x35   :  { %818 = vmatprep.subr.bf16.mxu0 %v1393_v55 }
  0x37   :  { %726 = vmatpush1.bf16.msra.mxu1 %v1395_v56  ;;  %v134_v56 = vshrl.u32 %v133_v54, 7 }
  0x38   :  { %819 = vmatpush1.bf16.msra.mxu0 %v1396_v57  ;;  %727 = vmatprep.subr.bf16.mxu1 %v1397_v58 }
  0x39   :  { %820 = vmatprep.subr.bf16.mxu0 %v1399_v59 }
  0x3b   :  { %728 = vmatpush1.bf16.msra.mxu1 %v1401_v60  ;;  %v135_v60 = vsub.s32 0, %v134_v56 }
  0x3c   :  { %821 = vmatpush1.bf16.msra.mxu0 %v1402_v61  ;;  %729 = vmatprep.subr.bf16.mxu1 %v1403_v62  ;;  %v131_v62 = vld [vmem:[%s1955_s2] sm:$0x3] }
  0x3d   :  { %822 = vmatprep.subr.bf16.mxu0 %v1405_v63  ;;  %v139_v63 = vsub.s32 1, %v134_v56 }
  0x3f   :  { %730 = vmatpush1.bf16.msra.mxu1 %v1407_v0  ;;  %v1853_v0 = vrot.slane %v131_v62, %v135_v60 }
  0x40   :  { %823 = vmatpush1.bf16.msra.mxu0 %v1408_v1  ;;  %1224 = vmatprep.subr.bf16.mxu1 %v1417_v2  ;;  %v1855_v1 = vrot.slane %v131_v62, %v139_v63 }
  0x41   :  { %885 = vmatprep.subr.bf16.mxu0 %v1417_v2 }
  0x42   :  { %732 = vmatmul.mubr.bf16.vlgmr.msra.gmra.mrb[0].mxu1 %v1409_v3 }
  0x43   :  { %825 = vmatmul.mubr.bf16.vlgmr.msra.gmra.mrb[0].mxu0 %v1412_v4  ;;  %1232 = vmatpush1.bf16.msra.mxu1 %v1415_v5 }
  0x44   :  { %886 = vmatpush1.bf16.msra.mxu0 %v1415_v5  ;;  %1225 = vmatprep.subr.bf16.mxu1 %v1420_v6 }
  0x45   :  { %887 = vmatprep.subr.bf16.mxu0 %v1420_v6  ;;  %741 = vmatprep.mubr.bf16.mxu1 %v1421_v7 }
  0x46   :  { %834 = vmatprep.mubr.bf16.mxu0 %v1423_v8 }
  0x47   :  { %1233 = vmatpush1.bf16.msra.mxu1 %v1418_v9 }
  0x48   :  { %888 = vmatpush1.bf16.msra.mxu0 %v1418_v9  ;;  %1226 = vmatprep.subr.bf16.mxu1 %v1429_v11 }
  0x49   :  { %889 = vmatprep.subr.bf16.mxu0 %v1429_v11 }
  0x4a   :  { %742 = vmatmul.mubr.bf16.gmra.mrb[4].mxu1 %v1425_v10 }
  0x4b   :  { %835 = vmatmul.mubr.bf16.gmra.mrb[4].mxu0 %v1426_v12  ;;  %1234 = vmatpush1.bf16.msra.mxu1 %v1427_v13 }
  0x4c   :  { %890 = vmatpush1.bf16.msra.mxu0 %v1427_v13  ;;  %751 = vmatprep.mubr.bf16.mxu1 %v1430_v14 }
  0x4d   :  { %844 = vmatprep.mubr.bf16.mxu0 %v1432_v15  ;;  %891 = vmatprep.subr.bf16.mxu0 %v1438_v16 }
  0x4e   :  { %1227 = vmatprep.subr.bf16.mxu1 %v1438_v16 }
  0x4f   :  { %1235 = vmatpush1.bf16.msra.mxu1 %v1436_v17 }
  0x50   :  { %892 = vmatpush1.bf16.msra.mxu0 %v1436_v17  ;;  %1228 = vmatprep.subr.bf16.mxu1 %v1447_v18 }
  0x51   :  { %893 = vmatprep.subr.bf16.mxu0 %v1447_v18 }
  0x52   :  { %752 = vmatmul.mubr.bf16.gmra.mrb[8].mxu1 %v1434_v19 }
  0x53   :  { %845 = vmatmul.mubr.bf16.gmra.mrb[8].mxu0 %v1435_v20  ;;  %761 = vmatprep.mubr.bf16.mxu1 %v1439_v21 }
  0x54   :  { %854 = vmatprep.mubr.bf16.mxu0 %v1441_v22  ;;  %894 = vmatpush1.bf16.msra.mxu0 %v1445_v23 }
  0x55   :  { %1236 = vmatpush1.bf16.msra.mxu1 %v1445_v23  ;;  %895 = vmatprep.subr.bf16.mxu0 %v1450_v24 }
  0x56   :  { %1229 = vmatprep.subr.bf16.mxu1 %v1450_v24 }
  0x58   :  { %896 = vmatpush1.bf16.msra.mxu0 %v1448_v25 }
  0x59   :  { %1237 = vmatpush1.bf16.msra.mxu1 %v1448_v25  ;;  %897 = vmatprep.subr.bf16.mxu0 %v1459_v26 }
  0x5a   :  { %1230 = vmatprep.subr.bf16.mxu1 %v1459_v26  ;;  %762 = vmatmul.mubr.bf16.gmra.mrb[12].mxu1 %v1443_v27 }
  0x5b   :  { %855 = vmatmul.mubr.bf16.gmra.mrb[12].mxu0 %v1444_v28  ;;  %771 = vmatprep.mubr.bf16.mxu1 %v1451_v29 }
  0x5c   :  { %864 = vmatprep.mubr.bf16.mxu0 %v1453_v30  ;;  %898 = vmatpush1.bf16.msra.mxu0 %v1457_v31 }
  0x5d   :  { %1238 = vmatpush1.bf16.msra.mxu1 %v1457_v31  ;;  %899 = vmatprep.subr.bf16.mxu0 %v1468_v32 }
  0x5e   :  { %1231 = vmatprep.subr.bf16.mxu1 %v1468_v32 }
  0x60   :  { %900 = vmatpush1.bf16.msra.mxu0 %v1466_v33 }
  0x61   :  { %1239 = vmatpush1.bf16.msra.mxu1 %v1466_v33 }
  0x62   :  { %772 = vmatmul.mubr.bf16.gmra.mrb[16].mxu1 %v1455_v34 }
  0x63   :  { %865 = vmatmul.mubr.bf16.gmra.mrb[16].mxu0 %v1456_v35  ;;  %781 = vmatprep.mubr.bf16.mxu1 %v1460_v36 }
  0x64   :  { %874 = vmatprep.mubr.bf16.mxu0 %v1462_v37 }
  0x6a   :  { %782 = vmatmul.mubr.bf16.gmra.mrb[20].mxu1 %v1464_v38 }
  0x6b   :  { %875 = vmatmul.mubr.bf16.gmra.mrb[20].mxu0 %v1465_v39  ;;  %947 = vmatprep.mubr.bf16.mxu1 %v1475_v40 }
  0x6c   :  { %917 = vmatprep.mubr.bf16.mxu0 %v1475_v40 }
  0x72   :  { %948 = vmatmul.mubr.bf16.vlgmr.msra.gmra.mrb[24].mxu1 %v1470_v42 }
  0x73   :  { %918 = vmatmul.mubr.bf16.vlgmr.msra.gmra.mrb[0].mxu0 %v1469_v41  ;;  %957 = vmatprep.mubr.bf16.mxu1 %v1475_v40 }
  0x74   :  { %927 = vmatprep.mubr.bf16.mxu0 %v1475_v40 }
  0x7a   :  { %958 = vmatmul.mubr.bf16.gmra.mrb[28].mxu1 %v1472_v44 }
  0x7b   :  { %928 = vmatmul.mubr.bf16.gmra.mrb[4].mxu0 %v1471_v43  ;;  %967 = vmatprep.mubr.bf16.mxu1 %v1475_v40 }
  0x7c   :  { %937 = vmatprep.mubr.bf16.mxu0 %v1475_v40 }
  0x82   :  { %968 = vmatmul.mubr.bf16.gmra.mrb[32].mxu1 %v1474_v46 }
  0x83   :  { %938 = vmatmul.mubr.bf16.gmra.mrb[8].mxu0 %v1473_v45 }
 0x115   :  { %v1826_v47 = vpop.f32.mrb[0].mxu1 }
 0x116   :  { %v1828_v48 = vpop.f32.mrb[1].mxu1  ;;  %v734_v62 = vadd.f32 %v1826_v47, %v1853_v0 }
 0x117   :  { %v1830_v49 = vpop.f32.mrb[2].mxu1  ;;  %v736_v63 = vadd.f32 %v1828_v48, %v1855_v1 }
 0x118   :  { %v1832_v50 = vpop.f32.mrb[3].mxu1 }
 0x11d   :  { %v1834_v51 = vpop.f32.mrb[4].mxu1 }
 0x11e   :  { %v1836_v52 = vpop.f32.mrb[5].mxu1 }
 0x11f   :  { %v1838_v53 = vpop.f32.mrb[6].mxu1 }
 0x120   :  { %v1840_v55 = vpop.f32.mrb[7].mxu1 }
 0x125   :  { %v1842_v57 = vpop.f32.mrb[8].mxu1 }
 0x126   :  { %v1844_v58 = vpop.f32.mrb[9].mxu1 }
 0x127   :  { %v1846_v59 = vpop.f32.mrb[10].mxu1 }
 0x128   :  { %v1848_v61 = vpop.f32.mrb[11].mxu1 }
 0x12d   :  { %v763_v2 = vpop.f32.mrb[12].mxu1 }
 0x12e   :  { %v856_v3 = vpop.f32.mrb[12].mxu0  ;;  %v764_v4 = vadd.f32 %v763_v2, %v1853_v0  ;;  %v765_v5 = vpop.f32.mrb[13].mxu1 }
 0x12f   :  { %v858_v6 = vpop.f32.mrb[13].mxu0  ;;  %v766_v7 = vadd.f32 %v765_v5, %v1855_v1  ;;  %v767_v8 = vpop.f32.mrb[14].mxu1 }
 0x130   :  { %v860_v9 = vpop.f32.mrb[14].mxu0  ;;  %v857_v10 = vadd.f32 %v856_v3, %v764_v4  ;;  %v768_v11 = vadd.f32 %v767_v8, %v1853_v0  ;;  %v769_v12 = vpop.f32.mrb[15].mxu1  ;;  %v738_v4 = vadd.f32 %v1830_v49, %v1853_v0 }
 0x131   :  { %v862_v13 = vpop.f32.mrb[15].mxu0  ;;  %v859_v14 = vadd.f32 %v858_v6, %v766_v7  ;;  %v770_v15 = vadd.f32 %v769_v12, %v1855_v1 }
 0x132   :  { %v861_v16 = vadd.f32 %v860_v9, %v768_v11  ;;  %v740_v9 = vadd.f32 %v1832_v50, %v1855_v1 }
 0x133   :  { %v863_v17 = vadd.f32 %v862_v13, %v770_v15 }
 0x135   :  { %v773_v18 = vpop.f32.mrb[16].mxu1 }
 0x136   :  { %v866_v19 = vpop.f32.mrb[16].mxu0  ;;  %v774_v20 = vadd.f32 %v773_v18, %v1853_v0  ;;  %v775_v21 = vpop.f32.mrb[17].mxu1 }
 0x137   :  { %v868_v22 = vpop.f32.mrb[17].mxu0  ;;  %v776_v23 = vadd.f32 %v775_v21, %v1855_v1  ;;  %v777_v24 = vpop.f32.mrb[18].mxu1 }
 0x138   :  { %v870_v25 = vpop.f32.mrb[18].mxu0  ;;  %v1863_v26 = vadd.f32 %v866_v19, %v774_v20  ;;  %v778_v27 = vadd.f32 %v777_v24, %v1853_v0  ;;  %v779_v28 = vpop.f32.mrb[19].mxu1 }
 0x139   :  { %v872_v29 = vpop.f32.mrb[19].mxu0  ;;  %v1866_v30 = vadd.f32 %v868_v22, %v776_v23  ;;  %v780_v31 = vadd.f32 %v779_v28, %v1855_v1 }
 0x13a   :  { %v1869_v32 = vadd.f32 %v870_v25, %v778_v27 }
 0x13b   :  { %v1871_v33 = vadd.f32 %v872_v29, %v780_v31  ;;  %v746_v31 = vadd.f32 %v1836_v52, %v1855_v1 }
 0x13d   :  { %v783_v34 = vpop.f32.mrb[20].mxu1 }
 0x13e   :  { %v876_v35 = vpop.f32.mrb[20].mxu0  ;;  %v784_v36 = vadd.f32 %v783_v34, %v1853_v0  ;;  %v785_v37 = vpop.f32.mrb[21].mxu1 }
 0x13f   :  { %v878_v38 = vpop.f32.mrb[21].mxu0  ;;  %v786_v39 = vadd.f32 %v785_v37, %v1855_v1  ;;  %v787_v40 = vpop.f32.mrb[22].mxu1 }
 0x140   :  { %v880_v41 = vpop.f32.mrb[22].mxu0  ;;  %v1875_v42 = vadd.f32 %v876_v35, %v784_v36  ;;  %v788_v43 = vadd.f32 %v787_v40, %v1853_v0  ;;  %v789_v44 = vpop.f32.mrb[23].mxu1  ;;  %v748_v36 = vadd.f32 %v1838_v53, %v1853_v0 }
 0x141   :  { %v882_v45 = vpop.f32.mrb[23].mxu0  ;;  %v1878_v46 = vadd.f32 %v878_v38, %v786_v39  ;;  %v790_v54 = vadd.f32 %v789_v44, %v1855_v1  ;;  %v750_v39 = vadd.f32 %v1840_v55, %v1855_v1 }
 0x142   :  { %v1881_v56 = vadd.f32 %v880_v41, %v788_v43 }
 0x143   :  { %v1883_v60 = vadd.f32 %v882_v45, %v790_v54 }
 0x145   :  { %v949_v3 = vpop.f32.mrb[24].mxu1 }
 0x146   :  { %v919_v2 = vpop.f32.mrb[0].mxu0  ;;  %v950_v6 = vadd.f32 %v949_v3, %v857_v10  ;;  %v951_v8 = vpop.f32.mrb[25].mxu1 }
 0x147   :  { %v1241_v5 = vadd.f32 %v919_v2, %v734_v62  ;;  %v921_v7 = vpop.f32.mrb[1].mxu0  ;;  %v952_v12 = vadd.f32 %v951_v8, %v859_v14  ;;  %v953_v15 = vpop.f32.mrb[26].mxu1  ;;  %v744_v14 = vadd.f32 %v1834_v51, %v1853_v0 }
 0x148   :  { %v1243_v11 = vadd.f32 %v921_v7, %v736_v63  ;;  %v923_v13 = vpop.f32.mrb[2].mxu0  ;;  %v990_v18 = vmax.f32 %v950_v6, 0.0  ;;  %v954_v48 = vadd.f32 %v953_v15, %v861_v16  ;;  %v955_v21 = vpop.f32.mrb[27].mxu1 }
 0x149   :  { %v978_v47 = vmax.f32 %v1241_v5, 0.0  ;;  %v1245_v19 = vadd.f32 %v923_v13, %v738_v4  ;;  %v925_v20 = vpop.f32.mrb[3].mxu0  ;;  %v991_v23 = vmax.f32 %v952_v12, 0.0  ;;  %v956_v24 = vadd.f32 %v955_v21, %v863_v17 }
 0x14a   :  { %v979_v22 = vmax.f32 %v1243_v11, 0.0  ;;  %v1247_v49 = vadd.f32 %v925_v20, %v740_v9  ;;  %v992_v25 = vmax.f32 %v954_v48, 0.0  ;;  %v754_v11 = vadd.f32 %v1842_v57, %v1853_v0 }
 0x14b   :  { %v980_v10 = vmax.f32 %v1245_v19, 0.0  ;;  %v1218_v28 = vpack.c.bf16 %v991_v23, %v990_v18  ;;  %v993_v50 = vmax.f32 %v956_v24, 0.0  ;;  %v756_v12 = vadd.f32 %v1844_v58, %v1855_v1 }
 0x14c   :  { %v1212_v27 = vpack.c.bf16 %v979_v22, %v978_v47  ;;  %v981_v29 = vmax.f32 %v1247_v49, 0.0  ;;  %v758_v47 = vadd.f32 %v1846_v59, %v1853_v0  ;;  %v760_v48 = vadd.f32 %v1848_v61, %v1855_v1 }
 0x14d   :  { %1080 = vst [vmem:[%s1956_s3 + $0x30] sm:$0xff] %v1218_v28  ;;  %v1219_v17 = vpack.c.bf16 %v993_v50, %v992_v25  ;;  %v959_v35 = vpop.f32.mrb[28].mxu1 }
 0x14e   :  { %1074 = vst [vmem:[%s1956_s3] sm:$0xff] %v1212_v27  ;;  %v1213_v16 = vpack.c.bf16 %v981_v29, %v980_v10  ;;  %v929_v34 = vpop.f32.mrb[4].mxu0  ;;  %v960_v51 = vadd.f32 %v959_v35, %v1863_v26  ;;  %v961_v52 = vpop.f32.mrb[29].mxu1 }
 0x14f   :  { %v1249_v37 = vadd.f32 %v929_v34, %v744_v14  ;;  %v931_v38 = vpop.f32.mrb[5].mxu0  ;;  %1081 = vst [vmem:[%s1956_s3 + $0x38] sm:$0xff] %v1219_v17  ;;  %v962_v41 = vadd.f32 %v961_v52, %v1866_v30  ;;  %v963_v43 = vpop.f32.mrb[30].mxu1 }
 0x150   :  { %1075 = vst [vmem:[%s1956_s3 + $0x8] sm:$0xff] %v1213_v16  ;;  %v1251_v40 = vadd.f32 %v931_v38, %v746_v31  ;;  %v933_v53 = vpop.f32.mrb[6].mxu0  ;;  %v994_v26 = vmax.f32 %v960_v51, 0.0  ;;  %v964_v54 = vadd.f32 %v963_v43, %v1869_v32  ;;  %v965_v55 = vpop.f32.mrb[31].mxu1 }
 0x151   :  { %v982_v44 = vmax.f32 %v1249_v37, 0.0  ;;  %v1253_v45 = vadd.f32 %v933_v53, %v748_v36  ;;  %v935_v62 = vpop.f32.mrb[7].mxu0  ;;  %v995_v2 = vmax.f32 %v962_v41, 0.0  ;;  %v966_v4 = vadd.f32 %v965_v55, %v1871_v33 }
 0x152   :  { %v983_v63 = vmax.f32 %v1251_v40, 0.0  ;;  %v1255_v3 = vadd.f32 %v935_v62, %v750_v39  ;;  %v996_v6 = vmax.f32 %v964_v54, 0.0 }
 0x153   :  { %v984_v5 = vmax.f32 %v1253_v45, 0.0  ;;  %v1220_v8 = vpack.c.bf16 %v995_v2, %v994_v26  ;;  %v997_v30 = vmax.f32 %v966_v4, 0.0 }
 0x154   :  { %v1214_v7 = vpack.c.bf16 %v983_v63, %v982_v44  ;;  %v985_v9 = vmax.f32 %v1255_v3, 0.0 }
 0x155   :  { %1082 = vst [vmem:[%s1956_s3 + $0x40] sm:$0xff] %v1220_v8  ;;  %v1221_v33 = vpack.c.bf16 %v997_v30, %v996_v6  ;;  %v969_v15 = vpop.f32.mrb[32].mxu1 }
 0x156   :  { %1076 = vst [vmem:[%s1956_s3 + $0x10] sm:$0xff] %v1214_v7  ;;  %v1215_v32 = vpack.c.bf16 %v985_v9, %v984_v5  ;;  %v939_v13 = vpop.f32.mrb[8].mxu0  ;;  %v970_v57 = vadd.f32 %v969_v15, %v1875_v42  ;;  %v971_v58 = vpop.f32.mrb[33].mxu1 }
 0x157   :  { %v1257_v18 = vadd.f32 %v939_v13, %v754_v11  ;;  %v941_v19 = vpop.f32.mrb[9].mxu0  ;;  %1083 = vst [vmem:[%s1956_s3 + $0x48] sm:$0xff] %v1221_v33  ;;  %v972_v21 = vadd.f32 %v971_v58, %v1878_v46  ;;  %v973_v0 = vpop.f32.mrb[34].mxu1 }
 0x158   :  { %1077 = vst [vmem:[%s1956_s3 + $0x18] sm:$0xff] %v1215_v32  ;;  %v1259_v20 = vadd.f32 %v941_v19, %v756_v12  ;;  %v943_v59 = vpop.f32.mrb[10].mxu0  ;;  %v998_v42 = vmax.f32 %v970_v57, 0.0  ;;  %v974_v49 = vadd.f32 %v973_v0, %v1881_v56  ;;  %v975_v61 = vpop.f32.mrb[35].mxu1 }
 0x159   :  { %v986_v22 = vmax.f32 %v1257_v18, 0.0  ;;  %v1261_v23 = vadd.f32 %v943_v59, %v758_v47  ;;  %v945_v24 = vpop.f32.mrb[11].mxu0  ;;  %v999_v10 = vmax.f32 %v972_v21, 0.0  ;;  %v976_v27 = vadd.f32 %v975_v61, %v1883_v60 }
 0x15a   :  { %v987_v1 = vmax.f32 %v1259_v20, 0.0  ;;  %v1263_v25 = vadd.f32 %v945_v24, %v760_v48  ;;  %v1000_v29 = vmax.f32 %v974_v49, 0.0 }
 0x15b   :  { %v988_v28 = vmax.f32 %v1261_v23, 0.0  ;;  %v1222_v14 = vpack.c.bf16 %v999_v10, %v998_v42  ;;  %v1001_v46 = vmax.f32 %v976_v27, 0.0 }
 0x15c   :  { %v1216_v50 = vpack.c.bf16 %v987_v1, %v986_v22  ;;  %v989_v31 = vmax.f32 %v1263_v25, 0.0 }
 0x15d   :  { %1084 = vst [vmem:[%s1956_s3 + $0x50] sm:$0xff] %v1222_v14  ;;  %v1223_v16 = vpack.c.bf16 %v1001_v46, %v1000_v29 }
 0x15e   :  { %1078 = vst [vmem:[%s1956_s3 + $0x20] sm:$0xff] %v1216_v50  ;;  %v1217_v56 = vpack.c.bf16 %v989_v31, %v988_v28 }
 0x15f   :  { %1085 = vst [vmem:[%s1956_s3 + $0x58] sm:$0xff] %v1223_v16 }
 0x160   :  { %1079 = vst [vmem:[%s1956_s3 + $0x28] sm:$0xff] %v1217_v56 }

// kernel: _lambda_.123
= control target key start
LH: loop header
LB: loop body
LE: loop exit
PB: predicated region body
PF: predicated region fallthrough
CT: control target
= control target key end

     0   :  { %s646_s1 = inlined_call_operand.vmem [shape: bf16[512,128], index: 1, kind: input, shape index: {}]   ;;  %s647_s0 = inlined_call_operand.vmem [shape: bf16[16,512], index: 0, kind: input, shape index: {}]   ;;  %s648_s2 = inlined_call_operand.vmem [shape: f32[1,128], index: 2, kind: input, shape index: {}]   ;;  %s649_s3 = inlined_call_operand.vmem [shape: f32[16,128], index: 3, kind: output, shape index: {}]  }
   0x1   :  { %v471_v0 = vld [vmem:[%s646_s1 + $0x40] sm:$0xff]   ;;  %v475_v4 = vld [vmem:[%s646_s1 + $0x48] sm:$0xff]   ;;  %v479_v8 = vld [vmem:[%s646_s1 + $0x50] sm:$0xff]  }
   0x2   :  { %v472_v1 = vld [vmem:[%s646_s1 + $0xc0] sm:$0xff]   ;;  %427 = vmatprep.subr.bf16.mxu0 %v471_v0  ;;  %v476_v5 = vld [vmem:[%s646_s1 + $0xc8] sm:$0xff]   ;;  %v480_v9 = vld [vmem:[%s646_s1 + $0xd0] sm:$0xff]  }
   0x3   :  { %v473_v2 = vld [vmem:[%s646_s1] sm:$0xff]   ;;  %449 = vmatprep.subr.bf16.mxu1 %v472_v1  ;;  %v477_v6 = vld [vmem:[%s646_s1 + $0x8] sm:$0xff]   ;;  %v481_v10 = vld [vmem:[%s646_s1 + $0x10] sm:$0xff]  }
   0x4   :  { %v474_v3 = vld [vmem:[%s646_s1 + $0x80] sm:$0xff]   ;;  %428 = vmatpush3.bf16.msra.mxu0 %v473_v2  ;;  %v478_v7 = vld [vmem:[%s646_s1 + $0x88] sm:$0xff]   ;;  %v482_v11 = vld [vmem:[%s646_s1 + $0x90] sm:$0xff]  }
   0x5   :  { %450 = vmatpush3.bf16.msra.mxu1 %v474_v3  ;;  %429 = vmatprep.subr.bf16.mxu0 %v475_v4  ;;  %v483_v12 = vld [vmem:[%s646_s1 + $0x58] sm:$0xff]   ;;  %v487_v16 = vld [vmem:[%s646_s1 + $0x60] sm:$0xff]   ;;  %v491_v20 = vld [vmem:[%s646_s1 + $0x68] sm:$0xff]  }
   0x6   :  { %451 = vmatprep.subr.bf16.mxu1 %v476_v5  ;;  %v484_v13 = vld [vmem:[%s646_s1 + $0xd8] sm:$0xff]   ;;  %v488_v17 = vld [vmem:[%s646_s1 + $0xe0] sm:$0xff]   ;;  %v492_v21 = vld [vmem:[%s646_s1 + $0xe8] sm:$0xff]  }
   0x7   :  { %v485_v14 = vld [vmem:[%s646_s1 + $0x18] sm:$0xff]   ;;  %v489_v18 = vld [vmem:[%s646_s1 + $0x20] sm:$0xff]   ;;  %v493_v22 = vld [vmem:[%s646_s1 + $0x28] sm:$0xff]  }
   0x8   :  { %430 = vmatpush3.bf16.msra.mxu0 %v477_v6  ;;  %v486_v15 = vld [vmem:[%s646_s1 + $0x98] sm:$0xff]   ;;  %v490_v19 = vld [vmem:[%s646_s1 + $0xa0] sm:$0xff]   ;;  %v494_v23 = vld [vmem:[%s646_s1 + $0xa8] sm:$0xff]  }
   0x9   :  { %452 = vmatpush3.bf16.msra.mxu1 %v478_v7  ;;  %431 = vmatprep.subr.bf16.mxu0 %v479_v8  ;;  %v495_v24 = vld [vmem:[%s646_s1 + $0x70] sm:$0xff]   ;;  %v499_v28 = vld [vmem:[%s646_s1 + $0x78] sm:$0xff]   ;;  %v390_v38 = vld [vmem:[%s648_s2] ss:$0 sm:$0xff] }
   0xa   :  { %453 = vmatprep.subr.bf16.mxu1 %v480_v9  ;;  %v496_v25 = vld [vmem:[%s646_s1 + $0xf0] sm:$0xff]   ;;  %v500_v29 = vld [vmem:[%s646_s1 + $0xf8] sm:$0xff]  }
   0xb   :  { %v497_v26 = vld [vmem:[%s646_s1 + $0x30] sm:$0xff]   ;;  %v501_v30 = vld [vmem:[%s646_s1 + $0x38] sm:$0xff]  }
   0xc   :  { %432 = vmatpush3.bf16.msra.mxu0 %v481_v10  ;;  %v498_v27 = vld [vmem:[%s646_s1 + $0xb0] sm:$0xff]   ;;  %v502_v31 = vld [vmem:[%s646_s1 + $0xb8] sm:$0xff]  }
   0xd   :  { %454 = vmatpush3.bf16.msra.mxu1 %v482_v11  ;;  %433 = vmatprep.subr.bf16.mxu0 %v483_v12  ;;  %v503_v32 = vld [vmem:[%s647_s0] ss:$16 sps:$4 sm:$0xff]   ;;  %v505_v33 = vld [vmem:[%s647_s0 + $0x4] ss:$16 sps:$4 sm:$0xff]   ;;  %v506_v34 = vld [vmem:[%s647_s0 + $0x8] ss:$16 sps:$4 sm:$0xff]  }
   0xe   :  { %455 = vmatprep.subr.bf16.mxu1 %v484_v13  ;;  %v508_v35 = vld [vmem:[%s647_s0 + $0xc] ss:$16 sps:$4 sm:$0xff]   ;;  %334 = vmatprep.mubr.bf16.mxu0 %v505_v33 }
   0xf   :  { %375 = vmatprep.mubr.bf16.mxu1 %v508_v35 }
  0x10   :  { %434 = vmatpush3.bf16.msra.mxu0 %v485_v14 }
  0x11   :  { %456 = vmatpush3.bf16.msra.mxu1 %v486_v15  ;;  %435 = vmatprep.subr.bf16.mxu0 %v487_v16 }
  0x12   :  { %457 = vmatprep.subr.bf16.mxu1 %v488_v17 }
  0x14   :  { %436 = vmatpush3.bf16.msra.mxu0 %v489_v18 }
  0x15   :  { %458 = vmatpush3.bf16.msra.mxu1 %v490_v19  ;;  %437 = vmatprep.subr.bf16.mxu0 %v491_v20 }
  0x16   :  { %459 = vmatprep.subr.bf16.mxu1 %v492_v21 }
  0x18   :  { %438 = vmatpush3.bf16.msra.mxu0 %v493_v22 }
  0x19   :  { %460 = vmatpush3.bf16.msra.mxu1 %v494_v23  ;;  %439 = vmatprep.subr.bf16.mxu0 %v495_v24 }
  0x1a   :  { %461 = vmatprep.subr.bf16.mxu1 %v496_v25 }
  0x1c   :  { %440 = vmatpush3.bf16.msra.mxu0 %v497_v26 }
  0x1d   :  { %462 = vmatpush3.bf16.msra.mxu1 %v498_v27  ;;  %441 = vmatprep.subr.bf16.mxu0 %v499_v28 }
  0x1e   :  { %463 = vmatprep.subr.bf16.mxu1 %v500_v29 }
  0x20   :  { %442 = vmatpush3.bf16.msra.mxu0 %v501_v30 }
  0x21   :  { %464 = vmatpush3.bf16.msra.mxu1 %v502_v31 }
  0x23   :  { %335 = vmatmul.mubr.bf16.vlgmr.msra.gmra.mrb[0].mxu0 %v503_v32 }
  0x24   :  { %376 = vmatmul.mubr.bf16.vlgmr.msra.gmra.mrb[0].mxu1 %v506_v34 }
  0xf6   :  { %v443_v36 = vpop.f32.mrb[0].mxu0 }
  0xf7   :  { %v465_v37 = vpop.f32.mrb[0].mxu1  ;;  %v444_v39 = vpop.f32.mrb[1].mxu0 }
  0xf8   :  { %v445_v40 = vadd.f32 %v444_v39, %v443_v36  ;;  %v466_v41 = vpop.f32.mrb[1].mxu1  ;;  %v446_v42 = vpop.f32.mrb[2].mxu0 }
  0xf9   :  { %v467_v43 = vadd.f32 %v466_v41, %v465_v37  ;;  %v468_v44 = vpop.f32.mrb[2].mxu1  ;;  %v447_v45 = vpop.f32.mrb[3].mxu0 }
  0xfa   :  { %v337_v46 = vadd.f32 %v445_v40, %v390_v38  ;;  %v448_v47 = vadd.f32 %v447_v45, %v446_v42  ;;  %v469_v48 = vpop.f32.mrb[3].mxu1 }
  0xfb   :  { %v470_v49 = vadd.f32 %v469_v48, %v468_v44 }
  0xfc   :  { %v378_v50 = vadd.f32 %v467_v43, %v337_v46  ;;  %v340_v51 = vadd.f32 %v448_v47, %v390_v38 }
  0xfe   :  { %384 = vst [vmem:[%s649_s3] sm:$0xff] %v378_v50  ;;  %v381_v52 = vadd.f32 %v470_v49, %v340_v51 }
 0x100   :  { %385 = vst [vmem:[%s649_s3 + $0x8] sm:$0xff] %v381_v52 }

</bundles_post_ra>
